<compile_context>
chip_gen: v7x
topology: tpu7x:2x2x1
jax: 0.10.0
libtpu: 0.0.40
codegen_flags: <defaults>
</compile_context>

<pallas_src>
import functools

import jax
import jax.numpy as jnp
from jax import lax
from jax.experimental import pallas as pl
from jax.experimental.pallas import tpu as pltpu

ENC_DIMS = [784, 512, 256, 128, 64, 32, 16]
DEC_DIMS = [16, 32, 64, 128, 256, 512, 784]
N_ENC = len(ENC_DIMS) - 1  # 6 linear layers
N_DEC = len(DEC_DIMS) - 1  # 6 linear layers
IN_DIM = ENC_DIMS[0]
OUT_DIM = DEC_DIMS[-1]
LANE = 128
IN_PAD = -(-IN_DIM // LANE) * LANE    # 896 = 7 * 128
OUT_PAD = -(-OUT_DIM // LANE) * LANE  # 896 = 7 * 128
BN_EPS = 1e-5


# ---------------------------------------------------------------------------
# Kernels
# ---------------------------------------------------------------------------
def ae_main_kernel(*refs, tile_b, valid_rows, padded):
    """BN1 (pre-folded scale/shift) -> encoder -> decoder linears.

    Emits the pre-BN2 decoder activations (bf16) plus per-tile Welford
    statistics (masked sum + centered sum-of-squares) for exact full-batch BN2.
    """
    it = iter(refs)
    x_ref = next(it)          # (tile_b, IN_PAD)  bf16
    scale1_ref = next(it)     # (1, IN_PAD)       f32
    shift1_ref = next(it)     # (1, IN_PAD)       f32
    layers = [(next(it), next(it)) for _ in range(N_ENC + N_DEC)]
    hdec_ref = next(it)       # (tile_b, OUT_PAD) bf16
    tsum_ref = next(it)       # (1, 1, OUT_PAD)   f32
    tm2_ref = next(it)        # (1, 1, OUT_PAD)   f32

    # BatchNorm1d(784), training mode, folded into a per-feature scale/shift
    # built from full-batch statistics in the wrapper.
    h = x_ref[...].astype(jnp.float32) * scale1_ref[...] + shift1_ref[...]

    # Encoder: 6x (Linear -> ReLU). bf16 operands, fp32 accumulation on the MXU.
    for w_ref, b_ref in layers[:N_ENC]:
        h = jnp.dot(h.astype(jnp.bfloat16), w_ref[...],
                    preferred_element_type=jnp.float32) + b_ref[...]
        h = jnp.maximum(h, 0.0)

    # Decoder: 5x (Linear -> Tanh), then Linear(512, 784-padded).
    for li, (w_ref, b_ref) in enumerate(layers[N_ENC:]):
        h = jnp.dot(h.astype(jnp.bfloat16), w_ref[...],
                    preferred_element_type=jnp.float32) + b_ref[...]
        if li < N_DEC - 1:
            # fp32 tanh for v5e portability (no bf16 EUP there); cast to bf16
            # right away so the next dot consumes bf16 with no extra cast.
            h = jnp.tanh(h).astype(jnp.bfloat16)

    # Pre-BN2 activations: stored bf16 (halves the HBM round trip).
    hdec_ref[...] = h.astype(jnp.bfloat16)

    # Per-tile Welford statistics (fp32), masking any zero-padded batch rows.
    if padded:
        row0 = pl.program_id(0) * tile_b
        rows = row0 + lax.broadcasted_iota(jnp.int32, (tile_b, 1), 0)
        mask = (rows < valid_rows).astype(jnp.float32)
        cnt = jnp.minimum(valid_rows - row0, tile_b).astype(jnp.float32)
        hm = h * mask
    else:
        mask = None
        cnt = float(tile_b)
        hm = h

    tsum = jnp.sum(hm, axis=0, keepdims=True)          # (1, OUT_PAD)
    mean_t = tsum * (1.0 / cnt)
    d = h - mean_t
    if padded:
        d = d * mask
    tsum_ref[...] = tsum[None]                          # (1, 1, OUT_PAD)
    tm2_ref[...] = jnp.sum(d * d, axis=0, keepdims=True)[None]


def bn2_tanh_kernel(h_ref, scale_ref, shift_ref, out_ref):
    """Final BatchNorm1d (pre-folded full-batch scale/shift) + Tanh, bf16 in."""
    h = h_ref[...].astype(jnp.float32)
    y = jnp.tanh(h * scale_ref[...] + shift_ref[...])
    out_ref[...] = y[:, :OUT_DIM]


# ---------------------------------------------------------------------------
# Parameters (PyTorch-style init)
# ---------------------------------------------------------------------------
def init_params(key):
    """Uniform +/- 1/sqrt(fan_in) Linear init; BN gamma=1, beta=0 (fp32 master)."""
    params = {
        "bn1_g": jnp.ones((1, IN_DIM), jnp.float32),
        "bn1_b": jnp.zeros((1, IN_DIM), jnp.float32),
        "bn2_g": jnp.ones((1, OUT_DIM), jnp.float32),
        "bn2_b": jnp.zeros((1, OUT_DIM), jnp.float32),
        "enc": [],
        "dec": [],
    }

    def make_linear(key, fan_in, fan_out):
        kw, kb = jax.random.split(key)
        bound = 1.0 / (fan_in ** 0.5)
        w = jax.random.uniform(kw, (fan_in, fan_out), jnp.float32, -bound, bound)
        b = jax.random.uniform(kb, (1, fan_out), jnp.float32, -bound, bound)
        return w, b

    keys = jax.random.split(key, N_ENC + N_DEC)
    for i in range(N_ENC):
        params["enc"].append(make_linear(keys[i], ENC_DIMS[i], ENC_DIMS[i + 1]))
    for i in range(N_DEC):
        params["dec"].append(make_linear(keys[N_ENC + i], DEC_DIMS[i], DEC_DIMS[i + 1]))
    return params


# ---------------------------------------------------------------------------
# Tiling helpers
# ---------------------------------------------------------------------------
def _round_up(n, m):
    return -(-n // m) * m


def _pick_tile_b(batch, target=512):
    """Batch-tile height: multiple of 16, <= target, preferring an even tile
    count >= 2 (keeps both TensorCores busy on v7x).  The batch is zero-padded
    up to a multiple of the tile; padded rows are masked out of BN2 stats."""
    rounded = _round_up(max(batch, 1), 16)
    if rounded <= 16:
        return 16
    num_tiles = max(2, pl.cdiv(rounded, target))
    if num_tiles % 2:
        num_tiles += 1
    return _round_up(pl.cdiv(rounded, num_tiles), 16)


# ---------------------------------------------------------------------------
# Forward wrapper
# ---------------------------------------------------------------------------
def ae_forward(x, params):
    B = x.shape[0]
    tile_b = _pick_tile_b(B)
    num_tiles = pl.cdiv(B, tile_b)
    B_pad = num_tiles * tile_b
    padded = B_pad != B

    # ---- exact full-batch BN1 statistics (training-mode BatchNorm1d), 1 pass ----
    x32 = x.astype(jnp.float32)
    s1 = jnp.sum(x32, axis=0, keepdims=True)
    ss1 = jnp.sum(x32 * x32, axis=0, keepdims=True)
    mu1 = s1 / B
    var1 = jnp.maximum(ss1 / B - mu1 * mu1, 0.0)       # biased batch variance
    inv1 = lax.rsqrt(var1 + BN_EPS)
    scale1 = jnp.pad(params["bn1_g"] * inv1, ((0, 0), (0, IN_PAD - IN_DIM)))
    shift1 = jnp.pad(params["bn1_b"] - mu1 * (params["bn1_g"] * inv1),
                     ((0, 0), (0, IN_PAD - IN_DIM)))

    # bf16 + lane/row padded x stream for the main kernel.
    x_p = jnp.pad(x.astype(jnp.bfloat16),
                  ((0, B_pad - B), (0, IN_PAD - IN_DIM)))

    # bf16 weights (fp32 biases); pad first-layer rows / last-layer cols to 896.
    ws, bs = [], []
    all_layers = params["enc"] + params["dec"]
    for li, (w, b) in enumerate(all_layers):
        wq = w.astype(jnp.bfloat16)
        bq = b.astype(jnp.float32)
        if li == 0:
            wq = jnp.pad(wq, ((0, IN_PAD - IN_DIM), (0, 0)))
        if li == len(all_layers) - 1:
            wq = jnp.pad(wq, ((0, 0), (0, OUT_PAD - OUT_DIM)))
            bq = jnp.pad(bq, ((0, 0), (0, OUT_PAD - OUT_DIM)))
        ws.append(wq)
        bs.append(bq)

    # ---- pass 1: batch-tiled encoder/decoder (weights resident in VMEM) ----
    args = [x_p, scale1, shift1]
    in_specs = [
        pl.BlockSpec((tile_b, IN_PAD), lambda i: (i, 0)),
        pl.BlockSpec((1, IN_PAD), lambda i: (0, 0)),
        pl.BlockSpec((1, IN_PAD), lambda i: (0, 0)),
    ]
    for w, b in zip(ws, bs):
        args += [w, b]
        in_specs.append(pl.BlockSpec(w.shape, lambda i: (0, 0)))
        in_specs.append(pl.BlockSpec(b.shape, lambda i: (0, 0)))

    out_shape = (
        jax.ShapeDtypeStruct((B_pad, OUT_PAD), jnp.bfloat16),        # pre-BN2 acts
        jax.ShapeDtypeStruct((num_tiles, 1, OUT_PAD), jnp.float32),  # per-tile sum
        jax.ShapeDtypeStruct((num_tiles, 1, OUT_PAD), jnp.float32),  # per-tile M2
    )
    out_specs = (
        pl.BlockSpec((tile_b, OUT_PAD), lambda i: (i, 0)),
        pl.BlockSpec((1, 1, OUT_PAD), lambda i: (i, 0, 0)),
        pl.BlockSpec((1, 1, OUT_PAD), lambda i: (i, 0, 0)),
    )

    cparams = pltpu.CompilerParams(
        dimension_semantics=("parallel",),   # shards batch tiles across TCs on v7x
        vmem_limit_bytes=32 << 20,           # fits v7x's 64 MiB physical VMEM
    )

    kernel = functools.partial(ae_main_kernel, tile_b=tile_b,
                               valid_rows=B, padded=padded)
    h_dec, tsum, tm2 = pl.pallas_call(
        kernel,
        grid=(num_tiles,),
        out_shape=out_shape,
        in_specs=in_specs,
        out_specs=out_specs,
        compiler_params=cparams,
    )(*args)

    # ---- combine per-tile (sum, M2) -> exact full-batch BN2 statistics ----
    counts = jnp.full((num_tiles,), float(tile_b), jnp.float32)
    if padded:
        counts = counts.at[-1].set(float(B - (num_tiles - 1) * tile_b))
    tsum2 = tsum[:, 0, :]                                   # (num_tiles, OUT_PAD)
    means_t = tsum2 / counts[:, None]
    mu2 = jnp.sum(tsum2, axis=0, keepdims=True) / B
    m2 = (jnp.sum(tm2[:, 0, :], axis=0, keepdims=True)
          + jnp.sum(counts[:, None] * jnp.square(means_t - mu2),
                    axis=0, keepdims=True))
    var2 = m2 / B                                           # biased batch variance
    inv2 = lax.rsqrt(var2 + BN_EPS)
    gamma2 = jnp.pad(params["bn2_g"], ((0, 0), (0, OUT_PAD - OUT_DIM)))
    beta2 = jnp.pad(params["bn2_b"], ((0, 0), (0, OUT_PAD - OUT_DIM)))
    scale2 = gamma2 * inv2
    shift2 = beta2 - mu2 * scale2

    # ---- pass 2: BN2 affine + Tanh (elementwise, bf16 in, fp32 784-wide out) ----
    out = pl.pallas_call(
        bn2_tanh_kernel,
        grid=(num_tiles,),
        out_shape=jax.ShapeDtypeStruct((B_pad, OUT_DIM), jnp.float32),
        in_specs=[
            pl.BlockSpec((tile_b, OUT_PAD), lambda i: (i, 0)),
            pl.BlockSpec((1, OUT_PAD), lambda i: (0, 0)),
            pl.BlockSpec((1, OUT_PAD), lambda i: (0, 0)),
        ],
        out_specs=pl.BlockSpec((tile_b, OUT_DIM), lambda i: (i, 0)),
        compiler_params=cparams,
    )(h_dec, scale2, shift2)

    if padded:
        out = out[:B]
    return out


# ---------------------------------------------------------------------------
# Pure-JAX fp32 reference (same math / same params) for a loose sanity check.
# ---------------------------------------------------------------------------
def ae_reference(x, params):
    x = x.astype(jnp.float32)
    mu = jnp.mean(x, axis=0, keepdims=True)
    var = jnp.mean(jnp.square(x - mu), axis=0, keepdims=True)
    h = (x - mu) * lax.rsqrt(var + BN_EPS) * params["bn1_g"] + params["bn1_b"]
    for w, b in params["enc"]:
        h = jnp.maximum(h @ w + b, 0.0)
    for li, (w, b) in enumerate(params["dec"]):
        h = h @ w + b
        if li < N_DEC - 1:
            h = jnp.tanh(h)
    mu2 = jnp.mean(h, axis=0, keepdims=True)
    var2 = jnp.mean(jnp.square(h - mu2), axis=0, keepdims=True)
    h = (h - mu2) * lax.rsqrt(var2 + BN_EPS) * params["bn2_g"] + params["bn2_b"]
    return jnp.tanh(h)


if __name__ == "__main__":
    key = jax.random.PRNGKey(0)
    k_params, k_x = jax.random.split(key)

    params = init_params(k_params)
    # Small batch: exercises 2 batch tiles (dual-TC friendly) plus row
    # padding/masking of the BN2 statistics (100 rows -> 2 tiles of 64).
    B = 100
    x = jax.random.normal(k_x, (B, 28 * 28), jnp.float32)

    out = jax.jit(ae_forward)(x, params)
    out = jax.block_until_ready(out)

    assert out.shape == (B, OUT_DIM), out.shape
    assert out.dtype == jnp.float32
    assert bool(jnp.all(jnp.isfinite(out)))

    # Intentionally loose tolerance: the kernel uses bf16 weights/activations
    # (fp32 accumulate) while the reference is pure fp32 - fine for an AE.
    ref = ae_reference(x, params)
    max_err = float(jnp.max(jnp.abs(out - ref)))
    assert max_err < 0.25, max_err

    print("KERNEL_OK")
</pallas_src>

<mosaic_0001>
module attributes {stable_mosaic.version = 11 : i64} {
  func.func @ae_main_kernel(%arg0: i32, %arg1: memref<64x896xbf16, #tpu.memory_space<vmem>>, %arg2: memref<1x896xf32, #tpu.memory_space<vmem>>, %arg3: memref<1x896xf32, #tpu.memory_space<vmem>>, %arg4: memref<896x512xbf16, #tpu.memory_space<vmem>>, %arg5: memref<1x512xf32, #tpu.memory_space<vmem>>, %arg6: memref<512x256xbf16, #tpu.memory_space<vmem>>, %arg7: memref<1x256xf32, #tpu.memory_space<vmem>>, %arg8: memref<256x128xbf16, #tpu.memory_space<vmem>>, %arg9: memref<1x128xf32, #tpu.memory_space<vmem>>, %arg10: memref<128x64xbf16, #tpu.memory_space<vmem>>, %arg11: memref<1x64xf32, #tpu.memory_space<vmem>>, %arg12: memref<64x32xbf16, #tpu.memory_space<vmem>>, %arg13: memref<1x32xf32, #tpu.memory_space<vmem>>, %arg14: memref<32x16xbf16, #tpu.memory_space<vmem>>, %arg15: memref<1x16xf32, #tpu.memory_space<vmem>>, %arg16: memref<16x32xbf16, #tpu.memory_space<vmem>>, %arg17: memref<1x32xf32, #tpu.memory_space<vmem>>, %arg18: memref<32x64xbf16, #tpu.memory_space<vmem>>, %arg19: memref<1x64xf32, #tpu.memory_space<vmem>>, %arg20: memref<64x128xbf16, #tpu.memory_space<vmem>>, %arg21: memref<1x128xf32, #tpu.memory_space<vmem>>, %arg22: memref<128x256xbf16, #tpu.memory_space<vmem>>, %arg23: memref<1x256xf32, #tpu.memory_space<vmem>>, %arg24: memref<256x512xbf16, #tpu.memory_space<vmem>>, %arg25: memref<1x512xf32, #tpu.memory_space<vmem>>, %arg26: memref<512x896xbf16, #tpu.memory_space<vmem>>, %arg27: memref<1x896xf32, #tpu.memory_space<vmem>>, %arg28: memref<64x896xbf16, #tpu.memory_space<vmem>>, %arg29: memref<1x1x896xf32, #tpu.memory_space<vmem>>, %arg30: memref<1x1x896xf32, #tpu.memory_space<vmem>>) attributes {dimension_semantics = [#tpu.dimension_semantics<parallel>], iteration_bounds = array<i64: 2>, scalar_prefetch = 0 : i64, scratch_operands = 0 : i64, tpu.core_type = #tpu.core_type<tc>, window_params = [{transform_indices = @transform_0, window_bounds = array<i64: 64, 896>}, {pipeline_mode = #tpu.pipeline_mode<synchronous>, transform_indices = @transform_1, window_bounds = array<i64: 1, 896>}, {pipeline_mode = #tpu.pipeline_mode<synchronous>, transform_indices = @transform_2, window_bounds = array<i64: 1, 896>}, {pipeline_mode = #tpu.pipeline_mode<synchronous>, transform_indices = @transform_3, window_bounds = array<i64: 896, 512>}, {pipeline_mode = #tpu.pipeline_mode<synchronous>, transform_indices = @transform_4, window_bounds = array<i64: 1, 512>}, {pipeline_mode = #tpu.pipeline_mode<synchronous>, transform_indices = @transform_5, window_bounds = array<i64: 512, 256>}, {pipeline_mode = #tpu.pipeline_mode<synchronous>, transform_indices = @transform_6, window_bounds = array<i64: 1, 256>}, {pipeline_mode = #tpu.pipeline_mode<synchronous>, transform_indices = @transform_7, window_bounds = array<i64: 256, 128>}, {pipeline_mode = #tpu.pipeline_mode<synchronous>, transform_indices = @transform_8, window_bounds = array<i64: 1, 128>}, {pipeline_mode = #tpu.pipeline_mode<synchronous>, transform_indices = @transform_9, window_bounds = array<i64: 128, 64>}, {pipeline_mode = #tpu.pipeline_mode<synchronous>, transform_indices = @transform_10, window_bounds = array<i64: 1, 64>}, {pipeline_mode = #tpu.pipeline_mode<synchronous>, transform_indices = @transform_11, window_bounds = array<i64: 64, 32>}, {pipeline_mode = #tpu.pipeline_mode<synchronous>, transform_indices = @transform_12, window_bounds = array<i64: 1, 32>}, {pipeline_mode = #tpu.pipeline_mode<synchronous>, transform_indices = @transform_13, window_bounds = array<i64: 32, 16>}, {pipeline_mode = #tpu.pipeline_mode<synchronous>, transform_indices = @transform_14, window_bounds = array<i64: 1, 16>}, {pipeline_mode = #tpu.pipeline_mode<synchronous>, transform_indices = @transform_15, window_bounds = array<i64: 16, 32>}, {pipeline_mode = #tpu.pipeline_mode<synchronous>, transform_indices = @transform_16, window_bounds = array<i64: 1, 32>}, {pipeline_mode = #tpu.pipeline_mode<synchronous>, transform_indices = @transform_17, window_bounds = array<i64: 32, 64>}, {pipeline_mode = #tpu.pipeline_mode<synchronous>, transform_indices = @transform_18, window_bounds = array<i64: 1, 64>}, {pipeline_mode = #tpu.pipeline_mode<synchronous>, transform_indices = @transform_19, window_bounds = array<i64: 64, 128>}, {pipeline_mode = #tpu.pipeline_mode<synchronous>, transform_indices = @transform_20, window_bounds = array<i64: 1, 128>}, {pipeline_mode = #tpu.pipeline_mode<synchronous>, transform_indices = @transform_21, window_bounds = array<i64: 128, 256>}, {pipeline_mode = #tpu.pipeline_mode<synchronous>, transform_indices = @transform_22, window_bounds = array<i64: 1, 256>}, {pipeline_mode = #tpu.pipeline_mode<synchronous>, transform_indices = @transform_23, window_bounds = array<i64: 256, 512>}, {pipeline_mode = #tpu.pipeline_mode<synchronous>, transform_indices = @transform_24, window_bounds = array<i64: 1, 512>}, {pipeline_mode = #tpu.pipeline_mode<synchronous>, transform_indices = @transform_25, window_bounds = array<i64: 512, 896>}, {pipeline_mode = #tpu.pipeline_mode<synchronous>, transform_indices = @transform_26, window_bounds = array<i64: 1, 896>}, {transform_indices = @transform_27, window_bounds = array<i64: 64, 896>}, {transform_indices = @transform_28, window_bounds = array<i64: 1, 1, 896>}, {transform_indices = @transform_29, window_bounds = array<i64: 1, 1, 896>}]} {
    %c0 = arith.constant 0 : index
    %c0_0 = arith.constant 0 : index
    %0 = vector.load %arg1[%c0, %c0_0] : memref<64x896xbf16, #tpu.memory_space<vmem>>, vector<64x896xbf16>
    %1 = arith.extf %0 : vector<64x896xbf16> to vector<64x896xf32>
    %c0_1 = arith.constant 0 : index
    %c0_2 = arith.constant 0 : index
    %2 = vector.load %arg2[%c0_1, %c0_2] : memref<1x896xf32, #tpu.memory_space<vmem>>, vector<1x896xf32>
    %3 = vector.broadcast %2 : vector<1x896xf32> to vector<64x896xf32>
    %4 = arith.mulf %1, %3 : vector<64x896xf32>
    %c0_3 = arith.constant 0 : index
    %c0_4 = arith.constant 0 : index
    %5 = vector.load %arg3[%c0_3, %c0_4] : memref<1x896xf32, #tpu.memory_space<vmem>>, vector<1x896xf32>
    %6 = vector.broadcast %5 : vector<1x896xf32> to vector<64x896xf32>
    %7 = arith.addf %4, %6 : vector<64x896xf32>
    %8 = arith.truncf %7 : vector<64x896xf32> to vector<64x896xbf16>
    %c0_5 = arith.constant 0 : index
    %c0_6 = arith.constant 0 : index
    %9 = vector.load %arg4[%c0_5, %c0_6] : memref<896x512xbf16, #tpu.memory_space<vmem>>, vector<896x512xbf16>
    %cst = arith.constant dense<0.000000e+00> : vector<64x512xf32>
    %10 = tpu.matmul %8, %9, %cst {dimension_numbers = #tpu.dot_dimension_numbers<[1], [0], [0], [1], [0, 0, 1, 1], [], []>} : vector<64x896xbf16>, vector<896x512xbf16>, vector<64x512xf32> -> vector<64x512xf32>
    %c0_7 = arith.constant 0 : index
    %c0_8 = arith.constant 0 : index
    %11 = vector.load %arg5[%c0_7, %c0_8] : memref<1x512xf32, #tpu.memory_space<vmem>>, vector<1x512xf32>
    %12 = vector.broadcast %11 : vector<1x512xf32> to vector<64x512xf32>
    %13 = arith.addf %10, %12 : vector<64x512xf32>
    %cst_9 = arith.constant 0.000000e+00 : f32
    %14 = vector.broadcast %cst_9 : f32 to vector<64x512xf32>
    %15 = arith.maximumf %13, %14 : vector<64x512xf32>
    %16 = arith.truncf %15 : vector<64x512xf32> to vector<64x512xbf16>
    %c0_10 = arith.constant 0 : index
    %c0_11 = arith.constant 0 : index
    %17 = vector.load %arg6[%c0_10, %c0_11] : memref<512x256xbf16, #tpu.memory_space<vmem>>, vector<512x256xbf16>
    %cst_12 = arith.constant dense<0.000000e+00> : vector<64x256xf32>
    %18 = tpu.matmul %16, %17, %cst_12 {dimension_numbers = #tpu.dot_dimension_numbers<[1], [0], [0], [1], [0, 0, 1, 1], [], []>} : vector<64x512xbf16>, vector<512x256xbf16>, vector<64x256xf32> -> vector<64x256xf32>
    %c0_13 = arith.constant 0 : index
    %c0_14 = arith.constant 0 : index
    %19 = vector.load %arg7[%c0_13, %c0_14] : memref<1x256xf32, #tpu.memory_space<vmem>>, vector<1x256xf32>
    %20 = vector.broadcast %19 : vector<1x256xf32> to vector<64x256xf32>
    %21 = arith.addf %18, %20 : vector<64x256xf32>
    %cst_15 = arith.constant 0.000000e+00 : f32
    %22 = vector.broadcast %cst_15 : f32 to vector<64x256xf32>
    %23 = arith.maximumf %21, %22 : vector<64x256xf32>
    %24 = arith.truncf %23 : vector<64x256xf32> to vector<64x256xbf16>
    %c0_16 = arith.constant 0 : index
    %c0_17 = arith.constant 0 : index
    %25 = vector.load %arg8[%c0_16, %c0_17] : memref<256x128xbf16, #tpu.memory_space<vmem>>, vector<256x128xbf16>
    %cst_18 = arith.constant dense<0.000000e+00> : vector<64x128xf32>
    %26 = tpu.matmul %24, %25, %cst_18 {dimension_numbers = #tpu.dot_dimension_numbers<[1], [0], [0], [1], [0, 0, 1, 1], [], []>} : vector<64x256xbf16>, vector<256x128xbf16>, vector<64x128xf32> -> vector<64x128xf32>
    %c0_19 = arith.constant 0 : index
    %c0_20 = arith.constant 0 : index
    %27 = vector.load %arg9[%c0_19, %c0_20] : memref<1x128xf32, #tpu.memory_space<vmem>>, vector<1x128xf32>
    %28 = vector.broadcast %27 : vector<1x128xf32> to vector<64x128xf32>
    %29 = arith.addf %26, %28 : vector<64x128xf32>
    %cst_21 = arith.constant 0.000000e+00 : f32
    %30 = vector.broadcast %cst_21 : f32 to vector<64x128xf32>
    %31 = arith.maximumf %29, %30 : vector<64x128xf32>
    %32 = arith.truncf %31 : vector<64x128xf32> to vector<64x128xbf16>
    %c0_22 = arith.constant 0 : index
    %c0_23 = arith.constant 0 : index
    %33 = vector.load %arg10[%c0_22, %c0_23] : memref<128x64xbf16, #tpu.memory_space<vmem>>, vector<128x64xbf16>
    %cst_24 = arith.constant dense<0.000000e+00> : vector<64x64xf32>
    %34 = tpu.matmul %32, %33, %cst_24 {dimension_numbers = #tpu.dot_dimension_numbers<[1], [0], [0], [1], [0, 0, 1, 1], [], []>} : vector<64x128xbf16>, vector<128x64xbf16>, vector<64x64xf32> -> vector<64x64xf32>
    %c0_25 = arith.constant 0 : index
    %c0_26 = arith.constant 0 : index
    %35 = vector.load %arg11[%c0_25, %c0_26] : memref<1x64xf32, #tpu.memory_space<vmem>>, vector<1x64xf32>
    %36 = vector.broadcast %35 : vector<1x64xf32> to vector<64x64xf32>
    %37 = arith.addf %34, %36 : vector<64x64xf32>
    %cst_27 = arith.constant 0.000000e+00 : f32
    %38 = vector.broadcast %cst_27 : f32 to vector<64x64xf32>
    %39 = arith.maximumf %37, %38 : vector<64x64xf32>
    %40 = arith.truncf %39 : vector<64x64xf32> to vector<64x64xbf16>
    %c0_28 = arith.constant 0 : index
    %c0_29 = arith.constant 0 : index
    %41 = vector.load %arg12[%c0_28, %c0_29] : memref<64x32xbf16, #tpu.memory_space<vmem>>, vector<64x32xbf16>
    %cst_30 = arith.constant dense<0.000000e+00> : vector<64x32xf32>
    %42 = tpu.matmul %40, %41, %cst_30 {dimension_numbers = #tpu.dot_dimension_numbers<[1], [0], [0], [1], [0, 0, 1, 1], [], []>} : vector<64x64xbf16>, vector<64x32xbf16>, vector<64x32xf32> -> vector<64x32xf32>
    %c0_31 = arith.constant 0 : index
    %c0_32 = arith.constant 0 : index
    %43 = vector.load %arg13[%c0_31, %c0_32] : memref<1x32xf32, #tpu.memory_space<vmem>>, vector<1x32xf32>
    %44 = vector.broadcast %43 : vector<1x32xf32> to vector<64x32xf32>
    %45 = arith.addf %42, %44 : vector<64x32xf32>
    %cst_33 = arith.constant 0.000000e+00 : f32
    %46 = vector.broadcast %cst_33 : f32 to vector<64x32xf32>
    %47 = arith.maximumf %45, %46 : vector<64x32xf32>
    %48 = arith.truncf %47 : vector<64x32xf32> to vector<64x32xbf16>
    %c0_34 = arith.constant 0 : index
    %c0_35 = arith.constant 0 : index
    %49 = vector.load %arg14[%c0_34, %c0_35] : memref<32x16xbf16, #tpu.memory_space<vmem>>, vector<32x16xbf16>
    %cst_36 = arith.constant dense<0.000000e+00> : vector<64x16xf32>
    %50 = tpu.matmul %48, %49, %cst_36 {dimension_numbers = #tpu.dot_dimension_numbers<[1], [0], [0], [1], [0, 0, 1, 1], [], []>} : vector<64x32xbf16>, vector<32x16xbf16>, vector<64x16xf32> -> vector<64x16xf32>
    %c0_37 = arith.constant 0 : index
    %c0_38 = arith.constant 0 : index
    %51 = vector.load %arg15[%c0_37, %c0_38] : memref<1x16xf32, #tpu.memory_space<vmem>>, vector<1x16xf32>
    %52 = vector.broadcast %51 : vector<1x16xf32> to vector<64x16xf32>
    %53 = arith.addf %50, %52 : vector<64x16xf32>
    %cst_39 = arith.constant 0.000000e+00 : f32
    %54 = vector.broadcast %cst_39 : f32 to vector<64x16xf32>
    %55 = arith.maximumf %53, %54 : vector<64x16xf32>
    %56 = arith.truncf %55 : vector<64x16xf32> to vector<64x16xbf16>
    %c0_40 = arith.constant 0 : index
    %c0_41 = arith.constant 0 : index
    %57 = vector.load %arg16[%c0_40, %c0_41] : memref<16x32xbf16, #tpu.memory_space<vmem>>, vector<16x32xbf16>
    %cst_42 = arith.constant dense<0.000000e+00> : vector<64x32xf32>
    %58 = tpu.matmul %56, %57, %cst_42 {dimension_numbers = #tpu.dot_dimension_numbers<[1], [0], [0], [1], [0, 0, 1, 1], [], []>} : vector<64x16xbf16>, vector<16x32xbf16>, vector<64x32xf32> -> vector<64x32xf32>
    %c0_43 = arith.constant 0 : index
    %c0_44 = arith.constant 0 : index
    %59 = vector.load %arg17[%c0_43, %c0_44] : memref<1x32xf32, #tpu.memory_space<vmem>>, vector<1x32xf32>
    %60 = vector.broadcast %59 : vector<1x32xf32> to vector<64x32xf32>
    %61 = arith.addf %58, %60 : vector<64x32xf32>
    %62 = math.tanh %61 : vector<64x32xf32>
    %63 = arith.truncf %62 : vector<64x32xf32> to vector<64x32xbf16>
    %c0_45 = arith.constant 0 : index
    %c0_46 = arith.constant 0 : index
    %64 = vector.load %arg18[%c0_45, %c0_46] : memref<32x64xbf16, #tpu.memory_space<vmem>>, vector<32x64xbf16>
    %cst_47 = arith.constant dense<0.000000e+00> : vector<64x64xf32>
    %65 = tpu.matmul %63, %64, %cst_47 {dimension_numbers = #tpu.dot_dimension_numbers<[1], [0], [0], [1], [0, 0, 1, 1], [], []>} : vector<64x32xbf16>, vector<32x64xbf16>, vector<64x64xf32> -> vector<64x64xf32>
    %c0_48 = arith.constant 0 : index
    %c0_49 = arith.constant 0 : index
    %66 = vector.load %arg19[%c0_48, %c0_49] : memref<1x64xf32, #tpu.memory_space<vmem>>, vector<1x64xf32>
    %67 = vector.broadcast %66 : vector<1x64xf32> to vector<64x64xf32>
    %68 = arith.addf %65, %67 : vector<64x64xf32>
    %69 = math.tanh %68 : vector<64x64xf32>
    %70 = arith.truncf %69 : vector<64x64xf32> to vector<64x64xbf16>
    %c0_50 = arith.constant 0 : index
    %c0_51 = arith.constant 0 : index
    %71 = vector.load %arg20[%c0_50, %c0_51] : memref<64x128xbf16, #tpu.memory_space<vmem>>, vector<64x128xbf16>
    %cst_52 = arith.constant dense<0.000000e+00> : vector<64x128xf32>
    %72 = tpu.matmul %70, %71, %cst_52 {dimension_numbers = #tpu.dot_dimension_numbers<[1], [0], [0], [1], [0, 0, 1, 1], [], []>} : vector<64x64xbf16>, vector<64x128xbf16>, vector<64x128xf32> -> vector<64x128xf32>
    %c0_53 = arith.constant 0 : index
    %c0_54 = arith.constant 0 : index
    %73 = vector.load %arg21[%c0_53, %c0_54] : memref<1x128xf32, #tpu.memory_space<vmem>>, vector<1x128xf32>
    %74 = vector.broadcast %73 : vector<1x128xf32> to vector<64x128xf32>
    %75 = arith.addf %72, %74 : vector<64x128xf32>
    %76 = math.tanh %75 : vector<64x128xf32>
    %77 = arith.truncf %76 : vector<64x128xf32> to vector<64x128xbf16>
    %c0_55 = arith.constant 0 : index
    %c0_56 = arith.constant 0 : index
    %78 = vector.load %arg22[%c0_55, %c0_56] : memref<128x256xbf16, #tpu.memory_space<vmem>>, vector<128x256xbf16>
    %cst_57 = arith.constant dense<0.000000e+00> : vector<64x256xf32>
    %79 = tpu.matmul %77, %78, %cst_57 {dimension_numbers = #tpu.dot_dimension_numbers<[1], [0], [0], [1], [0, 0, 1, 1], [], []>} : vector<64x128xbf16>, vector<128x256xbf16>, vector<64x256xf32> -> vector<64x256xf32>
    %c0_58 = arith.constant 0 : index
    %c0_59 = arith.constant 0 : index
    %80 = vector.load %arg23[%c0_58, %c0_59] : memref<1x256xf32, #tpu.memory_space<vmem>>, vector<1x256xf32>
    %81 = vector.broadcast %80 : vector<1x256xf32> to vector<64x256xf32>
    %82 = arith.addf %79, %81 : vector<64x256xf32>
    %83 = math.tanh %82 : vector<64x256xf32>
    %84 = arith.truncf %83 : vector<64x256xf32> to vector<64x256xbf16>
    %c0_60 = arith.constant 0 : index
    %c0_61 = arith.constant 0 : index
    %85 = vector.load %arg24[%c0_60, %c0_61] : memref<256x512xbf16, #tpu.memory_space<vmem>>, vector<256x512xbf16>
    %cst_62 = arith.constant dense<0.000000e+00> : vector<64x512xf32>
    %86 = tpu.matmul %84, %85, %cst_62 {dimension_numbers = #tpu.dot_dimension_numbers<[1], [0], [0], [1], [0, 0, 1, 1], [], []>} : vector<64x256xbf16>, vector<256x512xbf16>, vector<64x512xf32> -> vector<64x512xf32>
    %c0_63 = arith.constant 0 : index
    %c0_64 = arith.constant 0 : index
    %87 = vector.load %arg25[%c0_63, %c0_64] : memref<1x512xf32, #tpu.memory_space<vmem>>, vector<1x512xf32>
    %88 = vector.broadcast %87 : vector<1x512xf32> to vector<64x512xf32>
    %89 = arith.addf %86, %88 : vector<64x512xf32>
    %90 = math.tanh %89 : vector<64x512xf32>
    %91 = arith.truncf %90 : vector<64x512xf32> to vector<64x512xbf16>
    %c0_65 = arith.constant 0 : index
    %c0_66 = arith.constant 0 : index
    %92 = vector.load %arg26[%c0_65, %c0_66] : memref<512x896xbf16, #tpu.memory_space<vmem>>, vector<512x896xbf16>
    %cst_67 = arith.constant dense<0.000000e+00> : vector<64x896xf32>
    %93 = tpu.matmul %91, %92, %cst_67 {dimension_numbers = #tpu.dot_dimension_numbers<[1], [0], [0], [1], [0, 0, 1, 1], [], []>} : vector<64x512xbf16>, vector<512x896xbf16>, vector<64x896xf32> -> vector<64x896xf32>
    %c0_68 = arith.constant 0 : index
    %c0_69 = arith.constant 0 : index
    %94 = vector.load %arg27[%c0_68, %c0_69] : memref<1x896xf32, #tpu.memory_space<vmem>>, vector<1x896xf32>
    %95 = vector.broadcast %94 : vector<1x896xf32> to vector<64x896xf32>
    %96 = arith.addf %93, %95 : vector<64x896xf32>
    %97 = arith.truncf %96 : vector<64x896xf32> to vector<64x896xbf16>
    %c0_70 = arith.constant 0 : index
    %c0_71 = arith.constant 0 : index
    %98 = vector.load %arg28[%c0_70, %c0_71] : memref<64x896xbf16, #tpu.memory_space<vmem>>, vector<64x896xbf16>
    tpu.vector_store %arg28[%c0_70, %c0_71], %97 {strides = array<i32>} : memref<64x896xbf16, #tpu.memory_space<vmem>>, vector<64x896xbf16>,
    %c64_i32 = arith.constant 64 : i32
    %99 = arith.muli %arg0, %c64_i32 : i32
    %100 = tpu.iota {dimensions = array<i32: 0>} : vector<64x1xi32>
    %101 = vector.broadcast %99 : i32 to vector<64x1xi32>
    %102 = arith.addi %101, %100 : vector<64x1xi32>
    %c100_i32 = arith.constant 100 : i32
    %103 = vector.broadcast %c100_i32 : i32 to vector<64x1xi32>
    %104 = arith.cmpi slt, %102, %103 : vector<64x1xi32>
    %105 = arith.extui %104 : vector<64x1xi1> to vector<64x1xi32>
    %106 = arith.sitofp %105 : vector<64x1xi32> to vector<64x1xf32>
    %c100_i32_72 = arith.constant 100 : i32
    %107 = arith.subi %c100_i32_72, %99 : i32
    %c64_i32_73 = arith.constant 64 : i32
    %108 = arith.minsi %107, %c64_i32_73 : i32
    %109 = arith.sitofp %108 : i32 to f32
    %110 = vector.broadcast %106 : vector<64x1xf32> to vector<64x896xf32>
    %111 = arith.mulf %96, %110 : vector<64x896xf32>
    %cst_74 = arith.constant dense<0.000000e+00> : vector<896xf32>
    %112 = vector.multi_reduction <add>, %111, %cst_74 [0] : vector<64x896xf32> to vector<896xf32>
    %113 = vector.shape_cast %112 : vector<896xf32> to vector<1x896xf32>
    %cst_75 = arith.constant 1.000000e+00 : f32
    %114 = arith.divf %cst_75, %109 : f32
    %115 = vector.broadcast %114 : f32 to vector<1x896xf32>
    %116 = arith.mulf %113, %115 : vector<1x896xf32>
    %117 = vector.broadcast %116 : vector<1x896xf32> to vector<64x896xf32>
    %118 = arith.subf %96, %117 : vector<64x896xf32>
    %119 = vector.broadcast %106 : vector<64x1xf32> to vector<64x896xf32>
    %120 = arith.mulf %118, %119 : vector<64x896xf32>
    %121 = vector.shape_cast %113 : vector<1x896xf32> to vector<1x1x896xf32>
    %c0_76 = arith.constant 0 : index
    %c0_77 = arith.constant 0 : index
    %c0_78 = arith.constant 0 : index
    %122 = vector.load %arg29[%c0_76, %c0_77, %c0_78] : memref<1x1x896xf32, #tpu.memory_space<vmem>>, vector<1x1x896xf32>
    tpu.vector_store %arg29[%c0_76, %c0_77, %c0_78], %121 {strides = array<i32>} : memref<1x1x896xf32, #tpu.memory_space<vmem>>, vector<1x1x896xf32>,
    %123 = arith.mulf %120, %120 : vector<64x896xf32>
    %cst_79 = arith.constant dense<0.000000e+00> : vector<896xf32>
    %124 = vector.multi_reduction <add>, %123, %cst_79 [0] : vector<64x896xf32> to vector<896xf32>
    %125 = vector.shape_cast %124 : vector<896xf32> to vector<1x896xf32>
    %126 = vector.shape_cast %125 : vector<1x896xf32> to vector<1x1x896xf32>
    %c0_80 = arith.constant 0 : index
    %c0_81 = arith.constant 0 : index
    %c0_82 = arith.constant 0 : index
    %127 = vector.load %arg30[%c0_80, %c0_81, %c0_82] : memref<1x1x896xf32, #tpu.memory_space<vmem>>, vector<1x1x896xf32>
    tpu.vector_store %arg30[%c0_80, %c0_81, %c0_82], %126 {strides = array<i32>} : memref<1x1x896xf32, #tpu.memory_space<vmem>>, vector<1x1x896xf32>,
    return
  }
  func.func @transform_0(%arg0: i32) -> (i32, i32) {
    %c0_i32 = arith.constant 0 : i32
    %c0_i32_0 = arith.constant 0 : i32
    return %arg0, %c0_i32 : i32, i32
  }
  func.func @transform_1(%arg0: i32) -> (i32, i32) {
    %c0_i32 = arith.constant 0 : i32
    %c0_i32_0 = arith.constant 0 : i32
    %c0_i32_1 = arith.constant 0 : i32
    return %c0_i32, %c0_i32_0 : i32, i32
  }
  func.func @transform_2(%arg0: i32) -> (i32, i32) {
    %c0_i32 = arith.constant 0 : i32
    %c0_i32_0 = arith.constant 0 : i32
    %c0_i32_1 = arith.constant 0 : i32
    return %c0_i32, %c0_i32_0 : i32, i32
  }
  func.func @transform_3(%arg0: i32) -> (i32, i32) {
    %c0_i32 = arith.constant 0 : i32
    %c0_i32_0 = arith.constant 0 : i32
    %c0_i32_1 = arith.constant 0 : i32
    return %c0_i32, %c0_i32_0 : i32, i32
  }
  func.func @transform_4(%arg0: i32) -> (i32, i32) {
    %c0_i32 = arith.constant 0 : i32
    %c0_i32_0 = arith.constant 0 : i32
    %c0_i32_1 = arith.constant 0 : i32
    return %c0_i32, %c0_i32_0 : i32, i32
  }
  func.func @transform_5(%arg0: i32) -> (i32, i32) {
    %c0_i32 = arith.constant 0 : i32
    %c0_i32_0 = arith.constant 0 : i32
    %c0_i32_1 = arith.constant 0 : i32
    return %c0_i32, %c0_i32_0 : i32, i32
  }
  func.func @transform_6(%arg0: i32) -> (i32, i32) {
    %c0_i32 = arith.constant 0 : i32
    %c0_i32_0 = arith.constant 0 : i32
    %c0_i32_1 = arith.constant 0 : i32
    return %c0_i32, %c0_i32_0 : i32, i32
  }
  func.func @transform_7(%arg0: i32) -> (i32, i32) {
    %c0_i32 = arith.constant 0 : i32
    %c0_i32_0 = arith.constant 0 : i32
    %c0_i32_1 = arith.constant 0 : i32
    return %c0_i32, %c0_i32_0 : i32, i32
  }
  func.func @transform_8(%arg0: i32) -> (i32, i32) {
    %c0_i32 = arith.constant 0 : i32
    %c0_i32_0 = arith.constant 0 : i32
    %c0_i32_1 = arith.constant 0 : i32
    return %c0_i32, %c0_i32_0 : i32, i32
  }
  func.func @transform_9(%arg0: i32) -> (i32, i32) {
    %c0_i32 = arith.constant 0 : i32
    %c0_i32_0 = arith.constant 0 : i32
    %c0_i32_1 = arith.constant 0 : i32
    return %c0_i32, %c0_i32_0 : i32, i32
  }
  func.func @transform_10(%arg0: i32) -> (i32, i32) {
    %c0_i32 = arith.constant 0 : i32
    %c0_i32_0 = arith.constant 0 : i32
    %c0_i32_1 = arith.constant 0 : i32
    return %c0_i32, %c0_i32_0 : i32, i32
  }
  func.func @transform_11(%arg0: i32) -> (i32, i32) {
    %c0_i32 = arith.constant 0 : i32
    %c0_i32_0 = arith.constant 0 : i32
    %c0_i32_1 = arith.constant 0 : i32
    return %c0_i32, %c0_i32_0 : i32, i32
  }
  func.func @transform_12(%arg0: i32) -> (i32, i32) {
    %c0_i32 = arith.constant 0 : i32
    %c0_i32_0 = arith.constant 0 : i32
    %c0_i32_1 = arith.constant 0 : i32
    return %c0_i32, %c0_i32_0 : i32, i32
  }
  func.func @transform_13(%arg0: i32) -> (i32, i32) {
    %c0_i32 = arith.constant 0 : i32
    %c0_i32_0 = arith.constant 0 : i32
    %c0_i32_1 = arith.constant 0 : i32
    return %c0_i32, %c0_i32_0 : i32, i32
  }
  func.func @transform_14(%arg0: i32) -> (i32, i32) {
    %c0_i32 = arith.constant 0 : i32
    %c0_i32_0 = arith.constant 0 : i32
    %c0_i32_1 = arith.constant 0 : i32
    return %c0_i32, %c0_i32_0 : i32, i32
  }
  func.func @transform_15(%arg0: i32) -> (i32, i32) {
    %c0_i32 = arith.constant 0 : i32
    %c0_i32_0 = arith.constant 0 : i32
    %c0_i32_1 = arith.constant 0 : i32
    return %c0_i32, %c0_i32_0 : i32, i32
  }
  func.func @transform_16(%arg0: i32) -> (i32, i32) {
    %c0_i32 = arith.constant 0 : i32
    %c0_i32_0 = arith.constant 0 : i32
    %c0_i32_1 = arith.constant 0 : i32
    return %c0_i32, %c0_i32_0 : i32, i32
  }
  func.func @transform_17(%arg0: i32) -> (i32, i32) {
    %c0_i32 = arith.constant 0 : i32
    %c0_i32_0 = arith.constant 0 : i32
    %c0_i32_1 = arith.constant 0 : i32
    return %c0_i32, %c0_i32_0 : i32, i32
  }
  func.func @transform_18(%arg0: i32) -> (i32, i32) {
    %c0_i32 = arith.constant 0 : i32
    %c0_i32_0 = arith.constant 0 : i32
    %c0_i32_1 = arith.constant 0 : i32
    return %c0_i32, %c0_i32_0 : i32, i32
  }
  func.func @transform_19(%arg0: i32) -> (i32, i32) {
    %c0_i32 = arith.constant 0 : i32
    %c0_i32_0 = arith.constant 0 : i32
    %c0_i32_1 = arith.constant 0 : i32
    return %c0_i32, %c0_i32_0 : i32, i32
  }
  func.func @transform_20(%arg0: i32) -> (i32, i32) {
    %c0_i32 = arith.constant 0 : i32
    %c0_i32_0 = arith.constant 0 : i32
    %c0_i32_1 = arith.constant 0 : i32
    return %c0_i32, %c0_i32_0 : i32, i32
  }
  func.func @transform_21(%arg0: i32) -> (i32, i32) {
    %c0_i32 = arith.constant 0 : i32
    %c0_i32_0 = arith.constant 0 : i32
    %c0_i32_1 = arith.constant 0 : i32
    return %c0_i32, %c0_i32_0 : i32, i32
  }
  func.func @transform_22(%arg0: i32) -> (i32, i32) {
    %c0_i32 = arith.constant 0 : i32
    %c0_i32_0 = arith.constant 0 : i32
    %c0_i32_1 = arith.constant 0 : i32
    return %c0_i32, %c0_i32_0 : i32, i32
  }
  func.func @transform_23(%arg0: i32) -> (i32, i32) {
    %c0_i32 = arith.constant 0 : i32
    %c0_i32_0 = arith.constant 0 : i32
    %c0_i32_1 = arith.constant 0 : i32
    return %c0_i32, %c0_i32_0 : i32, i32
  }
  func.func @transform_24(%arg0: i32) -> (i32, i32) {
    %c0_i32 = arith.constant 0 : i32
    %c0_i32_0 = arith.constant 0 : i32
    %c0_i32_1 = arith.constant 0 : i32
    return %c0_i32, %c0_i32_0 : i32, i32
  }
  func.func @transform_25(%arg0: i32) -> (i32, i32) {
    %c0_i32 = arith.constant 0 : i32
    %c0_i32_0 = arith.constant 0 : i32
    %c0_i32_1 = arith.constant 0 : i32
    return %c0_i32, %c0_i32_0 : i32, i32
  }
  func.func @transform_26(%arg0: i32) -> (i32, i32) {
    %c0_i32 = arith.constant 0 : i32
    %c0_i32_0 = arith.constant 0 : i32
    %c0_i32_1 = arith.constant 0 : i32
    return %c0_i32, %c0_i32_0 : i32, i32
  }
  func.func @transform_27(%arg0: i32) -> (i32, i32) {
    %c0_i32 = arith.constant 0 : i32
    %c0_i32_0 = arith.constant 0 : i32
    return %arg0, %c0_i32 : i32, i32
  }
  func.func @transform_28(%arg0: i32) -> (i32, i32, i32) {
    %c0_i32 = arith.constant 0 : i32
    %c0_i32_0 = arith.constant 0 : i32
    %c0_i32_1 = arith.constant 0 : i32
    return %arg0, %c0_i32, %c0_i32_0 : i32, i32, i32
  }
  func.func @transform_29(%arg0: i32) -> (i32, i32, i32) {
    %c0_i32 = arith.constant 0 : i32
    %c0_i32_0 = arith.constant 0 : i32
    %c0_i32_1 = arith.constant 0 : i32
    return %arg0, %c0_i32, %c0_i32_0 : i32, i32, i32
  }
}

module attributes {stable_mosaic.version = 11 : i64} {
  func.func @bn2_tanh_kernel(%arg0: i32, %arg1: memref<64x896xbf16, #tpu.memory_space<vmem>>, %arg2: memref<1x896xf32, #tpu.memory_space<vmem>>, %arg3: memref<1x896xf32, #tpu.memory_space<vmem>>, %arg4: memref<64x784xf32, #tpu.memory_space<vmem>>) attributes {dimension_semantics = [#tpu.dimension_semantics<parallel>], iteration_bounds = array<i64: 2>, scalar_prefetch = 0 : i64, scratch_operands = 0 : i64, tpu.core_type = #tpu.core_type<tc>, window_params = [{transform_indices = @transform_0, window_bounds = array<i64: 64, 896>}, {pipeline_mode = #tpu.pipeline_mode<synchronous>, transform_indices = @transform_1, window_bounds = array<i64: 1, 896>}, {pipeline_mode = #tpu.pipeline_mode<synchronous>, transform_indices = @transform_2, window_bounds = array<i64: 1, 896>}, {transform_indices = @transform_3, window_bounds = array<i64: 64, 784>}]} {
    %c0 = arith.constant 0 : index
    %c0_0 = arith.constant 0 : index
    %0 = vector.load %arg1[%c0, %c0_0] : memref<64x896xbf16, #tpu.memory_space<vmem>>, vector<64x896xbf16>
    %1 = arith.extf %0 : vector<64x896xbf16> to vector<64x896xf32>
    %c0_1 = arith.constant 0 : index
    %c0_2 = arith.constant 0 : index
    %2 = vector.load %arg2[%c0_1, %c0_2] : memref<1x896xf32, #tpu.memory_space<vmem>>, vector<1x896xf32>
    %3 = vector.broadcast %2 : vector<1x896xf32> to vector<64x896xf32>
    %4 = arith.mulf %1, %3 : vector<64x896xf32>
    %c0_3 = arith.constant 0 : index
    %c0_4 = arith.constant 0 : index
    %5 = vector.load %arg3[%c0_3, %c0_4] : memref<1x896xf32, #tpu.memory_space<vmem>>, vector<1x896xf32>
    %6 = vector.broadcast %5 : vector<1x896xf32> to vector<64x896xf32>
    %7 = arith.addf %4, %6 : vector<64x896xf32>
    %8 = math.tanh %7 : vector<64x896xf32>
    %9 = vector.extract_strided_slice %8 {offsets = [0, 0], sizes = [64, 784], strides = [1, 1]} : vector<64x896xf32> to vector<64x784xf32>
    %c0_5 = arith.constant 0 : index
    %c0_6 = arith.constant 0 : index
    %10 = vector.load %arg4[%c0_5, %c0_6] : memref<64x784xf32, #tpu.memory_space<vmem>>, vector<64x784xf32>
    tpu.vector_store %arg4[%c0_5, %c0_6], %9 {strides = array<i32>} : memref<64x784xf32, #tpu.memory_space<vmem>>, vector<64x784xf32>,
    return
  }
  func.func @transform_0(%arg0: i32) -> (i32, i32) {
    %c0_i32 = arith.constant 0 : i32
    %c0_i32_0 = arith.constant 0 : i32
    return %arg0, %c0_i32 : i32, i32
  }
  func.func @transform_1(%arg0: i32) -> (i32, i32) {
    %c0_i32 = arith.constant 0 : i32
    %c0_i32_0 = arith.constant 0 : i32
    %c0_i32_1 = arith.constant 0 : i32
    return %c0_i32, %c0_i32_0 : i32, i32
  }
  func.func @transform_2(%arg0: i32) -> (i32, i32) {
    %c0_i32 = arith.constant 0 : i32
    %c0_i32_0 = arith.constant 0 : i32
    %c0_i32_1 = arith.constant 0 : i32
    return %c0_i32, %c0_i32_0 : i32, i32
  }
  func.func @transform_3(%arg0: i32) -> (i32, i32) {
    %c0_i32 = arith.constant 0 : i32
    %c0_i32_0 = arith.constant 0 : i32
    return %arg0, %c0_i32 : i32, i32
  }
}

</mosaic_0001>

<bundles_post_ra>
// kernel: ae_forward.3
= control target key start
LH: loop header
LB: loop body
LE: loop exit
PB: predicated region body
PF: predicated region fallthrough
CT: control target
= control target key end

     0   :  { %s785_s12 = smov 0   ;;  %s1060_s0 = inlined_call_operand.vmem [shape: bf16[128,896], index: 0, kind: input, shape index: {}]   ;;  %s1061_s1 = inlined_call_operand.vmem [shape: f32[1,896], index: 1, kind: input, shape index: {}]   ;;  %s1062_s2 = inlined_call_operand.vmem [shape: f32[1,896], index: 2, kind: input, shape index: {}]   ;;  %s1063_s3 = inlined_call_operand.vmem [shape: f32[128,784], index: 3, kind: output, shape index: {}]  }
   0x1 LB: > { %s624_s13 = sadd.s32 4294967295, %s763_s12   ;;  %p628_p0 = scmp.ge.s32.totalorder %s763_s12, 1  ;;  %s763_s12 = sphi %s785_s12, %s13_s12  }
   0x2   : > { %p139_p1 = scmp.lt.s32.totalorder %s763_s12, 3 }
   0x4   : > { %p140_p2 = pnand %p628_p0, %p139_p1 }
   0x5   : > { %s629_s14 = sshll.u32 (!%p140_p2), %s624_s13, 3  ;;  %v269_v0 = vlaneseq (!%p140_p2)  ;;  %v267_v2 = vld [vmem:[%s1061_s1] sm:$0xff] (!%p140_p2)  ;;  %vm515_vm0 = vcmask (!%p140_p2), 130048  }
   0x6   : > { %143 = sbr.rel (%p140_p2) target bundleno = 91 (0x5b), region = 32  ;;  %p166_p3 = scmp.lt.s32.totalorder (!%p140_p2), %s629_s14, 15  ;;  %v360_v3 = vld [vmem:[%s1062_s2] sm:$0xff] (!%p140_p2) }
   0x7   : > { %v270_v1 = vshrl.u32 (!%p140_p2), %v269_v0, 7 }
   0x9   : > { %v271_v4 = vsub.s32 (!%p140_p2), 0, %v270_v1  ;;  %v275_v5 = vsub.s32 (!%p140_p2), 1, %v270_v1  ;;  %v279_v6 = vsub.s32 (!%p140_p2), 2, %v270_v1  ;;  %v283_v7 = vsub.s32 (!%p140_p2), 3, %v270_v1 }
   0xa   : > { %v287_v8 = vsub.s32 (!%p140_p2), 4, %v270_v1  ;;  %v291_v9 = vsub.s32 (!%p140_p2), 5, %v270_v1  ;;  %v295_v10 = vsub.s32 (!%p140_p2), 6, %v270_v1 }
   0xb   : > { %v802_v11 = vrot.slane (!%p140_p2), %v267_v2, %v271_v4  ;;  %v804_v12 = vrot.slane (!%p140_p2), %v360_v3, %v271_v4  ;;  %v806_v13 = vrot.slane (!%p140_p2), %v267_v2, %v275_v5  ;;  %v808_v14 = vrot.slane (!%p140_p2), %v360_v3, %v275_v5 }
   0xc   : > { %v815_v15 = vrot.slane (!%p140_p2), %v267_v2, %v279_v6  ;;  %v817_v16 = vrot.slane (!%p140_p2), %v360_v3, %v279_v6  ;;  %v819_v17 = vrot.slane (!%p140_p2), %v267_v2, %v283_v7  ;;  %v821_v18 = vrot.slane (!%p140_p2), %v360_v3, %v283_v7 }
   0xd   : > { %s1065_s14 = smov (!%p166_p3, %s629_s14), 15  ;;  %v826_v22 = vrot.slane %v267_v2, %v287_v8  ;;  %v828_v23 = vrot.slane %v360_v3, %v287_v8  ;;  %v830_v24 = vrot.slane %v267_v2, %v291_v9  ;;  %v832_v25 = vrot.slane %v360_v3, %v291_v9 }
   0xe   : > { %s635_s19 = smul.u32 28, %s1065_s14  ;;  %v835_v34 = vrot.slane %v267_v2, %v295_v10  ;;  %v845_v43 = vrot.slane %v360_v3, %v295_v10 }
   0xf   : > { %s636_s23 = smul.u32 56, %s1065_s14 }
  0x10   : > { %s813_s22 = scalar_lea.vmem %s1060_s0, %s635_s19 }
  0x11   : > { %v179_v19 = vld [vmem:[%s813_s22] sm:$0xff]  ;;  %v180_v20 = vld [vmem:[%s813_s22 + $0x8] sm:$0xff]  ;;  %v181_v21 = vld [vmem:[%s813_s22 + $0x10] sm:$0xff]  ;;  %s876_s26 = scalar_lea.vmem %s1063_s3, %s636_s23 }
  0x12   : > { %v211_v26 = vunpack.c.l.bf16 %v179_v19  ;;  %v212_v27 = vunpack.c.h.bf16 %v179_v19  ;;  %v213_v28 = vunpack.c.l.bf16 %v180_v20  ;;  %v214_v29 = vunpack.c.h.bf16 %v180_v20  ;;  %v182_v30 = vld [vmem:[%s813_s22 + $0x18] ss:$28 sps:$4 sm:$0xff]   ;;  %v183_v39 = vld [vmem:[%s813_s22 + $0x1c] sm:$0xff]  ;;  %v184_v44 = vld [vmem:[%s813_s22 + $0x24] sm:$0xff] }
  0x13   : > { %v215_v31 = vunpack.c.l.bf16 %v181_v21  ;;  %v216_v32 = vunpack.c.h.bf16 %v181_v21  ;;  %v217_v33 = vunpack.c.l.bf16 %v182_v30  ;;  %v185_v49 = vld [vmem:[%s813_s22 + $0x2c] sm:$0xff]  ;;  %v218_v53 = vunpack.c.l.bf16 %v183_v39  ;;  %v187_v2 = vld [vmem:[%s813_s22 + $0x38] sm:$0xff]  ;;  %v188_v3 = vld [vmem:[%s813_s22 + $0x40] sm:$0xff] }
  0x14   : > { %v304_v35 = vmul.f32 %v802_v11, %v211_v26  ;;  %v305_v36 = vmul.f32 %v806_v13, %v212_v27  ;;  %v306_v37 = vmul.f32 %v815_v15, %v213_v28  ;;  %v307_v38 = vmul.f32 %v819_v17, %v214_v29  ;;  %v189_v7 = vld [vmem:[%s813_s22 + $0x48] sm:$0xff] }
  0x15   : > { %v308_v40 = vmul.f32 %v826_v22, %v215_v31  ;;  %v309_v41 = vmul.f32 %v830_v24, %v216_v32  ;;  %v310_v42 = vmul.f32 %v835_v34, %v217_v33  ;;  %v219_v54 = vunpack.c.h.bf16 %v183_v39 }
  0x16   : > { %v397_v45 = vadd.f32 %v804_v12, %v304_v35  ;;  %v398_v46 = vadd.f32 %v808_v14, %v305_v36  ;;  %v399_v47 = vadd.f32 %v817_v16, %v306_v37  ;;  %v400_v48 = vadd.f32 %v821_v18, %v307_v38  ;;  %v885_v36 = vld [vmem:[%s813_s22 + $0x50] ss:$28 sps:$4 sm:$0xff]   ;;  %v191_v37 = vld [vmem:[%s813_s22 + $0x54] sm:$0xff] }
  0x17   : > { %v401_v50 = vadd.f32 %v828_v23, %v308_v40  ;;  %v402_v51 = vadd.f32 %v832_v25, %v309_v41  ;;  %v403_v52 = vadd.f32 %v845_v43, %v310_v42  ;;  %v220_v55 = vunpack.c.l.bf16 %v184_v44  ;;  %v192_v42 = vld [vmem:[%s813_s22 + $0x5c] sm:$0xff] }
  0x18   : > { %645 = vtanh.f32 %v397_v45  ;;  %v221_v56 = vunpack.c.h.bf16 %v184_v44  ;;  %v311_v57 = vmul.f32 %v802_v11, %v218_v53  ;;  %v222_v58 = vunpack.c.l.bf16 %v185_v49 }
  0x19   : > { %647 = vtanh.f32 %v398_v46  ;;  %v223_v59 = vunpack.c.h.bf16 %v185_v49  ;;  %v312_v60 = vmul.f32 %v806_v13, %v219_v54  ;;  %v313_v61 = vmul.f32 %v815_v15, %v220_v55 }
  0x1a   : > { %649 = vtanh.f32 %v399_v47  ;;  %v314_v62 = vmul.f32 %v819_v17, %v221_v56  ;;  %v404_v63 = vadd.f32 %v804_v12, %v311_v57  ;;  %v315_v0 = vmul.f32 %v826_v22, %v222_v58 }
  0x1b   : > { %651 = vtanh.f32 %v400_v48  ;;  %v316_v1 = vmul.f32 %v830_v24, %v223_v59  ;;  %v405_v4 = vadd.f32 %v808_v14, %v312_v60  ;;  %v406_v5 = vadd.f32 %v817_v16, %v313_v61  ;;  %v193_v60 = vld [vmem:[%s813_s22 + $0x64] sm:$0xff] }
  0x1c   : > { %653 = vtanh.f32 %v401_v50  ;;  %v407_v6 = vadd.f32 %v821_v18, %v314_v62  ;;  %v408_v8 = vadd.f32 %v828_v23, %v315_v0  ;;  %v224_v10 = vunpack.c.h.bf16 %v182_v30 }
  0x1d   : > { %655 = vtanh.f32 %v402_v51  ;;  %v409_v9 = vadd.f32 %v832_v25, %v316_v1  ;;  %v225_v19 = vunpack.c.l.bf16 %v187_v2  ;;  %v226_v20 = vunpack.c.h.bf16 %v187_v2  ;;  %v195_v1 = vld [vmem:[%s813_s22 + $0x70] sm:$0xff] }
  0x1e   : > { %657 = vtanh.f32 %v403_v52  ;;  %v227_v21 = vunpack.c.l.bf16 %v188_v3  ;;  %v317_v26 = vmul.f32 %v835_v34, %v224_v10  ;;  %v228_v27 = vunpack.c.h.bf16 %v188_v3 }
  0x1f   : > { %659 = vtanh.f32 %v404_v63  ;;  %v229_v28 = vunpack.c.l.bf16 %v189_v7  ;;  %v318_v29 = vmul.f32 %v802_v11, %v225_v19  ;;  %v319_v30 = vmul.f32 %v806_v13, %v226_v20 }
  0x20   : > { %661 = vtanh.f32 %v405_v4  ;;  %v320_v31 = vmul.f32 %v815_v15, %v227_v21  ;;  %v410_v32 = vadd.f32 %v845_v43, %v317_v26  ;;  %v321_v33 = vmul.f32 %v819_v17, %v228_v27 }
  0x21   : > { %663 = vtanh.f32 %v406_v5  ;;  %v322_v35 = vmul.f32 %v826_v22, %v229_v28  ;;  %v411_v39 = vadd.f32 %v804_v12, %v318_v29  ;;  %v412_v40 = vadd.f32 %v808_v14, %v319_v30 }
  0x22   : > { %v646_v38 = vpop.eup %645  ;;  %665 = vtanh.f32 %v407_v6  ;;  %v413_v41 = vadd.f32 %v817_v16, %v320_v31  ;;  %v414_v45 = vadd.f32 %v821_v18, %v321_v33  ;;  %v230_v47 = vunpack.c.h.bf16 %v189_v7  ;;  %v196_v6 = vld [vmem:[%s813_s22 + $0x78] sm:$0xff] }
  0x23   : > { %v648_v44 = vpop.eup %647  ;;  %509 = vst [vmem:[%s876_s26] sm:$0xff] %v646_v38  ;;  %667 = vtanh.f32 %v408_v8  ;;  %v415_v46 = vadd.f32 %v828_v23, %v322_v35  ;;  %v231_v49 = vunpack.c.l.bf16 %v885_v36  ;;  %v232_v50 = vunpack.c.l.bf16 %v191_v37 }
  0x24   : > { %v650_v48 = vpop.eup %649  ;;  %510 = vst [vmem:[%s876_s26 + $0x8] sm:$0xff] %v648_v44  ;;  %669 = vtanh.f32 %v409_v9  ;;  %v233_v51 = vunpack.c.h.bf16 %v191_v37  ;;  %v323_v53 = vmul.f32 %v830_v24, %v230_v47  ;;  %v234_v54 = vunpack.c.l.bf16 %v192_v42  ;;  %v199_v47 = vld [vmem:[%s813_s22 + $0x8c] sm:$0xff] }
  0x25   : > { %v652_v52 = vpop.eup %651  ;;  %511 = vst [vmem:[%s876_s26 + $0x10] sm:$0xff] %v650_v48  ;;  %671 = vtanh.f32 %v410_v32  ;;  %v235_v55 = vunpack.c.h.bf16 %v192_v42  ;;  %v324_v57 = vmul.f32 %v835_v34, %v231_v49  ;;  %v325_v58 = vmul.f32 %v802_v11, %v232_v50 }
  0x26   : > { %v654_v56 = vpop.eup %653  ;;  %512 = vst [vmem:[%s876_s26 + $0x18] sm:$0xff] %v652_v52  ;;  %673 = vtanh.f32 %v411_v39  ;;  %v326_v59 = vmul.f32 %v806_v13, %v233_v51  ;;  %v416_v62 = vadd.f32 %v832_v25, %v323_v53  ;;  %v327_v63 = vmul.f32 %v815_v15, %v234_v54 }
  0x27   : > { %v656_v61 = vpop.eup %655  ;;  %513 = vst [vmem:[%s876_s26 + $0x20] sm:$0xff] %v654_v56  ;;  %675 = vtanh.f32 %v412_v40  ;;  %v328_v0 = vmul.f32 %v819_v17, %v235_v55  ;;  %v417_v3 = vadd.f32 %v845_v43, %v324_v57  ;;  %v418_v4 = vadd.f32 %v804_v12, %v325_v58  ;;  %v197_v40 = vld [vmem:[%s813_s22 + $0x80] sm:$0xff] }
  0x28   : > { %v658_v2 = vpop.eup %657  ;;  %514 = vst [vmem:[%s876_s26 + $0x28] sm:$0xff] %v656_v61  ;;  %677 = vtanh.f32 %v413_v41  ;;  %v419_v5 = vadd.f32 %v808_v14, %v326_v59  ;;  %v420_v8 = vadd.f32 %v817_v16, %v327_v63  ;;  %v236_v10 = vunpack.c.l.bf16 %v193_v60  ;;  %v932_v41 = vld [vmem:[%s813_s22 + $0x88] ss:$28 sps:$4 sm:$0xff]  }
  0x29   : > { %v660_v7 = vpop.eup %659  ;;  %516 = vst.msk [vmem:[%s876_s26 + $0x30] sm:$0xff] %vm515_vm0, %v658_v2  ;;  %679 = vtanh.f32 %v414_v45  ;;  %v421_v9 = vadd.f32 %v821_v18, %v328_v0  ;;  %v237_v20 = vunpack.c.h.bf16 %v193_v60  ;;  %v238_v21 = vunpack.c.h.bf16 %v885_v36  ;;  %v200_v0 = vld [vmem:[%s813_s22 + $0x94] sm:$0xff] }
  0x2a   : > { %v662_v19 = vpop.eup %661  ;;  %517 = vst [vmem:[%s876_s26 + $0x38] sm:$0xff] %v660_v7  ;;  %681 = vtanh.f32 %v415_v46  ;;  %v239_v26 = vunpack.c.l.bf16 %v195_v1  ;;  %v329_v28 = vmul.f32 %v826_v22, %v236_v10  ;;  %v240_v29 = vunpack.c.h.bf16 %v195_v1  ;;  %v203_v10 = vld [vmem:[%s813_s22 + $0xa8] sm:$0xff] }
  0x2b   : > { %v664_v27 = vpop.eup %663  ;;  %518 = vst [vmem:[%s876_s26 + $0x40] sm:$0xff] %v662_v19  ;;  %683 = vtanh.f32 %v416_v62  ;;  %v241_v30 = vunpack.c.l.bf16 %v196_v6  ;;  %v330_v32 = vmul.f32 %v830_v24, %v237_v20  ;;  %v331_v33 = vmul.f32 %v835_v34, %v238_v21 }
  0x2c   : > { %v666_v31 = vpop.eup %665  ;;  %519 = vst [vmem:[%s876_s26 + $0x48] sm:$0xff] %v664_v27  ;;  %685 = vtanh.f32 %v417_v3  ;;  %v332_v35 = vmul.f32 %v802_v11, %v239_v26  ;;  %v422_v37 = vadd.f32 %v828_v23, %v329_v28  ;;  %v333_v38 = vmul.f32 %v806_v13, %v240_v29 }
  0x2d   : > { %v668_v36 = vpop.eup %667  ;;  %520 = vst [vmem:[%s876_s26 + $0x50] sm:$0xff] %v666_v31  ;;  %687 = vtanh.f32 %v418_v4  ;;  %v334_v39 = vmul.f32 %v815_v15, %v241_v30  ;;  %v423_v44 = vadd.f32 %v832_v25, %v330_v32  ;;  %v424_v45 = vadd.f32 %v845_v43, %v331_v33 }
  0x2e   : > { %v670_v42 = vpop.eup %669  ;;  %521 = vst [vmem:[%s876_s26 + $0x58] sm:$0xff] %v668_v36  ;;  %689 = vtanh.f32 %v419_v5  ;;  %v425_v46 = vadd.f32 %v804_v12, %v332_v35  ;;  %v426_v49 = vadd.f32 %v808_v14, %v333_v38  ;;  %v242_v51 = vunpack.c.h.bf16 %v196_v6  ;;  %v201_v5 = vld [vmem:[%s813_s22 + $0x9c] sm:$0xff] }
  0x2f   : > { %v672_v48 = vpop.eup %671  ;;  %522 = vst [vmem:[%s876_s26 + $0x60] sm:$0xff] %v670_v42  ;;  %691 = vtanh.f32 %v420_v8  ;;  %v427_v50 = vadd.f32 %v817_v16, %v334_v39  ;;  %v243_v53 = vunpack.c.l.bf16 %v197_v40  ;;  %v244_v54 = vunpack.c.h.bf16 %v197_v40 }
  0x30   : > { %v674_v52 = vpop.eup %673  ;;  %523 = vst.msk [vmem:[%s876_s26 + $0x68] sm:$0xff] %vm515_vm0, %v672_v48  ;;  %693 = vtanh.f32 %v421_v9  ;;  %v245_v55 = vunpack.c.l.bf16 %v932_v41  ;;  %v335_v57 = vmul.f32 %v819_v17, %v242_v51  ;;  %v246_v58 = vunpack.c.l.bf16 %v199_v47  ;;  %v985_v51 = vld [vmem:[%s813_s22 + $0xc0] ss:$28 sps:$4 sm:$0xff]  }
  0x31   : > { %v676_v56 = vpop.eup %675  ;;  %524 = vst [vmem:[%s876_s26 + $0x70] sm:$0xff] %v674_v52  ;;  %695 = vtanh.f32 %v422_v37  ;;  %v247_v59 = vunpack.c.h.bf16 %v199_v47  ;;  %v336_v61 = vmul.f32 %v826_v22, %v243_v53  ;;  %v337_v62 = vmul.f32 %v830_v24, %v244_v54 }
  0x32   : > { %v678_v60 = vpop.eup %677  ;;  %525 = vst [vmem:[%s876_s26 + $0x78] sm:$0xff] %v676_v56  ;;  %697 = vtanh.f32 %v423_v44  ;;  %v338_v63 = vmul.f32 %v835_v34, %v245_v55  ;;  %v428_v2 = vadd.f32 %v821_v18, %v335_v57  ;;  %v339_v3 = vmul.f32 %v802_v11, %v246_v58 }
  0x33   : > { %v680_v1 = vpop.eup %679  ;;  %526 = vst [vmem:[%s876_s26 + $0x80] sm:$0xff] %v678_v60  ;;  %699 = vtanh.f32 %v424_v45  ;;  %v340_v4 = vmul.f32 %v806_v13, %v247_v59  ;;  %v429_v7 = vadd.f32 %v828_v23, %v336_v61  ;;  %v430_v8 = vadd.f32 %v832_v25, %v337_v62  ;;  %v204_v45 = vld [vmem:[%s813_s22 + $0xb0] sm:$0xff] }
  0x34   : > { %v682_v6 = vpop.eup %681  ;;  %527 = vst [vmem:[%s876_s26 + $0x88] sm:$0xff] %v680_v1  ;;  %701 = vtanh.f32 %v425_v46  ;;  %v431_v9 = vadd.f32 %v845_v43, %v338_v63  ;;  %v432_v20 = vadd.f32 %v804_v12, %v339_v3  ;;  %v248_v26 = vunpack.c.l.bf16 %v200_v0  ;;  %v205_v46 = vld [vmem:[%s813_s22 + $0xb8] sm:$0xff] }
  0x35   : > { %v684_v19 = vpop.eup %683  ;;  %528 = vst [vmem:[%s876_s26 + $0x90] sm:$0xff] %v682_v6  ;;  %703 = vtanh.f32 %v426_v49  ;;  %v433_v21 = vadd.f32 %v808_v14, %v340_v4  ;;  %v249_v28 = vunpack.c.h.bf16 %v200_v0  ;;  %v250_v29 = vunpack.c.l.bf16 %v201_v5  ;;  %v207_v4 = vld [vmem:[%s813_s22 + $0xc4] sm:$0xff] }
  0x36   : > { %v686_v27 = vpop.eup %685  ;;  %529 = vst [vmem:[%s876_s26 + $0x98] sm:$0xff] %v684_v19  ;;  %705 = vtanh.f32 %v427_v50  ;;  %v251_v30 = vunpack.c.h.bf16 %v201_v5  ;;  %v341_v32 = vmul.f32 %v815_v15, %v248_v26  ;;  %v252_v33 = vunpack.c.h.bf16 %v932_v41  ;;  %v209_v26 = vld [vmem:[%s813_s22 + $0xd4] sm:$0xff] }
  0x37   : > { %v688_v31 = vpop.eup %687  ;;  %530 = vst.msk [vmem:[%s876_s26 + $0xa0] sm:$0xff] %vm515_vm0, %v686_v27  ;;  %707 = vtanh.f32 %v428_v2  ;;  %v253_v35 = vunpack.c.l.bf16 %v203_v10  ;;  %v342_v37 = vmul.f32 %v819_v17, %v249_v28  ;;  %v343_v38 = vmul.f32 %v826_v22, %v250_v29 }
  0x38   : > { %v690_v36 = vpop.eup %689  ;;  %531 = vst [vmem:[%s876_s26 + $0xa8] sm:$0xff] %v688_v31  ;;  %709 = vtanh.f32 %v429_v7  ;;  %v344_v39 = vmul.f32 %v830_v24, %v251_v30  ;;  %v434_v42 = vadd.f32 %v817_v16, %v341_v32  ;;  %v345_v41 = vmul.f32 %v835_v34, %v252_v33 }
  0x39   : > { %v692_v40 = vpop.eup %691  ;;  %532 = vst [vmem:[%s876_s26 + $0xb0] sm:$0xff] %v690_v36  ;;  %711 = vtanh.f32 %v430_v8  ;;  %v346_v44 = vmul.f32 %v802_v11, %v253_v35  ;;  %v435_v48 = vadd.f32 %v821_v18, %v342_v37  ;;  %v436_v49 = vadd.f32 %v828_v23, %v343_v38 }
  0x3a   : > { %v694_v47 = vpop.eup %693  ;;  %533 = vst [vmem:[%s876_s26 + $0xb8] sm:$0xff] %v692_v40  ;;  %713 = vtanh.f32 %v431_v9  ;;  %v437_v50 = vadd.f32 %v832_v25, %v344_v39  ;;  %v438_v53 = vadd.f32 %v845_v43, %v345_v41  ;;  %v254_v55 = vunpack.c.h.bf16 %v203_v10  ;;  %v208_v9 = vld [vmem:[%s813_s22 + $0xcc] sm:$0xff] }
  0x3b   : > { %v696_v52 = vpop.eup %695  ;;  %534 = vst [vmem:[%s876_s26 + $0xc0] sm:$0xff] %v694_v47  ;;  %715 = vtanh.f32 %v432_v20  ;;  %v439_v54 = vadd.f32 %v804_v12, %v346_v44  ;;  %v255_v57 = vunpack.c.l.bf16 %v204_v45  ;;  %v256_v58 = vunpack.c.h.bf16 %v204_v45 }
  0x3c   : > { %v698_v56 = vpop.eup %697  ;;  %535 = vst [vmem:[%s876_s26 + $0xc8] sm:$0xff] %v696_v52  ;;  %717 = vtanh.f32 %v433_v21  ;;  %v257_v59 = vunpack.c.l.bf16 %v205_v46  ;;  %v347_v61 = vmul.f32 %v806_v13, %v254_v55  ;;  %v258_v62 = vunpack.c.h.bf16 %v205_v46 }
  0x3d   : > { %v700_v60 = vpop.eup %699  ;;  %536 = vst [vmem:[%s876_s26 + $0xd0] sm:$0xff] %v698_v56  ;;  %719 = vtanh.f32 %v434_v42  ;;  %v259_v63 = vunpack.c.l.bf16 %v985_v51  ;;  %v348_v1 = vmul.f32 %v815_v15, %v255_v57  ;;  %v349_v2 = vmul.f32 %v819_v17, %v256_v58 }
  0x3e   : > { %v702_v0 = vpop.eup %701  ;;  %537 = vst.msk [vmem:[%s876_s26 + $0xd8] sm:$0xff] %vm515_vm0, %v700_v60  ;;  %721 = vtanh.f32 %v435_v48  ;;  %v350_v3 = vmul.f32 %v826_v22, %v257_v59  ;;  %v440_v6 = vadd.f32 %v808_v14, %v347_v61  ;;  %v351_v7 = vmul.f32 %v830_v24, %v258_v62 }
  0x3f   : > { %v704_v5 = vpop.eup %703  ;;  %538 = vst [vmem:[%s876_s26 + $0xe0] sm:$0xff] %v702_v0  ;;  %723 = vtanh.f32 %v436_v49  ;;  %v352_v8 = vmul.f32 %v835_v34, %v259_v63  ;;  %v441_v19 = vadd.f32 %v817_v16, %v348_v1  ;;  %v442_v20 = vadd.f32 %v821_v18, %v349_v2 }
  0x40   : > { %v706_v10 = vpop.eup %705  ;;  %539 = vst [vmem:[%s876_s26 + $0xe8] sm:$0xff] %v704_v5  ;;  %725 = vtanh.f32 %v437_v50  ;;  %v443_v21 = vadd.f32 %v828_v23, %v350_v3  ;;  %v444_v28 = vadd.f32 %v832_v25, %v351_v7  ;;  %v260_v30 = vunpack.c.l.bf16 %v207_v4 }
  0x41   : > { %v708_v27 = vpop.eup %707  ;;  %540 = vst [vmem:[%s876_s26 + $0xf0] sm:$0xff] %v706_v10  ;;  %727 = vtanh.f32 %v438_v53  ;;  %v445_v29 = vadd.f32 %v845_v43, %v352_v8  ;;  %v261_v32 = vunpack.c.h.bf16 %v207_v4  ;;  %v262_v33 = vunpack.c.l.bf16 %v208_v9 }
  0x42   : > { %v710_v31 = vpop.eup %709  ;;  %541 = vst [vmem:[%s876_s26 + $0xf8] sm:$0xff] %v708_v27  ;;  %729 = vtanh.f32 %v439_v54  ;;  %v263_v35 = vunpack.c.h.bf16 %v208_v9  ;;  %v353_v37 = vmul.f32 %v802_v11, %v260_v30  ;;  %v264_v38 = vunpack.c.l.bf16 %v209_v26 }
  0x43   : > { %v712_v36 = vpop.eup %711  ;;  %542 = vst [vmem:[%s876_s26 + $0x100] sm:$0xff] %v710_v31  ;;  %731 = vtanh.f32 %v440_v6  ;;  %v265_v39 = vunpack.c.h.bf16 %v209_v26  ;;  %v354_v42 = vmul.f32 %v806_v13, %v261_v32  ;;  %v355_v41 = vmul.f32 %v815_v15, %v262_v33 }
  0x44   : > { %v714_v40 = vpop.eup %713  ;;  %543 = vst [vmem:[%s876_s26 + $0x108] sm:$0xff] %v712_v36  ;;  %733 = vtanh.f32 %v441_v19  ;;  %v356_v44 = vmul.f32 %v819_v17, %v263_v35  ;;  %v446_v46 = vadd.f32 %v804_v12, %v353_v37  ;;  %v357_v11 = vmul.f32 %v826_v22, %v264_v38 }
  0x45   : > { %v716_v45 = vpop.eup %715  ;;  %544 = vst.msk [vmem:[%s876_s26 + $0x110] sm:$0xff] %vm515_vm0, %v714_v40  ;;  %735 = vtanh.f32 %v442_v20  ;;  %v447_v48 = vadd.f32 %v808_v14, %v354_v42  ;;  %v358_v13 = vmul.f32 %v830_v24, %v265_v39  ;;  %v448_v17 = vadd.f32 %v817_v16, %v355_v41 }
  0x46   : > { %v718_v47 = vpop.eup %717  ;;  %545 = vst [vmem:[%s876_s26 + $0x118] sm:$0xff] %v716_v45  ;;  %737 = vtanh.f32 %v443_v21  ;;  %v266_v49 = vunpack.c.h.bf16 %v985_v51  ;;  %v449_v22 = vadd.f32 %v821_v18, %v356_v44  ;;  %v450_v14 = vadd.f32 %v828_v23, %v357_v11 }
  0x47   : > { %v720_v15 = vpop.eup %719  ;;  %546 = vst [vmem:[%s876_s26 + $0x120] sm:$0xff] %v718_v47  ;;  %739 = vtanh.f32 %v444_v28  ;;  %v451_v16 = vadd.f32 %v832_v25, %v358_v13 }
  0x48   : > { %v722_v12 = vpop.eup %721  ;;  %547 = vst [vmem:[%s876_s26 + $0x128] sm:$0xff] %v720_v15  ;;  %741 = vtanh.f32 %v445_v29  ;;  %v359_v24 = vmul.f32 %v835_v34, %v266_v49 }
  0x49   : > { %v724_v50 = vpop.eup %723  ;;  %548 = vst [vmem:[%s876_s26 + $0x130] sm:$0xff] %v722_v12  ;;  %743 = vtanh.f32 %v446_v46 }
  0x4a   : > { %v726_v52 = vpop.eup %725  ;;  %549 = vst [vmem:[%s876_s26 + $0x138] sm:$0xff] %v724_v50  ;;  %745 = vtanh.f32 %v447_v48  ;;  %v452_v18 = vadd.f32 %v845_v43, %v359_v24 }
  0x4b   : > { %v728_v51 = vpop.eup %727  ;;  %550 = vst [vmem:[%s876_s26 + $0x140] sm:$0xff] %v726_v52  ;;  %747 = vtanh.f32 %v448_v17 }
  0x4c   : > { %v730_v53 = vpop.eup %729  ;;  %551 = vst.msk [vmem:[%s876_s26 + $0x148] sm:$0xff] %vm515_vm0, %v728_v51  ;;  %749 = vtanh.f32 %v449_v22 }
  0x4d   : > { %v732_v23 = vpop.eup %731  ;;  %552 = vst [vmem:[%s876_s26 + $0x150] sm:$0xff] %v730_v53  ;;  %751 = vtanh.f32 %v450_v14 }
  0x4e   : > { %v734_v34 = vpop.eup %733  ;;  %553 = vst [vmem:[%s876_s26 + $0x158] sm:$0xff] %v732_v23  ;;  %753 = vtanh.f32 %v451_v16 }
  0x4f   : > { %v736_v25 = vpop.eup %735  ;;  %554 = vst [vmem:[%s876_s26 + $0x160] sm:$0xff] %v734_v34  ;;  %755 = vtanh.f32 %v452_v18 }
  0x50   : > { %v738_v43 = vpop.eup %737  ;;  %555 = vst [vmem:[%s876_s26 + $0x168] sm:$0xff] %v736_v25 }
  0x51   : > { %v740_v54 = vpop.eup %739  ;;  %556 = vst [vmem:[%s876_s26 + $0x170] sm:$0xff] %v738_v43 }
  0x52   : > { %v742_v55 = vpop.eup %741  ;;  %557 = vst [vmem:[%s876_s26 + $0x178] sm:$0xff] %v740_v54 }
  0x53   : > { %v744_v56 = vpop.eup %743  ;;  %558 = vst.msk [vmem:[%s876_s26 + $0x180] sm:$0xff] %vm515_vm0, %v742_v55 }
  0x54   : > { %v746_v57 = vpop.eup %745  ;;  %559 = vst [vmem:[%s876_s26 + $0x188] sm:$0xff] %v744_v56 }
  0x55   : > { %v748_v58 = vpop.eup %747  ;;  %560 = vst [vmem:[%s876_s26 + $0x190] sm:$0xff] %v746_v57 }
  0x56   : > { %v750_v59 = vpop.eup %749  ;;  %561 = vst [vmem:[%s876_s26 + $0x198] sm:$0xff] %v748_v58 }
  0x57   : > { %v752_v60 = vpop.eup %751  ;;  %562 = vst [vmem:[%s876_s26 + $0x1a0] sm:$0xff] %v750_v59 }
  0x58   : > { %v754_v61 = vpop.eup %753  ;;  %563 = vst [vmem:[%s876_s26 + $0x1a8] sm:$0xff] %v752_v60 }
  0x59   : > { %v756_v62 = vpop.eup %755  ;;  %564 = vst [vmem:[%s876_s26 + $0x1b0] sm:$0xff] %v754_v61 }
  0x5a   : > { %565 = vst.msk [vmem:[%s876_s26 + $0x1b8] sm:$0xff] %vm515_vm0, %v756_v62 }
  0x5b PF: > { %s13_s12 = sadd.s32 1, %s763_s12  }
  0x5c   : > { %p10_p4 = scmp.ge.s32.totalorder %s13_s12, 4  }
  0x5e   :  { %12 = sbr.rel (!%p10_p4) target bundleno = 1 (0x1), region = 62 }

// kernel: ae_forward.2
= control target key start
LH: loop header
LB: loop body
LE: loop exit
PB: predicated region body
PF: predicated region fallthrough
CT: control target
= control target key end

     0   :  { %s10878_s6 = smov 1   ;;  %s10879_s10 = smov 2   ;;  %s13180_s0 = inlined_call_operand.smem [shape: u32[30], index: -1, kind: input, shape index: {}] }
   0x1   :  { %s10918_s5 = sld [smem:[%s13180_s0]]   ;;  %s10880_s14 = smov 3  }
   0x2   :  { %s10923_s9 = sld [smem:[%s13180_s0 + %s10878_s6]]   ;;  %s10881_s18 = smov 4  }
   0x3   :  { %s10928_s13 = sld [smem:[%s13180_s0 + %s10879_s10]]   ;;  %s10882_s22 = smov 5  }
   0x4   :  { %s10933_s17 = sld [smem:[%s13180_s0 + %s10880_s14]]   ;;  %s10883_s26 = smov 6  }
   0x5   :  { %s10938_s21 = sld [smem:[%s13180_s0 + %s10881_s18]]   ;;  %s10884_s30 = smov 7  }
   0x6   :  { %s10943_s25 = sld [smem:[%s13180_s0 + %s10882_s22]]   ;;  %s10885_s4 = smov 8  }
   0x7   :  { %s10948_s29 = sld [smem:[%s13180_s0 + %s10883_s26]]   ;;  %s10886_s10 = smov 9  }
   0x8   :  { %s10953_s3 = sld [smem:[%s13180_s0 + %s10884_s30]]   ;;  %s10887_s15 = smov 10  }
   0x9   :  { %s10958_s8 = sld [smem:[%s13180_s0 + %s10885_s4]]   ;;  %s10888_s20 = smov 11  }
   0xa   :  { %s10963_s14 = sld [smem:[%s13180_s0 + %s10886_s10]]   ;;  %s10889_s26 = smov 12  }
   0xb   :  { %s10968_s19 = sld [smem:[%s13180_s0 + %s10887_s15]]   ;;  %s10890_s1 = smov 13  }
   0xc   :  { %s10973_s24 = sld [smem:[%s13180_s0 + %s10888_s20]]   ;;  %s10891_s7 = smov 14  }
   0xd   :  { %s10978_s30 = sld [smem:[%s13180_s0 + %s10889_s26]]   ;;  %s10892_s15 = smov 15  }
   0xe   :  { %s10983_s6 = sld [smem:[%s13180_s0 + %s10890_s1]]   ;;  %s10893_s22 = smov 16  }
   0xf   :  { %s10988_s12 = sld [smem:[%s13180_s0 + %s10891_s7]]   ;;  %s10894_s28 = smov 17  }
  0x10   :  { %s10993_s20 = sld [smem:[%s13180_s0 + %s10892_s15]]   ;;  %s10895_s7 = smov 18  }
  0x11   :  { %s10998_s27 = sld [smem:[%s13180_s0 + %s10893_s22]]   ;;  %s10896_s15 = smov 19  }
  0x12   :  { %s11003_s4 = sld [smem:[%s13180_s0 + %s10894_s28]]   ;;  %s10897_s22 = smov 20  }
  0x13   :  { %13216 = sst [smem:[#allocation2_spill]] %s10978_s30  ;;  %s10898_s28 = smov 21  }
  0x14   :  { %s11013_s30 = sld [smem:[%s13180_s0 + %s10896_s15]]   ;;  %s10900_s15 = smov 23  }
  0x15   :  { %13217 = sst [smem:[#allocation3_spill]] %s10988_s12 }
  0x16   :  { %s11008_s12 = sld [smem:[%s13180_s0 + %s10895_s7]]   ;;  %s10899_s7 = smov 22  }
  0x17   :  { %13218 = sst [smem:[#allocation4_spill]] %s10998_s27 }
  0x18   :  { %13219 = sst [smem:[#allocation5_spill]] %s11003_s4 }
  0x19   :  { %s11018_s27 = sld [smem:[%s13180_s0 + %s10897_s22]]   ;;  %s10901_s22 = smov 24  }
  0x1a   :  { %13221 = sst [smem:[#allocation7_spill]] %s11013_s30 }
  0x1b   :  { %s11023_s4 = sld [smem:[%s13180_s0 + %s10898_s28]]   ;;  %s10902_s28 = smov 25  }
  0x1c   :  { %13220 = sst [smem:[#allocation6_spill]] %s11008_s12 }
  0x1d   :  { %s11028_s12 = sld [smem:[%s13180_s0 + %s10899_s7]]   ;;  %s10903_s7 = smov 26  }
  0x1e   :  { %s11033_s30 = sld [smem:[%s13180_s0 + %s10900_s15]]   ;;  %s10904_s15 = smov 27  }
  0x1f   :  { %13222 = sst [smem:[#allocation8_spill]] %s11018_s27 }
  0x20   :  { %s11038_s27 = sld [smem:[%s13180_s0 + %s10901_s22]]   ;;  %s10905_s22 = smov 28  }
  0x21   :  { %13223 = sst [smem:[#allocation9_spill]] %s11023_s4 }
  0x22   :  { %s11043_s4 = sld [smem:[%s13180_s0 + %s10902_s28]]   ;;  %s10906_s28 = smov 29  }
  0x23   :  { %13224 = sst [smem:[#allocation10_spill]] %s11028_s12 }
  0x24   :  { %13225 = sst [smem:[#allocation11_spill]] %s11033_s30 }
  0x25   :  { %s11048_s12 = sld [smem:[%s13180_s0 + %s10903_s7]]   ;;  %s11065_s7 = smov 0  }
  0x26   :  { %13226 = sst [smem:[#allocation12_spill]] %s11038_s27 }
  0x27   :  { %s11053_s30 = sld [smem:[%s13180_s0 + %s10904_s15]]  }
  0x28   :  { %13227 = sst [smem:[#allocation13_spill]] %s11043_s4 }
  0x29   :  { %s11058_s27 = sld [smem:[%s13180_s0 + %s10905_s22]]  }
  0x2a   :  { %s11063_s4 = sld [smem:[%s13180_s0 + %s10906_s28]]  }
  0x2b LB: > { %s11071_s10 = sadd.s32 4294967295, %s10876_s7   ;;  %p8507_p0 = scmp.ge.s32.totalorder %s10876_s7, 1  ;;  %s10876_s7 = sphi %s11065_s7, %s70_s7  }
  0x2c   : > { %p824_p1 = scmp.lt.s32.totalorder %s10876_s7, 3 }
  0x2e   : > { %p825_p2 = pnand %p8507_p0, %p824_p1 }
  0x30   : > { %828 = sbr.rel (%p825_p2) target bundleno = 3361 (0xd21), region = 128 }
  0x37   : > { %v9814_v0 = vld [vmem:[%s10933_s17 + $0x4] ss:$16 sps:$4 sm:$0xff]   ;;  %v9816_v1 = vld [vmem:[%s10933_s17 + $0xc] ss:$16 sps:$4 sm:$0xff]   ;;  %v9818_v2 = vld [vmem:[%s10933_s17] ss:$16 sps:$4 sm:$0xff]   ;;  %v13186_v37 = vlaneseq }
  0x38   : > { %2601 = vmatprep.subr.bf16.mxu0 %v9814_v0  ;;  %v9819_v3 = vld [vmem:[%s10933_s17 + $0x8] ss:$16 sps:$4 sm:$0xff]   ;;  %2893 = vmatprep.subr.bf16.mxu1 %v9816_v1  ;;  %v9820_v4 = vld [vmem:[%s10933_s17 + $0x24] ss:$16 sps:$4 sm:$0xff]   ;;  %v9822_v5 = vld [vmem:[%s10933_s17 + $0x2c] ss:$16 sps:$4 sm:$0xff]  }
  0x39   : > { %2602 = vmatpush1.bf16.msra.mxu0 %v9818_v2  ;;  %2894 = vmatpush1.bf16.msra.mxu1 %v9819_v3  ;;  %v9824_v6 = vld [vmem:[%s10933_s17 + $0x20] ss:$16 sps:$4 sm:$0xff]   ;;  %v9825_v7 = vld [vmem:[%s10933_s17 + $0x28] ss:$16 sps:$4 sm:$0xff]   ;;  %v9826_v8 = vld [vmem:[%s10933_s17 + $0x44] ss:$16 sps:$4 sm:$0xff]  }
  0x3a   : > { %2603 = vmatprep.subr.bf16.mxu0 %v9820_v4  ;;  %2895 = vmatprep.subr.bf16.mxu1 %v9822_v5  ;;  %v9828_v9 = vld [vmem:[%s10933_s17 + $0x4c] ss:$16 sps:$4 sm:$0xff]   ;;  %v9830_v10 = vld [vmem:[%s10933_s17 + $0x40] ss:$16 sps:$4 sm:$0xff]   ;;  %v9831_v11 = vld [vmem:[%s10933_s17 + $0x48] ss:$16 sps:$4 sm:$0xff]  }
  0x3b   : > { %v9832_v12 = vld [vmem:[%s10933_s17 + $0x64] ss:$16 sps:$4 sm:$0xff]   ;;  %v9834_v13 = vld [vmem:[%s10933_s17 + $0x6c] ss:$16 sps:$4 sm:$0xff]   ;;  %v9836_v14 = vld [vmem:[%s10933_s17 + $0x60] ss:$16 sps:$4 sm:$0xff]  }
  0x3c   : > { %v9837_v15 = vld [vmem:[%s10933_s17 + $0x68] ss:$16 sps:$4 sm:$0xff]   ;;  %v9838_v16 = vld [vmem:[%s10933_s17 + $0x84] ss:$16 sps:$4 sm:$0xff]   ;;  %v9840_v17 = vld [vmem:[%s10933_s17 + $0x8c] ss:$16 sps:$4 sm:$0xff]  }
  0x3d   : > { %2604 = vmatpush1.bf16.msra.mxu0 %v9824_v6  ;;  %2896 = vmatpush1.bf16.msra.mxu1 %v9825_v7  ;;  %v9842_v18 = vld [vmem:[%s10933_s17 + $0x80] ss:$16 sps:$4 sm:$0xff]   ;;  %v9843_v19 = vld [vmem:[%s10933_s17 + $0x88] ss:$16 sps:$4 sm:$0xff]   ;;  %v9844_v20 = vld [vmem:[%s10933_s17 + $0xa4] ss:$16 sps:$4 sm:$0xff]  }
  0x3e   : > { %2605 = vmatprep.subr.bf16.mxu0 %v9826_v8  ;;  %2897 = vmatprep.subr.bf16.mxu1 %v9828_v9  ;;  %v9846_v21 = vld [vmem:[%s10933_s17 + $0xac] ss:$16 sps:$4 sm:$0xff]   ;;  %v9848_v22 = vld [vmem:[%s10933_s17 + $0xa0] ss:$16 sps:$4 sm:$0xff]   ;;  %v9849_v23 = vld [vmem:[%s10933_s17 + $0xa8] ss:$16 sps:$4 sm:$0xff]  }
  0x3f   : > { %v9850_v24 = vld [vmem:[%s10933_s17 + $0xc4] ss:$16 sps:$4 sm:$0xff]   ;;  %v9852_v25 = vld [vmem:[%s10933_s17 + $0xcc] ss:$16 sps:$4 sm:$0xff]   ;;  %v9854_v26 = vld [vmem:[%s10933_s17 + $0xc0] ss:$16 sps:$4 sm:$0xff]  }
  0x40   : > { %v9855_v27 = vld [vmem:[%s10933_s17 + $0xc8] ss:$16 sps:$4 sm:$0xff]   ;;  %v9856_v28 = vld [vmem:[%s10933_s17 + $0xe4] ss:$16 sps:$4 sm:$0xff]   ;;  %s8508_s0 = sshll.u32 %s11071_s10, 3  ;;  %v11121_v42 = vshrl.u32 %v13186_v37, 7 }
  0x41   : > { %2606 = vmatpush1.bf16.msra.mxu0 %v9830_v10  ;;  %2898 = vmatpush1.bf16.msra.mxu1 %v9831_v11  ;;  %v9858_v29 = vld [vmem:[%s10933_s17 + $0xec] ss:$16 sps:$4 sm:$0xff]   ;;  %v9860_v30 = vld [vmem:[%s10933_s17 + $0xe0] ss:$16 sps:$4 sm:$0xff]   ;;  %p911_p3 = scmp.lt.s32.totalorder %s8508_s0, 15  ;;  %vm4198_vm0 = vcmask 523264  }
  0x42   : > { %2607 = vmatprep.subr.bf16.mxu0 %v9832_v12  ;;  %2899 = vmatprep.subr.bf16.mxu1 %v9834_v13  ;;  %v9861_v31 = vld [vmem:[%s10933_s17 + $0xe8] ss:$16 sps:$4 sm:$0xff]   ;;  %v9862_v32 = vld [vmem:[%s10933_s17 + $0x104] ss:$16 sps:$4 sm:$0xff]   ;;  %v9864_v33 = vld [vmem:[%s10933_s17 + $0x10c] ss:$16 sps:$4 sm:$0xff]  }
  0x43   : > { %v9866_v34 = vld [vmem:[%s10933_s17 + $0x100] ss:$16 sps:$4 sm:$0xff]   ;;  %v9867_v35 = vld [vmem:[%s10933_s17 + $0x108] ss:$16 sps:$4 sm:$0xff]   ;;  %s13296_s0 = smov (!%p911_p3, %s8508_s0), 15  ;;  %v11133_v47 = vsub.s32 1, %v11121_v42 }
  0x44   : > { %v9868_v36 = vld [vmem:[%s10933_s17 + $0x124] ss:$16 sps:$4 sm:$0xff]   ;;  %v9870_v38 = vld [vmem:[%s10933_s17 + $0x12c] ss:$16 sps:$4 sm:$0xff]   ;;  %v9872_v39 = vld [vmem:[%s10933_s17 + $0x120] ss:$16 sps:$4 sm:$0xff]  }
  0x45   : > { %2608 = vmatpush1.bf16.msra.mxu0 %v9836_v14  ;;  %2900 = vmatpush1.bf16.msra.mxu1 %v9837_v15  ;;  %s9770_s11 = smul.u32 28, %s13296_s0  ;;  %v9873_v40 = vld [vmem:[%s10933_s17 + $0x128] ss:$16 sps:$4 sm:$0xff]   ;;  %v9874_v41 = vld [vmem:[%s10933_s17 + $0x144] ss:$16 sps:$4 sm:$0xff]   ;;  %v11161_v1 = vsub.s32 0, %v11121_v42 }
  0x46   : > { %2609 = vmatprep.subr.bf16.mxu0 %v9838_v16  ;;  %2901 = vmatprep.subr.bf16.mxu1 %v9840_v17  ;;  %v9876_v43 = vld [vmem:[%s10933_s17 + $0x14c] ss:$16 sps:$4 sm:$0xff]   ;;  %v9878_v44 = vld [vmem:[%s10933_s17 + $0x140] ss:$16 sps:$4 sm:$0xff]   ;;  %v9879_v45 = vld [vmem:[%s10933_s17 + $0x148] ss:$16 sps:$4 sm:$0xff]  }
  0x47   : > { %s11129_s15 = scalar_lea.vmem %s10918_s5, %s9770_s11  ;;  %v9880_v46 = vld [vmem:[%s10933_s17 + $0x164] ss:$16 sps:$4 sm:$0xff]   ;;  %v9882_v48 = vld [vmem:[%s10933_s17 + $0x16c] ss:$16 sps:$4 sm:$0xff]   ;;  %v9884_v49 = vld [vmem:[%s10933_s17 + $0x160] ss:$16 sps:$4 sm:$0xff]  }
  0x48   : > { %v9885_v50 = vld [vmem:[%s10933_s17 + $0x168] ss:$16 sps:$4 sm:$0xff]   ;;  %v933_v51 = vld [vmem:[%s11129_s15] sm:$0xff]  ;;  %v9888_v60 = vld [vmem:[%s10933_s17 + $0x18c] ss:$16 sps:$4 sm:$0xff]   ;;  %s13231_s16 = sld [smem:[#allocation2_spill]] }
  0x49   : > { %2610 = vmatpush1.bf16.msra.mxu0 %v9842_v18  ;;  %2902 = vmatpush1.bf16.msra.mxu1 %v9843_v19  ;;  %v937_v52 = vld [vmem:[%s11129_s15 + $0x1c] sm:$0xff]  ;;  %v966_v53 = vunpack.c.h.bf16 %v933_v51  ;;  %v9886_v56 = vld [vmem:[%s10933_s17 + $0x184] ss:$16 sps:$4 sm:$0xff]   ;;  %v9891_v0 = vld [vmem:[%s10933_s17 + $0x188] ss:$16 sps:$4 sm:$0xff]   ;;  %v965_v9 = vunpack.c.l.bf16 %v933_v51  ;;  %vm4311_vm1 = vcmask 261120  }
  0x4a   : > { %2611 = vmatprep.subr.bf16.mxu0 %v9844_v20  ;;  %2903 = vmatprep.subr.bf16.mxu1 %v9846_v21  ;;  %v11141_v54 = vld [vmem:[%s10923_s9] sm:$0xff]  ;;  %v973_v57 = vunpack.c.h.bf16 %v937_v52  ;;  %v9894_v5 = vld [vmem:[%s10933_s17 + $0x1ac] ss:$16 sps:$4 sm:$0xff]   ;;  %v9897_v8 = vld [vmem:[%s10933_s17 + $0x1a8] ss:$16 sps:$4 sm:$0xff]   ;;  %v972_v10 = vunpack.c.l.bf16 %v937_v52  ;;  %s13232_s18 = sld [smem:[#allocation3_spill]] }
  0x4b   : > { %v11144_v55 = vld [vmem:[%s10928_s13] sm:$0xff]  ;;  %v11149_v58 = vrot.slane %v11141_v54, %v11133_v47  ;;  %v11171_v11 = vrot.slane %v11141_v54, %v11161_v1  ;;  %v9900_v13 = vld [vmem:[%s10933_s17 + $0x1cc] ss:$16 sps:$4 sm:$0xff]   ;;  %v9903_v15 = vld [vmem:[%s10933_s17 + $0x1c8] ss:$16 sps:$4 sm:$0xff]   ;;  %vm4416_vm2 = vcmask 130048  }
  0x4c   : > { %v11153_v59 = vrot.slane %v11144_v55, %v11133_v47  ;;  %v9890_v63 = vld [vmem:[%s10933_s17 + $0x180] ss:$16 sps:$4 sm:$0xff]   ;;  %v9892_v2 = vld [vmem:[%s10933_s17 + $0x1a4] ss:$16 sps:$4 sm:$0xff]   ;;  %v11181_v18 = vrot.slane %v11144_v55, %v11161_v1  ;;  %v9906_v20 = vld [vmem:[%s10933_s17 + $0x1ec] ss:$16 sps:$4 sm:$0xff]  }
  0x4d   : > { %2612 = vmatpush1.bf16.msra.mxu0 %v9848_v22  ;;  %2904 = vmatpush1.bf16.msra.mxu1 %v9849_v23  ;;  %v1059_v61 = vmul.f32 %v11149_v58, %v966_v53  ;;  %v1066_v62 = vmul.f32 %v11149_v58, %v973_v57  ;;  %v9896_v7 = vld [vmem:[%s10933_s17 + $0x1a0] ss:$16 sps:$4 sm:$0xff]   ;;  %v9898_v12 = vld [vmem:[%s10933_s17 + $0x1c4] ss:$16 sps:$4 sm:$0xff]   ;;  %v1058_v16 = vmul.f32 %v11171_v11, %v965_v9  ;;  %v9909_v22 = vld [vmem:[%s10933_s17 + $0x1e8] ss:$16 sps:$4 sm:$0xff]  }
  0x4e   : > { %2613 = vmatprep.subr.bf16.mxu0 %v9850_v24  ;;  %2905 = vmatprep.subr.bf16.mxu1 %v9852_v25  ;;  %v9902_v14 = vld [vmem:[%s10933_s17 + $0x1c0] ss:$16 sps:$4 sm:$0xff]   ;;  %v1065_v17 = vmul.f32 %v11171_v11, %v972_v10  ;;  %v9904_v19 = vld [vmem:[%s10933_s17 + $0x1e4] ss:$16 sps:$4 sm:$0xff]   ;;  %v9937_v10 = vld [vmem:[%s10933_s17 + $0x288] ss:$16 sps:$4 sm:$0xff]  }
  0x4f   : > { %v1152_v3 = vadd.f32 %v11153_v59, %v1059_v61  ;;  %v1159_v4 = vadd.f32 %v11153_v59, %v1066_v62  ;;  %v9908_v21 = vld [vmem:[%s10933_s17 + $0x1e0] ss:$16 sps:$4 sm:$0xff]   ;;  %v1151_v23 = vadd.f32 %v11181_v18, %v1058_v16  ;;  %v9912_v25 = vld [vmem:[%s10933_s17 + $0x204] ss:$16 sps:$4 sm:$0xff]   ;;  %v9939_v62 = vld [vmem:[%s10933_s17 + $0x28c] ss:$16 sps:$4 sm:$0xff]  }
  0x50   : > { %v1158_v24 = vadd.f32 %v11181_v18, %v1065_v17  ;;  %v9928_v51 = vld [vmem:[%s10933_s17 + $0x260] ss:$16 sps:$4 sm:$0xff]   ;;  %v9936_v61 = vld [vmem:[%s10933_s17 + $0x284] ss:$16 sps:$4 sm:$0xff]   ;;  %s13233_s22 = sld [smem:[#allocation5_spill]]  ;;  %s13234_s23 = sld [smem:[#allocation4_spill]] }
  0x51   : > { %2614 = vmatpush1.bf16.msra.mxu0 %v9854_v26  ;;  %2906 = vmatpush1.bf16.msra.mxu1 %v9855_v27  ;;  %v1208_v6 = vpack.c.bf16 %v1159_v4, %v1152_v3  ;;  %v9915_v26 = vld [vmem:[%s10933_s17 + $0x20c] ss:$16 sps:$4 sm:$0xff]   ;;  %v9910_v27 = vld [vmem:[%s10933_s17 + $0x200] ss:$16 sps:$4 sm:$0xff]   ;;  %s13235_s26 = sld [smem:[#allocation7_spill]]  ;;  %s13236_s28 = sld [smem:[#allocation9_spill]] }
  0x52   : > { %2615 = vmatprep.subr.bf16.mxu0 %v9856_v28  ;;  %2907 = vmatprep.subr.bf16.mxu1 %v9858_v29  ;;  %v9913_v28 = vld [vmem:[%s10933_s17 + $0x208] ss:$16 sps:$4 sm:$0xff]   ;;  %v1207_v29 = vpack.c.bf16 %v1158_v24, %v1151_v23  ;;  %v953_v3 = vld [vmem:[%s11129_s15 + $0x8c] sm:$0xff]  ;;  %v11231_v23 = vsub.s32 2, %v11121_v42  ;;  %v11234_v24 = vsub.s32 3, %v11121_v42  ;;  %s13237_s1 = sld [smem:[#allocation6_spill]] }
  0x53   : > { %2633 = vmatprep.mubr.bf16.mxu0 %v1208_v6  ;;  %2925 = vmatprep.mubr.bf16.mxu1 %v1208_v6  ;;  %v9934_v9 = vld [vmem:[%s10933_s17 + $0x280] ss:$16 sps:$4 sm:$0xff]   ;;  %s13238_s2 = sld [smem:[#allocation11_spill]]  ;;  %p924_p5 = scmp.lt.s32.totalorder %s11071_s10, 1 }
  0x55   : > { %2616 = vmatpush1.bf16.msra.mxu0 %v9860_v30  ;;  %2908 = vmatpush1.bf16.msra.mxu1 %v9861_v31  ;;  %v9918_v30 = vld [vmem:[%s10933_s17 + $0x224] ss:$16 sps:$4 sm:$0xff]   ;;  %v9921_v31 = vld [vmem:[%s10933_s17 + $0x22c] ss:$16 sps:$4 sm:$0xff]  }
  0x56   : > { %2617 = vmatprep.subr.bf16.mxu0 %v9862_v32  ;;  %2909 = vmatprep.subr.bf16.mxu1 %v9864_v33  ;;  %v9916_v32 = vld [vmem:[%s10933_s17 + $0x220] ss:$16 sps:$4 sm:$0xff]   ;;  %v9919_v33 = vld [vmem:[%s10933_s17 + $0x228] ss:$16 sps:$4 sm:$0xff]  }
  0x59   : > { %2618 = vmatpush1.bf16.msra.mxu0 %v9866_v34  ;;  %2910 = vmatpush1.bf16.msra.mxu1 %v9867_v35  ;;  %v9924_v34 = vld [vmem:[%s10933_s17 + $0x244] ss:$16 sps:$4 sm:$0xff]   ;;  %v9927_v35 = vld [vmem:[%s10933_s17 + $0x24c] ss:$16 sps:$4 sm:$0xff]  }
  0x5a   : > { %2619 = vmatprep.subr.bf16.mxu0 %v9868_v36  ;;  %2911 = vmatprep.subr.bf16.mxu1 %v9870_v38  ;;  %v941_v36 = vld [vmem:[%s11129_s15 + $0x38] sm:$0xff] }
  0x5b   : > { %v945_v38 = vld [vmem:[%s11129_s15 + $0x54] sm:$0xff] }
  0x5d   : > { %2620 = vmatpush1.bf16.msra.mxu0 %v9872_v39  ;;  %2912 = vmatpush1.bf16.msra.mxu1 %v9873_v40  ;;  %v980_v39 = vunpack.c.h.bf16 %v941_v36  ;;  %v979_v40 = vunpack.c.l.bf16 %v941_v36  ;;  %v9951_v36 = vld [vmem:[%s10933_s17 + $0x2cc] ss:$16 sps:$4 sm:$0xff]  }
  0x5e   : > { %2621 = vmatprep.subr.bf16.mxu0 %v9874_v41  ;;  %2913 = vmatprep.subr.bf16.mxu1 %v9876_v43  ;;  %v9922_v41 = vld [vmem:[%s10933_s17 + $0x240] ss:$16 sps:$4 sm:$0xff]   ;;  %v9925_v43 = vld [vmem:[%s10933_s17 + $0x248] ss:$16 sps:$4 sm:$0xff]  }
  0x61   : > { %2622 = vmatpush1.bf16.msra.mxu0 %v9878_v44  ;;  %2914 = vmatpush1.bf16.msra.mxu1 %v9879_v45  ;;  %v987_v44 = vunpack.c.h.bf16 %v945_v38  ;;  %v986_v45 = vunpack.c.l.bf16 %v945_v38 }
  0x62   : > { %2623 = vmatprep.subr.bf16.mxu0 %v9880_v46  ;;  %2915 = vmatprep.subr.bf16.mxu1 %v9882_v48  ;;  %v9930_v46 = vld [vmem:[%s10933_s17 + $0x264] ss:$16 sps:$4 sm:$0xff]   ;;  %v9933_v48 = vld [vmem:[%s10933_s17 + $0x26c] ss:$16 sps:$4 sm:$0xff]  }
  0x63   : > { %v1080_v52 = vmul.f32 %v11149_v58, %v987_v44  ;;  %v1079_v53 = vmul.f32 %v11171_v11, %v986_v45  ;;  %v9949_v44 = vld [vmem:[%s10933_s17 + $0x2c8] ss:$16 sps:$4 sm:$0xff]  }
  0x65   : > { %2624 = vmatpush1.bf16.msra.mxu0 %v9884_v49  ;;  %2916 = vmatpush1.bf16.msra.mxu1 %v9885_v50  ;;  %v1073_v49 = vmul.f32 %v11149_v58, %v980_v39  ;;  %v1072_v50 = vmul.f32 %v11171_v11, %v979_v40  ;;  %v9946_v39 = vld [vmem:[%s10933_s17 + $0x2c0] ss:$16 sps:$4 sm:$0xff]  }
  0x66   : > { %2625 = vmatprep.subr.bf16.mxu0 %v9886_v56  ;;  %2917 = vmatprep.subr.bf16.mxu1 %v9888_v60  ;;  %v9931_v56 = vld [vmem:[%s10933_s17 + $0x268] ss:$16 sps:$4 sm:$0xff]  }
  0x67   : > { %v1166_v57 = vadd.f32 %v11153_v59, %v1073_v49  ;;  %v1165_v60 = vadd.f32 %v11181_v18, %v1072_v50  ;;  %v11256_v49 = vrot.slane %v11141_v54, %v11234_v24  ;;  %v9957_v50 = vld [vmem:[%s10933_s17 + $0x2ec] ss:$16 sps:$4 sm:$0xff]  }
  0x69   : > { %2626 = vmatpush1.bf16.msra.mxu0 %v9890_v63  ;;  %2918 = vmatpush1.bf16.msra.mxu1 %v9891_v0  ;;  %v1173_v63 = vadd.f32 %v11153_v59, %v1080_v52  ;;  %v1172_v0 = vadd.f32 %v11181_v18, %v1079_v53  ;;  %v934_v52 = vld [vmem:[%s11129_s15 + $0x8] sm:$0xff] }
  0x6a   : > { %2627 = vmatprep.subr.bf16.mxu0 %v9892_v2  ;;  %2919 = vmatprep.subr.bf16.mxu1 %v9894_v5  ;;  %v949_v2 = vld [vmem:[%s11129_s15 + $0x70] sm:$0xff]  ;;  %v938_v53 = vld [vmem:[%s11129_s15 + $0x24] sm:$0xff] }
  0x6b   : > { %v994_v4 = vunpack.c.h.bf16 %v949_v2  ;;  %v993_v5 = vunpack.c.l.bf16 %v949_v2  ;;  %v1215_v6 = vpack.c.bf16 %v1173_v63, %v1166_v57  ;;  %v968_v57 = vunpack.c.h.bf16 %v934_v52  ;;  %v9955_v2 = vld [vmem:[%s10933_s17 + $0x2e8] ss:$16 sps:$4 sm:$0xff]  }
  0x6c   : > { %v974_v63 = vunpack.c.l.bf16 %v938_v53 }
  0x6d   : > { %2628 = vmatpush1.bf16.msra.mxu0 %v9896_v7  ;;  %2920 = vmatpush1.bf16.msra.mxu1 %v9897_v8  ;;  %v1001_v7 = vunpack.c.h.bf16 %v953_v3  ;;  %v1000_v8 = vunpack.c.l.bf16 %v953_v3 }
  0x6e   : > { %2629 = vmatprep.subr.bf16.mxu0 %v9898_v12  ;;  %2921 = vmatprep.subr.bf16.mxu1 %v9900_v13  ;;  %v1214_v12 = vpack.c.bf16 %v1172_v0, %v1165_v60  ;;  %v1087_v13 = vmul.f32 %v11149_v58, %v994_v4  ;;  %v11269_v60 = vrot.slane %v11144_v55, %v11231_v23  ;;  %v9952_v0 = vld [vmem:[%s10933_s17 + $0x2e0] ss:$16 sps:$4 sm:$0xff]  }
  0x6f   : > { %v1094_v16 = vmul.f32 %v11149_v58, %v1001_v7  ;;  %v1093_v17 = vmul.f32 %v11171_v11, %v1000_v8 }
  0x71   : > { %2630 = vmatpush1.bf16.msra.mxu0 %v9902_v14  ;;  %2922 = vmatpush1.bf16.msra.mxu1 %v9903_v15  ;;  %v1086_v14 = vmul.f32 %v11171_v11, %v993_v5  ;;  %v9942_v15 = vld [vmem:[%s10933_s17 + $0x2a4] ss:$16 sps:$4 sm:$0xff]   ;;  %v1061_v5 = vmul.f32 %v11256_v49, %v968_v57 }
  0x72   : > { %2631 = vmatprep.subr.bf16.mxu0 %v9904_v19  ;;  %2923 = vmatprep.subr.bf16.mxu1 %v9906_v20  ;;  %v9945_v19 = vld [vmem:[%s10933_s17 + $0x2ac] ss:$16 sps:$4 sm:$0xff]   ;;  %v1180_v20 = vadd.f32 %v11153_v59, %v1087_v13 }
  0x75   : > { %2632 = vmatpush1.bf16.msra.mxu0 %v9908_v21  ;;  %2924 = vmatpush1.bf16.msra.mxu1 %v9909_v22  ;;  %v1187_v21 = vadd.f32 %v11153_v59, %v1094_v16  ;;  %v957_v22 = vld [vmem:[%s11129_s15 + $0xa8] sm:$0xff] }
  0x76   : > { %2674 = vmatprep.subr.bf16.mxu0 %v9912_v25  ;;  %2966 = vmatprep.subr.bf16.mxu1 %v9915_v26  ;;  %v1179_v25 = vadd.f32 %v11181_v18, %v1086_v14  ;;  %v1186_v26 = vadd.f32 %v11181_v18, %v1093_v17  ;;  %v9958_v14 = vld [vmem:[%s10933_s17 + $0x300] ss:$16 sps:$4 sm:$0xff]   ;;  %v9966_v17 = vld [vmem:[%s10933_s17 + $0x324] ss:$16 sps:$4 sm:$0xff]  }
  0x78   : > { %2634 = vmatmul.mubr.bf16.vlgmr.msra.gmra.mrb[0].mxu0 %v1207_v29  ;;  %2926 = vmatmul.mubr.bf16.vlgmr.msra.gmra.mrb[0].mxu1 %v1207_v29  ;;  %v1007_v29 = vunpack.c.l.bf16 %v957_v22  ;;  %v1221_v45 = vpack.c.bf16 %v1186_v26, %v1179_v25  ;;  %v9967_v25 = vld [vmem:[%s10933_s17 + $0x328] ss:$16 sps:$4 sm:$0xff]   ;;  %v9972_v26 = vld [vmem:[%s10933_s17 + $0x344] ss:$16 sps:$4 sm:$0xff]  }
  0x79   : > { %2675 = vmatpush1.bf16.msra.mxu0 %v9910_v27  ;;  %2967 = vmatpush1.bf16.msra.mxu1 %v9913_v28  ;;  %v961_v27 = vld [vmem:[%s11129_s15 + $0xc4] sm:$0xff]  ;;  %v1008_v28 = vunpack.c.h.bf16 %v957_v22  ;;  %v9964_v22 = vld [vmem:[%s10933_s17 + $0x320] ss:$16 sps:$4 sm:$0xff]  }
  0x7a   : > { %2676 = vmatprep.subr.bf16.mxu0 %v9918_v30  ;;  %2968 = vmatprep.subr.bf16.mxu1 %v9921_v31  ;;  %v9940_v30 = vld [vmem:[%s10933_s17 + $0x2a0] ss:$16 sps:$4 sm:$0xff]   ;;  %v9943_v31 = vld [vmem:[%s10933_s17 + $0x2a8] ss:$16 sps:$4 sm:$0xff]  }
  0x7b   : > { %2643 = vmatprep.mubr.bf16.mxu0 %v1215_v6  ;;  %2935 = vmatprep.mubr.bf16.mxu1 %v1215_v6  ;;  %v1101_v38 = vmul.f32 %v11149_v58, %v1008_v28  ;;  %v9960_v6 = vld [vmem:[%s10933_s17 + $0x304] ss:$16 sps:$4 sm:$0xff]   ;;  %v9970_v28 = vld [vmem:[%s10933_s17 + $0x340] ss:$16 sps:$4 sm:$0xff]  }
  0x7d   : > { %2677 = vmatpush1.bf16.msra.mxu0 %v9916_v32  ;;  %2969 = vmatpush1.bf16.msra.mxu1 %v9919_v33  ;;  %v1222_v32 = vpack.c.bf16 %v1187_v21, %v1180_v20  ;;  %v1015_v33 = vunpack.c.h.bf16 %v961_v27  ;;  %v9969_v20 = vld [vmem:[%s10933_s17 + $0x32c] ss:$16 sps:$4 sm:$0xff]  }
  0x7e   : > { %2678 = vmatprep.subr.bf16.mxu0 %v9924_v34  ;;  %2970 = vmatprep.subr.bf16.mxu1 %v9927_v35  ;;  %v1014_v34 = vunpack.c.l.bf16 %v961_v27  ;;  %v9948_v35 = vld [vmem:[%s10933_s17 + $0x2c4] ss:$16 sps:$4 sm:$0xff]   ;;  %v9975_v27 = vld [vmem:[%s10933_s17 + $0x34c] ss:$16 sps:$4 sm:$0xff]  }
  0x7f   : > { %v1108_v40 = vmul.f32 %v11149_v58, %v1015_v33  ;;  %v9954_v58 = vld [vmem:[%s10933_s17 + $0x2e4] ss:$16 sps:$4 sm:$0xff]   ;;  %v9979_v33 = vld [vmem:[%s10933_s17 + $0x368] ss:$16 sps:$4 sm:$0xff]  }
  0x80   : > { %2644 = vmatmul.mubr.bf16.gmra.mrb[4].mxu0 %v1214_v12  ;;  %2936 = vmatmul.mubr.bf16.gmra.mrb[4].mxu1 %v1214_v12 }
  0x81   : > { %2679 = vmatpush1.bf16.msra.mxu0 %v9922_v41  ;;  %2971 = vmatpush1.bf16.msra.mxu1 %v9925_v43  ;;  %v1100_v41 = vmul.f32 %v11171_v11, %v1007_v29  ;;  %v11249_v43 = vrot.slane %v11141_v54, %v11231_v23  ;;  %v9973_v29 = vld [vmem:[%s10933_s17 + $0x348] ss:$16 sps:$4 sm:$0xff]  }
  0x82   : > { %2680 = vmatprep.subr.bf16.mxu0 %v9930_v46  ;;  %2972 = vmatprep.subr.bf16.mxu1 %v9933_v48  ;;  %v1194_v46 = vadd.f32 %v11153_v59, %v1101_v38  ;;  %v1107_v48 = vmul.f32 %v11171_v11, %v1014_v34  ;;  %v11265_v11 = vrot.slane %v11144_v55, %v11234_v24  ;;  %v9984_v34 = vld [vmem:[%s10933_s17 + $0x384] ss:$16 sps:$4 sm:$0xff]   ;;  %v9985_v38 = vld [vmem:[%s10933_s17 + $0x388] ss:$16 sps:$4 sm:$0xff]  }
  0x83   : > { %2653 = vmatprep.mubr.bf16.mxu0 %v1222_v32  ;;  %2945 = vmatprep.mubr.bf16.mxu1 %v1222_v32  ;;  %v1067_v7 = vmul.f32 %v11249_v43, %v974_v63  ;;  %v9976_v32 = vld [vmem:[%s10933_s17 + $0x360] ss:$16 sps:$4 sm:$0xff]   ;;  %v10002_v63 = vld [vmem:[%s10933_s17 + $0x3e4] ss:$16 sps:$4 sm:$0xff]  }
  0x84   : > { %v1200_v3 = vadd.f32 %v11181_v18, %v1107_v48  ;;  %v9996_v48 = vld [vmem:[%s10933_s17 + $0x3c4] ss:$16 sps:$4 sm:$0xff]  }
  0x85   : > { %2681 = vmatpush1.bf16.msra.mxu0 %v9928_v51  ;;  %2973 = vmatpush1.bf16.msra.mxu1 %v9931_v56  ;;  %v1201_v51 = vadd.f32 %v11153_v59, %v1108_v40  ;;  %v967_v56 = vunpack.c.l.bf16 %v934_v52  ;;  %v975_v59 = vunpack.c.h.bf16 %v938_v53  ;;  %v1160_v13 = vadd.f32 %v11269_v60, %v1067_v7  ;;  %v9993_v40 = vld [vmem:[%s10933_s17 + $0x3ac] ss:$16 sps:$4 sm:$0xff]   ;;  %v10000_v7 = vld [vmem:[%s10933_s17 + $0x3e0] ss:$16 sps:$4 sm:$0xff]  }
  0x86   : > { %2682 = vmatprep.subr.bf16.mxu0 %v9936_v61  ;;  %2974 = vmatprep.subr.bf16.mxu1 %v9939_v62  ;;  %v1193_v62 = vadd.f32 %v11181_v18, %v1100_v41  ;;  %v9988_v41 = vld [vmem:[%s10933_s17 + $0x3a0] ss:$16 sps:$4 sm:$0xff]  }
  0x87   : > { %v1229_v61 = vpack.c.bf16 %v1201_v51, %v1194_v46  ;;  %v1060_v4 = vmul.f32 %v11249_v43, %v967_v56  ;;  %v1068_v8 = vmul.f32 %v11256_v49, %v975_v59  ;;  %v946_v46 = vld [vmem:[%s11129_s15 + $0x5c] sm:$0xff] }
  0x88   : > { %2654 = vmatmul.mubr.bf16.gmra.mrb[8].mxu0 %v1221_v45  ;;  %2946 = vmatmul.mubr.bf16.gmra.mrb[8].mxu1 %v1221_v45  ;;  %v1228_v16 = vpack.c.bf16 %v1200_v3, %v1193_v62  ;;  %v942_v45 = vld [vmem:[%s11129_s15 + $0x40] sm:$0xff]  ;;  %v988_v51 = vunpack.c.l.bf16 %v946_v46  ;;  %v989_v53 = vunpack.c.h.bf16 %v946_v46  ;;  %v9997_v62 = vld [vmem:[%s10933_s17 + $0x3c8] ss:$16 sps:$4 sm:$0xff]   ;;  %v10005_v59 = vld [vmem:[%s10933_s17 + $0x3ec] ss:$16 sps:$4 sm:$0xff]   ;;  %v11358_v46 = vsub.s32 6, %v11121_v42 }
  0x89   : > { %2683 = vmatpush1.bf16.msra.mxu0 %v9934_v9  ;;  %2975 = vmatpush1.bf16.msra.mxu1 %v9937_v10  ;;  %v9963_v9 = vld [vmem:[%s10933_s17 + $0x30c] ss:$16 sps:$4 sm:$0xff]   ;;  %v1153_v18 = vadd.f32 %v11269_v60, %v1060_v4  ;;  %v1154_v10 = vadd.f32 %v11265_v11, %v1061_v5  ;;  %v1161_v12 = vadd.f32 %v11265_v11, %v1068_v8  ;;  %v982_v52 = vunpack.c.h.bf16 %v942_v45  ;;  %v10003_v8 = vld [vmem:[%s10933_s17 + $0x3e8] ss:$16 sps:$4 sm:$0xff]  }
  0x8a   : > { %2684 = vmatprep.subr.bf16.mxu0 %v9942_v15  ;;  %2976 = vmatprep.subr.bf16.mxu1 %v9945_v19  ;;  %v9961_v15 = vld [vmem:[%s10933_s17 + $0x308] ss:$16 sps:$4 sm:$0xff]   ;;  %v1081_v57 = vmul.f32 %v11249_v43, %v988_v51  ;;  %v1082_v3 = vmul.f32 %v11256_v49, %v989_v53  ;;  %13230 = vst [vmem:[#allocation16_spill] sm:$0xff] %v11358_v46  ;;  %v10012_v51 = vld [vmem:[%s10933_s17 + $0x420] ss:$16 sps:$4 sm:$0xff]  }
  0x8b   : > { %2663 = vmatprep.mubr.bf16.mxu0 %v1229_v61  ;;  %2955 = vmatprep.mubr.bf16.mxu1 %v1229_v61  ;;  %v11288_v19 = vpack.c.bf16 %v1160_v13, %v1153_v18  ;;  %v1210_v21 = vpack.c.bf16 %v1161_v12, %v1154_v10  ;;  %v9994_v61 = vld [vmem:[%s10933_s17 + $0x3c0] ss:$16 sps:$4 sm:$0xff]   ;;  %v950_v5 = vld [vmem:[%s11129_s15 + $0x78] sm:$0xff]  ;;  %v10008_v12 = vld [vmem:[%s10933_s17 + $0x404] ss:$16 sps:$4 sm:$0xff]  }
  0x8c   : > { %v1174_v4 = vadd.f32 %v11269_v60, %v1081_v57  ;;  %v995_v10 = vunpack.c.l.bf16 %v950_v5 }
  0x8d   : > { %2685 = vmatpush1.bf16.msra.mxu0 %v9940_v30  ;;  %2977 = vmatpush1.bf16.msra.mxu1 %v9943_v31  ;;  %v9978_v30 = vld [vmem:[%s10933_s17 + $0x364] ss:$16 sps:$4 sm:$0xff]   ;;  %v9981_v31 = vld [vmem:[%s10933_s17 + $0x36c] ss:$16 sps:$4 sm:$0xff]  }
  0x8e   : > { %2686 = vmatprep.subr.bf16.mxu0 %v9948_v35  ;;  %2978 = vmatprep.subr.bf16.mxu1 %v9951_v36  ;;  %v9987_v35 = vld [vmem:[%s10933_s17 + $0x38c] ss:$16 sps:$4 sm:$0xff]   ;;  %v9982_v36 = vld [vmem:[%s10933_s17 + $0x380] ss:$16 sps:$4 sm:$0xff]  }
  0x90   : > { %2664 = vmatmul.mubr.bf16.gmra.mrb[12].mxu0 %v1228_v16  ;;  %2956 = vmatmul.mubr.bf16.gmra.mrb[12].mxu1 %v1228_v16  ;;  %v1088_v16 = vmul.f32 %v11249_v43, %v995_v10 }
  0x91   : > { %2687 = vmatpush1.bf16.msra.mxu0 %v9946_v39  ;;  %2979 = vmatpush1.bf16.msra.mxu1 %v9949_v44  ;;  %v9990_v39 = vld [vmem:[%s10933_s17 + $0x3a4] ss:$16 sps:$4 sm:$0xff]   ;;  %v9991_v44 = vld [vmem:[%s10933_s17 + $0x3a8] ss:$16 sps:$4 sm:$0xff]  }
  0x92   : > { %2688 = vmatprep.subr.bf16.mxu0 %v9954_v58  ;;  %2980 = vmatprep.subr.bf16.mxu1 %v9957_v50  ;;  %v9999_v58 = vld [vmem:[%s10933_s17 + $0x3cc] ss:$16 sps:$4 sm:$0xff]   ;;  %v981_v50 = vunpack.c.l.bf16 %v942_v45 }
  0x93   : > { %2706 = vmatprep.mubr.bf16.mxu0 %v1210_v21  ;;  %2998 = vmatprep.mubr.bf16.mxu1 %v1210_v21  ;;  %v1175_v21 = vadd.f32 %v11265_v11, %v1082_v3  ;;  %v11390_v3 = vrot.slane %v11141_v54, %v11358_v46 }
  0x94   : > { %v1074_v56 = vmul.f32 %v11249_v43, %v981_v50 }
  0x95   : > { %2689 = vmatpush1.bf16.msra.mxu0 %v9952_v0  ;;  %2981 = vmatpush1.bf16.msra.mxu1 %v9955_v2  ;;  %v1075_v2 = vmul.f32 %v11256_v49, %v982_v52  ;;  %v10015_v52 = vld [vmem:[%s10933_s17 + $0x428] ss:$16 sps:$4 sm:$0xff]  }
  0x96   : > { %2690 = vmatprep.subr.bf16.mxu0 %v9960_v6  ;;  %2982 = vmatprep.subr.bf16.mxu1 %v9963_v9  ;;  %v1167_v0 = vadd.f32 %v11269_v60, %v1074_v56  ;;  %v954_v6 = vld [vmem:[%s11129_s15 + $0x94] sm:$0xff]  ;;  %v996_v9 = vunpack.c.h.bf16 %v950_v5 }
  0x97   : > { %v1003_v18 = vunpack.c.h.bf16 %v954_v6  ;;  %v10021_v5 = vld [vmem:[%s10933_s17 + $0x448] ss:$16 sps:$4 sm:$0xff]  }
  0x98   : > { %v11328_v13 = vpack.c.bf16 %v1174_v4, %v1167_v0  ;;  %v939_v0 = vld [vmem:[%s11129_s15 + $0x2c] sm:$0xff] }
  0x99   : > { %2691 = vmatpush1.bf16.msra.mxu0 %v9958_v14  ;;  %2983 = vmatpush1.bf16.msra.mxu1 %v9961_v15  ;;  %v1002_v14 = vunpack.c.l.bf16 %v954_v6  ;;  %v10011_v15 = vld [vmem:[%s10933_s17 + $0x40c] ss:$16 sps:$4 sm:$0xff]   ;;  %v10018_v4 = vld [vmem:[%s10933_s17 + $0x440] ss:$16 sps:$4 sm:$0xff]   ;;  %v977_v10 = vunpack.c.h.bf16 %v939_v0 }
  0x9a   : > { %2692 = vmatprep.subr.bf16.mxu0 %v9966_v17  ;;  %2984 = vmatprep.subr.bf16.mxu1 %v9969_v20  ;;  %v11333_v17 = vsub.s32 5, %v11121_v42  ;;  %v1168_v20 = vadd.f32 %v11265_v11, %v1075_v2 }
  0x9c   : > { %13228 = vst [vmem:[#allocation14_spill] sm:$0xff] %v11333_v17 }
  0x9d   : > { %2693 = vmatpush1.bf16.msra.mxu0 %v9964_v22  ;;  %2985 = vmatpush1.bf16.msra.mxu1 %v9967_v25  ;;  %v1095_v22 = vmul.f32 %v11249_v43, %v1002_v14  ;;  %v10006_v25 = vld [vmem:[%s10933_s17 + $0x400] ss:$16 sps:$4 sm:$0xff]  }
  0x9e   : > { %2694 = vmatprep.subr.bf16.mxu0 %v9972_v26  ;;  %2986 = vmatprep.subr.bf16.mxu1 %v9975_v27  ;;  %v10009_v26 = vld [vmem:[%s10933_s17 + $0x408] ss:$16 sps:$4 sm:$0xff]   ;;  %v1089_v27 = vmul.f32 %v11256_v49, %v996_v9  ;;  %v976_v9 = vunpack.c.l.bf16 %v939_v0 }
  0xa1   : > { %2695 = vmatpush1.bf16.msra.mxu0 %v9970_v28  ;;  %2987 = vmatpush1.bf16.msra.mxu1 %v9973_v29  ;;  %v1096_v28 = vmul.f32 %v11256_v49, %v1003_v18  ;;  %v1181_v29 = vadd.f32 %v11269_v60, %v1088_v16 }
  0xa2   : > { %2696 = vmatprep.subr.bf16.mxu0 %v9978_v30  ;;  %2988 = vmatprep.subr.bf16.mxu1 %v9981_v31  ;;  %v1188_v30 = vadd.f32 %v11269_v60, %v1095_v22  ;;  %v958_v31 = vld [vmem:[%s11129_s15 + $0xb0] sm:$0xff] }
  0xa3   : > { %v10024_v22 = vld [vmem:[%s10933_s17 + $0x460] ss:$16 sps:$4 sm:$0xff]  }
  0xa5   : > { %2697 = vmatpush1.bf16.msra.mxu0 %v9976_v32  ;;  %2989 = vmatpush1.bf16.msra.mxu1 %v9979_v33  ;;  %v962_v32 = vld [vmem:[%s11129_s15 + $0xcc] sm:$0xff]  ;;  %v11347_v33 = vsub.s32 4, %v11121_v42 }
  0xa6   : > { %2698 = vmatprep.subr.bf16.mxu0 %v9984_v34  ;;  %2990 = vmatprep.subr.bf16.mxu1 %v9987_v35  ;;  %v10014_v34 = vld [vmem:[%s10933_s17 + $0x424] ss:$16 sps:$4 sm:$0xff]   ;;  %v10017_v35 = vld [vmem:[%s10933_s17 + $0x42c] ss:$16 sps:$4 sm:$0xff]   ;;  %v1016_v45 = vunpack.c.l.bf16 %v962_v32 }
  0xa7   : > { %13229 = vst [vmem:[#allocation15_spill] sm:$0xff] %v11347_v33  ;;  %v11386_v2 = vrot.slane %v11144_v55, %v11347_v33 }
  0xa8   : > { %v1109_v57 = vmul.f32 %v11249_v43, %v1016_v45 }
  0xa9   : > { %2699 = vmatpush1.bf16.msra.mxu0 %v9982_v36  ;;  %2991 = vmatpush1.bf16.msra.mxu1 %v9985_v38  ;;  %v1010_v36 = vunpack.c.h.bf16 %v958_v31  ;;  %v1017_v38 = vunpack.c.h.bf16 %v962_v32 }
  0xaa   : > { %2700 = vmatprep.subr.bf16.mxu0 %v9990_v39  ;;  %2992 = vmatprep.subr.bf16.mxu1 %v9993_v40  ;;  %v1009_v39 = vunpack.c.l.bf16 %v958_v31  ;;  %v11353_v40 = vrot.slane %v11141_v54, %v11333_v17 }
  0xab   : > { %v1103_v53 = vmul.f32 %v11256_v49, %v1010_v36  ;;  %v1110_v56 = vmul.f32 %v11256_v49, %v1017_v38  ;;  %v935_v49 = vld [vmem:[%s11129_s15 + $0x10] sm:$0xff] }
  0xac   : > { %v1102_v50 = vmul.f32 %v11249_v43, %v1009_v39  ;;  %v1202_v43 = vadd.f32 %v11269_v60, %v1109_v57  ;;  %v10030_v57 = vld [vmem:[%s10933_s17 + $0x480] ss:$16 sps:$4 sm:$0xff]  }
  0xad   : > { %2701 = vmatpush1.bf16.msra.mxu0 %v9988_v41  ;;  %2993 = vmatpush1.bf16.msra.mxu1 %v9991_v44  ;;  %v1217_v41 = vpack.c.bf16 %v1175_v21, %v1168_v20  ;;  %v11355_v44 = vpack.c.bf16 %v1188_v30, %v1181_v29  ;;  %v1203_v18 = vadd.f32 %v11265_v11, %v1110_v56  ;;  %v943_v20 = vld [vmem:[%s11129_s15 + $0x48] sm:$0xff] }
  0xae   : > { %2702 = vmatprep.subr.bf16.mxu0 %v9996_v48  ;;  %2994 = vmatprep.subr.bf16.mxu1 %v9999_v58  ;;  %v1182_v48 = vadd.f32 %v11265_v11, %v1089_v27  ;;  %v1189_v58 = vadd.f32 %v11265_v11, %v1096_v28  ;;  %v947_v21 = vld [vmem:[%s11129_s15 + $0x64] sm:$0xff]  ;;  %v983_v27 = vunpack.c.l.bf16 %v943_v20 }
  0xaf   : > { %v10027_v28 = vld [vmem:[%s10933_s17 + $0x468] ss:$16 sps:$4 sm:$0xff]   ;;  %v990_v32 = vunpack.c.l.bf16 %v947_v21 }
  0xb0   : > { %v1224_v6 = vpack.c.bf16 %v1189_v58, %v1182_v48  ;;  %v955_v58 = vld [vmem:[%s11129_s15 + $0x9c] sm:$0xff] }
  0xb1   : > { %2703 = vmatpush1.bf16.msra.mxu0 %v9994_v61  ;;  %2995 = vmatpush1.bf16.msra.mxu1 %v9997_v62  ;;  %v10023_v61 = vld [vmem:[%s10933_s17 + $0x44c] ss:$16 sps:$4 sm:$0xff]   ;;  %v1195_v62 = vadd.f32 %v11269_v60, %v1102_v50  ;;  %v10026_v60 = vld [vmem:[%s10933_s17 + $0x464] ss:$16 sps:$4 sm:$0xff]   ;;  %v1005_v56 = vunpack.c.h.bf16 %v955_v58 }
  0xb2   : > { %2704 = vmatprep.subr.bf16.mxu0 %v10002_v63  ;;  %2996 = vmatprep.subr.bf16.mxu1 %v10005_v59  ;;  %v11375_v63 = vrot.slane %v11141_v54, %v11347_v33  ;;  %v11379_v59 = vrot.slane %v11144_v55, %v11333_v17  ;;  %v1196_v55 = vadd.f32 %v11265_v11, %v1103_v53 }
  0xb3   : > { %v11397_v54 = vpack.c.bf16 %v1202_v43, %v1195_v62  ;;  %v1070_v11 = vmul.f32 %v11353_v40, %v977_v10 }
  0xb4   : > { %v1069_v16 = vmul.f32 %v11375_v63, %v976_v9  ;;  %v1076_v45 = vmul.f32 %v11375_v63, %v983_v27  ;;  %v1083_v48 = vmul.f32 %v11375_v63, %v990_v32  ;;  %v1231_v0 = vpack.c.bf16 %v1203_v18, %v1196_v55  ;;  %v10038_v9 = vld [vmem:[%s10933_s17 + $0x4a4] ss:$16 sps:$4 sm:$0xff]  }
  0xb5   : > { %2705 = vmatpush1.bf16.msra.mxu0 %v10000_v7  ;;  %2997 = vmatpush1.bf16.msra.mxu1 %v10003_v8  ;;  %v969_v7 = vunpack.c.l.bf16 %v935_v49  ;;  %v970_v8 = vunpack.c.h.bf16 %v935_v49  ;;  %v1163_v36 = vadd.f32 %v11379_v59, %v1070_v11  ;;  %v10869_v27 = vld [vmem:[%s10928_s13] sm:$0xff] }
  0xb6   : > { %2747 = vmatprep.subr.bf16.mxu0 %v10008_v12  ;;  %3039 = vmatprep.subr.bf16.mxu1 %v10011_v15  ;;  %v10029_v12 = vld [vmem:[%s10933_s17 + $0x46c] ss:$16 sps:$4 sm:$0xff]   ;;  %v1162_v31 = vadd.f32 %v11386_v2, %v1069_v16  ;;  %v1176_v62 = vadd.f32 %v11386_v2, %v1083_v48 }
  0xb7   : > { %v1062_v14 = vmul.f32 %v11375_v63, %v969_v7  ;;  %v1063_v15 = vmul.f32 %v11353_v40, %v970_v8  ;;  %v959_v7 = vld [vmem:[%s11129_s15 + $0xb8] sm:$0xff] }
  0xb8   : > { %2707 = vmatmul.mubr.bf16.vlgmr.msra.gmra.mrb[0].mxu0 %v11288_v19  ;;  %2999 = vmatmul.mubr.bf16.vlgmr.msra.gmra.mrb[0].mxu1 %v11288_v19  ;;  %v10020_v19 = vld [vmem:[%s10933_s17 + $0x444] ss:$16 sps:$4 sm:$0xff]   ;;  %v1012_v18 = vunpack.c.h.bf16 %v959_v7 }
  0xb9   : > { %2748 = vmatpush1.bf16.msra.mxu0 %v10006_v25  ;;  %3040 = vmatpush1.bf16.msra.mxu1 %v10009_v26  ;;  %v984_v25 = vunpack.c.h.bf16 %v943_v20  ;;  %v991_v26 = vunpack.c.h.bf16 %v947_v21  ;;  %v1156_v29 = vadd.f32 %v11379_v59, %v1063_v15  ;;  %v1155_v30 = vadd.f32 %v11386_v2, %v1062_v14  ;;  %v963_v8 = vld [vmem:[%s11129_s15 + $0xd4] sm:$0xff]  ;;  %v10036_v21 = vld [vmem:[%s10933_s17 + $0x4a0] ss:$16 sps:$4 sm:$0xff]  }
  0xba   : > { %2749 = vmatprep.subr.bf16.mxu0 %v10014_v34  ;;  %3041 = vmatprep.subr.bf16.mxu1 %v10017_v35  ;;  %v10032_v34 = vld [vmem:[%s10933_s17 + $0x484] ss:$16 sps:$4 sm:$0xff]   ;;  %v10035_v35 = vld [vmem:[%s10933_s17 + $0x48c] ss:$16 sps:$4 sm:$0xff]   ;;  %v1019_v16 = vunpack.c.h.bf16 %v963_v8  ;;  %v1011_v20 = vunpack.c.l.bf16 %v959_v7  ;;  %v1105_v11 = vmul.f32 %v11353_v40, %v1012_v18 }
  0xbb   : > { %2716 = vmatprep.mubr.bf16.mxu0 %v1217_v41  ;;  %3008 = vmatprep.mubr.bf16.mxu1 %v1217_v41  ;;  %v1077_v38 = vmul.f32 %v11353_v40, %v984_v25  ;;  %v1084_v39 = vmul.f32 %v11353_v40, %v991_v26  ;;  %v11419_v41 = vpack.c.bf16 %v1162_v31, %v1155_v30  ;;  %v1018_v25 = vunpack.c.l.bf16 %v963_v8  ;;  %v936_v26 = vld [vmem:[%s11129_s15 + $0x18] ss:$28 sps:$4 sm:$0xff]  }
  0xbc   : > { %v10044_v30 = vld [vmem:[%s10933_s17 + $0x4c4] ss:$16 sps:$4 sm:$0xff]   ;;  %v1112_v32 = vmul.f32 %v11353_v40, %v1019_v16  ;;  %v960_v16 = vld [vmem:[%s11129_s15 + $0xc0] ss:$28 sps:$4 sm:$0xff]  }
  0xbd   : > { %2750 = vmatpush1.bf16.msra.mxu0 %v10012_v51  ;;  %3042 = vmatpush1.bf16.msra.mxu1 %v10015_v52  ;;  %v11424_v51 = vpack.c.bf16 %v1163_v36, %v1156_v29  ;;  %v1170_v52 = vadd.f32 %v11379_v59, %v1077_v38  ;;  %v1177_v53 = vadd.f32 %v11379_v59, %v1084_v39  ;;  %v10039_v29 = vld [vmem:[%s10933_s17 + $0x4a8] ss:$16 sps:$4 sm:$0xff]  }
  0xbe   : > { %2751 = vmatprep.subr.bf16.mxu0 %v10020_v19  ;;  %3043 = vmatprep.subr.bf16.mxu1 %v10023_v61  ;;  %v10033_v19 = vld [vmem:[%s10933_s17 + $0x488] ss:$16 sps:$4 sm:$0xff]   ;;  %v1169_v61 = vadd.f32 %v11386_v2, %v1076_v45  ;;  %v1198_v36 = vadd.f32 %v11379_v59, %v1105_v11  ;;  %v1104_v38 = vmul.f32 %v11375_v63, %v1011_v20  ;;  %v10056_v20 = vld [vmem:[%s10933_s17 + $0x504] ss:$16 sps:$4 sm:$0xff]  }
  0xbf   : > { %v1111_v39 = vmul.f32 %v11375_v63, %v1018_v25  ;;  %v1205_v48 = vadd.f32 %v11379_v59, %v1112_v32 }
  0xc0   : > { %2717 = vmatmul.mubr.bf16.gmra.mrb[4].mxu0 %v11328_v13  ;;  %3009 = vmatmul.mubr.bf16.gmra.mrb[4].mxu1 %v11328_v13  ;;  %v951_v13 = vld [vmem:[%s11129_s15 + $0x80] sm:$0xff]  ;;  %v11440_v10 = vpack.c.bf16 %v1176_v62, %v1169_v61 }
  0xc1   : > { %2752 = vmatpush1.bf16.msra.mxu0 %v10018_v4  ;;  %3044 = vmatpush1.bf16.msra.mxu1 %v10021_v5  ;;  %v998_v50 = vunpack.c.h.bf16 %v951_v13  ;;  %v997_v49 = vunpack.c.l.bf16 %v951_v13  ;;  %v11433_v4 = vpack.c.bf16 %v1177_v53, %v1170_v52  ;;  %v1098_v5 = vmul.f32 %v11353_v40, %v1005_v56  ;;  %v10045_v52 = vld [vmem:[%s10933_s17 + $0x4c8] ss:$16 sps:$4 sm:$0xff]  }
  0xc2   : > { %2753 = vmatprep.subr.bf16.mxu0 %v10026_v60  ;;  %3045 = vmatprep.subr.bf16.mxu1 %v10029_v12  ;;  %v10041_v60 = vld [vmem:[%s10933_s17 + $0x4ac] ss:$16 sps:$4 sm:$0xff]   ;;  %v978_v13 = vunpack.c.h.bf16 %v936_v26  ;;  %v1197_v53 = vadd.f32 %v11386_v2, %v1104_v38  ;;  %v1204_v56 = vadd.f32 %v11386_v2, %v1111_v39  ;;  %v11477_v61 = vpack.c.bf16 %v1205_v48, %v1198_v36  ;;  %v10060_v38 = vld [vmem:[%s10933_s17 + $0x520] ss:$16 sps:$4 sm:$0xff]   ;;  %v10063_v39 = vld [vmem:[%s10933_s17 + $0x528] ss:$16 sps:$4 sm:$0xff]  }
  0xc3   : > { %2726 = vmatprep.mubr.bf16.mxu0 %v1224_v6  ;;  %3018 = vmatprep.mubr.bf16.mxu1 %v1224_v6  ;;  %v1091_v43 = vmul.f32 %v11353_v40, %v998_v50  ;;  %v1004_v6 = vunpack.c.l.bf16 %v955_v58  ;;  %v1090_v55 = vmul.f32 %v11375_v63, %v997_v49  ;;  %v1191_v14 = vadd.f32 %v11379_v59, %v1098_v5  ;;  %v944_v58 = vld [vmem:[%s11129_s15 + $0x50] ss:$28 sps:$4 sm:$0xff]   ;;  %v952_v5 = vld [vmem:[%s11129_s15 + $0x88] ss:$28 sps:$4 sm:$0xff]   ;;  %s13239_s15 = sld [smem:[#allocation8_spill]] }
  0xc4   : > { %v10042_v50 = vld [vmem:[%s10933_s17 + $0x4c0] ss:$16 sps:$4 sm:$0xff]   ;;  %v992_v62 = vunpack.c.h.bf16 %v944_v58  ;;  %v11481_v49 = vpack.c.bf16 %v1204_v56, %v1197_v53  ;;  %v999_v7 = vunpack.c.l.bf16 %v952_v5  ;;  %v1006_v8 = vunpack.c.h.bf16 %v952_v5  ;;  %v10071_v48 = vld [vmem:[%s10933_s17 + $0x54c] ss:$16 sps:$4 sm:$0xff]   ;;  %v10075_v53 = vld [vmem:[%s10933_s17 + $0x568] ss:$16 sps:$4 sm:$0xff]  }
  0xc5   : > { %2754 = vmatpush1.bf16.msra.mxu0 %v10024_v22  ;;  %3046 = vmatpush1.bf16.msra.mxu1 %v10027_v28  ;;  %v1184_v12 = vadd.f32 %v11379_v59, %v1091_v43  ;;  %v1097_v15 = vmul.f32 %v11375_v63, %v1004_v6  ;;  %v1183_v22 = vadd.f32 %v11386_v2, %v1090_v55  ;;  %v10053_v43 = vld [vmem:[%s10933_s17 + $0x4ec] ss:$16 sps:$4 sm:$0xff]   ;;  %v10051_v55 = vld [vmem:[%s10933_s17 + $0x4e8] ss:$16 sps:$4 sm:$0xff]   ;;  %v10080_v56 = vld [vmem:[%s10933_s17 + $0x584] ss:$16 sps:$4 sm:$0xff]  }
  0xc6   : > { %2755 = vmatprep.subr.bf16.mxu0 %v10032_v34  ;;  %3047 = vmatprep.subr.bf16.mxu1 %v10035_v35  ;;  %v11454_v28 = vrot.slane %v10869_v27, %v11358_v46  ;;  %v971_v34 = vunpack.c.l.bf16 %v936_v26  ;;  %v10047_v35 = vld [vmem:[%s10933_s17 + $0x4cc] ss:$16 sps:$4 sm:$0xff]   ;;  %v1071_v63 = vmul.f32 %v11390_v3, %v978_v13  ;;  %v1085_v6 = vmul.f32 %v11390_v3, %v992_v62  ;;  %v10068_v13 = vld [vmem:[%s10933_s17 + $0x544] ss:$16 sps:$4 sm:$0xff]  }
  0xc7   : > { %v11458_v31 = vpack.c.bf16 %v1191_v14, %v1184_v12  ;;  %v1092_v14 = vmul.f32 %v11390_v3, %v999_v7  ;;  %v10089_v62 = vld [vmem:[%s10933_s17 + $0x5ac] ss:$16 sps:$4 sm:$0xff]   ;;  %v10093_v7 = vld [vmem:[%s10933_s17 + $0x5c8] ss:$16 sps:$4 sm:$0xff]  }
  0xc8   : > { %2727 = vmatmul.mubr.bf16.gmra.mrb[8].mxu0 %v11355_v44  ;;  %3019 = vmatmul.mubr.bf16.gmra.mrb[8].mxu1 %v11355_v44  ;;  %v1190_v44 = vadd.f32 %v11386_v2, %v1097_v15  ;;  %v1064_v40 = vmul.f32 %v11390_v3, %v971_v34  ;;  %v1164_v2 = vadd.f32 %v11454_v28, %v1071_v63  ;;  %v10065_v34 = vld [vmem:[%s10933_s17 + $0x52c] ss:$16 sps:$4 sm:$0xff]  }
  0xc9   : > { %2756 = vmatpush1.bf16.msra.mxu0 %v10030_v57  ;;  %3048 = vmatpush1.bf16.msra.mxu1 %v10033_v19  ;;  %v985_v57 = vunpack.c.l.bf16 %v944_v58  ;;  %v10050_v19 = vld [vmem:[%s10933_s17 + $0x4e4] ss:$16 sps:$4 sm:$0xff]   ;;  %v1178_v18 = vadd.f32 %v11454_v28, %v1085_v6  ;;  %v1099_v15 = vmul.f32 %v11390_v3, %v1006_v8  ;;  %v1185_v25 = vadd.f32 %v11454_v28, %v1092_v14  ;;  %v10069_v58 = vld [vmem:[%s10933_s17 + $0x548] ss:$16 sps:$4 sm:$0xff]   ;;  %v10083_v63 = vld [vmem:[%s10933_s17 + $0x58c] ss:$16 sps:$4 sm:$0xff]  }
  0xca   : > { %2757 = vmatprep.subr.bf16.mxu0 %v10038_v9  ;;  %3049 = vmatprep.subr.bf16.mxu1 %v10041_v60  ;;  %v11466_v45 = vpack.c.bf16 %v1190_v44, %v1183_v22  ;;  %v1157_v59 = vadd.f32 %v11454_v28, %v1064_v40  ;;  %v10048_v9 = vld [vmem:[%s10933_s17 + $0x4e0] ss:$16 sps:$4 sm:$0xff]   ;;  %v1020_v22 = vunpack.c.h.bf16 %v960_v16  ;;  %v10057_v44 = vld [vmem:[%s10933_s17 + $0x508] ss:$16 sps:$4 sm:$0xff]   ;;  %v10095_v5 = vld [vmem:[%s10933_s17 + $0x5cc] ss:$16 sps:$4 sm:$0xff]  }
  0xcb   : > { %2736 = vmatprep.mubr.bf16.mxu0 %v1231_v0  ;;  %3028 = vmatprep.mubr.bf16.mxu1 %v1231_v0  ;;  %v1078_v0 = vmul.f32 %v11390_v3, %v985_v57  ;;  %v1192_v26 = vadd.f32 %v11454_v28, %v1099_v15  ;;  %v10066_v40 = vld [vmem:[%s10933_s17 + $0x540] ss:$16 sps:$4 sm:$0xff]   ;;  %v10098_v8 = vld [vmem:[%s10933_s17 + $0x5e4] ss:$16 sps:$4 sm:$0xff]  }
  0xcc   : > { %v11490_v60 = vpack.c.bf16 %v1164_v2, %v1157_v59  ;;  %v10078_v57 = vld [vmem:[%s10933_s17 + $0x580] ss:$16 sps:$4 sm:$0xff]   ;;  %v10086_v59 = vld [vmem:[%s10933_s17 + $0x5a4] ss:$16 sps:$4 sm:$0xff]   ;;  %v10087_v2 = vld [vmem:[%s10933_s17 + $0x5a8] ss:$16 sps:$4 sm:$0xff]  }
  0xcd   : > { %2758 = vmatpush1.bf16.msra.mxu0 %v10036_v21  ;;  %3050 = vmatpush1.bf16.msra.mxu1 %v10039_v29  ;;  %v1171_v12 = vadd.f32 %v11454_v28, %v1078_v0  ;;  %v1013_v21 = vunpack.c.l.bf16 %v960_v16  ;;  %v1113_v29 = vmul.f32 %v11390_v3, %v1020_v22  ;;  %v11510_v32 = vpack.c.bf16 %v1192_v26, %v1185_v25  ;;  %v10092_v0 = vld [vmem:[%s10933_s17 + $0x5c4] ss:$16 sps:$4 sm:$0xff]   ;;  %v10090_v6 = vld [vmem:[%s10933_s17 + $0x5c0] ss:$16 sps:$4 sm:$0xff]  }
  0xce   : > { %2759 = vmatprep.subr.bf16.mxu0 %v10044_v30  ;;  %3051 = vmatprep.subr.bf16.mxu1 %v10047_v35  ;;  %v10054_v30 = vld [vmem:[%s10933_s17 + $0x500] ss:$16 sps:$4 sm:$0xff]   ;;  %v10107_v15 = vld [vmem:[%s10933_s17 + $0x624] ss:$16 sps:$4 sm:$0xff]  }
  0xcf   : > { %v11502_v11 = vpack.c.bf16 %v1178_v18, %v1171_v12  ;;  %v1106_v27 = vmul.f32 %v11390_v3, %v1013_v21  ;;  %v1206_v3 = vadd.f32 %v11454_v28, %v1113_v29  ;;  %v10096_v12 = vld [vmem:[%s10933_s17 + $0x5e0] ss:$16 sps:$4 sm:$0xff]   ;;  %v10104_v18 = vld [vmem:[%s10933_s17 + $0x604] ss:$16 sps:$4 sm:$0xff]  }
  0xd0   : > { %2737 = vmatmul.mubr.bf16.gmra.mrb[12].mxu0 %v11397_v54  ;;  %3029 = vmatmul.mubr.bf16.gmra.mrb[12].mxu1 %v11397_v54  ;;  %v10059_v54 = vld [vmem:[%s10933_s17 + $0x50c] ss:$16 sps:$4 sm:$0xff]   ;;  %v10102_v14 = vld [vmem:[%s10933_s17 + $0x600] ss:$16 sps:$4 sm:$0xff]   ;;  %v10113_v21 = vld [vmem:[%s10933_s17 + $0x664] ss:$16 sps:$4 sm:$0xff]  }
  0xd1   : > { %2760 = vmatpush1.bf16.msra.mxu0 %v10042_v50  ;;  %3052 = vmatpush1.bf16.msra.mxu1 %v10045_v52  ;;  %v1199_v35 = vadd.f32 %v11454_v28, %v1106_v27  ;;  %v10074_v50 = vld [vmem:[%s10933_s17 + $0x564] ss:$16 sps:$4 sm:$0xff]   ;;  %v10077_v28 = vld [vmem:[%s10933_s17 + $0x56c] ss:$16 sps:$4 sm:$0xff]   ;;  %v10072_v52 = vld [vmem:[%s10933_s17 + $0x560] ss:$16 sps:$4 sm:$0xff]  }
  0xd2   : > { %2761 = vmatprep.subr.bf16.mxu0 %v10050_v19  ;;  %3053 = vmatprep.subr.bf16.mxu1 %v10053_v43  ;;  %v10081_v19 = vld [vmem:[%s10933_s17 + $0x588] ss:$16 sps:$4 sm:$0xff]   ;;  %v10084_v43 = vld [vmem:[%s10933_s17 + $0x5a0] ss:$16 sps:$4 sm:$0xff]   ;;  %v10119_v25 = vld [vmem:[%s10933_s17 + $0x6a4] ss:$16 sps:$4 sm:$0xff]  }
  0xd3   : > { %2779 = vmatprep.mubr.bf16.mxu0 %v11424_v51  ;;  %3071 = vmatprep.mubr.bf16.mxu1 %v11424_v51  ;;  %v10062_v51 = vld [vmem:[%s10933_s17 + $0x524] ss:$16 sps:$4 sm:$0xff]   ;;  %v11516_v36 = vpack.c.bf16 %v1206_v3, %v1199_v35  ;;  %v10105_v16 = vld [vmem:[%s10933_s17 + $0x620] ss:$16 sps:$4 sm:$0xff]   ;;  %v10137_v35 = vld [vmem:[%s10933_s17 + $0x66c] ss:$16 sps:$4 sm:$0xff]  }
  0xd4   : > { %v10111_v22 = vld [vmem:[%s10933_s17 + $0x660] ss:$16 sps:$4 sm:$0xff]   ;;  %v10125_v27 = vld [vmem:[%s10933_s17 + $0x6e4] ss:$16 sps:$4 sm:$0xff]   ;;  %v10135_v3 = vld [vmem:[%s10933_s17 + $0x668] ss:$16 sps:$4 sm:$0xff]  }
  0xd5   : > { %2762 = vmatpush1.bf16.msra.mxu0 %v10048_v9  ;;  %3054 = vmatpush1.bf16.msra.mxu1 %v10051_v55  ;;  %v10101_v9 = vld [vmem:[%s10933_s17 + $0x5ec] ss:$16 sps:$4 sm:$0xff]   ;;  %v10099_v55 = vld [vmem:[%s10933_s17 + $0x5e8] ss:$16 sps:$4 sm:$0xff]   ;;  %v10117_v26 = vld [vmem:[%s10933_s17 + $0x6a0] ss:$16 sps:$4 sm:$0xff]  }
  0xd6   : > { %2763 = vmatprep.subr.bf16.mxu0 %v10056_v20  ;;  %3055 = vmatprep.subr.bf16.mxu1 %v10059_v54  ;;  %v10110_v20 = vld [vmem:[%s10933_s17 + $0x644] ss:$16 sps:$4 sm:$0xff]   ;;  %v10108_v54 = vld [vmem:[%s10933_s17 + $0x640] ss:$16 sps:$4 sm:$0xff]  }
  0xd7   : > { %v10123_v29 = vld [vmem:[%s10933_s17 + $0x6e0] ss:$16 sps:$4 sm:$0xff]  }
  0xd9   : > { %2764 = vmatpush1.bf16.msra.mxu0 %v10054_v30  ;;  %3056 = vmatpush1.bf16.msra.mxu1 %v10057_v44  ;;  %v10907_v30 = vmov 0   ;;  %v10131_v44 = vld [vmem:[%s10933_s17 + $0x62c] ss:$16 sps:$4 sm:$0xff]  }
  0xda   : > { %2765 = vmatprep.subr.bf16.mxu0 %v10062_v51  ;;  %3057 = vmatprep.subr.bf16.mxu1 %v10065_v34  ;;  %v10129_v51 = vld [vmem:[%s10933_s17 + $0x628] ss:$16 sps:$4 sm:$0xff]  }
  0xdb   : > { %v10132_v34 = vld [vmem:[%s10933_s17 + $0x648] ss:$16 sps:$4 sm:$0xff]  }
  0xdd   : > { %2766 = vmatpush1.bf16.msra.mxu0 %v10060_v38  ;;  %3058 = vmatpush1.bf16.msra.mxu1 %v10063_v39  ;;  %v10140_v38 = vld [vmem:[%s10933_s17 + $0x68c] ss:$16 sps:$4 sm:$0xff]   ;;  %v10138_v39 = vld [vmem:[%s10933_s17 + $0x688] ss:$16 sps:$4 sm:$0xff]  }
  0xde   : > { %2767 = vmatprep.subr.bf16.mxu0 %v10068_v13  ;;  %3059 = vmatprep.subr.bf16.mxu1 %v10071_v48  ;;  %v10143_v13 = vld [vmem:[%s10933_s17 + $0x6ac] ss:$16 sps:$4 sm:$0xff]   ;;  %v10141_v48 = vld [vmem:[%s10933_s17 + $0x6a8] ss:$16 sps:$4 sm:$0xff]  }
  0xe1   : > { %2768 = vmatpush1.bf16.msra.mxu0 %v10066_v40  ;;  %3060 = vmatpush1.bf16.msra.mxu1 %v10069_v58  ;;  %v10146_v40 = vld [vmem:[%s10933_s17 + $0x6cc] ss:$16 sps:$4 sm:$0xff]   ;;  %v10144_v58 = vld [vmem:[%s10933_s17 + $0x6c8] ss:$16 sps:$4 sm:$0xff]  }
  0xe2   : > { %2769 = vmatprep.subr.bf16.mxu0 %v10074_v50  ;;  %3061 = vmatprep.subr.bf16.mxu1 %v10077_v28  ;;  %v10149_v50 = vld [vmem:[%s10933_s17 + $0x6ec] ss:$16 sps:$4 sm:$0xff]   ;;  %v10147_v28 = vld [vmem:[%s10933_s17 + $0x6e8] ss:$16 sps:$4 sm:$0xff]  }
  0xe5   : > { %2770 = vmatpush1.bf16.msra.mxu0 %v10072_v52  ;;  %3062 = vmatpush1.bf16.msra.mxu1 %v10075_v53  ;;  %v10152_v52 = vld [vmem:[%s10943_s25 + $0x4] ss:$8 sps:$4 sm:$0xff]   ;;  %v10150_v53 = vld [vmem:[%s10943_s25] ss:$8 sps:$4 sm:$0xff]  }
  0xe6   : > { %2771 = vmatprep.subr.bf16.mxu0 %v10080_v56  ;;  %3063 = vmatprep.subr.bf16.mxu1 %v10083_v63  ;;  %v10155_v56 = vld [vmem:[%s10943_s25 + $0x14] ss:$8 sps:$4 sm:$0xff]   ;;  %v10153_v63 = vld [vmem:[%s10943_s25 + $0x10] ss:$8 sps:$4 sm:$0xff]  }
  0xe9   : > { %2772 = vmatpush1.bf16.msra.mxu0 %v10078_v57  ;;  %3064 = vmatpush1.bf16.msra.mxu1 %v10081_v19  ;;  %v10158_v57 = vld [vmem:[%s10943_s25 + $0x24] ss:$8 sps:$4 sm:$0xff]   ;;  %v10156_v19 = vld [vmem:[%s10943_s25 + $0x20] ss:$8 sps:$4 sm:$0xff]  }
  0xea   : > { %2773 = vmatprep.subr.bf16.mxu0 %v10086_v59  ;;  %3065 = vmatprep.subr.bf16.mxu1 %v10089_v62  ;;  %v10161_v59 = vld [vmem:[%s10943_s25 + $0x34] ss:$8 sps:$4 sm:$0xff]   ;;  %v10159_v62 = vld [vmem:[%s10943_s25 + $0x30] ss:$8 sps:$4 sm:$0xff]  }
  0xed   : > { %2774 = vmatpush1.bf16.msra.mxu0 %v10084_v43  ;;  %3066 = vmatpush1.bf16.msra.mxu1 %v10087_v2  ;;  %v10164_v43 = vld [vmem:[%s10943_s25 + $0x44] ss:$8 sps:$4 sm:$0xff]   ;;  %v10167_v2 = vld [vmem:[%s10943_s25 + $0x54] ss:$8 sps:$4 sm:$0xff]  }
  0xee   : > { %2775 = vmatprep.subr.bf16.mxu0 %v10092_v0  ;;  %3067 = vmatprep.subr.bf16.mxu1 %v10095_v5  ;;  %v10165_v0 = vld [vmem:[%s10943_s25 + $0x50] ss:$8 sps:$4 sm:$0xff]   ;;  %v10168_v5 = vld [vmem:[%s10943_s25 + $0x60] ss:$8 sps:$4 sm:$0xff]  }
  0xf1   : > { %2776 = vmatpush1.bf16.msra.mxu0 %v10090_v6  ;;  %3068 = vmatpush1.bf16.msra.mxu1 %v10093_v7  ;;  %v10171_v6 = vld [vmem:[%s10943_s25 + $0x70] ss:$8 sps:$4 sm:$0xff]   ;;  %v10173_v7 = vld [vmem:[%s10943_s25 + $0x74] ss:$8 sps:$4 sm:$0xff]  }
  0xf2   : > { %2777 = vmatprep.subr.bf16.mxu0 %v10098_v8  ;;  %3069 = vmatprep.subr.bf16.mxu1 %v10101_v9  ;;  %v10174_v8 = vld [vmem:[%s10943_s25 + $0x80] ss:$8 sps:$4 sm:$0xff]   ;;  %v10177_v9 = vld [vmem:[%s10943_s25 + $0x90] ss:$8 sps:$4 sm:$0xff]  }
  0xf5   : > { %2778 = vmatpush1.bf16.msra.mxu0 %v10096_v12  ;;  %3070 = vmatpush1.bf16.msra.mxu1 %v10099_v55  ;;  %v10179_v12 = vld [vmem:[%s10943_s25 + $0x94] ss:$8 sps:$4 sm:$0xff]   ;;  %v10182_v55 = vld [vmem:[%s10943_s25 + $0xa4] ss:$8 sps:$4 sm:$0xff]  }
  0xf6   : > { %2820 = vmatprep.subr.bf16.mxu0 %v10104_v18  ;;  %v10180_v18 = vld [vmem:[%s10943_s25 + $0xa0] ss:$8 sps:$4 sm:$0xff]  }
  0xf8   : > { %2780 = vmatmul.mubr.bf16.vlgmr.msra.gmra.mrb[0].mxu0 %v11419_v41  ;;  %3072 = vmatmul.mubr.bf16.vlgmr.msra.gmra.mrb[0].mxu1 %v11419_v41  ;;  %v10116_v41 = vld [vmem:[%s10933_s17 + $0x684] ss:$16 sps:$4 sm:$0xff]  }
  0xf9   : > { %2821 = vmatpush1.bf16.msra.mxu0 %v10102_v14  ;;  %2789 = vmatprep.mubr.bf16.mxu0 %v11433_v4  ;;  %v10185_v14 = vld [vmem:[%s10943_s25 + $0xb4] ss:$8 sps:$4 sm:$0xff]  }
  0xfa   : > { %2822 = vmatprep.subr.bf16.mxu0 %v10107_v15  ;;  %3081 = vmatprep.mubr.bf16.mxu1 %v11433_v4  ;;  %v10114_v4 = vld [vmem:[%s10933_s17 + $0x680] ss:$16 sps:$4 sm:$0xff]   ;;  %v10188_v15 = vld [vmem:[%s10943_s25 + $0xc4] ss:$8 sps:$4 sm:$0xff]  }
  0xfd   : > { %2823 = vmatpush1.bf16.msra.mxu0 %v10105_v16  ;;  %v10186_v16 = vld [vmem:[%s10943_s25 + $0xc0] ss:$8 sps:$4 sm:$0xff]  }
  0xfe   : > { %2824 = vmatprep.subr.bf16.mxu0 %v10110_v20  ;;  %v10189_v20 = vld [vmem:[%s10943_s25 + $0xd0] ss:$8 sps:$4 sm:$0xff]  }
 0x100   : > { %2790 = vmatmul.mubr.bf16.gmra.mrb[4].mxu0 %v11440_v10  ;;  %3082 = vmatmul.mubr.bf16.gmra.mrb[4].mxu1 %v11440_v10  ;;  %v10122_v10 = vld [vmem:[%s10933_s17 + $0x6c4] ss:$16 sps:$4 sm:$0xff]  }
 0x101   : > { %2825 = vmatpush1.bf16.msra.mxu0 %v10108_v54  ;;  %2799 = vmatprep.mubr.bf16.mxu0 %v11458_v31  ;;  %v10191_v54 = vld [vmem:[%s10943_s25 + $0xd4] ss:$8 sps:$4 sm:$0xff]  }
 0x102   : > { %2826 = vmatprep.subr.bf16.mxu0 %v10113_v21  ;;  %3091 = vmatprep.mubr.bf16.mxu1 %v11458_v31  ;;  %v10120_v31 = vld [vmem:[%s10933_s17 + $0x6c0] ss:$16 sps:$4 sm:$0xff]   ;;  %v10194_v21 = vld [vmem:[%s10943_s25 + $0xe4] ss:$8 sps:$4 sm:$0xff]  }
 0x105   : > { %2827 = vmatpush1.bf16.msra.mxu0 %v10111_v22  ;;  %v10192_v22 = vld [vmem:[%s10943_s25 + $0xe0] ss:$8 sps:$4 sm:$0xff]  }
 0x106   : > { %2828 = vmatprep.subr.bf16.mxu0 %v10116_v41  ;;  %v10197_v41 = vld [vmem:[%s10943_s25 + $0xf4] ss:$8 sps:$4 sm:$0xff]  }
 0x108   : > { %2800 = vmatmul.mubr.bf16.gmra.mrb[8].mxu0 %v11466_v45  ;;  %3092 = vmatmul.mubr.bf16.gmra.mrb[8].mxu1 %v11466_v45  ;;  %v10128_v45 = vld [vmem:[%s10933_s17 + $0x60c] ss:$16 sps:$4 sm:$0xff]  }
 0x109   : > { %2829 = vmatpush1.bf16.msra.mxu0 %v10114_v4  ;;  %2809 = vmatprep.mubr.bf16.mxu0 %v11477_v61  ;;  %v10195_v4 = vld [vmem:[%s10943_s25 + $0xf0] ss:$8 sps:$4 sm:$0xff]  }
 0x10a   : > { %2830 = vmatprep.subr.bf16.mxu0 %v10119_v25  ;;  %3101 = vmatprep.mubr.bf16.mxu1 %v11477_v61  ;;  %v10126_v61 = vld [vmem:[%s10933_s17 + $0x608] ss:$16 sps:$4 sm:$0xff]   ;;  %v10200_v25 = vld [vmem:[%s10943_s25 + $0x104] ss:$8 sps:$4 sm:$0xff]  }
 0x10d   : > { %2831 = vmatpush1.bf16.msra.mxu0 %v10117_v26 }
 0x10e   : > { %2832 = vmatprep.subr.bf16.mxu0 %v10122_v10 }
 0x110   : > { %2810 = vmatmul.mubr.bf16.gmra.mrb[12].mxu0 %v11481_v49  ;;  %3102 = vmatmul.mubr.bf16.gmra.mrb[12].mxu1 %v11481_v49  ;;  %v10134_v49 = vld [vmem:[%s10933_s17 + $0x64c] ss:$16 sps:$4 sm:$0xff]  }
 0x111   : > { %2833 = vmatpush1.bf16.msra.mxu0 %v10120_v31  ;;  %2852 = vmatprep.mubr.bf16.mxu0 %v10907_v30 }
 0x112   : > { %2834 = vmatprep.subr.bf16.mxu0 %v10125_v27 }
 0x115   : > { %2835 = vmatpush1.bf16.msra.mxu0 %v10123_v29  ;;  %v10246_v29 = vld [vmem:[%s10953_s3 + $0x40] sm:$0xff]  }
 0x116   : > { %3112 = vmatprep.subr.bf16.mxu0 %v10128_v45  ;;  %v10247_v45 = vld [vmem:[%s10953_s3] sm:$0xff]   ;;  %9243 = vmatprep.subr.bf16.mxu1 %v10246_v29  ;;  %v10201_v29 = vld [vmem:[%s10943_s25 + $0x110] ss:$8 sps:$4 sm:$0xff]  }
 0x117   : > { %9244 = vmatpush3.bf16.msra.mxu1 %v10247_v45 }
 0x118   : > { %2853 = vmatmul.mubr.bf16.vlgmr.msra.gmra.mrb[0].mxu0 %v11490_v60 }
 0x119   : > { %3113 = vmatpush1.bf16.msra.mxu0 %v10126_v61  ;;  %2862 = vmatprep.mubr.bf16.mxu0 %v10907_v30  ;;  %v10248_v61 = vld [vmem:[%s10953_s3 + $0x48] sm:$0xff]  }
 0x11a   : > { %3114 = vmatprep.subr.bf16.mxu0 %v10131_v44  ;;  %v10249_v44 = vld [vmem:[%s10953_s3 + $0x8] sm:$0xff]   ;;  %9245 = vmatprep.subr.bf16.mxu1 %v10248_v61 }
 0x11b   : > { %9246 = vmatpush3.bf16.msra.mxu1 %v10249_v44  ;;  %v10206_v44 = vld [vmem:[%s10943_s25 + $0x124] ss:$8 sps:$4 sm:$0xff]  }
 0x11d   : > { %3115 = vmatpush1.bf16.msra.mxu0 %v10129_v51  ;;  %v10250_v51 = vld [vmem:[%s10953_s3 + $0x50] sm:$0xff]  }
 0x11e   : > { %3116 = vmatprep.subr.bf16.mxu0 %v10134_v49  ;;  %9247 = vmatprep.subr.bf16.mxu1 %v10250_v51 }
 0x120   : > { %2863 = vmatmul.mubr.bf16.gmra.mrb[4].mxu0 %v11502_v11 }
 0x121   : > { %3117 = vmatpush1.bf16.msra.mxu0 %v10132_v34  ;;  %2872 = vmatprep.mubr.bf16.mxu0 %v10907_v30 }
 0x122   : > { %3118 = vmatprep.subr.bf16.mxu0 %v10137_v35 }
 0x125   : > { %3119 = vmatpush1.bf16.msra.mxu0 %v10135_v3  ;;  %v10251_v3 = vld [vmem:[%s10953_s3 + $0x10] sm:$0xff]  }
 0x126   : > { %3120 = vmatprep.subr.bf16.mxu0 %v10140_v38  ;;  %9248 = vmatpush3.bf16.msra.mxu1 %v10251_v3 }
 0x128   : > { %2873 = vmatmul.mubr.bf16.gmra.mrb[8].mxu0 %v11510_v32 }
 0x129   : > { %3121 = vmatpush1.bf16.msra.mxu0 %v10138_v39  ;;  %2882 = vmatprep.mubr.bf16.mxu0 %v10907_v30  ;;  %v10252_v39 = vld [vmem:[%s10953_s3 + $0x58] sm:$0xff]  }
 0x12a   : > { %3122 = vmatprep.subr.bf16.mxu0 %v10143_v13  ;;  %v10253_v13 = vld [vmem:[%s10953_s3 + $0x18] sm:$0xff]   ;;  %9249 = vmatprep.subr.bf16.mxu1 %v10252_v39 }
 0x12b   : > { %9250 = vmatpush3.bf16.msra.mxu1 %v10253_v13 }
 0x12d   : > { %3123 = vmatpush1.bf16.msra.mxu0 %v10141_v48  ;;  %v10254_v48 = vld [vmem:[%s10953_s3 + $0x60] sm:$0xff]  }
 0x12e   : > { %3124 = vmatprep.subr.bf16.mxu0 %v10146_v40  ;;  %9251 = vmatprep.subr.bf16.mxu1 %v10254_v48 }
 0x130   : > { %2883 = vmatmul.mubr.bf16.gmra.mrb[12].mxu0 %v11516_v36 }
 0x131   : > { %3125 = vmatpush1.bf16.msra.mxu0 %v10144_v58  ;;  %3144 = vmatprep.mubr.bf16.mxu0 %v10907_v30 }
 0x132   : > { %3126 = vmatprep.subr.bf16.mxu0 %v10149_v50 }
 0x135   : > { %3127 = vmatpush1.bf16.msra.mxu0 %v10147_v28  ;;  %v10255_v28 = vld [vmem:[%s10953_s3 + $0x20] sm:$0xff]  }
 0x136   : > { %3629 = vmatprep.subr.bf16.mxu0 %v10152_v52  ;;  %9252 = vmatpush3.bf16.msra.mxu1 %v10255_v28  ;;  %v10204_v28 = vld [vmem:[%s10943_s25 + $0x120] ss:$8 sps:$4 sm:$0xff]  }
 0x138   : > { %3145 = vmatmul.mubr.bf16.vlgmr.msra.gmra.mrb[16].mxu0 %v11490_v60  ;;  %v10162_v60 = vld [vmem:[%s10943_s25 + $0x40] ss:$8 sps:$4 sm:$0xff]  }
 0x139   : > { %3154 = vmatprep.mubr.bf16.mxu0 %v10907_v30  ;;  %3630 = vmatpush1.bf16.msra.mxu0 %v10150_v53  ;;  %v10256_v53 = vld [vmem:[%s10953_s3 + $0x68] sm:$0xff]  }
 0x13a   : > { %3631 = vmatprep.subr.bf16.mxu0 %v10155_v56  ;;  %9253 = vmatprep.subr.bf16.mxu1 %v10256_v53 }
 0x13d   : > { %3632 = vmatpush1.bf16.msra.mxu0 %v10153_v63 }
 0x13e   : > { %3633 = vmatprep.subr.bf16.mxu0 %v10158_v57 }
 0x140   : > { %3155 = vmatmul.mubr.bf16.gmra.mrb[20].mxu0 %v11502_v11  ;;  %v10170_v11 = vld [vmem:[%s10943_s25 + $0x64] ss:$8 sps:$4 sm:$0xff]  }
 0x141   : > { %3164 = vmatprep.mubr.bf16.mxu0 %v10907_v30  ;;  %3634 = vmatpush1.bf16.msra.mxu0 %v10156_v19 }
 0x142   : > { %3635 = vmatprep.subr.bf16.mxu0 %v10161_v59  ;;  %v11683_v59 = vld [vmem:[%s10938_s21] sm:$0xf] }
 0x145   : > { %3636 = vmatpush1.bf16.msra.mxu0 %v10159_v62  ;;  %v11687_v62 = vrot.slane %v11683_v59, %v11161_v1 }
 0x146   : > { %3637 = vmatprep.subr.bf16.mxu0 %v10164_v43  ;;  %v11691_v43 = vrot.slane %v11683_v59, %v11133_v47 }
 0x148   : > { %3165 = vmatmul.mubr.bf16.gmra.mrb[24].mxu0 %v11510_v32  ;;  %v10176_v32 = vld [vmem:[%s10943_s25 + $0x84] ss:$8 sps:$4 sm:$0xff]  }
 0x149   : > { %3174 = vmatprep.mubr.bf16.mxu0 %v10907_v30  ;;  %3638 = vmatpush1.bf16.msra.mxu0 %v10162_v60 }
 0x14a   : > { %3639 = vmatprep.subr.bf16.mxu0 %v10167_v2 }
 0x14d   : > { %3640 = vmatpush1.bf16.msra.mxu0 %v10165_v0 }
 0x14e   : > { %3641 = vmatprep.subr.bf16.mxu0 %v10170_v11 }
 0x150   : > { %3175 = vmatmul.mubr.bf16.gmra.mrb[28].mxu0 %v11516_v36  ;;  %v10183_v36 = vld [vmem:[%s10943_s25 + $0xb0] ss:$8 sps:$4 sm:$0xff]  }
 0x151   : > { %3642 = vmatpush1.bf16.msra.mxu0 %v10168_v5 }
 0x152   : > { %3643 = vmatprep.subr.bf16.mxu0 %v10173_v7 }
 0x155   : > { %3644 = vmatpush1.bf16.msra.mxu0 %v10171_v6 }
 0x156   : > { %3645 = vmatprep.subr.bf16.mxu0 %v10176_v32 }
 0x159   : > { %3646 = vmatpush1.bf16.msra.mxu0 %v10174_v8 }
 0x15a   : > { %3647 = vmatprep.subr.bf16.mxu0 %v10179_v12 }
 0x15d   : > { %3648 = vmatpush1.bf16.msra.mxu0 %v10177_v9 }
 0x15e   : > { %3649 = vmatprep.subr.bf16.mxu0 %v10182_v55 }
 0x161   : > { %3650 = vmatpush1.bf16.msra.mxu0 %v10180_v18 }
 0x162   : > { %3651 = vmatprep.subr.bf16.mxu0 %v10185_v14 }
 0x165   : > { %3652 = vmatpush1.bf16.msra.mxu0 %v10183_v36 }
 0x166   : > { %3653 = vmatprep.subr.bf16.mxu0 %v10188_v15  ;;  %v10198_v15 = vld [vmem:[%s10943_s25 + $0x100] ss:$8 sps:$4 sm:$0xff]  }
 0x169   : > { %3654 = vmatpush1.bf16.msra.mxu0 %v10186_v16 }
 0x16a   : > { %3655 = vmatprep.subr.bf16.mxu0 %v10191_v54  ;;  %v10203_v54 = vld [vmem:[%s10943_s25 + $0x114] ss:$8 sps:$4 sm:$0xff]  }
 0x16d   : > { %3656 = vmatpush1.bf16.msra.mxu0 %v10189_v20 }
 0x16e   : > { %3657 = vmatprep.subr.bf16.mxu0 %v10194_v21 }
 0x171   : > { %3658 = vmatpush1.bf16.msra.mxu0 %v10192_v22 }
 0x172   : > { %3659 = vmatprep.subr.bf16.mxu0 %v10197_v41 }
 0x175   : > { %3660 = vmatpush1.bf16.msra.mxu0 %v10195_v4 }
 0x176   : > { %3702 = vmatprep.subr.bf16.mxu0 %v10200_v25 }
 0x1cb   : > { %v11639_v26 = vpop.f32.mrb[0].mxu1 }
 0x1cc   : > { %v11641_v10 = vpop.f32.mrb[1].mxu1 }
 0x1cd   : > { %v11643_v31 = vpop.f32.mrb[2].mxu1 }
 0x1ce   : > { %v11645_v27 = vpop.f32.mrb[3].mxu1 }
 0x1d3   : > { %v11652_v49 = vpop.f32.mrb[4].mxu1 }
 0x1d4   : > { %v11654_v34 = vpop.f32.mrb[5].mxu1 }
 0x1d5   : > { %v11656_v35 = vpop.f32.mrb[6].mxu1 }
 0x1d6   : > { %v11659_v38 = vpop.f32.mrb[7].mxu1 }
 0x1db   : > { %v11664_v40 = vpop.f32.mrb[8].mxu1 }
 0x1dc   : > { %v11666_v58 = vpop.f32.mrb[9].mxu1 }
 0x1dd   : > { %v11668_v50 = vpop.f32.mrb[10].mxu1 }
 0x1de   : > { %v11671_v52 = vpop.f32.mrb[11].mxu1 }
 0x1e3   : > { %v11674_v56 = vpop.f32.mrb[12].mxu1 }
 0x1e4   : > { %v11676_v63 = vpop.f32.mrb[13].mxu1 }
 0x1e5   : > { %v11678_v57 = vpop.f32.mrb[14].mxu1 }
 0x1e6   : > { %v11680_v19 = vpop.f32.mrb[15].mxu1 }
 0x1eb   : > { %v2854_v60 = vpop.f32.mrb[0].mxu0 }
 0x1ec   : > { %v9514_v2 = vadd.f32 %v2854_v60, %v11687_v62  ;;  %v2856_v0 = vpop.f32.mrb[1].mxu0 }
 0x1ed   : > { %v9515_v11 = vadd.f32 %v2856_v0, %v11691_v43  ;;  %v2858_v5 = vpop.f32.mrb[2].mxu0 }
 0x1ee   : > { %v9516_v6 = vadd.f32 %v2858_v5, %v11687_v62  ;;  %v2860_v7 = vpop.f32.mrb[3].mxu0  ;;  %v3185_v8 = vmax.f32 %v9514_v2, 0.0  ;;  %v10209_v2 = vld [vmem:[%s10943_s25 + $0x134] ss:$8 sps:$4 sm:$0xff]  }
 0x1ef   : > { %v9517_v32 = vadd.f32 %v2860_v7, %v11691_v43  ;;  %v3186_v12 = vmax.f32 %v9515_v11, 0.0 }
 0x1f0   : > { %v3189_v9 = vmax.f32 %v9516_v6, 0.0 }
 0x1f1   : > { %v3190_v55 = vmax.f32 %v9517_v32, 0.0  ;;  %v10207_v32 = vld [vmem:[%s10943_s25 + $0x130] ss:$8 sps:$4 sm:$0xff]  }
 0x1f2   : > { %v3217_v18 = vpack.c.bf16 %v3189_v9, %v3185_v8 }
 0x1f3   : > { %v3218_v36 = vpack.c.bf16 %v3190_v55, %v3186_v12  ;;  %v2864_v14 = vpop.f32.mrb[4].mxu0  ;;  %v10212_v12 = vld [vmem:[%s10943_s25 + $0x144] ss:$8 sps:$4 sm:$0xff]  }
 0x1f4   : > { %v9518_v16 = vadd.f32 %v2864_v14, %v11687_v62  ;;  %v2866_v20 = vpop.f32.mrb[5].mxu0 }
 0x1f5   : > { %v9519_v21 = vadd.f32 %v2866_v20, %v11691_v43  ;;  %v2868_v22 = vpop.f32.mrb[6].mxu0  ;;  %3661 = vmatprep.mubr.bf16.mxu0 %v3218_v36 }
 0x1f6   : > { %v9520_v41 = vadd.f32 %v2868_v22, %v11687_v62  ;;  %v2870_v4 = vpop.f32.mrb[7].mxu0  ;;  %3662 = vmatmul.mubr.bf16.vlgmr.msra.gmra.mrb[32].mxu0 %v3217_v18  ;;  %v3193_v45 = vmax.f32 %v9518_v16, 0.0  ;;  %v10210_v16 = vld [vmem:[%s10943_s25 + $0x140] ss:$8 sps:$4 sm:$0xff]  }
 0x1f7   : > { %v9521_v25 = vadd.f32 %v2870_v4, %v11691_v43  ;;  %3703 = vmatpush1.bf16.msra.mxu0 %v10198_v15  ;;  %v3194_v51 = vmax.f32 %v9519_v21, 0.0  ;;  %v10215_v21 = vld [vmem:[%s10943_s25 + $0x154] ss:$8 sps:$4 sm:$0xff]   ;;  %v11719_v4 = vrot.slane %v11683_v59, %v11231_v23 }
 0x1f8   : > { %v3197_v61 = vmax.f32 %v9520_v41, 0.0  ;;  %3704 = vmatprep.subr.bf16.mxu0 %v10203_v54 }
 0x1f9   : > { %v3198_v3 = vmax.f32 %v9521_v25, 0.0 }
 0x1fa   : > { %v3221_v39 = vpack.c.bf16 %v3197_v61, %v3193_v45  ;;  %v11724_v45 = vrot.slane %v11683_v59, %v11234_v24 }
 0x1fb   : > { %v3222_v13 = vpack.c.bf16 %v3198_v3, %v3194_v51  ;;  %3705 = vmatpush1.bf16.msra.mxu0 %v10201_v29  ;;  %v2874_v48 = vpop.f32.mrb[8].mxu0 }
 0x1fc   : > { %v9522_v53 = vadd.f32 %v2874_v48, %v11687_v62  ;;  %v2876_v60 = vpop.f32.mrb[9].mxu0  ;;  %3706 = vmatprep.subr.bf16.mxu0 %v10206_v44  ;;  %v10213_v44 = vld [vmem:[%s10943_s25 + $0x150] ss:$8 sps:$4 sm:$0xff]   ;;  %v9532_v59 = vadd.f32 %v11641_v10, %v11724_v45 }
 0x1fd   : > { %v9523_v0 = vadd.f32 %v2876_v60, %v11691_v43  ;;  %v2878_v11 = vpop.f32.mrb[10].mxu0  ;;  %3671 = vmatprep.mubr.bf16.mxu0 %v3222_v13 }
 0x1fe   : > { %v9524_v5 = vadd.f32 %v2878_v11, %v11687_v62  ;;  %v2880_v6 = vpop.f32.mrb[11].mxu0  ;;  %3672 = vmatmul.mubr.bf16.gmra.mrb[36].mxu0 %v3221_v39  ;;  %v3201_v8 = vmax.f32 %v9522_v53, 0.0  ;;  %v10218_v39 = vld [vmem:[%s10943_s25 + $0x164] ss:$8 sps:$4 sm:$0xff]  }
 0x1ff   : > { %v9525_v7 = vadd.f32 %v2880_v6, %v11691_v43  ;;  %3707 = vmatpush1.bf16.msra.mxu0 %v10204_v28  ;;  %v3202_v55 = vmax.f32 %v9523_v0, 0.0 }
 0x200   : > { %v3205_v9 = vmax.f32 %v9524_v5, 0.0  ;;  %3708 = vmatprep.subr.bf16.mxu0 %v10209_v2  ;;  %v9534_v2 = vadd.f32 %v11643_v31, %v11719_v4  ;;  %v10221_v5 = vld [vmem:[%s10943_s25 + $0x174] ss:$8 sps:$4 sm:$0xff]  }
 0x201   : > { %v3206_v18 = vmax.f32 %v9525_v7, 0.0 }
 0x202   : > { %v3225_v36 = vpack.c.bf16 %v3205_v9, %v3201_v8  ;;  %v10219_v9 = vld [vmem:[%s10943_s25 + $0x170] ss:$8 sps:$4 sm:$0xff]  }
 0x203   : > { %v3226_v14 = vpack.c.bf16 %v3206_v18, %v3202_v55  ;;  %3709 = vmatpush1.bf16.msra.mxu0 %v10207_v32  ;;  %v2884_v15 = vpop.f32.mrb[12].mxu0  ;;  %v10224_v55 = vld [vmem:[%s10943_s25 + $0x184] ss:$8 sps:$4 sm:$0xff]  }
 0x204   : > { %v9526_v20 = vadd.f32 %v2884_v15, %v11687_v62  ;;  %v2886_v54 = vpop.f32.mrb[13].mxu0  ;;  %3710 = vmatprep.subr.bf16.mxu0 %v10212_v12  ;;  %v9540_v15 = vadd.f32 %v11654_v34, %v11724_v45 }
 0x205   : > { %v9527_v22 = vadd.f32 %v2886_v54, %v11691_v43  ;;  %v2888_v41 = vpop.f32.mrb[14].mxu0  ;;  %3681 = vmatprep.mubr.bf16.mxu0 %v3226_v14  ;;  %v10222_v54 = vld [vmem:[%s10943_s25 + $0x180] ss:$8 sps:$4 sm:$0xff]  }
 0x206   : > { %v9528_v25 = vadd.f32 %v2888_v41, %v11687_v62  ;;  %v2890_v29 = vpop.f32.mrb[15].mxu0  ;;  %3682 = vmatmul.mubr.bf16.gmra.mrb[40].mxu0 %v3225_v36  ;;  %v3209_v51 = vmax.f32 %v9526_v20, 0.0  ;;  %v9530_v62 = vadd.f32 %v11639_v26, %v11719_v4  ;;  %v9536_v26 = vadd.f32 %v11645_v27, %v11724_v45 }
 0x207   : > { %v9529_v61 = vadd.f32 %v2890_v29, %v11691_v43  ;;  %3711 = vmatpush1.bf16.msra.mxu0 %v10210_v16  ;;  %v3210_v13 = vmax.f32 %v9527_v22, 0.0  ;;  %v10216_v43 = vld [vmem:[%s10943_s25 + $0x160] ss:$8 sps:$4 sm:$0xff]   ;;  %v9538_v27 = vadd.f32 %v11652_v49, %v11719_v4  ;;  %v9544_v49 = vadd.f32 %v11659_v38, %v11724_v45 }
 0x208   : > { %v3213_v3 = vmax.f32 %v9528_v25, 0.0  ;;  %3712 = vmatprep.subr.bf16.mxu0 %v10215_v21  ;;  %v9542_v21 = vadd.f32 %v11656_v35, %v11719_v4  ;;  %v10227_v25 = vld [vmem:[%s10943_s25 + $0x194] ss:$8 sps:$4 sm:$0xff]   ;;  %v10230_v35 = vld [vmem:[%s10943_s25 + $0x1a4] ss:$8 sps:$4 sm:$0xff]  }
 0x209   : > { %v3214_v48 = vmax.f32 %v9529_v61, 0.0 }
 0x20a   : > { %v3229_v28 = vpack.c.bf16 %v3213_v3, %v3209_v51  ;;  %v10225_v3 = vld [vmem:[%s10943_s25 + $0x190] ss:$8 sps:$4 sm:$0xff]  }
 0x20b   : > { %v3230_v53 = vpack.c.bf16 %v3214_v48, %v3210_v13  ;;  %3713 = vmatpush1.bf16.msra.mxu0 %v10213_v44  ;;  %v3146_v60 = vpop.f32.mrb[16].mxu0 }
 0x20c   : > { %v9531_v0 = vadd.f32 %v9530_v62, %v3146_v60  ;;  %v3148_v11 = vpop.f32.mrb[17].mxu0  ;;  %3714 = vmatprep.subr.bf16.mxu0 %v10218_v39 }
 0x20d   : > { %v9533_v6 = vadd.f32 %v9532_v59, %v3148_v11  ;;  %v3150_v7 = vpop.f32.mrb[18].mxu0  ;;  %3691 = vmatprep.mubr.bf16.mxu0 %v3230_v53  ;;  %v9548_v59 = vadd.f32 %v11666_v58, %v11724_v45 }
 0x20e   : > { %v9535_v10 = vadd.f32 %v9534_v2, %v3150_v7  ;;  %v3152_v32 = vpop.f32.mrb[19].mxu0  ;;  %3692 = vmatmul.mubr.bf16.gmra.mrb[44].mxu0 %v3229_v28  ;;  %v3187_v12 = vmax.f32 %v9531_v0, 0.0  ;;  %v9546_v28 = vadd.f32 %v11664_v40, %v11719_v4  ;;  %v9550_v2 = vadd.f32 %v11668_v50, %v11719_v4  ;;  %v10236_v50 = vld [vmem:[%s10943_s25 + $0x1c4] ss:$8 sps:$4 sm:$0xff]  }
 0x20f   : > { %v9537_v8 = vadd.f32 %v9536_v26, %v3152_v32  ;;  %3715 = vmatpush1.bf16.msra.mxu0 %v10216_v43  ;;  %v3188_v18 = vmax.f32 %v9533_v6, 0.0  ;;  %v10228_v43 = vld [vmem:[%s10943_s25 + $0x1a0] ss:$8 sps:$4 sm:$0xff]   ;;  %v9552_v40 = vadd.f32 %v11671_v52, %v11724_v45  ;;  %v10231_v32 = vld [vmem:[%s10943_s25 + $0x1b0] ss:$8 sps:$4 sm:$0xff]   ;;  %v9556_v52 = vadd.f32 %v11676_v63, %v11724_v45 }
 0x210   : > { %v3191_v31 = vmax.f32 %v9535_v10, 0.0  ;;  %3716 = vmatprep.subr.bf16.mxu0 %v10221_v5  ;;  %v10233_v5 = vld [vmem:[%s10943_s25 + $0x1b4] ss:$8 sps:$4 sm:$0xff]  }
 0x211   : > { %v3192_v36 = vmax.f32 %v9537_v8, 0.0 }
 0x212   : > { %v11743_v14 = vpack.c.bf16 %v3191_v31, %v3187_v12 }
 0x213   : > { %v3220_v16 = vpack.c.bf16 %v3192_v36, %v3188_v18  ;;  %3717 = vmatpush1.bf16.msra.mxu0 %v10219_v9  ;;  %v3156_v20 = vpop.f32.mrb[20].mxu0 }
 0x214   : > { %v9539_v22 = vadd.f32 %v9538_v27, %v3156_v20  ;;  %v3158_v41 = vpop.f32.mrb[21].mxu0  ;;  %3718 = vmatprep.subr.bf16.mxu0 %v10224_v55  ;;  %v9554_v55 = vadd.f32 %v11674_v56, %v11719_v4  ;;  %v9560_v56 = vadd.f32 %v11680_v19, %v11724_v45  ;;  %v10240_v19 = vld [vmem:[%s10943_s25 + $0x1e0] ss:$8 sps:$4 sm:$0xff]   ;;  %v10245_v45 = vld [vmem:[%s10943_s25 + $0x1f4] ss:$8 sps:$4 sm:$0xff]  }
 0x215   : > { %v9541_v29 = vadd.f32 %v9540_v15, %v3158_v41  ;;  %v3160_v61 = vpop.f32.mrb[22].mxu0  ;;  %3734 = vmatprep.mubr.bf16.mxu0 %v3220_v16  ;;  %v10234_v15 = vld [vmem:[%s10943_s25 + $0x1c0] ss:$8 sps:$4 sm:$0xff]   ;;  %v9558_v16 = vadd.f32 %v11678_v57, %v11719_v4  ;;  %v10242_v4 = vld [vmem:[%s10943_s25 + $0x1e4] ss:$8 sps:$4 sm:$0xff]  }
 0x216   : > { %v9543_v34 = vadd.f32 %v9542_v21, %v3160_v61  ;;  %v3162_v44 = vpop.f32.mrb[23].mxu0  ;;  %v3195_v39 = vmax.f32 %v9539_v22, 0.0  ;;  %v10239_v21 = vld [vmem:[%s10943_s25 + $0x1d4] ss:$8 sps:$4 sm:$0xff]  }
 0x217   : > { %v9545_v51 = vadd.f32 %v9544_v49, %v3162_v44  ;;  %3719 = vmatpush1.bf16.msra.mxu0 %v10222_v54  ;;  %v3196_v48 = vmax.f32 %v9541_v29, 0.0  ;;  %v10237_v29 = vld [vmem:[%s10943_s25 + $0x1d0] ss:$8 sps:$4 sm:$0xff]  }
 0x218   : > { %v3199_v13 = vmax.f32 %v9543_v34, 0.0  ;;  %3720 = vmatprep.subr.bf16.mxu0 %v10227_v25 }
 0x219   : > { %v3200_v62 = vmax.f32 %v9545_v51, 0.0 }
 0x21a   : > { %v3223_v38 = vpack.c.bf16 %v3199_v13, %v3195_v39  ;;  %v10243_v39 = vld [vmem:[%s10943_s25 + $0x1f0] ss:$8 sps:$4 sm:$0xff]   ;;  %v10257_v13 = vld [vmem:[%s10953_s3 + $0x28] sm:$0xff]  }
 0x21b   : > { %v3224_v53 = vpack.c.bf16 %v3200_v62, %v3196_v48  ;;  %3721 = vmatpush1.bf16.msra.mxu0 %v10225_v3  ;;  %v3166_v60 = vpop.f32.mrb[24].mxu0  ;;  %9254 = vmatpush3.bf16.msra.mxu1 %v10257_v13  ;;  %v10259_v48 = vld [vmem:[%s10953_s3 + $0x30] sm:$0xff]   ;;  %v10260_v62 = vld [vmem:[%s10953_s3 + $0x78] sm:$0xff]  }
 0x21c   : > { %v9547_v0 = vadd.f32 %v9546_v28, %v3166_v60  ;;  %v3168_v11 = vpop.f32.mrb[25].mxu0  ;;  %3722 = vmatprep.subr.bf16.mxu0 %v10230_v35  ;;  %v10258_v35 = vld [vmem:[%s10953_s3 + $0x70] sm:$0xff]   ;;  %v10261_v28 = vld [vmem:[%s10953_s3 + $0x38] sm:$0xff]  }
 0x21d   : > { %v9549_v26 = vadd.f32 %v9548_v59, %v3168_v11  ;;  %v3170_v6 = vpop.f32.mrb[26].mxu0  ;;  %9255 = vmatprep.subr.bf16.mxu1 %v10258_v35 }
 0x21e   : > { %v9551_v7 = vadd.f32 %v9550_v2, %v3170_v6  ;;  %v3172_v58 = vpop.f32.mrb[27].mxu0  ;;  %v3203_v8 = vmax.f32 %v9547_v0, 0.0 }
 0x21f   : > { %v9553_v10 = vadd.f32 %v9552_v40, %v3172_v58  ;;  %3723 = vmatpush1.bf16.msra.mxu0 %v10228_v43  ;;  %v3204_v12 = vmax.f32 %v9549_v26, 0.0  ;;  %9256 = vmatpush3.bf16.msra.mxu1 %v10259_v48 }
 0x220   : > { %v3207_v9 = vmax.f32 %v9551_v7, 0.0  ;;  %3724 = vmatprep.subr.bf16.mxu0 %v10233_v5  ;;  %9257 = vmatprep.subr.bf16.mxu1 %v10260_v62 }
 0x221   : > { %v3208_v31 = vmax.f32 %v9553_v10, 0.0 }
 0x222   : > { %v3227_v18 = vpack.c.bf16 %v3207_v9, %v3203_v8 }
 0x223   : > { %v3228_v36 = vpack.c.bf16 %v3208_v31, %v3204_v12  ;;  %3725 = vmatpush1.bf16.msra.mxu0 %v10231_v32  ;;  %v3176_v27 = vpop.f32.mrb[28].mxu0  ;;  %9258 = vmatpush3.bf16.msra.mxu1 %v10261_v28  ;;  %v10263_v31 = vld [vmem:[%s10963_s14 + $0x8] sm:$0xff]  }
 0x224   : > { %v9555_v20 = vadd.f32 %v9554_v55, %v3176_v27  ;;  %v3178_v54 = vpop.f32.mrb[29].mxu0  ;;  %3726 = vmatprep.subr.bf16.mxu0 %v10236_v50 }
 0x225   : > { %v9557_v22 = vadd.f32 %v9556_v52, %v3178_v54  ;;  %v3180_v41 = vpop.f32.mrb[30].mxu0 }
 0x226   : > { %v9559_v63 = vadd.f32 %v9558_v16, %v3180_v41  ;;  %v3182_v25 = vpop.f32.mrb[31].mxu0  ;;  %v3211_v61 = vmax.f32 %v9555_v20, 0.0  ;;  %v10264_v20 = vld [vmem:[%s10963_s14 + $0x10] sm:$0xff]  }
 0x227   : > { %v9561_v49 = vadd.f32 %v9560_v56, %v3182_v25  ;;  %3727 = vmatpush1.bf16.msra.mxu0 %v10234_v15  ;;  %v3212_v34 = vmax.f32 %v9557_v22, 0.0 }
 0x228   : > { %v3215_v57 = vmax.f32 %v9559_v63, 0.0  ;;  %3728 = vmatprep.subr.bf16.mxu0 %v10239_v21 }
 0x229   : > { %v3216_v44 = vmax.f32 %v9561_v49, 0.0 }
 0x22a   : > { %v3231_v51 = vpack.c.bf16 %v3215_v57, %v3211_v61 }
 0x22b   : > { %v3232_v3 = vpack.c.bf16 %v3216_v44, %v3212_v34  ;;  %3729 = vmatpush1.bf16.msra.mxu0 %v10237_v29 }
 0x22c   : > { %3730 = vmatprep.subr.bf16.mxu0 %v10242_v4 }
 0x22f   : > { %3731 = vmatpush1.bf16.msra.mxu0 %v10240_v19 }
 0x230   : > { %3732 = vmatprep.subr.bf16.mxu0 %v10245_v45 }
 0x233   : > { %3733 = vmatpush1.bf16.msra.mxu0 %v10243_v39 }
 0x236   : > { %3735 = vmatmul.mubr.bf16.vlgmr.msra.gmra.mrb[32].mxu0 %v11743_v14  ;;  %v10262_v14 = vld [vmem:[%s10963_s14] sm:$0xff]  }
 0x237   : > { %3744 = vmatprep.mubr.bf16.mxu0 %v3224_v53  ;;  %9408 = vmatprep.subr.bf16.mxu1 %v10262_v14 }
 0x23e   : > { %3745 = vmatmul.mubr.bf16.gmra.mrb[36].mxu0 %v3223_v38  ;;  %v3297_v38 = vld [vmem:[%s10948_s29] sm:$0x3] }
 0x23f   : > { %3754 = vmatprep.mubr.bf16.mxu0 %v3228_v36  ;;  %v3302_v59 = vrot.slane %v3297_v38, %v11161_v1  ;;  %v11793_v53 = vrot.slane %v3297_v38, %v11133_v47 }
 0x246   : > { %3755 = vmatmul.mubr.bf16.gmra.mrb[40].mxu0 %v3227_v18 }
 0x247   : > { %3764 = vmatprep.mubr.bf16.mxu0 %v3232_v3 }
 0x24e   : > { %3765 = vmatmul.mubr.bf16.gmra.mrb[44].mxu0 %v3231_v51 }
 0x24f   : > { %4886 = vmatprep.mubr.bf16.mxu0 %v10907_v30 }
 0x309   : > { %v3736_v60 = vpop.f32.mrb[32].mxu0 }
 0x30a   : > { %v9562_v43 = vadd.f32 %v3736_v60, %v3302_v59  ;;  %v3738_v2 = vpop.f32.mrb[33].mxu0 }
 0x30b   : > { %v9563_v0 = vadd.f32 %v3738_v2, %v11793_v53  ;;  %v3740_v11 = vpop.f32.mrb[34].mxu0 }
 0x30c   : > { %v9564_v5 = vadd.f32 %v3740_v11, %v3302_v59  ;;  %v3742_v40 = vpop.f32.mrb[35].mxu0  ;;  %v3775_v6 = vmax.f32 %v9562_v43, 0.0 }
 0x30d   : > { %v9565_v26 = vadd.f32 %v3742_v40, %v11793_v53  ;;  %v3776_v58 = vmax.f32 %v9563_v0, 0.0  ;;  %v10265_v40 = vld [vmem:[%s10963_s14 + $0x18] sm:$0xff]  }
 0x30e   : > { %v3777_v7 = vmax.f32 %v9564_v5, 0.0 }
 0x30f   : > { %v3778_v10 = vmax.f32 %v9565_v26, 0.0  ;;  %v10267_v26 = vld [vmem:[%s10963_s14 + $0x28] sm:$0xff]  }
 0x310   : > { %v3791_v32 = vpack.c.bf16 %v3777_v7, %v3775_v6  ;;  %v10269_v6 = vld [vmem:[%s10963_s14 + $0x38] sm:$0xff]   ;;  %v10270_v7 = vld [vmem:[%s10973_s24] sm:$0xff]  }
 0x311   : > { %v3792_v8 = vpack.c.bf16 %v3778_v10, %v3776_v58  ;;  %v3746_v9 = vpop.f32.mrb[36].mxu0  ;;  %v8800_v10 = vld [vmem:[%s10958_s8] ss:$0 sm:$0xff] }
 0x312   : > { %v9566_v50 = vadd.f32 %v3746_v9, %v3302_v59  ;;  %v3748_v12 = vpop.f32.mrb[37].mxu0 }
 0x313   : > { %v9567_v55 = vadd.f32 %v3748_v12, %v11793_v53  ;;  %v3750_v18 = vpop.f32.mrb[38].mxu0  ;;  %3966 = vmatprep.mubr.bf16.mxu1 %v3792_v8 }
 0x314   : > { %v9568_v52 = vadd.f32 %v3750_v18, %v3302_v59  ;;  %v3752_v36 = vpop.f32.mrb[39].mxu0  ;;  %3967 = vmatmul.mubr.bf16.vlgmr.msra.gmra.mrb[16].mxu1 %v3791_v32  ;;  %v3779_v15 = vmax.f32 %v9566_v50, 0.0 }
 0x315   : > { %v9569_v27 = vadd.f32 %v3752_v36, %v11793_v53  ;;  %9409 = vmatpush3.bf16.msra.mxu1 %v10262_v14  ;;  %v3780_v54 = vmax.f32 %v9567_v55, 0.0 }
 0x316   : > { %v3781_v16 = vmax.f32 %v9568_v52, 0.0  ;;  %9410 = vmatprep.subr.bf16.mxu1 %v10263_v31 }
 0x317   : > { %v3782_v21 = vmax.f32 %v9569_v27, 0.0 }
 0x318   : > { %v3793_v56 = vpack.c.bf16 %v3781_v16, %v3779_v15 }
 0x319   : > { %v3794_v22 = vpack.c.bf16 %v3782_v21, %v3780_v54  ;;  %v3756_v41 = vpop.f32.mrb[40].mxu0  ;;  %9411 = vmatpush3.bf16.msra.mxu1 %v10263_v31 }
 0x31a   : > { %v9570_v63 = vadd.f32 %v3756_v41, %v3302_v59  ;;  %v3758_v25 = vpop.f32.mrb[41].mxu0  ;;  %9412 = vmatprep.subr.bf16.mxu1 %v10264_v20 }
 0x31b   : > { %v9571_v49 = vadd.f32 %v3758_v25, %v11793_v53  ;;  %v3760_v29 = vpop.f32.mrb[42].mxu0  ;;  %3974 = vmatprep.mubr.bf16.mxu1 %v3794_v22 }
 0x31c   : > { %v9572_v61 = vadd.f32 %v3760_v29, %v3302_v59  ;;  %v3762_v57 = vpop.f32.mrb[43].mxu0  ;;  %3975 = vmatmul.mubr.bf16.gmra.mrb[20].mxu1 %v3793_v56  ;;  %v3783_v34 = vmax.f32 %v9570_v63, 0.0 }
 0x31d   : > { %v9573_v4 = vadd.f32 %v3762_v57, %v11793_v53  ;;  %9413 = vmatpush3.bf16.msra.mxu1 %v10264_v20  ;;  %v3784_v51 = vmax.f32 %v9571_v49, 0.0 }
 0x31e   : > { %v3785_v44 = vmax.f32 %v9572_v61, 0.0  ;;  %9414 = vmatprep.subr.bf16.mxu1 %v10265_v40 }
 0x31f   : > { %v3786_v3 = vmax.f32 %v9573_v4, 0.0  ;;  %v10271_v4 = vld [vmem:[%s10973_s24 + $0x8] sm:$0xff]  }
 0x320   : > { %v3795_v19 = vpack.c.bf16 %v3785_v44, %v3783_v34 }
 0x321   : > { %v3796_v45 = vpack.c.bf16 %v3786_v3, %v3784_v51  ;;  %v3766_v39 = vpop.f32.mrb[44].mxu0  ;;  %9415 = vmatpush3.bf16.msra.mxu1 %v10265_v40  ;;  %v10274_v40 = vld [vmem:[%s10983_s6] sm:$0xff]  }
 0x322   : > { %v9574_v13 = vadd.f32 %v3766_v39, %v3302_v59  ;;  %v3768_v35 = vpop.f32.mrb[45].mxu0 }
 0x323   : > { %v9575_v48 = vadd.f32 %v3768_v35, %v11793_v53  ;;  %v3770_v62 = vpop.f32.mrb[46].mxu0  ;;  %3982 = vmatprep.mubr.bf16.mxu1 %v3796_v45 }
 0x324   : > { %v9576_v28 = vadd.f32 %v3770_v62, %v3302_v59  ;;  %v3772_v14 = vpop.f32.mrb[47].mxu0  ;;  %3983 = vmatmul.mubr.bf16.gmra.mrb[24].mxu1 %v3795_v19  ;;  %v3787_v60 = vmax.f32 %v9574_v13, 0.0  ;;  %v10266_v59 = vld [vmem:[%s10963_s14 + $0x20] sm:$0xff]  }
 0x325   : > { %v9577_v38 = vadd.f32 %v3772_v14, %v11793_v53  ;;  %v3788_v2 = vmax.f32 %v9575_v48, 0.0  ;;  %9416 = vmatprep.subr.bf16.mxu1 %v10266_v59  ;;  %v10268_v53 = vld [vmem:[%s10963_s14 + $0x30] sm:$0xff]  }
 0x326   : > { %v3789_v43 = vmax.f32 %v9576_v28, 0.0  ;;  %9417 = vmatpush3.bf16.msra.mxu1 %v10266_v59  ;;  %v8817_v59 = vld [vmem:[%s10968_s19] ss:$0 sm:$0xff] }
 0x327   : > { %v3790_v0 = vmax.f32 %v9577_v38, 0.0  ;;  %9418 = vmatprep.subr.bf16.mxu1 %v10267_v26 }
 0x328   : > { %v3797_v11 = vpack.c.bf16 %v3789_v43, %v3787_v60 }
 0x329   : > { %v3798_v5 = vpack.c.bf16 %v3790_v0, %v3788_v2 }
 0x32a   : > { %9419 = vmatpush3.bf16.msra.mxu1 %v10267_v26 }
 0x32b   : > { %3990 = vmatprep.mubr.bf16.mxu1 %v3798_v5  ;;  %9420 = vmatprep.subr.bf16.mxu1 %v10268_v53  ;;  %v10273_v5 = vld [vmem:[%s10973_s24 + $0x18] sm:$0xff]  }
 0x32c   : > { %3991 = vmatmul.mubr.bf16.gmra.mrb[28].mxu1 %v3797_v11  ;;  %v10272_v11 = vld [vmem:[%s10973_s24 + $0x10] sm:$0xff]  }
 0x32e   : > { %9421 = vmatpush3.bf16.msra.mxu1 %v10268_v53 }
 0x32f   : > { %9422 = vmatprep.subr.bf16.mxu1 %v10269_v6 }
 0x332   : > { %9423 = vmatpush3.bf16.msra.mxu1 %v10269_v6 }
 0x333   : > { %9432 = vmatprep.subr.bf16.mxu1 %v10270_v7 }
 0x3e7   : > { %v9259_v58 = vpop.f32.mrb[16].mxu1 }
 0x3e8   : > { %v9260_v32 = vpop.f32.mrb[17].mxu1 }
 0x3e9   : > { %v9261_v8 = vadd.f32 %v9260_v32, %v9259_v58  ;;  %v9262_v9 = vpop.f32.mrb[18].mxu1 }
 0x3ea   : > { %v9263_v50 = vpop.f32.mrb[19].mxu1 }
 0x3eb   : > { %v3969_v12 = vadd.f32 %v9261_v8, %v8800_v10  ;;  %v9264_v31 = vadd.f32 %v9263_v50, %v9262_v9 }
 0x3ed   : > { %v3972_v55 = vadd.f32 %v9264_v31, %v8800_v10  ;;  %v3999_v18 = vmax.f32 %v3969_v12, 0.0 }
 0x3ef   : > { %v4000_v52 = vmax.f32 %v3972_v55, 0.0  ;;  %v9265_v36 = vpop.f32.mrb[20].mxu1 }
 0x3f0   : > { %v9266_v27 = vpop.f32.mrb[21].mxu1 }
 0x3f1   : > { %v9267_v15 = vadd.f32 %v9266_v27, %v9265_v36  ;;  %v9268_v16 = vpop.f32.mrb[22].mxu1  ;;  %v4007_v20 = vpack.c.bf16 %v4000_v52, %v3999_v18 }
 0x3f2   : > { %v9269_v54 = vpop.f32.mrb[23].mxu1 }
 0x3f3   : > { %v3977_v21 = vadd.f32 %v9267_v15, %v8800_v10  ;;  %v9270_v56 = vadd.f32 %v9269_v54, %v9268_v16  ;;  %9424 = vmatprep.mubr.bf16.mxu1 %v4007_v20 }
 0x3f5   : > { %v3980_v22 = vadd.f32 %v9270_v56, %v8800_v10  ;;  %v4001_v41 = vmax.f32 %v3977_v21, 0.0 }
 0x3f7   : > { %v4002_v63 = vmax.f32 %v3980_v22, 0.0  ;;  %v9271_v25 = vpop.f32.mrb[24].mxu1 }
 0x3f8   : > { %v9272_v49 = vpop.f32.mrb[25].mxu1 }
 0x3f9   : > { %v4008_v29 = vpack.c.bf16 %v4002_v63, %v4001_v41  ;;  %v9273_v61 = vadd.f32 %v9272_v49, %v9271_v25  ;;  %v9274_v57 = vpop.f32.mrb[26].mxu1 }
 0x3fa   : > { %v9275_v34 = vpop.f32.mrb[27].mxu1 }
 0x3fb   : > { %v3985_v44 = vadd.f32 %v9273_v61, %v8800_v10  ;;  %v9276_v51 = vadd.f32 %v9275_v34, %v9274_v57  ;;  %9425 = vmatmul.mubr.bf16.vlgmr.msra.gmra.mrb[32].mxu1 %v4008_v29  ;;  %v10275_v29 = vld [vmem:[%s10983_s6 + $0x8] sm:$0xff]   ;;  %v10276_v61 = vld [vmem:[%s10993_s20] sm:$0xff]  }
 0x3fc   : > { %9433 = vmatpush3.bf16.msra.mxu1 %v10270_v7  ;;  %v8826_v57 = vld [vmem:[%s13231_s16] ss:$0 sm:$0xff]  ;;  %s13240_s16 = sld [smem:[#allocation13_spill]] }
 0x3fd   : > { %v3988_v3 = vadd.f32 %v9276_v51, %v8800_v10  ;;  %9434 = vmatprep.subr.bf16.mxu1 %v10271_v4  ;;  %v4003_v19 = vmax.f32 %v3985_v44, 0.0 }
 0x3ff   : > { %v4004_v45 = vmax.f32 %v3988_v3, 0.0  ;;  %v9277_v39 = vpop.f32.mrb[28].mxu1 }
 0x400   : > { %v9278_v13 = vpop.f32.mrb[29].mxu1  ;;  %9435 = vmatpush3.bf16.msra.mxu1 %v10271_v4 }
 0x401   : > { %v9279_v35 = vadd.f32 %v9278_v13, %v9277_v39  ;;  %v9280_v48 = vpop.f32.mrb[30].mxu1  ;;  %v4009_v62 = vpack.c.bf16 %v4004_v45, %v4003_v19  ;;  %9436 = vmatprep.subr.bf16.mxu1 %v10272_v11 }
 0x402   : > { %v9281_v28 = vpop.f32.mrb[31].mxu1 }
 0x403   : > { %v3993_v14 = vadd.f32 %v9279_v35, %v8800_v10  ;;  %v9282_v38 = vadd.f32 %v9281_v28, %v9280_v48  ;;  %9428 = vmatprep.mubr.bf16.mxu1 %v4009_v62 }
 0x404   : > { %9437 = vmatpush3.bf16.msra.mxu1 %v10272_v11 }
 0x405   : > { %v3996_v60 = vadd.f32 %v9282_v38, %v8800_v10  ;;  %v4005_v43 = vmax.f32 %v3993_v14, 0.0  ;;  %9438 = vmatprep.subr.bf16.mxu1 %v10273_v5 }
 0x407   : > { %v4006_v2 = vmax.f32 %v3996_v60, 0.0 }
 0x408   : > { %9439 = vmatpush3.bf16.msra.mxu1 %v10273_v5 }
 0x409   : > { %v4010_v0 = vpack.c.bf16 %v4006_v2, %v4005_v43  ;;  %9448 = vmatprep.subr.bf16.mxu1 %v10274_v40 }
 0x40b   : > { %9429 = vmatmul.mubr.bf16.gmra.mrb[36].mxu1 %v4010_v0 }
 0x4ce   : > { %v9426_v26 = vpop.f32.mrb[32].mxu1 }
 0x4cf   : > { %v4125_v53 = vadd.f32 %v9426_v26, %v8817_v59  ;;  %v4116_v6 = vpop.f32.mrb[33].mxu1 }
 0x4d0   : > { %v4117_v7 = vadd.f32 %v8817_v59, %v4116_v6  ;;  %v9427_v58 = vpop.f32.mrb[34].mxu1 }
 0x4d1   : > { %v4128_v32 = vadd.f32 %v9427_v58, %v8817_v59  ;;  %v4119_v10 = vpop.f32.mrb[35].mxu1  ;;  %v4149_v9 = vmax.f32 %v4125_v53, 0.0 }
 0x4d2   : > { %v4120_v8 = vadd.f32 %v8817_v59, %v4119_v10  ;;  %v4147_v12 = vmax.f32 %v4117_v7, 0.0 }
 0x4d3   : > { %v4150_v50 = vmax.f32 %v4128_v32, 0.0  ;;  %v8835_v32 = vld [vmem:[%s13232_s18] ss:$0 sm:$0xff]  ;;  %s13241_s18 = sld [smem:[#allocation10_spill]] }
 0x4d4   : > { %v4148_v31 = vmax.f32 %v4120_v8, 0.0 }
 0x4d5   : > { %v4156_v55 = vpack.c.bf16 %v4150_v50, %v4149_v9 }
 0x4d6   : > { %v4155_v18 = vpack.c.bf16 %v4148_v31, %v4147_v12 }
 0x4d8   : > { %9440 = vmatprep.mubr.msk.bf16.mxu1 %vm4198_vm0, %v4155_v18 }
 0x4d9   : > { %9441 = vmatmul.mubr.msk.bf16.vlgmr.msra.gmra.mrb[40].mxu1 %vm4198_vm0, %v4156_v55 }
 0x4da   : > { %9449 = vmatpush3.bf16.msra.mxu1 %v10274_v40 }
 0x4db   : > { %9450 = vmatprep.subr.bf16.mxu1 %v10275_v29 }
 0x4de   : > { %v9430_v52 = vpop.f32.mrb[36].mxu1  ;;  %9451 = vmatpush3.bf16.msra.mxu1 %v10275_v29 }
 0x4df   : > { %v4141_v36 = vadd.f32 %v9430_v52, %v8817_v59  ;;  %v4132_v27 = vpop.f32.mrb[37].mxu1  ;;  %9460 = vmatprep.subr.bf16.mxu1 %v10276_v61 }
 0x4e0   : > { %v4133_v15 = vadd.f32 %v8817_v59, %v4132_v27  ;;  %v9431_v16 = vpop.f32.mrb[38].mxu1 }
 0x4e1   : > { %v4144_v20 = vadd.f32 %v9431_v16, %v8817_v59  ;;  %v4135_v54 = vpop.f32.mrb[39].mxu1  ;;  %v4153_v56 = vmax.f32 %v4141_v36, 0.0 }
 0x4e2   : > { %v4136_v21 = vadd.f32 %v8817_v59, %v4135_v54  ;;  %v4151_v41 = vmax.f32 %v4133_v15, 0.0 }
 0x4e3   : > { %v4154_v22 = vmax.f32 %v4144_v20, 0.0 }
 0x4e4   : > { %v4152_v63 = vmax.f32 %v4136_v21, 0.0 }
 0x4e5   : > { %v4158_v25 = vpack.c.bf16 %v4154_v22, %v4153_v56 }
 0x4e6   : > { %v4157_v49 = vpack.c.bf16 %v4152_v63, %v4151_v41 }
 0x4e8   : > { %9444 = vmatprep.mubr.msk.bf16.mxu1 %vm4198_vm0, %v4157_v49 }
 0x4e9   : > { %9445 = vmatmul.mubr.msk.bf16.gmra.mrb[44].mxu1 %vm4198_vm0, %v4158_v25 }
 0x5ac   : > { %v9442_v4 = vpop.f32.mrb[40].mxu1 }
 0x5ad   : > { %v4254_v34 = vadd.f32 %v9442_v4, %v8826_v57  ;;  %v4245_v44 = vpop.f32.mrb[41].mxu1 }
 0x5ae   : > { %v4246_v51 = vadd.f32 %v8826_v57, %v4245_v44  ;;  %v9443_v3 = vpop.f32.mrb[42].mxu1 }
 0x5af   : > { %v4257_v19 = vadd.f32 %v9443_v3, %v8826_v57  ;;  %v4248_v45 = vpop.f32.mrb[43].mxu1  ;;  %v4278_v13 = vmax.f32 %v4254_v34, 0.0  ;;  %v10278_v3 = vld [vmem:[%s13233_s22 + $0x8] sm:$0xff]  }
 0x5b0   : > { %v4249_v39 = vadd.f32 %v8826_v57, %v4248_v45  ;;  %v4276_v48 = vmax.f32 %v4246_v51, 0.0  ;;  %v10277_v51 = vld [vmem:[%s13233_s22] sm:$0xff]  }
 0x5b1   : > { %v4279_v35 = vmax.f32 %v4257_v19, 0.0  ;;  %v8842_v19 = vld [vmem:[%s13234_s23] ss:$0 sm:$0xff]  ;;  %s13242_s23 = sld [smem:[#allocation12_spill]] }
 0x5b2   : > { %v4277_v62 = vmax.f32 %v4249_v39, 0.0 }
 0x5b3   : > { %v4285_v28 = vpack.c.bf16 %v4279_v35, %v4278_v13 }
 0x5b4   : > { %v4284_v14 = vpack.c.bf16 %v4277_v62, %v4276_v48 }
 0x5b6   : > { %9452 = vmatprep.mubr.msk.bf16.mxu1 %vm4311_vm1, %v4284_v14 }
 0x5b7   : > { %9453 = vmatmul.mubr.msk.bf16.vlgmr.msra.gmra.mrb[48].mxu1 %vm4311_vm1, %v4285_v28 }
 0x5b8   : > { %9461 = vmatpush3.bf16.msra.mxu1 %v10276_v61 }
 0x5b9   : > { %9470 = vmatprep.subr.bf16.mxu1 %v10277_v51 }
 0x5bc   : > { %v9446_v38 = vpop.f32.mrb[44].mxu1 }
 0x5bd   : > { %v4270_v60 = vadd.f32 %v9446_v38, %v8826_v57  ;;  %v4261_v43 = vpop.f32.mrb[45].mxu1 }
 0x5be   : > { %v4262_v2 = vadd.f32 %v8826_v57, %v4261_v43  ;;  %v9447_v0 = vpop.f32.mrb[46].mxu1 }
 0x5bf   : > { %v4273_v11 = vadd.f32 %v9447_v0, %v8826_v57  ;;  %v4264_v5 = vpop.f32.mrb[47].mxu1  ;;  %v4282_v59 = vmax.f32 %v4270_v60, 0.0 }
 0x5c0   : > { %v4265_v40 = vadd.f32 %v8826_v57, %v4264_v5  ;;  %v4280_v53 = vmax.f32 %v4262_v2, 0.0 }
 0x5c1   : > { %v4283_v26 = vmax.f32 %v4273_v11, 0.0 }
 0x5c2   : > { %v4281_v6 = vmax.f32 %v4265_v40, 0.0 }
 0x5c3   : > { %v4287_v7 = vpack.c.bf16 %v4283_v26, %v4282_v59 }
 0x5c4   : > { %v4286_v58 = vpack.c.bf16 %v4281_v6, %v4280_v53 }
 0x5c6   : > { %9456 = vmatprep.mubr.msk.bf16.mxu1 %vm4311_vm1, %v4286_v58 }
 0x5c7   : > { %9457 = vmatmul.mubr.msk.bf16.gmra.mrb[52].mxu1 %vm4311_vm1, %v4287_v7 }
 0x68a   : > { %v9454_v10 = vpop.f32.mrb[48].mxu1 }
 0x68b   : > { %v4367_v8 = vadd.f32 %v9454_v10, %v8835_v32  ;;  %v4358_v9 = vpop.f32.mrb[49].mxu1 }
 0x68c   : > { %v4359_v50 = vadd.f32 %v8835_v32, %v4358_v9  ;;  %v9455_v12 = vpop.f32.mrb[50].mxu1 }
 0x68d   : > { %v4370_v31 = vadd.f32 %v9455_v12, %v8835_v32  ;;  %v4361_v55 = vpop.f32.mrb[51].mxu1  ;;  %v4391_v52 = vmax.f32 %v4367_v8, 0.0 }
 0x68e   : > { %v4362_v18 = vadd.f32 %v8835_v32, %v4361_v55  ;;  %v4389_v27 = vmax.f32 %v4359_v50, 0.0  ;;  %v10280_v55 = vld [vmem:[%s13235_s26 + $0x8] sm:$0xff]  }
 0x68f   : > { %v4392_v36 = vmax.f32 %v4370_v31, 0.0  ;;  %v10279_v31 = vld [vmem:[%s13235_s26] sm:$0xff]  }
 0x690   : > { %v4390_v15 = vmax.f32 %v4362_v18, 0.0  ;;  %v10281_v18 = vld [vmem:[%s13235_s26 + $0x10] sm:$0xff]  }
 0x691   : > { %v4398_v16 = vpack.c.bf16 %v4392_v36, %v4391_v52  ;;  %v10282_v52 = vld [vmem:[%s13235_s26 + $0x18] sm:$0xff]   ;;  %v10283_v36 = vld [vmem:[%s13236_s28] ss:$8 sps:$4 sm:$0xff]  }
 0x692   : > { %v4397_v20 = vpack.c.bf16 %v4390_v15, %v4389_v27  ;;  %v10285_v27 = vld [vmem:[%s13236_s28 + $0x4] ss:$8 sps:$4 sm:$0xff]   ;;  %v10288_v15 = vld [vmem:[%s13236_s28 + $0x14] ss:$8 sps:$4 sm:$0xff]  }
 0x693   : > { %4854 = vmatprep.subr.bf16.mxu0 %v10285_v27  ;;  %v10331_v27 = vld [vmem:[%s13238_s2 + $0x80] ss:$16 sps:$4 sm:$0xff]  }
 0x694   : > { %9462 = vmatprep.mubr.msk.bf16.mxu1 %vm4416_vm2, %v4397_v20  ;;  %4855 = vmatpush1.bf16.msra.mxu0 %v10283_v36  ;;  %v10291_v20 = vld [vmem:[%s13236_s28 + $0x24] ss:$8 sps:$4 sm:$0xff]  }
 0x695   : > { %9463 = vmatmul.mubr.msk.bf16.vlgmr.msra.gmra.mrb[56].mxu1 %vm4416_vm2, %v4398_v16  ;;  %v10286_v16 = vld [vmem:[%s13236_s28 + $0x10] ss:$8 sps:$4 sm:$0xff]   ;;  %4856 = vmatprep.subr.bf16.mxu0 %v10288_v15  ;;  %v10333_v36 = vld [vmem:[%s13238_s2 + $0x84] ss:$16 sps:$4 sm:$0xff]  }
 0x696   : > { %9471 = vmatpush3.bf16.msra.mxu1 %v10277_v51  ;;  %v10339_v15 = vld [vmem:[%s13238_s2 + $0xa4] ss:$16 sps:$4 sm:$0xff]  }
 0x697   : > { %9472 = vmatprep.subr.bf16.mxu1 %v10278_v3 }
 0x698   : > { %4857 = vmatpush1.bf16.msra.mxu0 %v10286_v16  ;;  %v10337_v16 = vld [vmem:[%s13238_s2 + $0xa0] ss:$16 sps:$4 sm:$0xff]  }
 0x699   : > { %4858 = vmatprep.subr.bf16.mxu0 %v10291_v20  ;;  %v10345_v20 = vld [vmem:[%s13238_s2 + $0xc4] ss:$16 sps:$4 sm:$0xff]  }
 0x69a   : > { %v9458_v54 = vpop.f32.mrb[52].mxu1  ;;  %9473 = vmatpush3.bf16.msra.mxu1 %v10278_v3 }
 0x69b   : > { %v4383_v21 = vadd.f32 %v9458_v54, %v8835_v32  ;;  %v4374_v56 = vpop.f32.mrb[53].mxu1  ;;  %9482 = vmatprep.subr.bf16.mxu1 %v10279_v31  ;;  %v10289_v54 = vld [vmem:[%s13236_s28 + $0x20] ss:$8 sps:$4 sm:$0xff]  }
 0x69c   : > { %v4375_v22 = vadd.f32 %v8835_v32, %v4374_v56  ;;  %v9459_v41 = vpop.f32.mrb[54].mxu1  ;;  %4859 = vmatpush1.bf16.msra.mxu0 %v10289_v54  ;;  %v10292_v56 = vld [vmem:[%s13236_s28 + $0x30] ss:$8 sps:$4 sm:$0xff]  }
 0x69d   : > { %v4386_v63 = vadd.f32 %v9459_v41, %v8835_v32  ;;  %v4377_v25 = vpop.f32.mrb[55].mxu1  ;;  %v4395_v29 = vmax.f32 %v4383_v21, 0.0  ;;  %v10294_v21 = vld [vmem:[%s13236_s28 + $0x34] ss:$8 sps:$4 sm:$0xff]   ;;  %v10343_v54 = vld [vmem:[%s13238_s2 + $0xc0] ss:$16 sps:$4 sm:$0xff]  }
 0x69e   : > { %v4378_v49 = vadd.f32 %v8835_v32, %v4377_v25  ;;  %v4393_v57 = vmax.f32 %v4375_v22, 0.0  ;;  %4860 = vmatprep.subr.bf16.mxu0 %v10294_v21  ;;  %v8848_v22 = vld [vmem:[%s13237_s1] ss:$0 sm:$0xff]  ;;  %v10351_v21 = vld [vmem:[%s13238_s2 + $0xe4] ss:$16 sps:$4 sm:$0xff]   ;;  %s9200_s1 = sshll.u32 %s11071_s10, 6 }
 0x69f   : > { %v4396_v61 = vmax.f32 %v4386_v63, 0.0  ;;  %s13300_s10 = smov (!%p924_p5, %s11071_s10), 1 }
 0x6a0   : > { %v4394_v4 = vmax.f32 %v4378_v49, 0.0  ;;  %4861 = vmatpush1.bf16.msra.mxu0 %v10292_v56  ;;  %v10349_v56 = vld [vmem:[%s13238_s2 + $0xe0] ss:$16 sps:$4 sm:$0xff]  }
 0x6a1   : > { %v4400_v34 = vpack.c.bf16 %v4396_v61, %v4395_v29 }
 0x6a2   : > { %v4399_v44 = vpack.c.bf16 %v4394_v4, %v4393_v57 }
 0x6a4   : > { %9466 = vmatprep.mubr.msk.bf16.mxu1 %vm4416_vm2, %v4399_v44 }
 0x6a5   : > { %9467 = vmatmul.mubr.msk.bf16.gmra.mrb[60].mxu1 %vm4416_vm2, %v4400_v34 }
 0x768   : > { %v9464_v45 = vpop.f32.mrb[56].mxu1 }
 0x769   : > { %v4472_v39 = vadd.f32 %v9464_v45, %v8842_v19  ;;  %v4463_v13 = vpop.f32.mrb[57].mxu1 }
 0x76a   : > { %v4464_v35 = vadd.f32 %v8842_v19, %v4463_v13  ;;  %v9465_v48 = vpop.f32.mrb[58].mxu1 }
 0x76b   : > { %10723 = vtanh.f32 %v4472_v39  ;;  %v4475_v62 = vadd.f32 %v9465_v48, %v8842_v19  ;;  %v4466_v28 = vpop.f32.mrb[59].mxu1 }
 0x76c   : > { %10725 = vtanh.f32 %v4464_v35  ;;  %v4467_v14 = vadd.f32 %v8842_v19, %v4466_v28 }
 0x76d   : > { %10727 = vtanh.f32 %v4475_v62 }
 0x76e   : > { %10729 = vtanh.f32 %v4467_v14 }
 0x775   : > { %v10724_v38 = vpop.eup %10723 }
 0x776   : > { %v10726_v60 = vpop.eup %10725 }
 0x777   : > { %v10728_v43 = vpop.eup %10727 }
 0x778   : > { %v10730_v2 = vpop.eup %10729  ;;  %v4503_v0 = vpack.c.bf16 %v10728_v43, %v10724_v38  ;;  %v9468_v11 = vpop.f32.mrb[60].mxu1 }
 0x779   : > { %v4488_v5 = vadd.f32 %v9468_v11, %v8842_v19  ;;  %v4479_v40 = vpop.f32.mrb[61].mxu1  ;;  %v4502_v59 = vpack.c.bf16 %v10730_v2, %v10726_v60 }
 0x77a   : > { %v4480_v26 = vadd.f32 %v8842_v19, %v4479_v40  ;;  %v9469_v53 = vpop.f32.mrb[62].mxu1  ;;  %v10297_v40 = vld [vmem:[%s13236_s28 + $0x44] ss:$8 sps:$4 sm:$0xff]  }
 0x77b   : > { %10731 = vtanh.f32 %v4488_v5  ;;  %v4491_v6 = vadd.f32 %v9469_v53, %v8842_v19  ;;  %v4482_v7 = vpop.f32.mrb[63].mxu1  ;;  %9474 = vmatprep.mubr.msk.bf16.mxu1 %vm4311_vm1, %v4502_v59  ;;  %v10295_v59 = vld [vmem:[%s13236_s28 + $0x40] ss:$8 sps:$4 sm:$0xff]   ;;  %4862 = vmatprep.subr.bf16.mxu0 %v10297_v40  ;;  %v10298_v53 = vld [vmem:[%s13236_s28 + $0x50] ss:$8 sps:$4 sm:$0xff]  }
 0x77c   : > { %10733 = vtanh.f32 %v4480_v26  ;;  %v4483_v58 = vadd.f32 %v8842_v19, %v4482_v7  ;;  %9475 = vmatmul.mubr.msk.bf16.vlgmr.msra.gmra.mrb[64].mxu1 %vm4311_vm1, %v4503_v0  ;;  %4863 = vmatpush1.bf16.msra.mxu0 %v10295_v59  ;;  %v10300_v26 = vld [vmem:[%s13236_s28 + $0x54] ss:$8 sps:$4 sm:$0xff]   ;;  %v10301_v7 = vld [vmem:[%s13236_s28 + $0x60] ss:$8 sps:$4 sm:$0xff]  }
 0x77d   : > { %10735 = vtanh.f32 %v4491_v6  ;;  %9483 = vmatpush3.bf16.msra.mxu1 %v10279_v31  ;;  %v10303_v6 = vld [vmem:[%s13236_s28 + $0x64] ss:$8 sps:$4 sm:$0xff]   ;;  %4864 = vmatprep.subr.bf16.mxu0 %v10300_v26  ;;  %v10316_v26 = vld [vmem:[%s13238_s2 + $0x28] ss:$16 sps:$4 sm:$0xff]  }
 0x77e   : > { %10737 = vtanh.f32 %v4483_v58  ;;  %9484 = vmatprep.subr.bf16.mxu1 %v10280_v55  ;;  %v10306_v58 = vld [vmem:[%s13236_s28 + $0x74] ss:$8 sps:$4 sm:$0xff]  }
 0x77f   : > { %v10321_v31 = vld [vmem:[%s13238_s2 + $0x44] ss:$16 sps:$4 sm:$0xff]  }
 0x780   : > { %4865 = vmatpush1.bf16.msra.mxu0 %v10298_v53  ;;  %v10324_v53 = vld [vmem:[%s13238_s2 + $0x4c] ss:$16 sps:$4 sm:$0xff]  }
 0x781   : > { %9485 = vmatpush3.bf16.msra.mxu1 %v10280_v55  ;;  %4866 = vmatprep.subr.bf16.mxu0 %v10303_v6  ;;  %v10319_v55 = vld [vmem:[%s13238_s2 + $0x40] ss:$16 sps:$4 sm:$0xff]   ;;  %v10322_v6 = vld [vmem:[%s13238_s2 + $0x48] ss:$16 sps:$4 sm:$0xff]  }
 0x782   : > { %9486 = vmatprep.subr.bf16.mxu1 %v10281_v18 }
 0x784   : > { %4867 = vmatpush1.bf16.msra.mxu0 %v10301_v7  ;;  %v10330_v7 = vld [vmem:[%s13238_s2 + $0x6c] ss:$16 sps:$4 sm:$0xff]  }
 0x785   : > { %v10732_v32 = vpop.eup %10731  ;;  %9487 = vmatpush3.bf16.msra.mxu1 %v10281_v18  ;;  %4868 = vmatprep.subr.bf16.mxu0 %v10306_v58  ;;  %v10327_v18 = vld [vmem:[%s13238_s2 + $0x64] ss:$16 sps:$4 sm:$0xff]   ;;  %v10328_v58 = vld [vmem:[%s13238_s2 + $0x68] ss:$16 sps:$4 sm:$0xff]  }
 0x786   : > { %v10734_v10 = vpop.eup %10733  ;;  %9488 = vmatprep.subr.bf16.mxu1 %v10282_v52 }
 0x787   : > { %v10736_v8 = vpop.eup %10735 }
 0x788   : > { %v10738_v9 = vpop.eup %10737  ;;  %v4505_v50 = vpack.c.bf16 %v10736_v8, %v10732_v32  ;;  %v10304_v32 = vld [vmem:[%s13236_s28 + $0x70] ss:$8 sps:$4 sm:$0xff]   ;;  %v10309_v8 = vld [vmem:[%s13238_s2 + $0x4] ss:$16 sps:$4 sm:$0xff]  }
 0x789   : > { %v4504_v12 = vpack.c.bf16 %v10738_v9, %v10734_v10  ;;  %9489 = vmatpush3.bf16.msra.mxu1 %v10282_v52  ;;  %4869 = vmatpush1.bf16.msra.mxu0 %v10304_v32  ;;  %v10307_v10 = vld [vmem:[%s13238_s2] ss:$16 sps:$4 sm:$0xff]   ;;  %v10312_v9 = vld [vmem:[%s13238_s2 + $0xc] ss:$16 sps:$4 sm:$0xff]  }
 0x78a   : > { %5357 = vmatprep.subr.bf16.mxu1 %v10309_v8  ;;  %5430 = vmatprep.subr.bf16.mxu0 %v10312_v9  ;;  %v10325_v52 = vld [vmem:[%s13238_s2 + $0x60] ss:$16 sps:$4 sm:$0xff]  }
 0x78b   : > { %9478 = vmatprep.mubr.msk.bf16.mxu1 %vm4311_vm1, %v4504_v12  ;;  %v10313_v12 = vld [vmem:[%s13238_s2 + $0x20] ss:$16 sps:$4 sm:$0xff]  }
 0x78c   : > { %9479 = vmatmul.mubr.msk.bf16.gmra.mrb[68].mxu1 %vm4311_vm1, %v4505_v50  ;;  %v10315_v50 = vld [vmem:[%s13238_s2 + $0x24] ss:$16 sps:$4 sm:$0xff]  }
 0x84f   : > { %v9476_v41 = vpop.f32.mrb[64].mxu1 }
 0x850   : > { %v4584_v63 = vadd.f32 %v9476_v41, %v8848_v22  ;;  %v4575_v25 = vpop.f32.mrb[65].mxu1  ;;  %v10355_v41 = vld [vmem:[%s13238_s2 + $0x100] ss:$16 sps:$4 sm:$0xff]  }
 0x851   : > { %v4576_v49 = vadd.f32 %v8848_v22, %v4575_v25  ;;  %v9477_v29 = vpop.f32.mrb[66].mxu1  ;;  %v10361_v25 = vld [vmem:[%s13238_s2 + $0x120] ss:$16 sps:$4 sm:$0xff]  }
 0x852   : > { %10739 = vtanh.f32 %v4584_v63  ;;  %v4587_v61 = vadd.f32 %v9477_v29, %v8848_v22  ;;  %v4578_v57 = vpop.f32.mrb[67].mxu1  ;;  %v10363_v63 = vld [vmem:[%s13238_s2 + $0x124] ss:$16 sps:$4 sm:$0xff]   ;;  %v10367_v29 = vld [vmem:[%s13238_s2 + $0x140] ss:$16 sps:$4 sm:$0xff]  }
 0x853   : > { %10741 = vtanh.f32 %v4576_v49  ;;  %v4579_v4 = vadd.f32 %v8848_v22, %v4578_v57  ;;  %v10369_v49 = vld [vmem:[%s13238_s2 + $0x144] ss:$16 sps:$4 sm:$0xff]  }
 0x854   : > { %10743 = vtanh.f32 %v4587_v61  ;;  %v8855_v61 = vld [vmem:[%s13239_s15] ss:$0 sm:$0xff]  ;;  %s7815_s15 = ssub.s32 100, %s9200_s1 }
 0x855   : > { %10745 = vtanh.f32 %v4579_v4  ;;  %p7816_p4 = scmp.lt.s32.totalorder %s7815_s15, 64 }
 0x857   : > { %s13298_s15 = smov (!%p7816_p4, %s7815_s15), 64 }
 0x85c   : > { %v10740_v34 = vpop.eup %10739 }
 0x85d   : > { %v10742_v44 = vpop.eup %10741 }
 0x85e   : > { %v10744_v51 = vpop.eup %10743 }
 0x85f   : > { %v10746_v3 = vpop.eup %10745  ;;  %v4615_v19 = vpack.c.bf16 %v10744_v51, %v10740_v34  ;;  %v9480_v45 = vpop.f32.mrb[68].mxu1 }
 0x860   : > { %v4600_v39 = vadd.f32 %v9480_v45, %v8848_v22  ;;  %v4591_v13 = vpop.f32.mrb[69].mxu1  ;;  %v4614_v35 = vpack.c.bf16 %v10746_v3, %v10742_v44 }
 0x861   : > { %v4592_v48 = vadd.f32 %v8848_v22, %v4591_v13  ;;  %v9481_v62 = vpop.f32.mrb[70].mxu1 }
 0x862   : > { %10747 = vtanh.f32 %v4600_v39  ;;  %v4603_v28 = vadd.f32 %v9481_v62, %v8848_v22  ;;  %v4594_v14 = vpop.f32.mrb[71].mxu1  ;;  %9490 = vmatprep.mubr.msk.bf16.mxu1 %vm4198_vm0, %v4614_v35 }
 0x863   : > { %10749 = vtanh.f32 %v4592_v48  ;;  %v4595_v38 = vadd.f32 %v8848_v22, %v4594_v14  ;;  %9491 = vmatmul.mubr.msk.bf16.vlgmr.msra.gmra.mrb[72].mxu1 %vm4198_vm0, %v4615_v19  ;;  %v10357_v22 = vld [vmem:[%s13238_s2 + $0x104] ss:$16 sps:$4 sm:$0xff]   ;;  %v10310_v14 = vld [vmem:[%s13238_s2 + $0x8] ss:$16 sps:$4 sm:$0xff]  }
 0x864   : > { %10751 = vtanh.f32 %v4603_v28  ;;  %5358 = vmatpush1.bf16.msra.mxu1 %v10307_v10  ;;  %v10336_v10 = vld [vmem:[%s13238_s2 + $0x8c] ss:$16 sps:$4 sm:$0xff]  }
 0x865   : > { %10753 = vtanh.f32 %v4595_v38  ;;  %5359 = vmatprep.subr.bf16.mxu1 %v10315_v50 }
 0x868   : > { %5360 = vmatpush1.bf16.msra.mxu1 %v10313_v12 }
 0x869   : > { %5361 = vmatprep.subr.bf16.mxu1 %v10321_v31  ;;  %v10334_v31 = vld [vmem:[%s13238_s2 + $0x88] ss:$16 sps:$4 sm:$0xff]  }
 0x86c   : > { %v10748_v60 = vpop.eup %10747  ;;  %5362 = vmatpush1.bf16.msra.mxu1 %v10319_v55 }
 0x86d   : > { %v10750_v43 = vpop.eup %10749  ;;  %5363 = vmatprep.subr.bf16.mxu1 %v10327_v18  ;;  %v10342_v18 = vld [vmem:[%s13238_s2 + $0xac] ss:$16 sps:$4 sm:$0xff]  }
 0x86e   : > { %v10752_v2 = vpop.eup %10751 }
 0x86f   : > { %v10754_v0 = vpop.eup %10753  ;;  %v4617_v11 = vpack.c.bf16 %v10752_v2, %v10748_v60  ;;  %v10318_v2 = vld [vmem:[%s13238_s2 + $0x2c] ss:$16 sps:$4 sm:$0xff]  }
 0x870   : > { %v4616_v5 = vpack.c.bf16 %v10754_v0, %v10750_v43  ;;  %5364 = vmatpush1.bf16.msra.mxu1 %v10325_v52  ;;  %v10340_v52 = vld [vmem:[%s13238_s2 + $0xa8] ss:$16 sps:$4 sm:$0xff]  }
 0x871   : > { %5365 = vmatprep.subr.bf16.mxu1 %v10333_v36  ;;  %v10348_v36 = vld [vmem:[%s13238_s2 + $0xcc] ss:$16 sps:$4 sm:$0xff]  }
 0x872   : > { %9494 = vmatprep.mubr.msk.bf16.mxu1 %vm4198_vm0, %v4616_v5 }
 0x873   : > { %9495 = vmatmul.mubr.msk.bf16.gmra.mrb[76].mxu1 %vm4198_vm0, %v4617_v11 }
 0x874   : > { %5366 = vmatpush1.bf16.msra.mxu1 %v10331_v27  ;;  %v10346_v27 = vld [vmem:[%s13238_s2 + $0xc8] ss:$16 sps:$4 sm:$0xff]  }
 0x875   : > { %5367 = vmatprep.subr.bf16.mxu1 %v10339_v15  ;;  %v10354_v15 = vld [vmem:[%s13238_s2 + $0xec] ss:$16 sps:$4 sm:$0xff]  }
 0x878   : > { %5368 = vmatpush1.bf16.msra.mxu1 %v10337_v16  ;;  %v10352_v16 = vld [vmem:[%s13238_s2 + $0xe8] ss:$16 sps:$4 sm:$0xff]  }
 0x879   : > { %5369 = vmatprep.subr.bf16.mxu1 %v10345_v20  ;;  %v10358_v20 = vld [vmem:[%s13238_s2 + $0x108] ss:$16 sps:$4 sm:$0xff]  }
 0x87c   : > { %5370 = vmatpush1.bf16.msra.mxu1 %v10343_v54  ;;  %v10366_v54 = vld [vmem:[%s13238_s2 + $0x12c] ss:$16 sps:$4 sm:$0xff]  }
 0x87d   : > { %5371 = vmatprep.subr.bf16.mxu1 %v10351_v21  ;;  %v10364_v21 = vld [vmem:[%s13238_s2 + $0x128] ss:$16 sps:$4 sm:$0xff]  }
 0x880   : > { %5372 = vmatpush1.bf16.msra.mxu1 %v10349_v56  ;;  %v10372_v56 = vld [vmem:[%s13238_s2 + $0x14c] ss:$16 sps:$4 sm:$0xff]  }
 0x881   : > { %5373 = vmatprep.subr.bf16.mxu1 %v10357_v22  ;;  %v10370_v22 = vld [vmem:[%s13238_s2 + $0x148] ss:$16 sps:$4 sm:$0xff]  }
 0x884   : > { %5374 = vmatpush1.bf16.msra.mxu1 %v10355_v41  ;;  %v10375_v41 = vld [vmem:[%s13238_s2 + $0x164] ss:$16 sps:$4 sm:$0xff]  }
 0x885   : > { %5375 = vmatprep.subr.bf16.mxu1 %v10363_v63  ;;  %v10378_v63 = vld [vmem:[%s13238_s2 + $0x16c] ss:$16 sps:$4 sm:$0xff]  }
 0x888   : > { %5376 = vmatpush1.bf16.msra.mxu1 %v10361_v25  ;;  %v10373_v25 = vld [vmem:[%s13238_s2 + $0x160] ss:$16 sps:$4 sm:$0xff]  }
 0x889   : > { %5377 = vmatprep.subr.bf16.mxu1 %v10369_v49  ;;  %v10376_v49 = vld [vmem:[%s13238_s2 + $0x168] ss:$16 sps:$4 sm:$0xff]  }
 0x88c   : > { %5378 = vmatpush1.bf16.msra.mxu1 %v10367_v29  ;;  %v10381_v29 = vld [vmem:[%s13238_s2 + $0x184] ss:$16 sps:$4 sm:$0xff]  }
 0x88d   : > { %5379 = vmatprep.subr.bf16.mxu1 %v10375_v41  ;;  %v10414_v41 = vld [vmem:[%s13240_s16 + $0x44] ss:$28 sps:$4 sm:$0xff]  }
 0x890   : > { %5380 = vmatpush1.bf16.msra.mxu1 %v10373_v25 }
 0x891   : > { %5381 = vmatprep.subr.bf16.mxu1 %v10381_v29 }
 0x936   : > { %v9492_v57 = vpop.f32.mrb[72].mxu1 }
 0x937   : > { %v4712_v4 = vadd.f32 %v9492_v57, %v8855_v61  ;;  %v4703_v34 = vpop.f32.mrb[73].mxu1  ;;  %v10379_v57 = vld [vmem:[%s13238_s2 + $0x180] ss:$16 sps:$4 sm:$0xff]  }
 0x938   : > { %v4704_v44 = vadd.f32 %v8855_v61, %v4703_v34  ;;  %v9493_v51 = vpop.f32.mrb[74].mxu1  ;;  %5382 = vmatpush1.bf16.msra.mxu1 %v10379_v57  ;;  %v10387_v34 = vld [vmem:[%s13238_s2 + $0x1a4] ss:$16 sps:$4 sm:$0xff]   ;;  %v10412_v57 = vld [vmem:[%s13240_s16 + $0x40] ss:$28 sps:$4 sm:$0xff]  }
 0x939   : > { %10755 = vtanh.f32 %v4712_v4  ;;  %v4715_v3 = vadd.f32 %v9493_v51, %v8855_v61  ;;  %v4706_v19 = vpop.f32.mrb[75].mxu1  ;;  %v10382_v4 = vld [vmem:[%s13238_s2 + $0x188] ss:$16 sps:$4 sm:$0xff]   ;;  %v10385_v51 = vld [vmem:[%s13238_s2 + $0x1a0] ss:$16 sps:$4 sm:$0xff]   ;;  %5383 = vmatprep.subr.bf16.mxu1 %v10387_v34 }
 0x93a   : > { %10757 = vtanh.f32 %v4704_v44  ;;  %v4707_v45 = vadd.f32 %v8855_v61, %v4706_v19  ;;  %v10390_v44 = vld [vmem:[%s13238_s2 + $0x1ac] ss:$16 sps:$4 sm:$0xff]   ;;  %v10393_v19 = vld [vmem:[%s13238_s2 + $0x1c4] ss:$16 sps:$4 sm:$0xff]  }
 0x93b   : > { %10759 = vtanh.f32 %v4715_v3  ;;  %v10388_v3 = vld [vmem:[%s13238_s2 + $0x1a8] ss:$16 sps:$4 sm:$0xff]   ;;  %v10417_v34 = vld [vmem:[%s13240_s16 + $0x74] ss:$28 sps:$4 sm:$0xff]  }
 0x93c   : > { %10761 = vtanh.f32 %v4707_v45  ;;  %5384 = vmatpush1.bf16.msra.mxu1 %v10385_v51  ;;  %v10396_v45 = vld [vmem:[%s13238_s2 + $0x1cc] ss:$16 sps:$4 sm:$0xff]  }
 0x93d   : > { %5385 = vmatprep.subr.bf16.mxu1 %v10393_v19 }
 0x943   : > { %v10756_v39 = vpop.eup %10755 }
 0x944   : > { %v10758_v13 = vpop.eup %10757 }
 0x945   : > { %v10760_v35 = vpop.eup %10759 }
 0x946   : > { %v10762_v48 = vpop.eup %10761  ;;  %v9496_v62 = vpop.f32.mrb[76].mxu1  ;;  %v4743_v28 = vpack.c.bf16 %v10760_v35, %v10756_v39  ;;  %v10391_v39 = vld [vmem:[%s13238_s2 + $0x1c0] ss:$16 sps:$4 sm:$0xff]   ;;  %v10399_v35 = vld [vmem:[%s13238_s2 + $0x1e4] ss:$16 sps:$4 sm:$0xff]  }
 0x947   : > { %v4728_v38 = vadd.f32 %v9496_v62, %v8855_v61  ;;  %v4719_v60 = vpop.f32.mrb[77].mxu1  ;;  %v4742_v43 = vpack.c.bf16 %v10762_v48, %v10758_v13  ;;  %v10394_v13 = vld [vmem:[%s13238_s2 + $0x1c8] ss:$16 sps:$4 sm:$0xff]   ;;  %5386 = vmatpush1.bf16.msra.mxu1 %v10391_v39  ;;  %v10402_v48 = vld [vmem:[%s13238_s2 + $0x1ec] ss:$16 sps:$4 sm:$0xff]  }
 0x948   : > { %v4720_v0 = vadd.f32 %v8855_v61, %v4719_v60  ;;  %v9497_v11 = vpop.f32.mrb[78].mxu1  ;;  %v10397_v62 = vld [vmem:[%s13238_s2 + $0x1e0] ss:$16 sps:$4 sm:$0xff]   ;;  %5387 = vmatprep.subr.bf16.mxu1 %v10399_v35 }
 0x949   : > { %10763 = vtanh.f32 %v4728_v38  ;;  %v4731_v5 = vadd.f32 %v9497_v11, %v8855_v61  ;;  %v4722_v40 = vpop.f32.mrb[79].mxu1  ;;  %4887 = vmatmul.mubr.bf16.vlgmr.msra.gmra.mrb[48].mxu0 %v4742_v43  ;;  %v10408_v38 = vld [vmem:[%s13240_s16 + $0xc] ss:$28 sps:$4 sm:$0xff]   ;;  %v4762_v60 = vld [vmem:[%s13241_s18] sm:$0x3]  ;;  %s7818_s18 = scvt.s32.f32 %s13298_s15 }
 0x94a   : > { %10765 = vtanh.f32 %v4720_v0  ;;  %v4723_v59 = vadd.f32 %v8855_v61, %v4722_v40  ;;  %4896 = vmatprep.mubr.bf16.mxu0 %v10907_v30  ;;  %5431 = vmatpush1.bf16.msra.mxu0 %v10310_v14  ;;  %v10384_v61 = vld [vmem:[%s13238_s2 + $0x18c] ss:$16 sps:$4 sm:$0xff]   ;;  %v10405_v14 = vld [vmem:[%s13240_s16 + $0x4] ss:$28 sps:$4 sm:$0xff]   ;;  %v11937_v43 = vrot.slane %v4762_v60, %v11161_v1 }
 0x94b   : > { %10767 = vtanh.f32 %v4731_v5  ;;  %5432 = vmatprep.subr.bf16.mxu0 %v10318_v2  ;;  %5388 = vmatpush1.bf16.msra.mxu1 %v10397_v62  ;;  %v11940_v2 = vrot.slane %v4762_v60, %v11133_v47  ;;  %v10418_v62 = vld [vmem:[%s13240_s16 + $0x78] ss:$28 sps:$4 sm:$0xff]  }
 0x94c   : > { %10769 = vtanh.f32 %v4723_v59  ;;  %6996 = vmatprep.subr.bf16.mxu1 %v10405_v14  ;;  %v10426_v60 = vld [vmem:[%s13240_s16 + $0xb4] ss:$28 sps:$4 sm:$0xff]  }
 0x94e   : > { %5433 = vmatpush1.bf16.msra.mxu0 %v10316_v26 }
 0x94f   : > { %5434 = vmatprep.subr.bf16.mxu0 %v10324_v53 }
 0x951   : > { %4897 = vmatmul.mubr.bf16.gmra.mrb[52].mxu0 %v4743_v28  ;;  %v10400_v28 = vld [vmem:[%s13238_s2 + $0x1e8] ss:$16 sps:$4 sm:$0xff]  }
 0x952   : > { %4906 = vmatprep.mubr.bf16.mxu0 %v10907_v30  ;;  %5435 = vmatpush1.bf16.msra.mxu0 %v10322_v6 }
 0x953   : > { %v10764_v32 = vpop.eup %10763  ;;  %5436 = vmatprep.subr.bf16.mxu0 %v10330_v7 }
 0x954   : > { %v10766_v8 = vpop.eup %10765 }
 0x955   : > { %v10768_v9 = vpop.eup %10767 }
 0x956   : > { %v10770_v50 = vpop.eup %10769  ;;  %v4745_v12 = vpack.c.bf16 %v10768_v9, %v10764_v32  ;;  %5437 = vmatpush1.bf16.msra.mxu0 %v10328_v58 }
 0x957   : > { %v4744_v55 = vpack.c.bf16 %v10770_v50, %v10766_v8  ;;  %5438 = vmatprep.subr.bf16.mxu0 %v10336_v10 }
 0x959   : > { %4907 = vmatmul.mubr.bf16.gmra.mrb[56].mxu0 %v4744_v55 }
 0x95a   : > { %4916 = vmatprep.mubr.bf16.mxu0 %v10907_v30  ;;  %5439 = vmatpush1.bf16.msra.mxu0 %v10334_v31  ;;  %v10360_v30 = vld [vmem:[%s13238_s2 + $0x10c] ss:$16 sps:$4 sm:$0xff]  }
 0x95b   : > { %5440 = vmatprep.subr.bf16.mxu0 %v10342_v18 }
 0x95e   : > { %5441 = vmatpush1.bf16.msra.mxu0 %v10340_v52 }
 0x95f   : > { %5442 = vmatprep.subr.bf16.mxu0 %v10348_v36 }
 0x961   : > { %4917 = vmatmul.mubr.bf16.gmra.mrb[60].mxu0 %v4745_v12 }
 0x962   : > { %5443 = vmatpush1.bf16.msra.mxu0 %v10346_v27 }
 0x963   : > { %5444 = vmatprep.subr.bf16.mxu0 %v10354_v15 }
 0x966   : > { %5445 = vmatpush1.bf16.msra.mxu0 %v10352_v16 }
 0x967   : > { %5446 = vmatprep.subr.bf16.mxu0 %v10360_v30 }
 0x96a   : > { %5447 = vmatpush1.bf16.msra.mxu0 %v10358_v20  ;;  %v10403_v20 = vld [vmem:[%s13240_s16] ss:$28 sps:$4 sm:$0xff]  }
 0x96b   : > { %5448 = vmatprep.subr.bf16.mxu0 %v10366_v54  ;;  %v10406_v54 = vld [vmem:[%s13240_s16 + $0x8] ss:$28 sps:$4 sm:$0xff]  }
 0x96e   : > { %5449 = vmatpush1.bf16.msra.mxu0 %v10364_v21 }
 0x96f   : > { %5450 = vmatprep.subr.bf16.mxu0 %v10372_v56 }
 0x972   : > { %5451 = vmatpush1.bf16.msra.mxu0 %v10370_v22  ;;  %v10411_v22 = vld [vmem:[%s13240_s16 + $0x3c] ss:$28 sps:$4 sm:$0xff]  }
 0x973   : > { %5452 = vmatprep.subr.bf16.mxu0 %v10378_v63 }
 0x976   : > { %5453 = vmatpush1.bf16.msra.mxu0 %v10376_v49 }
 0x977   : > { %5454 = vmatprep.subr.bf16.mxu0 %v10384_v61  ;;  %v10409_v61 = vld [vmem:[%s13240_s16 + $0x38] ss:$28 sps:$4 sm:$0xff]  }
 0x97a   : > { %5455 = vmatpush1.bf16.msra.mxu0 %v10382_v4 }
 0x97b   : > { %5456 = vmatprep.subr.bf16.mxu0 %v10390_v44  ;;  %v10420_v44 = vld [vmem:[%s13240_s16 + $0x7c] ss:$28 sps:$4 sm:$0xff]  }
 0x97e   : > { %5457 = vmatpush1.bf16.msra.mxu0 %v10388_v3 }
 0x97f   : > { %5458 = vmatprep.subr.bf16.mxu0 %v10396_v45 }
 0x982   : > { %5459 = vmatpush1.bf16.msra.mxu0 %v10394_v13 }
 0x983   : > { %5460 = vmatprep.subr.bf16.mxu0 %v10402_v48  ;;  %v10415_v48 = vld [vmem:[%s13240_s16 + $0x70] ss:$28 sps:$4 sm:$0xff]  }
 0x986   : > { %5461 = vmatpush1.bf16.msra.mxu0 %v10400_v28 }
 0x987   : > { %7142 = vmatprep.subr.bf16.mxu0 %v10408_v38  ;;  %v10423_v38 = vld [vmem:[%s13240_s16 + $0xac] ss:$28 sps:$4 sm:$0xff]  }
 0xa1c   : > { %v4888_v0 = vpop.f32.mrb[48].mxu0 }
 0xa1d   : > { %v4889_v11 = vadd.f32 %v4888_v0, %v11937_v43  ;;  %v4890_v5 = vpop.f32.mrb[49].mxu0 }
 0xa1e   : > { %v4891_v40 = vadd.f32 %v4890_v5, %v11940_v2  ;;  %v4892_v59 = vpop.f32.mrb[50].mxu0 }
 0xa1f   : > { %10771 = vtanh.f32 %v4889_v11  ;;  %v4893_v26 = vadd.f32 %v4892_v59, %v11937_v43  ;;  %v4894_v53 = vpop.f32.mrb[51].mxu0  ;;  %v10421_v59 = vld [vmem:[%s13240_s16 + $0xa8] ss:$28 sps:$4 sm:$0xff]  }
 0xa20   : > { %10773 = vtanh.f32 %v4891_v40  ;;  %v4895_v6 = vadd.f32 %v4894_v53, %v11940_v2 }
 0xa21   : > { %10775 = vtanh.f32 %v4893_v26  ;;  %v10424_v26 = vld [vmem:[%s13240_s16 + $0xb0] ss:$28 sps:$4 sm:$0xff]  }
 0xa22   : > { %10777 = vtanh.f32 %v4895_v6  ;;  %v10432_v6 = vld [vmem:[%s13240_s16 + $0xec] ss:$28 sps:$4 sm:$0xff]  }
 0xa24   : > { %v4898_v7 = vpop.f32.mrb[52].mxu0 }
 0xa25   : > { %v4899_v58 = vadd.f32 %v4898_v7, %v11937_v43  ;;  %v4900_v32 = vpop.f32.mrb[53].mxu0 }
 0xa26   : > { %v4901_v10 = vadd.f32 %v4900_v32, %v11940_v2  ;;  %v4902_v8 = vpop.f32.mrb[54].mxu0 }
 0xa27   : > { %10779 = vtanh.f32 %v4899_v58  ;;  %v4903_v9 = vadd.f32 %v4902_v8, %v11937_v43  ;;  %v4904_v50 = vpop.f32.mrb[55].mxu0  ;;  %v10430_v8 = vld [vmem:[%s13240_s16 + $0xe8] ss:$28 sps:$4 sm:$0xff]  }
 0xa28   : > { %10781 = vtanh.f32 %v4901_v10  ;;  %v4905_v12 = vadd.f32 %v4904_v50, %v11940_v2  ;;  %v10427_v10 = vld [vmem:[%s13240_s16 + $0xe0] ss:$28 sps:$4 sm:$0xff]  }
 0xa29   : > { %v10772_v31 = vpop.eup %10771  ;;  %10783 = vtanh.f32 %v4903_v9  ;;  %v10435_v9 = vld [vmem:[%s13240_s16 + $0x11c] ss:$28 sps:$4 sm:$0xff]   ;;  %v10438_v50 = vld [vmem:[%s13240_s16 + $0x124] ss:$28 sps:$4 sm:$0xff]  }
 0xa2a   : > { %v10774_v55 = vpop.eup %10773  ;;  %10785 = vtanh.f32 %v4905_v12 }
 0xa2b   : > { %v10776_v18 = vpop.eup %10775 }
 0xa2c   : > { %v10778_v52 = vpop.eup %10777  ;;  %v4908_v36 = vpop.f32.mrb[56].mxu0  ;;  %v4943_v27 = vpack.c.bf16 %v10776_v18, %v10772_v31  ;;  %v10433_v31 = vld [vmem:[%s13240_s16 + $0x118] ss:$28 sps:$4 sm:$0xff]  }
 0xa2d   : > { %v4909_v15 = vadd.f32 %v4908_v36, %v11937_v43  ;;  %v4910_v16 = vpop.f32.mrb[57].mxu0  ;;  %v4944_v30 = vpack.c.bf16 %v10778_v52, %v10774_v55  ;;  %v10436_v55 = vld [vmem:[%s13240_s16 + $0x120] ss:$28 sps:$4 sm:$0xff]   ;;  %v10441_v52 = vld [vmem:[%s13240_s16 + $0x154] ss:$28 sps:$4 sm:$0xff]  }
 0xa2e   : > { %v4911_v21 = vadd.f32 %v4910_v16, %v11940_v2  ;;  %v4912_v56 = vpop.f32.mrb[58].mxu0  ;;  %v10444_v36 = vld [vmem:[%s13240_s16 + $0x15c] ss:$28 sps:$4 sm:$0xff]  }
 0xa2f   : > { %10787 = vtanh.f32 %v4909_v15  ;;  %v4913_v63 = vadd.f32 %v4912_v56, %v11937_v43  ;;  %v4914_v25 = vpop.f32.mrb[59].mxu0  ;;  %5389 = vmatprep.mubr.bf16.mxu1 %v4944_v30  ;;  %5462 = vmatprep.mubr.bf16.mxu0 %v4944_v30  ;;  %v10450_v56 = vld [vmem:[%s13240_s16 + $0x194] ss:$28 sps:$4 sm:$0xff]  }
 0xa30   : > { %10789 = vtanh.f32 %v4911_v21  ;;  %v4915_v49 = vadd.f32 %v4914_v25, %v11940_v2  ;;  %5390 = vmatmul.mubr.bf16.vlgmr.msra.gmra.mrb[80].mxu1 %v4943_v27  ;;  %5463 = vmatmul.mubr.bf16.vlgmr.msra.gmra.mrb[64].mxu0 %v4943_v27  ;;  %v10447_v21 = vld [vmem:[%s13240_s16 + $0x18c] ss:$28 sps:$4 sm:$0xff]  }
 0xa31   : > { %v10780_v29 = vpop.eup %10779  ;;  %10791 = vtanh.f32 %v4913_v63  ;;  %6997 = vmatpush1.bf16.msra.mxu1 %v10403_v20  ;;  %7143 = vmatpush1.bf16.msra.mxu0 %v10406_v54  ;;  %v10439_v20 = vld [vmem:[%s13240_s16 + $0x150] ss:$28 sps:$4 sm:$0xff]   ;;  %v10442_v54 = vld [vmem:[%s13240_s16 + $0x158] ss:$28 sps:$4 sm:$0xff]   ;;  %v10453_v63 = vld [vmem:[%s13240_s16 + $0x1c4] ss:$28 sps:$4 sm:$0xff]  }
 0xa32   : > { %v10782_v4 = vpop.eup %10781  ;;  %10793 = vtanh.f32 %v4915_v49  ;;  %6998 = vmatprep.subr.bf16.mxu1 %v10411_v22  ;;  %7144 = vmatprep.subr.bf16.mxu0 %v10414_v41  ;;  %v10445_v22 = vld [vmem:[%s13240_s16 + $0x188] ss:$28 sps:$4 sm:$0xff]   ;;  %v10448_v41 = vld [vmem:[%s13240_s16 + $0x190] ss:$28 sps:$4 sm:$0xff]   ;;  %v10451_v49 = vld [vmem:[%s13240_s16 + $0x1c0] ss:$28 sps:$4 sm:$0xff]  }
 0xa33   : > { %v10784_v51 = vpop.eup %10783  ;;  %v10456_v25 = vld [vmem:[%s13240_s16 + $0x1cc] ss:$28 sps:$4 sm:$0xff]  }
 0xa34   : > { %v10786_v3 = vpop.eup %10785  ;;  %v4918_v19 = vpop.f32.mrb[60].mxu0  ;;  %v4945_v45 = vpack.c.bf16 %v10784_v51, %v10780_v29  ;;  %v10454_v29 = vld [vmem:[%s13240_s16 + $0x1c8] ss:$28 sps:$4 sm:$0xff]   ;;  %v10468_v51 = vld [vmem:[%s13240_s16 + $0x23c] ss:$28 sps:$4 sm:$0xff]  }
 0xa35   : > { %v4919_v39 = vadd.f32 %v4918_v19, %v11937_v43  ;;  %v4920_v13 = vpop.f32.mrb[61].mxu0  ;;  %v4946_v35 = vpack.c.bf16 %v10786_v3, %v10782_v4  ;;  %6999 = vmatpush1.bf16.msra.mxu1 %v10409_v61  ;;  %7145 = vmatpush1.bf16.msra.mxu0 %v10412_v57  ;;  %v10459_v61 = vld [vmem:[%s13240_s16 + $0x1fc] ss:$28 sps:$4 sm:$0xff]   ;;  %v10462_v57 = vld [vmem:[%s13240_s16 + $0x204] ss:$28 sps:$4 sm:$0xff]  }
 0xa36   : > { %v4921_v28 = vadd.f32 %v4920_v13, %v11940_v2  ;;  %v4922_v14 = vpop.f32.mrb[62].mxu0  ;;  %7000 = vmatprep.subr.bf16.mxu1 %v10417_v34  ;;  %7146 = vmatprep.subr.bf16.mxu0 %v10420_v44  ;;  %v10457_v4 = vld [vmem:[%s13240_s16 + $0x1f8] ss:$28 sps:$4 sm:$0xff]   ;;  %v10460_v34 = vld [vmem:[%s13240_s16 + $0x200] ss:$28 sps:$4 sm:$0xff]  }
 0xa37   : > { %10795 = vtanh.f32 %v4919_v39  ;;  %v4923_v0 = vadd.f32 %v4922_v14, %v11937_v43  ;;  %v4924_v11 = vpop.f32.mrb[63].mxu0  ;;  %5399 = vmatprep.mubr.bf16.mxu1 %v4946_v35  ;;  %5472 = vmatprep.mubr.bf16.mxu0 %v4946_v35  ;;  %v10429_v43 = vld [vmem:[%s13240_s16 + $0xe4] ss:$28 sps:$4 sm:$0xff]   ;;  %v10465_v44 = vld [vmem:[%s13240_s16 + $0x234] ss:$28 sps:$4 sm:$0xff]  }
 0xa38   : > { %10797 = vtanh.f32 %v4921_v28  ;;  %v4925_v5 = vadd.f32 %v4924_v11, %v11940_v2  ;;  %5400 = vmatmul.mubr.bf16.gmra.mrb[84].mxu1 %v4945_v45  ;;  %5473 = vmatmul.mubr.bf16.gmra.mrb[68].mxu0 %v4945_v45  ;;  %v10463_v3 = vld [vmem:[%s13240_s16 + $0x230] ss:$28 sps:$4 sm:$0xff]   ;;  %v10466_v19 = vld [vmem:[%s13240_s16 + $0x238] ss:$28 sps:$4 sm:$0xff]   ;;  %v10469_v13 = vld [vmem:[%s13240_s16 + $0x268] ss:$28 sps:$4 sm:$0xff]  }
 0xa39   : > { %v10788_v40 = vpop.eup %10787  ;;  %10799 = vtanh.f32 %v4923_v0  ;;  %7001 = vmatpush1.bf16.msra.mxu1 %v10415_v48  ;;  %7147 = vmatpush1.bf16.msra.mxu0 %v10418_v62  ;;  %v10471_v45 = vld [vmem:[%s13240_s16 + $0x26c] ss:$28 sps:$4 sm:$0xff]   ;;  %v10474_v39 = vld [vmem:[%s13240_s16 + $0x274] ss:$28 sps:$4 sm:$0xff]   ;;  %v10477_v48 = vld [vmem:[%s13240_s16 + $0x2a4] ss:$28 sps:$4 sm:$0xff]  }
 0xa3a   : > { %v10790_v53 = vpop.eup %10789  ;;  %10801 = vtanh.f32 %v4925_v5  ;;  %7002 = vmatprep.subr.bf16.mxu1 %v10423_v38  ;;  %7148 = vmatprep.subr.bf16.mxu0 %v10426_v60  ;;  %v10472_v35 = vld [vmem:[%s13240_s16 + $0x270] ss:$28 sps:$4 sm:$0xff]   ;;  %v10475_v28 = vld [vmem:[%s13240_s16 + $0x2a0] ss:$28 sps:$4 sm:$0xff]   ;;  %v10478_v14 = vld [vmem:[%s13240_s16 + $0x2a8] ss:$28 sps:$4 sm:$0xff]  }
 0xa3b   : > { %v10792_v7 = vpop.eup %10791  ;;  %v10480_v62 = vld [vmem:[%s13240_s16 + $0x2ac] ss:$28 sps:$4 sm:$0xff]   ;;  %v10483_v38 = vld [vmem:[%s13240_s16 + $0x2dc] ss:$28 sps:$4 sm:$0xff]   ;;  %v10486_v60 = vld [vmem:[%s13240_s16 + $0x2e4] ss:$28 sps:$4 sm:$0xff]  }
 0xa3c   : > { %v10794_v2 = vpop.eup %10793  ;;  %v4947_v58 = vpack.c.bf16 %v10792_v7, %v10788_v40  ;;  %v10481_v0 = vld [vmem:[%s13240_s16 + $0x2d8] ss:$28 sps:$4 sm:$0xff]   ;;  %v10484_v11 = vld [vmem:[%s13240_s16 + $0x2e0] ss:$28 sps:$4 sm:$0xff]   ;;  %v10496_v7 = vld [vmem:[%s13240_s16 + $0x350] ss:$28 sps:$4 sm:$0xff]  }
 0xa3d   : > { %v4948_v32 = vpack.c.bf16 %v10794_v2, %v10790_v53  ;;  %7003 = vmatpush1.bf16.msra.mxu1 %v10421_v59  ;;  %7149 = vmatpush1.bf16.msra.mxu0 %v10424_v26  ;;  %v10489_v5 = vld [vmem:[%s13240_s16 + $0x314] ss:$28 sps:$4 sm:$0xff]   ;;  %v10492_v40 = vld [vmem:[%s13240_s16 + $0x31c] ss:$28 sps:$4 sm:$0xff]   ;;  %v10495_v53 = vld [vmem:[%s13240_s16 + $0x34c] ss:$28 sps:$4 sm:$0xff]  }
 0xa3e   : > { %7004 = vmatprep.subr.bf16.mxu1 %v10429_v43  ;;  %7150 = vmatprep.subr.bf16.mxu0 %v10432_v6  ;;  %v10487_v59 = vld [vmem:[%s13240_s16 + $0x310] ss:$28 sps:$4 sm:$0xff]   ;;  %v10490_v26 = vld [vmem:[%s13240_s16 + $0x318] ss:$28 sps:$4 sm:$0xff]   ;;  %v10493_v6 = vld [vmem:[%s13240_s16 + $0x348] ss:$28 sps:$4 sm:$0xff]  }
 0xa3f   : > { %5409 = vmatprep.mubr.bf16.mxu1 %v4948_v32  ;;  %5482 = vmatprep.mubr.bf16.mxu0 %v4948_v32  ;;  %v10498_v43 = vld [vmem:[%s13240_s16 + $0x354] ss:$28 sps:$4 sm:$0xff]   ;;  %v10501_v2 = vld [vmem:[%s13240_s16 + $0x384] ss:$28 sps:$4 sm:$0xff]  }
 0xa40   : > { %5410 = vmatmul.mubr.bf16.gmra.mrb[88].mxu1 %v4947_v58  ;;  %5483 = vmatmul.mubr.bf16.gmra.mrb[72].mxu0 %v4947_v58  ;;  %v10504_v58 = vld [vmem:[%s13240_s16 + $0x38c] ss:$28 sps:$4 sm:$0xff]   ;;  %v5015_v32 = vld [vmem:[%s13242_s23] sm:$0xf]  ;;  %s12453_s23 = scalar_lea.vmem %s11053_s30, %s9770_s11  ;;  %s9771_s11 = smul.u32 7, %s13300_s10 }
 0xa41   : > { %v10796_v12 = vpop.eup %10795  ;;  %7005 = vmatpush1.bf16.msra.mxu1 %v10427_v10  ;;  %7151 = vmatpush1.bf16.msra.mxu0 %v10430_v8  ;;  %v12024_v10 = vrot.slane %v5015_v32, %v11161_v1  ;;  %v12027_v8 = vrot.slane %v5015_v32, %v11231_v23 }
 0xa42   : > { %v10798_v18 = vpop.eup %10797  ;;  %7006 = vmatprep.subr.bf16.mxu1 %v10435_v9  ;;  %7152 = vmatprep.subr.bf16.mxu0 %v10438_v50  ;;  %v12030_v9 = vrot.slane %v5015_v32, %v11133_v47  ;;  %v12033_v50 = vrot.slane %v5015_v32, %v11234_v24  ;;  %s931_s15 = scalar_lea.vmem %s11063_s4, %s9771_s11 }
 0xa43   : > { %v10800_v27 = vpop.eup %10799 }
 0xa44   : > { %v10802_v15 = vpop.eup %10801  ;;  %v4949_v16 = vpack.c.bf16 %v10800_v27, %v10796_v12 }
 0xa45   : > { %v4950_v30 = vpack.c.bf16 %v10802_v15, %v10798_v18  ;;  %7007 = vmatpush1.bf16.msra.mxu1 %v10433_v31  ;;  %7153 = vmatpush1.bf16.msra.mxu0 %v10436_v55 }
 0xa46   : > { %7008 = vmatprep.subr.bf16.mxu1 %v10441_v52  ;;  %7154 = vmatprep.subr.bf16.mxu0 %v10444_v36 }
 0xa47   : > { %5419 = vmatprep.mubr.bf16.mxu1 %v4950_v30  ;;  %5492 = vmatprep.mubr.bf16.mxu0 %v4950_v30 }
 0xa48   : > { %5420 = vmatmul.mubr.bf16.gmra.mrb[92].mxu1 %v4949_v16  ;;  %5493 = vmatmul.mubr.bf16.gmra.mrb[76].mxu0 %v4949_v16 }
 0xa49   : > { %7009 = vmatpush1.bf16.msra.mxu1 %v10439_v20  ;;  %7155 = vmatpush1.bf16.msra.mxu0 %v10442_v54 }
 0xa4a   : > { %7010 = vmatprep.subr.bf16.mxu1 %v10447_v21  ;;  %7156 = vmatprep.subr.bf16.mxu0 %v10450_v56 }
 0xa4d   : > { %7011 = vmatpush1.bf16.msra.mxu1 %v10445_v22  ;;  %7157 = vmatpush1.bf16.msra.mxu0 %v10448_v41 }
 0xa4e   : > { %7012 = vmatprep.subr.bf16.mxu1 %v10453_v63  ;;  %7158 = vmatprep.subr.bf16.mxu0 %v10456_v25 }
 0xa51   : > { %7013 = vmatpush1.bf16.msra.mxu1 %v10451_v49  ;;  %7159 = vmatpush1.bf16.msra.mxu0 %v10454_v29 }
 0xa52   : > { %7014 = vmatprep.subr.bf16.mxu1 %v10459_v61  ;;  %7160 = vmatprep.subr.bf16.mxu0 %v10462_v57 }
 0xa55   : > { %7015 = vmatpush1.bf16.msra.mxu1 %v10457_v4  ;;  %7161 = vmatpush1.bf16.msra.mxu0 %v10460_v34 }
 0xa56   : > { %7016 = vmatprep.subr.bf16.mxu1 %v10465_v44  ;;  %7162 = vmatprep.subr.bf16.mxu0 %v10468_v51 }
 0xa59   : > { %7017 = vmatpush1.bf16.msra.mxu1 %v10463_v3  ;;  %7163 = vmatpush1.bf16.msra.mxu0 %v10466_v19 }
 0xa5a   : > { %7018 = vmatprep.subr.bf16.mxu1 %v10471_v45  ;;  %7164 = vmatprep.subr.bf16.mxu0 %v10474_v39 }
 0xa5d   : > { %7019 = vmatpush1.bf16.msra.mxu1 %v10469_v13  ;;  %7165 = vmatpush1.bf16.msra.mxu0 %v10472_v35 }
 0xa5e   : > { %7020 = vmatprep.subr.bf16.mxu1 %v10477_v48  ;;  %7166 = vmatprep.subr.bf16.mxu0 %v10480_v62 }
 0xa61   : > { %7021 = vmatpush1.bf16.msra.mxu1 %v10475_v28  ;;  %7167 = vmatpush1.bf16.msra.mxu0 %v10478_v14 }
 0xa62   : > { %7022 = vmatprep.subr.bf16.mxu1 %v10483_v38  ;;  %7168 = vmatprep.subr.bf16.mxu0 %v10486_v60 }
 0xa65   : > { %7023 = vmatpush1.bf16.msra.mxu1 %v10481_v0  ;;  %7169 = vmatpush1.bf16.msra.mxu0 %v10484_v11 }
 0xa66   : > { %7024 = vmatprep.subr.bf16.mxu1 %v10489_v5  ;;  %7170 = vmatprep.subr.bf16.mxu0 %v10492_v40 }
 0xa69   : > { %7025 = vmatpush1.bf16.msra.mxu1 %v10487_v59  ;;  %7171 = vmatpush1.bf16.msra.mxu0 %v10490_v26 }
 0xa6a   : > { %7026 = vmatprep.subr.bf16.mxu1 %v10495_v53  ;;  %7172 = vmatprep.subr.bf16.mxu0 %v10498_v43 }
 0xa6d   : > { %7027 = vmatpush1.bf16.msra.mxu1 %v10493_v6  ;;  %7173 = vmatpush1.bf16.msra.mxu0 %v10496_v7 }
 0xa6e   : > { %7069 = vmatprep.subr.bf16.mxu1 %v10501_v2  ;;  %7215 = vmatprep.subr.bf16.mxu0 %v10504_v58 }
 0xb03   : > { %v5391_v12 = vpop.f32.mrb[80].mxu1  ;;  %v5464_v31 = vpop.f32.mrb[64].mxu0 }
 0xb04   : > { %v5392_v55 = vadd.f32 %v5391_v12, %v12024_v10  ;;  %v5465_v18 = vadd.f32 %v5464_v31, %v12027_v8  ;;  %v5393_v52 = vpop.f32.mrb[81].mxu1  ;;  %v5466_v36 = vpop.f32.mrb[65].mxu0 }
 0xb05   : > { %v5394_v27 = vadd.f32 %v5393_v52, %v12030_v9  ;;  %v5467_v15 = vadd.f32 %v5466_v36, %v12033_v50  ;;  %v5395_v16 = vpop.f32.mrb[82].mxu1  ;;  %v5468_v30 = vpop.f32.mrb[66].mxu0 }
 0xb06   : > { %10803 = vtanh.f32 %v5392_v55  ;;  %v5396_v20 = vadd.f32 %v5395_v16, %v12024_v10  ;;  %v5397_v54 = vpop.f32.mrb[83].mxu1  ;;  %v5470_v21 = vpop.f32.mrb[67].mxu0  ;;  %v5469_v56 = vadd.f32 %v5468_v30, %v12027_v8 }
 0xb07   : > { %10805 = vtanh.f32 %v5465_v18  ;;  %v5398_v22 = vadd.f32 %v5397_v54, %v12030_v9  ;;  %v5471_v41 = vadd.f32 %v5470_v21, %v12033_v50  ;;  %v10510_v54 = vld [vmem:[%s13240_s16 + $0x3c4] ss:$28 sps:$4 sm:$0xff]  }
 0xb08   : > { %10807 = vtanh.f32 %v5394_v27  ;;  %v10499_v27 = vld [vmem:[%s13240_s16 + $0x380] ss:$28 sps:$4 sm:$0xff]  }
 0xb09   : > { %10809 = vtanh.f32 %v5467_v15  ;;  %v10502_v15 = vld [vmem:[%s13240_s16 + $0x388] ss:$28 sps:$4 sm:$0xff]  }
 0xb0a   : > { %10811 = vtanh.f32 %v5396_v20  ;;  %v10507_v20 = vld [vmem:[%s13240_s16 + $0x3bc] ss:$28 sps:$4 sm:$0xff]  }
 0xb0b   : > { %10813 = vtanh.f32 %v5469_v56  ;;  %v5401_v63 = vpop.f32.mrb[84].mxu1  ;;  %v5474_v25 = vpop.f32.mrb[68].mxu0 }
 0xb0c   : > { %10815 = vtanh.f32 %v5398_v22  ;;  %v5402_v49 = vadd.f32 %v5401_v63, %v12024_v10  ;;  %v5475_v29 = vadd.f32 %v5474_v25, %v12027_v8  ;;  %v5403_v61 = vpop.f32.mrb[85].mxu1  ;;  %v5476_v57 = vpop.f32.mrb[69].mxu0  ;;  %v10505_v25 = vld [vmem:[%s13240_s16 + $0x3b8] ss:$28 sps:$4 sm:$0xff]  }
 0xb0d   : > { %10817 = vtanh.f32 %v5471_v41  ;;  %v5404_v4 = vadd.f32 %v5403_v61, %v12030_v9  ;;  %v5477_v34 = vadd.f32 %v5476_v57, %v12033_v50  ;;  %v5405_v44 = vpop.f32.mrb[86].mxu1  ;;  %v5478_v51 = vpop.f32.mrb[70].mxu0 }
 0xb0e   : > { %10819 = vtanh.f32 %v5402_v49  ;;  %v5406_v3 = vadd.f32 %v5405_v44, %v12024_v10  ;;  %v5407_v19 = vpop.f32.mrb[87].mxu1  ;;  %v5480_v45 = vpop.f32.mrb[71].mxu0  ;;  %v5479_v39 = vadd.f32 %v5478_v51, %v12027_v8  ;;  %v10508_v49 = vld [vmem:[%s13240_s16 + $0x3c0] ss:$28 sps:$4 sm:$0xff]  }
 0xb0f   : > { %10821 = vtanh.f32 %v5475_v29  ;;  %v5408_v35 = vadd.f32 %v5407_v19, %v12030_v9  ;;  %v5481_v62 = vadd.f32 %v5480_v45, %v12033_v50  ;;  %v10516_v19 = vld [vmem:[%s13240_s16 + $0x3fc] ss:$28 sps:$4 sm:$0xff]  }
 0xb10   : > { %v10804_v13 = vpop.eup %10803  ;;  %10823 = vtanh.f32 %v5404_v4 }
 0xb11   : > { %v10806_v48 = vpop.eup %10805  ;;  %10825 = vtanh.f32 %v5477_v34 }
 0xb12   : > { %v10808_v28 = vpop.eup %10807  ;;  %10827 = vtanh.f32 %v5406_v3  ;;  %v10513_v3 = vld [vmem:[%s13240_s16 + $0x3f4] ss:$28 sps:$4 sm:$0xff]  }
 0xb13   : > { %v10810_v14 = vpop.eup %10809  ;;  %10829 = vtanh.f32 %v5479_v39  ;;  %v5411_v38 = vpop.f32.mrb[88].mxu1 }
 0xb14   : > { %v5484_v60 = vpop.f32.mrb[72].mxu0  ;;  %v10812_v0 = vpop.eup %10811  ;;  %10831 = vtanh.f32 %v5408_v35  ;;  %v5412_v11 = vadd.f32 %v5411_v38, %v12024_v10 }
 0xb15   : > { %v5485_v5 = vadd.f32 %v5484_v60, %v12027_v8  ;;  %v5413_v40 = vpop.f32.mrb[89].mxu1  ;;  %v5486_v59 = vpop.f32.mrb[73].mxu0  ;;  %10833 = vtanh.f32 %v5481_v62  ;;  %v12055_v2 = vpack.c.bf16 %v10812_v0, %v10804_v13 }
 0xb16   : > { %v10814_v26 = vpop.eup %10813  ;;  %v5414_v53 = vadd.f32 %v5413_v40, %v12030_v9  ;;  %v5487_v43 = vadd.f32 %v5486_v59, %v12033_v50  ;;  %v5415_v6 = vpop.f32.mrb[90].mxu1  ;;  %10835 = vtanh.f32 %v5412_v11  ;;  %v10511_v59 = vld [vmem:[%s13240_s16 + $0x3f0] ss:$28 sps:$4 sm:$0xff]  }
 0xb17   : > { %v5488_v7 = vpop.f32.mrb[74].mxu0  ;;  %v10816_v58 = vpop.eup %10815  ;;  %v5416_v32 = vadd.f32 %v5415_v6, %v12024_v10  ;;  %v12058_v55 = vpack.c.bf16 %v10814_v26, %v10806_v48  ;;  %10837 = vtanh.f32 %v5485_v5  ;;  %v10514_v26 = vld [vmem:[%s13240_s16 + $0x3f8] ss:$28 sps:$4 sm:$0xff]  }
 0xb18   : > { %v5417_v12 = vpop.f32.mrb[91].mxu1  ;;  %v5490_v31 = vpop.f32.mrb[75].mxu0  ;;  %v5489_v52 = vadd.f32 %v5488_v7, %v12027_v8  ;;  %v12061_v36 = vpack.c.bf16 %v10816_v58, %v10808_v28  ;;  %10839 = vtanh.f32 %v5414_v53  ;;  %v10522_v6 = vld [vmem:[%s13240_s16 + $0x434] ss:$28 sps:$4 sm:$0xff]  }
 0xb19   : > { %v10818_v18 = vpop.eup %10817  ;;  %v5418_v30 = vadd.f32 %v5417_v12, %v12030_v9  ;;  %10841 = vtanh.f32 %v5487_v43  ;;  %v5491_v22 = vadd.f32 %v5490_v31, %v12033_v50  ;;  %v10519_v43 = vld [vmem:[%s13240_s16 + $0x42c] ss:$28 sps:$4 sm:$0xff]  }
 0xb1a   : > { %v10820_v16 = vpop.eup %10819  ;;  %v12068_v21 = vpack.c.bf16 %v10818_v18, %v10810_v14  ;;  %7028 = vmatprep.mubr.bf16.mxu1 %v12061_v36  ;;  %7174 = vmatprep.mubr.bf16.mxu0 %v12061_v36  ;;  %10843 = vtanh.f32 %v5416_v32  ;;  %v10517_v12 = vld [vmem:[%s13240_s16 + $0x428] ss:$28 sps:$4 sm:$0xff]   ;;  %v10520_v31 = vld [vmem:[%s13240_s16 + $0x430] ss:$28 sps:$4 sm:$0xff]  }
 0xb1b   : > { %v10822_v56 = vpop.eup %10821  ;;  %7029 = vmatmul.mubr.bf16.vlgmr.msra.gmra.mrb[96].mxu1 %v12055_v2  ;;  %7175 = vmatmul.mubr.bf16.vlgmr.msra.gmra.mrb[80].mxu0 %v12055_v2  ;;  %10845 = vtanh.f32 %v5489_v52  ;;  %v5421_v29 = vpop.f32.mrb[92].mxu1  ;;  %v10525_v18 = vld [vmem:[%s13240_s16 + $0x464] ss:$28 sps:$4 sm:$0xff]   ;;  %v10528_v52 = vld [vmem:[%s13240_s16 + $0x46c] ss:$28 sps:$4 sm:$0xff]  }
 0xb1c   : > { %v10824_v41 = vpop.eup %10823  ;;  %7070 = vmatpush1.bf16.msra.mxu1 %v10499_v27  ;;  %7216 = vmatpush1.bf16.msra.mxu0 %v10502_v15  ;;  %v5494_v61 = vpop.f32.mrb[76].mxu0  ;;  %10847 = vtanh.f32 %v5418_v30  ;;  %v5422_v4 = vadd.f32 %v5421_v29, %v12024_v10 }
 0xb1d   : > { %v10826_v63 = vpop.eup %10825  ;;  %7071 = vmatprep.subr.bf16.mxu1 %v10507_v20  ;;  %7217 = vmatprep.subr.bf16.mxu0 %v10510_v54  ;;  %v5495_v34 = vadd.f32 %v5494_v61, %v12027_v8  ;;  %v5423_v44 = vpop.f32.mrb[93].mxu1  ;;  %10849 = vtanh.f32 %v5491_v22  ;;  %v10526_v22 = vld [vmem:[%s13240_s16 + $0x468] ss:$28 sps:$4 sm:$0xff]  }
 0xb1e   : > { %v10828_v57 = vpop.eup %10827  ;;  %v5496_v51 = vpop.f32.mrb[77].mxu0  ;;  %v5424_v39 = vadd.f32 %v5423_v44, %v12030_v9  ;;  %10851 = vtanh.f32 %v5422_v4  ;;  %v10529_v4 = vld [vmem:[%s13240_s16 + $0x498] ss:$28 sps:$4 sm:$0xff]  }
 0xb1f   : > { %v10830_v45 = vpop.eup %10829  ;;  %v5497_v13 = vadd.f32 %v5496_v51, %v12033_v50  ;;  %v5425_v35 = vpop.f32.mrb[94].mxu1  ;;  %v12083_v62 = vpack.c.bf16 %v10828_v57, %v10820_v16  ;;  %10853 = vtanh.f32 %v5495_v34  ;;  %v10532_v34 = vld [vmem:[%s13240_s16 + $0x4a0] ss:$28 sps:$4 sm:$0xff]   ;;  %v10537_v51 = vld [vmem:[%s13240_s16 + $0x4d4] ss:$28 sps:$4 sm:$0xff]  }
 0xb20   : > { %v5498_v48 = vpop.f32.mrb[78].mxu0  ;;  %v10832_v28 = vpop.eup %10831  ;;  %v5426_v14 = vadd.f32 %v5425_v35, %v12024_v10  ;;  %v12086_v0 = vpack.c.bf16 %v10830_v45, %v10822_v56  ;;  %7072 = vmatpush1.bf16.msra.mxu1 %v10505_v25  ;;  %7218 = vmatpush1.bf16.msra.mxu0 %v10508_v49  ;;  %10855 = vtanh.f32 %v5424_v39  ;;  %v10523_v56 = vld [vmem:[%s13240_s16 + $0x460] ss:$28 sps:$4 sm:$0xff]  }
 0xb21   : > { %v5427_v38 = vpop.f32.mrb[95].mxu1  ;;  %v5500_v60 = vpop.f32.mrb[79].mxu0  ;;  %v5499_v5 = vadd.f32 %v5498_v48, %v12027_v8  ;;  %v12089_v40 = vpack.c.bf16 %v10832_v28, %v10824_v41  ;;  %7073 = vmatprep.subr.bf16.mxu1 %v10513_v3  ;;  %7219 = vmatprep.subr.bf16.mxu0 %v10516_v19  ;;  %10857 = vtanh.f32 %v5497_v13  ;;  %v10534_v25 = vld [vmem:[%s13240_s16 + $0x4a4] ss:$28 sps:$4 sm:$0xff]   ;;  %v10540_v3 = vld [vmem:[%s13240_s16 + $0x4dc] ss:$28 sps:$4 sm:$0xff]  }
 0xb22   : > { %v10834_v11 = vpop.eup %10833  ;;  %v5428_v10 = vadd.f32 %v5427_v38, %v12030_v9  ;;  %v5501_v8 = vadd.f32 %v5500_v60, %v12033_v50  ;;  %10859 = vtanh.f32 %v5426_v14  ;;  %v10535_v28 = vld [vmem:[%s13240_s16 + $0x4d0] ss:$28 sps:$4 sm:$0xff]   ;;  %v10538_v14 = vld [vmem:[%s13240_s16 + $0x4d8] ss:$28 sps:$4 sm:$0xff]  }
 0xb23   : > { %v10836_v53 = vpop.eup %10835  ;;  %v12096_v7 = vpack.c.bf16 %v10834_v11, %v10826_v63  ;;  %7038 = vmatprep.mubr.bf16.mxu1 %v12089_v40  ;;  %7184 = vmatprep.mubr.bf16.mxu0 %v12089_v40  ;;  %10861 = vtanh.f32 %v5499_v5  ;;  %v10531_v63 = vld [vmem:[%s13240_s16 + $0x49c] ss:$28 sps:$4 sm:$0xff]   ;;  %v10543_v60 = vld [vmem:[%s13240_s16 + $0x50c] ss:$28 sps:$4 sm:$0xff]   ;;  %v10546_v11 = vld [vmem:[%s13240_s16 + $0x514] ss:$28 sps:$4 sm:$0xff]  }
 0xb24   : > { %v10838_v58 = vpop.eup %10837  ;;  %7039 = vmatmul.mubr.bf16.gmra.mrb[100].mxu1 %v12083_v62  ;;  %7185 = vmatmul.mubr.bf16.gmra.mrb[84].mxu0 %v12083_v62  ;;  %10863 = vtanh.f32 %v5428_v10  ;;  %v10541_v5 = vld [vmem:[%s13240_s16 + $0x508] ss:$28 sps:$4 sm:$0xff]   ;;  %v10547_v10 = vld [vmem:[%s13240_s16 + $0x540] ss:$28 sps:$4 sm:$0xff]  }
 0xb25   : > { %v10840_v32 = vpop.eup %10839  ;;  %7074 = vmatpush1.bf16.msra.mxu1 %v10511_v59  ;;  %7220 = vmatpush1.bf16.msra.mxu0 %v10514_v26  ;;  %10865 = vtanh.f32 %v5501_v8  ;;  %v10544_v59 = vld [vmem:[%s13240_s16 + $0x510] ss:$28 sps:$4 sm:$0xff]   ;;  %v10549_v26 = vld [vmem:[%s13240_s16 + $0x544] ss:$28 sps:$4 sm:$0xff]   ;;  %v10553_v8 = vld [vmem:[%s13240_s16 + $0x578] ss:$28 sps:$4 sm:$0xff]  }
 0xb26   : > { %v10842_v9 = vpop.eup %10841  ;;  %7075 = vmatprep.subr.bf16.mxu1 %v10519_v43  ;;  %7221 = vmatprep.subr.bf16.mxu0 %v10522_v6  ;;  %v10550_v43 = vld [vmem:[%s13240_s16 + $0x548] ss:$28 sps:$4 sm:$0xff]   ;;  %v10555_v6 = vld [vmem:[%s13240_s16 + $0x57c] ss:$28 sps:$4 sm:$0xff]  }
 0xb27   : > { %v10844_v50 = vpop.eup %10843 }
 0xb28   : > { %v10846_v27 = vpop.eup %10845  ;;  %v12107_v15 = vpack.c.bf16 %v10844_v50, %v10836_v53  ;;  %v10552_v53 = vld [vmem:[%s13240_s16 + $0x54c] ss:$28 sps:$4 sm:$0xff]   ;;  %v10562_v50 = vld [vmem:[%s13240_s16 + $0x5b8] ss:$28 sps:$4 sm:$0xff]  }
 0xb29   : > { %v10848_v16 = vpop.eup %10847  ;;  %v12109_v30 = vpack.c.bf16 %v10846_v27, %v10838_v58  ;;  %7076 = vmatpush1.bf16.msra.mxu1 %v10517_v12  ;;  %7222 = vmatpush1.bf16.msra.mxu0 %v10520_v31  ;;  %v10558_v58 = vld [vmem:[%s13240_s16 + $0x584] ss:$28 sps:$4 sm:$0xff]   ;;  %v10564_v12 = vld [vmem:[%s13240_s16 + $0x5bc] ss:$28 sps:$4 sm:$0xff]   ;;  %v10559_v31 = vld [vmem:[%s13240_s16 + $0x5b0] ss:$28 sps:$4 sm:$0xff]  }
 0xb2a   : > { %v10850_v20 = vpop.eup %10849  ;;  %v12111_v54 = vpack.c.bf16 %v10848_v16, %v10840_v32  ;;  %7077 = vmatprep.subr.bf16.mxu1 %v10525_v18  ;;  %7223 = vmatprep.subr.bf16.mxu0 %v10528_v52  ;;  %v10556_v32 = vld [vmem:[%s13240_s16 + $0x580] ss:$28 sps:$4 sm:$0xff]   ;;  %v10567_v18 = vld [vmem:[%s13240_s16 + $0x5ec] ss:$28 sps:$4 sm:$0xff]   ;;  %v10570_v52 = vld [vmem:[%s13240_s16 + $0x5f4] ss:$28 sps:$4 sm:$0xff]  }
 0xb2b   : > { %v10852_v41 = vpop.eup %10851  ;;  %v12117_v49 = vpack.c.bf16 %v10850_v20, %v10842_v9  ;;  %v10561_v9 = vld [vmem:[%s13240_s16 + $0x5b4] ss:$28 sps:$4 sm:$0xff]   ;;  %v10565_v27 = vld [vmem:[%s13240_s16 + $0x5e8] ss:$28 sps:$4 sm:$0xff]  }
 0xb2c   : > { %v10854_v29 = vpop.eup %10853  ;;  %7048 = vmatprep.mubr.bf16.mxu1 %v12111_v54  ;;  %7194 = vmatprep.mubr.bf16.mxu0 %v12111_v54  ;;  %v10568_v16 = vld [vmem:[%s13240_s16 + $0x5f0] ss:$28 sps:$4 sm:$0xff]   ;;  %v10573_v20 = vld [vmem:[%s13240_s16 + $0x624] ss:$28 sps:$4 sm:$0xff]  }
 0xb2d   : > { %v10856_v61 = vpop.eup %10855  ;;  %7049 = vmatmul.mubr.bf16.gmra.mrb[104].mxu1 %v12107_v15  ;;  %7195 = vmatmul.mubr.bf16.gmra.mrb[88].mxu0 %v12107_v15 }
 0xb2e   : > { %v10858_v57 = vpop.eup %10857  ;;  %7078 = vmatpush1.bf16.msra.mxu1 %v10523_v56  ;;  %7224 = vmatpush1.bf16.msra.mxu0 %v10526_v22  ;;  %v10576_v56 = vld [vmem:[%s13240_s16 + $0x62c] ss:$28 sps:$4 sm:$0xff]   ;;  %v10571_v22 = vld [vmem:[%s13240_s16 + $0x620] ss:$28 sps:$4 sm:$0xff]  }
 0xb2f   : > { %v10860_v44 = vpop.eup %10859  ;;  %7079 = vmatprep.subr.bf16.mxu1 %v10531_v63  ;;  %7225 = vmatprep.subr.bf16.mxu0 %v10534_v25  ;;  %v10579_v63 = vld [vmem:[%s13240_s16 + $0x65c] ss:$28 sps:$4 sm:$0xff]   ;;  %v10582_v25 = vld [vmem:[%s13240_s16 + $0x664] ss:$28 sps:$4 sm:$0xff]  }
 0xb30   : > { %v10862_v19 = vpop.eup %10861  ;;  %v12127_v45 = vpack.c.bf16 %v10860_v44, %v10852_v41  ;;  %v10574_v41 = vld [vmem:[%s13240_s16 + $0x628] ss:$28 sps:$4 sm:$0xff]   ;;  %v10586_v44 = vld [vmem:[%s13240_s16 + $0x698] ss:$28 sps:$4 sm:$0xff]  }
 0xb31   : > { %v10864_v39 = vpop.eup %10863  ;;  %v12129_v13 = vpack.c.bf16 %v10862_v19, %v10854_v29  ;;  %v10577_v29 = vld [vmem:[%s13240_s16 + $0x658] ss:$28 sps:$4 sm:$0xff]   ;;  %v10589_v19 = vld [vmem:[%s13240_s16 + $0x6c8] ss:$28 sps:$4 sm:$0xff]  }
 0xb32   : > { %v10866_v35 = vpop.eup %10865  ;;  %7080 = vmatpush1.bf16.msra.mxu1 %v10529_v4  ;;  %7226 = vmatpush1.bf16.msra.mxu0 %v10532_v34  ;;  %v12131_v48 = vpack.c.bf16 %v10864_v39, %v10856_v61  ;;  %v10580_v61 = vld [vmem:[%s13240_s16 + $0x660] ss:$28 sps:$4 sm:$0xff]   ;;  %v10583_v34 = vld [vmem:[%s13240_s16 + $0x690] ss:$28 sps:$4 sm:$0xff]  }
 0xb33   : > { %7081 = vmatprep.subr.bf16.mxu1 %v10537_v51  ;;  %7227 = vmatprep.subr.bf16.mxu0 %v10540_v3  ;;  %v12135_v38 = vpack.c.bf16 %v10866_v35, %v10858_v57  ;;  %v10585_v57 = vld [vmem:[%s13240_s16 + $0x694] ss:$28 sps:$4 sm:$0xff]   ;;  %v10588_v4 = vld [vmem:[%s13240_s16 + $0x69c] ss:$28 sps:$4 sm:$0xff]   ;;  %v10591_v51 = vld [vmem:[%s13240_s16 + $0x6cc] ss:$28 sps:$4 sm:$0xff]  }
 0xb34   : > { %7058 = vmatprep.mubr.bf16.mxu1 %v12131_v48  ;;  %7204 = vmatprep.mubr.bf16.mxu0 %v12131_v48  ;;  %v10594_v3 = vld [vmem:[%s13240_s16 + $0x6d4] ss:$28 sps:$4 sm:$0xff]  }
 0xb35   : > { %7059 = vmatmul.mubr.bf16.gmra.mrb[108].mxu1 %v12127_v45  ;;  %7205 = vmatmul.mubr.bf16.gmra.mrb[92].mxu0 %v12127_v45  ;;  %v10592_v39 = vld [vmem:[%s13240_s16 + $0x6d0] ss:$28 sps:$4 sm:$0xff]  }
 0xb36   : > { %7082 = vmatpush1.bf16.msra.mxu1 %v10535_v28  ;;  %7228 = vmatpush1.bf16.msra.mxu0 %v10538_v14  ;;  %v10597_v35 = vld [vmem:[%s13240_s16 + $0x14] ss:$28 sps:$4 sm:$0xff]  }
 0xb37   : > { %7101 = vmatprep.mubr.bf16.mxu1 %v12068_v21  ;;  %7247 = vmatprep.mubr.bf16.mxu0 %v12068_v21  ;;  %v10598_v28 = vld [vmem:[%s13240_s16 + $0x1d8] ss:$28 sps:$4 sm:$0xff]   ;;  %v10595_v14 = vld [vmem:[%s13240_s16 + $0x10] ss:$28 sps:$4 sm:$0xff]  }
 0xb38   : > { %7083 = vmatprep.subr.bf16.mxu1 %v10543_v60  ;;  %7229 = vmatprep.subr.bf16.mxu0 %v10546_v11  ;;  %v10599_v60 = vld [vmem:[%s13240_s16 + $0x18] ss:$28 sps:$4 sm:$0xff]   ;;  %v10602_v11 = vld [vmem:[%s13240_s16 + $0x4c] ss:$28 sps:$4 sm:$0xff]  }
 0xb3a   : > { %7084 = vmatpush1.bf16.msra.mxu1 %v10541_v5  ;;  %7230 = vmatpush1.bf16.msra.mxu0 %v10544_v59  ;;  %v10603_v5 = vld [vmem:[%s13240_s16 + $0x210] ss:$28 sps:$4 sm:$0xff]   ;;  %v10600_v59 = vld [vmem:[%s13240_s16 + $0x48] ss:$28 sps:$4 sm:$0xff]  }
 0xb3b   : > { %7085 = vmatprep.subr.bf16.mxu1 %v10549_v26  ;;  %7231 = vmatprep.subr.bf16.mxu0 %v10552_v53  ;;  %v10604_v26 = vld [vmem:[%s13240_s16 + $0x50] ss:$28 sps:$4 sm:$0xff]   ;;  %v10607_v53 = vld [vmem:[%s13240_s16 + $0x84] ss:$28 sps:$4 sm:$0xff]  }
 0xb3e   : > { %7086 = vmatpush1.bf16.msra.mxu1 %v10547_v10  ;;  %7232 = vmatpush1.bf16.msra.mxu0 %v10550_v43  ;;  %v10608_v10 = vld [vmem:[%s13240_s16 + $0x248] ss:$28 sps:$4 sm:$0xff]   ;;  %v10605_v43 = vld [vmem:[%s13240_s16 + $0x80] ss:$28 sps:$4 sm:$0xff]  }
 0xb3f   : > { %7087 = vmatprep.subr.bf16.mxu1 %v10555_v6  ;;  %7233 = vmatprep.subr.bf16.mxu0 %v10558_v58  ;;  %v10609_v6 = vld [vmem:[%s13240_s16 + $0x88] ss:$28 sps:$4 sm:$0xff]   ;;  %v10612_v58 = vld [vmem:[%s13240_s16 + $0xbc] ss:$28 sps:$4 sm:$0xff]  }
 0xb42   : > { %7088 = vmatpush1.bf16.msra.mxu1 %v10553_v8  ;;  %7234 = vmatpush1.bf16.msra.mxu0 %v10556_v32  ;;  %v10613_v8 = vld [vmem:[%s13240_s16 + $0x280] ss:$28 sps:$4 sm:$0xff]   ;;  %v10610_v32 = vld [vmem:[%s13240_s16 + $0xb8] ss:$28 sps:$4 sm:$0xff]  }
 0xb43   : > { %7089 = vmatprep.subr.bf16.mxu1 %v10561_v9  ;;  %7235 = vmatprep.subr.bf16.mxu0 %v10564_v12  ;;  %v10614_v9 = vld [vmem:[%s13240_s16 + $0xc0] ss:$28 sps:$4 sm:$0xff]   ;;  %v10617_v12 = vld [vmem:[%s13240_s16 + $0xf4] ss:$28 sps:$4 sm:$0xff]  }
 0xb46   : > { %7090 = vmatpush1.bf16.msra.mxu1 %v10559_v31  ;;  %7236 = vmatpush1.bf16.msra.mxu0 %v10562_v50  ;;  %v10618_v31 = vld [vmem:[%s13240_s16 + $0x2b8] ss:$28 sps:$4 sm:$0xff]   ;;  %v10615_v50 = vld [vmem:[%s13240_s16 + $0xf0] ss:$28 sps:$4 sm:$0xff]  }
 0xb47   : > { %7091 = vmatprep.subr.bf16.mxu1 %v10567_v18  ;;  %7237 = vmatprep.subr.bf16.mxu0 %v10570_v52  ;;  %v10619_v18 = vld [vmem:[%s13240_s16 + $0xf8] ss:$28 sps:$4 sm:$0xff]   ;;  %v10622_v52 = vld [vmem:[%s13240_s16 + $0x12c] ss:$28 sps:$4 sm:$0xff]  }
 0xb4a   : > { %7092 = vmatpush1.bf16.msra.mxu1 %v10565_v27  ;;  %7238 = vmatpush1.bf16.msra.mxu0 %v10568_v16  ;;  %v10623_v27 = vld [vmem:[%s13240_s16 + $0x2f0] ss:$28 sps:$4 sm:$0xff]   ;;  %v10620_v16 = vld [vmem:[%s13240_s16 + $0x128] ss:$28 sps:$4 sm:$0xff]  }
 0xb4b   : > { %7093 = vmatprep.subr.bf16.mxu1 %v10573_v20  ;;  %7239 = vmatprep.subr.bf16.mxu0 %v10576_v56  ;;  %v10624_v20 = vld [vmem:[%s13240_s16 + $0x130] ss:$28 sps:$4 sm:$0xff]   ;;  %v10627_v56 = vld [vmem:[%s13240_s16 + $0x164] ss:$28 sps:$4 sm:$0xff]  }
 0xb4e   : > { %7094 = vmatpush1.bf16.msra.mxu1 %v10571_v22  ;;  %7240 = vmatpush1.bf16.msra.mxu0 %v10574_v41  ;;  %v10628_v22 = vld [vmem:[%s13240_s16 + $0x328] ss:$28 sps:$4 sm:$0xff]   ;;  %v10625_v41 = vld [vmem:[%s13240_s16 + $0x160] ss:$28 sps:$4 sm:$0xff]  }
 0xb4f   : > { %7095 = vmatprep.subr.bf16.mxu1 %v10579_v63  ;;  %7241 = vmatprep.subr.bf16.mxu0 %v10582_v25  ;;  %v10629_v63 = vld [vmem:[%s13240_s16 + $0x168] ss:$28 sps:$4 sm:$0xff]   ;;  %v10632_v25 = vld [vmem:[%s13240_s16 + $0x19c] ss:$28 sps:$4 sm:$0xff]  }
 0xb52   : > { %7096 = vmatpush1.bf16.msra.mxu1 %v10577_v29  ;;  %7242 = vmatpush1.bf16.msra.mxu0 %v10580_v61  ;;  %v10633_v29 = vld [vmem:[%s13240_s16 + $0x360] ss:$28 sps:$4 sm:$0xff]   ;;  %v10630_v61 = vld [vmem:[%s13240_s16 + $0x198] ss:$28 sps:$4 sm:$0xff]  }
 0xb53   : > { %7097 = vmatprep.subr.bf16.mxu1 %v10585_v57  ;;  %7243 = vmatprep.subr.bf16.mxu0 %v10588_v4  ;;  %v10634_v57 = vld [vmem:[%s13240_s16 + $0x1a0] ss:$28 sps:$4 sm:$0xff]   ;;  %v10637_v4 = vld [vmem:[%s13240_s16 + $0x1d4] ss:$28 sps:$4 sm:$0xff]  }
 0xb56   : > { %7098 = vmatpush1.bf16.msra.mxu1 %v10583_v34  ;;  %7244 = vmatpush1.bf16.msra.mxu0 %v10586_v44  ;;  %v12229_v34 = vld [vmem:[%s13240_s16 + $0x558] ss:$28 sps:$4 sm:$0xff]   ;;  %v10635_v44 = vld [vmem:[%s13240_s16 + $0x1d0] ss:$28 sps:$4 sm:$0xff]  }
 0xb57   : > { %7099 = vmatprep.subr.bf16.mxu1 %v10591_v51  ;;  %7245 = vmatprep.subr.bf16.mxu0 %v10594_v3  ;;  %v10642_v51 = vld [vmem:[%s13240_s16 + $0x20c] ss:$28 sps:$4 sm:$0xff]  }
 0xb58   : > { %v12238_v3 = vld [vmem:[%s13240_s16 + $0x590] ss:$28 sps:$4 sm:$0xff]  }
 0xb5a   : > { %7100 = vmatpush1.bf16.msra.mxu1 %v10589_v19  ;;  %7246 = vmatpush1.bf16.msra.mxu0 %v10592_v39  ;;  %v10640_v19 = vld [vmem:[%s13240_s16 + $0x208] ss:$28 sps:$4 sm:$0xff]   ;;  %v12246_v39 = vld [vmem:[%s13240_s16 + $0x3d0] ss:$28 sps:$4 sm:$0xff]  }
 0xb5b   : > { %7288 = vmatprep.subr.bf16.mxu1 %v10597_v35  ;;  %9328 = vmatprep.subr.bf16.mxu0 %v10598_v28  ;;  %v10647_v35 = vld [vmem:[%s13240_s16 + $0x244] ss:$28 sps:$4 sm:$0xff]  }
 0xb5c   : > { %v12253_v28 = vld [vmem:[%s13240_s16 + $0x5c8] ss:$28 sps:$4 sm:$0xff]  }
 0xb5d   : > { %7102 = vmatmul.mubr.bf16.vlgmr.msra.gmra.mrb[96].mxu1 %v12058_v55  ;;  %7248 = vmatmul.mubr.bf16.vlgmr.msra.gmra.mrb[80].mxu0 %v12058_v55 }
 0xb5e   : > { %7111 = vmatprep.mubr.bf16.mxu1 %v12096_v7  ;;  %7257 = vmatprep.mubr.bf16.mxu0 %v12096_v7 }
 0xb5f   : > { %7289 = vmatpush1.bf16.msra.mxu1 %v10595_v14  ;;  %9329 = vmatpush3.bf16.msra.mxu0 %v10599_v60  ;;  %v10645_v14 = vld [vmem:[%s13240_s16 + $0x240] ss:$28 sps:$4 sm:$0xff]   ;;  %v12258_v60 = vld [vmem:[%s13240_s16 + $0x408] ss:$28 sps:$4 sm:$0xff]  }
 0xb60   : > { %7290 = vmatprep.subr.bf16.mxu1 %v10602_v11  ;;  %9330 = vmatprep.subr.bf16.mxu0 %v10603_v5  ;;  %v10652_v11 = vld [vmem:[%s13240_s16 + $0x27c] ss:$28 sps:$4 sm:$0xff]  }
 0xb61   : > { %v12263_v5 = vld [vmem:[%s13240_s16 + $0x600] ss:$28 sps:$4 sm:$0xff]  }
 0xb63   : > { %7291 = vmatpush1.bf16.msra.mxu1 %v10600_v59  ;;  %9331 = vmatpush3.bf16.msra.mxu0 %v10604_v26  ;;  %v10650_v59 = vld [vmem:[%s13240_s16 + $0x278] ss:$28 sps:$4 sm:$0xff]   ;;  %v7966_v26 = vstv %s7818_s18 }
 0xb64   : > { %7292 = vmatprep.subr.bf16.mxu1 %v10607_v53  ;;  %9332 = vmatprep.subr.bf16.mxu0 %v10608_v10  ;;  %v12270_v53 = vld [vmem:[%s13240_s16 + $0x440] ss:$28 sps:$4 sm:$0xff]   ;;  %v10657_v10 = vld [vmem:[%s13240_s16 + $0x2b4] ss:$28 sps:$4 sm:$0xff]   ;;  %10867 = vrcp.f32 %v7966_v26 }
 0xb65   : > { %7112 = vmatmul.mubr.bf16.gmra.mrb[100].mxu1 %v12086_v0  ;;  %7258 = vmatmul.mubr.bf16.gmra.mrb[84].mxu0 %v12086_v0  ;;  %v10710_v26 = vld [vmem:[%s13240_s16 + $0x5fc] ss:$28 sps:$4 sm:$0xff]  }
 0xb66   : > { %7121 = vmatprep.mubr.bf16.mxu1 %v12117_v49  ;;  %7267 = vmatprep.mubr.bf16.mxu0 %v12117_v49 }
 0xb67   : > { %7293 = vmatpush1.bf16.msra.mxu1 %v10605_v43  ;;  %9333 = vmatpush3.bf16.msra.mxu0 %v10609_v6  ;;  %v12275_v43 = vld [vmem:[%s13240_s16 + $0x638] ss:$28 sps:$4 sm:$0xff]   ;;  %v10655_v6 = vld [vmem:[%s13240_s16 + $0x2b0] ss:$28 sps:$4 sm:$0xff]  }
 0xb68   : > { %7294 = vmatprep.subr.bf16.mxu1 %v10612_v58  ;;  %9334 = vmatprep.subr.bf16.mxu0 %v10613_v8  ;;  %v12280_v58 = vld [vmem:[%s13240_s16 + $0x478] ss:$28 sps:$4 sm:$0xff]   ;;  %v10662_v8 = vld [vmem:[%s13240_s16 + $0x2ec] ss:$28 sps:$4 sm:$0xff]  }
 0xb6b   : > { %7295 = vmatpush1.bf16.msra.mxu1 %v10610_v32  ;;  %9335 = vmatpush3.bf16.msra.mxu0 %v10614_v9  ;;  %v12285_v32 = vld [vmem:[%s13240_s16 + $0x670] ss:$28 sps:$4 sm:$0xff]   ;;  %v10660_v9 = vld [vmem:[%s13240_s16 + $0x2e8] ss:$28 sps:$4 sm:$0xff]  }
 0xb6c   : > { %7296 = vmatprep.subr.bf16.mxu1 %v10617_v12  ;;  %9336 = vmatprep.subr.bf16.mxu0 %v10618_v31  ;;  %v12292_v12 = vld [vmem:[%s13240_s16 + $0x4b0] ss:$28 sps:$4 sm:$0xff]   ;;  %v10667_v31 = vld [vmem:[%s13240_s16 + $0x324] ss:$28 sps:$4 sm:$0xff]  }
 0xb6d   : > { %7122 = vmatmul.mubr.bf16.gmra.mrb[104].mxu1 %v12109_v30  ;;  %7268 = vmatmul.mubr.bf16.gmra.mrb[88].mxu0 %v12109_v30 }
 0xb6e   : > { %7131 = vmatprep.mubr.bf16.mxu1 %v12135_v38  ;;  %7277 = vmatprep.mubr.bf16.mxu0 %v12135_v38 }
 0xb6f   : > { %7297 = vmatpush1.bf16.msra.mxu1 %v10615_v50  ;;  %9337 = vmatpush3.bf16.msra.mxu0 %v10619_v18  ;;  %v12297_v50 = vld [vmem:[%s13240_s16 + $0x6a8] ss:$28 sps:$4 sm:$0xff]   ;;  %v10868_v18 = vpop.eup %10867 }
 0xb70   : > { %7298 = vmatprep.subr.bf16.mxu1 %v10622_v52  ;;  %9338 = vmatprep.subr.bf16.mxu0 %v10623_v27  ;;  %v10665_v52 = vld [vmem:[%s13240_s16 + $0x320] ss:$28 sps:$4 sm:$0xff]   ;;  %9772 = vpush %v10868_v18  ;;  %v12302_v27 = vld [vmem:[%s13240_s16 + $0x4e8] ss:$28 sps:$4 sm:$0xff]  }
 0xb71   : > { %v10719_v18 = vld [vmem:[%s13240_s16 + $0x6a4] ss:$28 sps:$4 sm:$0xff]  }
 0xb73   : > { %7299 = vmatpush1.bf16.msra.mxu1 %v10620_v16  ;;  %9339 = vmatpush3.bf16.msra.mxu0 %v10624_v20  ;;  %v10672_v16 = vld [vmem:[%s13240_s16 + $0x35c] ss:$28 sps:$4 sm:$0xff]  }
 0xb74   : > { %7300 = vmatprep.subr.bf16.mxu1 %v10627_v56  ;;  %9340 = vmatprep.subr.bf16.mxu0 %v10628_v22  ;;  %v12307_v20 = vld [vmem:[%s13240_s16 + $0x6e0] ss:$28 sps:$4 sm:$0xff]   ;;  %v10670_v56 = vld [vmem:[%s13240_s16 + $0x358] ss:$28 sps:$4 sm:$0xff]  }
 0xb75   : > { %7132 = vmatmul.mubr.bf16.gmra.mrb[108].mxu1 %v12129_v13  ;;  %7278 = vmatmul.mubr.bf16.gmra.mrb[92].mxu0 %v12129_v13  ;;  %v12314_v22 = vld [vmem:[%s13240_s16 + $0x520] ss:$28 sps:$4 sm:$0xff]  }
 0xb76   : > { %7320 = vmatprep.mubr.bf16.mxu1 %v12061_v36  ;;  %7466 = vmatprep.mubr.bf16.mxu0 %v12061_v36  ;;  %v12234_v36 = vld [vmem:[%s13240_s16 + $0x398] ss:$28 sps:$4 sm:$0xff]  }
 0xb77   : > { %7301 = vmatpush1.bf16.msra.mxu1 %v10625_v41  ;;  %9341 = vmatpush3.bf16.msra.mxu0 %v10629_v63  ;;  %v10677_v41 = vld [vmem:[%s13240_s16 + $0x394] ss:$28 sps:$4 sm:$0xff]  }
 0xb78   : > { %7302 = vmatprep.subr.bf16.mxu1 %v10632_v25  ;;  %9342 = vmatprep.subr.bf16.mxu0 %v10633_v29  ;;  %v10675_v63 = vld [vmem:[%s13240_s16 + $0x390] ss:$28 sps:$4 sm:$0xff]   ;;  %v10678_v29 = vld [vmem:[%s13240_s16 + $0x3c8] ss:$28 sps:$4 sm:$0xff]  }
 0xb79   : > { %v10680_v25 = vld [vmem:[%s13240_s16 + $0x3cc] ss:$28 sps:$4 sm:$0xff]  }
 0xb7b   : > { %7303 = vmatpush1.bf16.msra.mxu1 %v10630_v61  ;;  %9343 = vmatpush3.bf16.msra.mxu0 %v10634_v57  ;;  %v10683_v61 = vld [vmem:[%s13240_s16 + $0x404] ss:$28 sps:$4 sm:$0xff]  }
 0xb7c   : > { %7304 = vmatprep.subr.bf16.mxu1 %v10637_v4  ;;  %9368 = vmatprep.subr.bf16.mxu0 %v12229_v34  ;;  %v10681_v57 = vld [vmem:[%s13240_s16 + $0x400] ss:$28 sps:$4 sm:$0xff]  }
 0xb7d   : > { %v10686_v4 = vld [vmem:[%s13240_s16 + $0x43c] ss:$28 sps:$4 sm:$0xff]  }
 0xb7e   : > { %7467 = vmatmul.mubr.bf16.vlgmr.msra.gmra.mrb[96].mxu0 %v12055_v2 }
 0xb7f   : > { %7305 = vmatpush1.bf16.msra.mxu1 %v10635_v44  ;;  %7474 = vmatprep.mubr.bf16.mxu0 %v12089_v40  ;;  %v10687_v44 = vld [vmem:[%s13240_s16 + $0x470] ss:$28 sps:$4 sm:$0xff]  }
 0xb80   : > { %9369 = vmatpush3.bf16.msra.mxu0 %v12234_v36  ;;  %7306 = vmatprep.subr.bf16.mxu1 %v10642_v51  ;;  %v10692_v51 = vld [vmem:[%s13240_s16 + $0x4ac] ss:$28 sps:$4 sm:$0xff]  }
 0xb81   : > { %9370 = vmatprep.subr.bf16.mxu0 %v12238_v3 }
 0xb83   : > { %7307 = vmatpush1.bf16.msra.mxu1 %v10640_v19  ;;  %v10693_v19 = vld [vmem:[%s13240_s16 + $0x4e0] ss:$28 sps:$4 sm:$0xff]  }
 0xb84   : > { %9371 = vmatpush3.bf16.msra.mxu0 %v12246_v39  ;;  %7308 = vmatprep.subr.bf16.mxu1 %v10647_v35  ;;  %v10698_v35 = vld [vmem:[%s13240_s16 + $0x51c] ss:$28 sps:$4 sm:$0xff]  }
 0xb85   : > { %9372 = vmatprep.subr.bf16.mxu0 %v12253_v28 }
 0xb86   : > { %7475 = vmatmul.mubr.bf16.gmra.mrb[100].mxu0 %v12083_v62 }
 0xb87   : > { %7309 = vmatpush1.bf16.msra.mxu1 %v10645_v14  ;;  %7482 = vmatprep.mubr.bf16.mxu0 %v12111_v54  ;;  %v10699_v14 = vld [vmem:[%s13240_s16 + $0x550] ss:$28 sps:$4 sm:$0xff]  }
 0xb88   : > { %9373 = vmatpush3.bf16.msra.mxu0 %v12258_v60  ;;  %7310 = vmatprep.subr.bf16.mxu1 %v10652_v11  ;;  %v10704_v11 = vld [vmem:[%s13240_s16 + $0x58c] ss:$28 sps:$4 sm:$0xff]  }
 0xb89   : > { %9374 = vmatprep.subr.bf16.mxu0 %v12263_v5 }
 0xb8b   : > { %7311 = vmatpush1.bf16.msra.mxu1 %v10650_v59  ;;  %v10702_v59 = vld [vmem:[%s13240_s16 + $0x588] ss:$28 sps:$4 sm:$0xff]  }
 0xb8c   : > { %9375 = vmatpush3.bf16.msra.mxu0 %v12270_v53  ;;  %7312 = vmatprep.subr.bf16.mxu1 %v10657_v10  ;;  %v10708_v10 = vld [vmem:[%s13240_s16 + $0x5f8] ss:$28 sps:$4 sm:$0xff]  }
 0xb8d   : > { %9376 = vmatprep.subr.bf16.mxu0 %v12275_v43 }
 0xb8e   : > { %7483 = vmatmul.mubr.bf16.gmra.mrb[104].mxu0 %v12107_v15 }
 0xb8f   : > { %7313 = vmatpush1.bf16.msra.mxu1 %v10655_v6  ;;  %7490 = vmatprep.mubr.bf16.mxu0 %v12131_v48  ;;  %v10713_v6 = vld [vmem:[%s13240_s16 + $0x634] ss:$28 sps:$4 sm:$0xff]  }
 0xb90   : > { %9377 = vmatpush3.bf16.msra.mxu0 %v12280_v58  ;;  %7314 = vmatprep.subr.bf16.mxu1 %v10662_v8  ;;  %v10711_v8 = vld [vmem:[%s13240_s16 + $0x630] ss:$28 sps:$4 sm:$0xff]  }
 0xb91   : > { %9378 = vmatprep.subr.bf16.mxu0 %v12285_v32 }
 0xb93   : > { %7315 = vmatpush1.bf16.msra.mxu1 %v10660_v9  ;;  %v10716_v9 = vld [vmem:[%s13240_s16 + $0x66c] ss:$28 sps:$4 sm:$0xff]  }
 0xb94   : > { %9379 = vmatpush3.bf16.msra.mxu0 %v12292_v12  ;;  %7316 = vmatprep.subr.bf16.mxu1 %v10667_v31  ;;  %v10714_v31 = vld [vmem:[%s13240_s16 + $0x668] ss:$28 sps:$4 sm:$0xff]  }
 0xb95   : > { %9380 = vmatprep.subr.bf16.mxu0 %v12297_v50 }
 0xb96   : > { %7491 = vmatmul.mubr.bf16.gmra.mrb[108].mxu0 %v12127_v45 }
 0xb97   : > { %7317 = vmatpush1.bf16.msra.mxu1 %v10665_v52  ;;  %7531 = vmatprep.mubr.bf16.mxu0 %v12068_v21  ;;  %v10717_v52 = vld [vmem:[%s13240_s16 + $0x6a0] ss:$28 sps:$4 sm:$0xff]  }
 0xb98   : > { %9381 = vmatpush3.bf16.msra.mxu0 %v12302_v27  ;;  %7318 = vmatprep.subr.bf16.mxu1 %v10672_v16  ;;  %v10722_v16 = vld [vmem:[%s13240_s16 + $0x6dc] ss:$28 sps:$4 sm:$0xff]  }
 0xb99   : > { %9382 = vmatprep.subr.bf16.mxu0 %v12307_v20 }
 0xb9b   : > { %7319 = vmatpush1.bf16.msra.mxu1 %v10670_v56  ;;  %v10720_v56 = vld [vmem:[%s13240_s16 + $0x6d8] ss:$28 sps:$4 sm:$0xff]  }
 0xb9c   : > { %9383 = vmatpush3.bf16.msra.mxu0 %v12314_v22  ;;  %7361 = vmatprep.subr.bf16.mxu1 %v10677_v41 }
 0xb9e   : > { %7321 = vmatmul.mubr.bf16.vlgmr.msra.gmra.mrb[112].mxu1 %v12055_v2  ;;  %v10684_v2 = vld [vmem:[%s13240_s16 + $0x438] ss:$28 sps:$4 sm:$0xff]  }
 0xb9f   : > { %7532 = vmatmul.mubr.bf16.vlgmr.msra.gmra.mrb[112].mxu0 %v12058_v55  ;;  %7330 = vmatprep.mubr.bf16.mxu1 %v12089_v40  ;;  %v10689_v40 = vld [vmem:[%s13240_s16 + $0x474] ss:$28 sps:$4 sm:$0xff]  }
 0xba0   : > { %7362 = vmatpush1.bf16.msra.mxu1 %v10675_v63  ;;  %7539 = vmatprep.mubr.bf16.mxu0 %v12096_v7 }
 0xba1   : > { %7363 = vmatprep.subr.bf16.mxu1 %v10680_v25  ;;  %s9773_s0 = spop %9772 }
 0xba4   : > { %7364 = vmatpush1.bf16.msra.mxu1 %v10678_v29  ;;  %v7780_v29 = vadd.s32 48, %v11121_v42 }
 0xba5   : > { %7365 = vmatprep.subr.bf16.mxu1 %v10683_v61 }
 0xba6   : > { %7331 = vmatmul.mubr.bf16.gmra.mrb[116].mxu1 %v12083_v62  ;;  %v10690_v62 = vld [vmem:[%s13240_s16 + $0x4a8] ss:$28 sps:$4 sm:$0xff]  }
 0xba7   : > { %7540 = vmatmul.mubr.bf16.gmra.mrb[116].mxu0 %v12086_v0  ;;  %7340 = vmatprep.mubr.bf16.mxu1 %v12111_v54  ;;  %v10695_v54 = vld [vmem:[%s13240_s16 + $0x4e4] ss:$28 sps:$4 sm:$0xff]  }
 0xba8   : > { %7366 = vmatpush1.bf16.msra.mxu1 %v10681_v57  ;;  %7547 = vmatprep.mubr.bf16.mxu0 %v12117_v49 }
 0xba9   : > { %7367 = vmatprep.subr.bf16.mxu1 %v10686_v4 }
 0xbac   : > { %7368 = vmatpush1.bf16.msra.mxu1 %v10684_v2 }
 0xbad   : > { %7369 = vmatprep.subr.bf16.mxu1 %v10689_v40 }
 0xbae   : > { %7341 = vmatmul.mubr.bf16.gmra.mrb[120].mxu1 %v12107_v15  ;;  %v10696_v15 = vld [vmem:[%s13240_s16 + $0x518] ss:$28 sps:$4 sm:$0xff]  }
 0xbaf   : > { %7548 = vmatmul.mubr.bf16.gmra.mrb[120].mxu0 %v12109_v30  ;;  %7350 = vmatprep.mubr.bf16.mxu1 %v12131_v48  ;;  %v10701_v48 = vld [vmem:[%s13240_s16 + $0x554] ss:$28 sps:$4 sm:$0xff]  }
 0xbb0   : > { %7370 = vmatpush1.bf16.msra.mxu1 %v10687_v44 }
 0xbb1   : > { %7371 = vmatprep.subr.bf16.mxu1 %v10692_v51 }
 0xbb4   : > { %7372 = vmatpush1.bf16.msra.mxu1 %v10690_v62 }
 0xbb5   : > { %7373 = vmatprep.subr.bf16.mxu1 %v10695_v54 }
 0xbb6   : > { %7351 = vmatmul.mubr.bf16.gmra.mrb[124].mxu1 %v12127_v45  ;;  %v10707_v45 = vld [vmem:[%s13240_s16 + $0x5c4] ss:$28 sps:$4 sm:$0xff]  }
 0xbb7   : > { %7393 = vmatprep.mubr.bf16.mxu1 %v12068_v21  ;;  %v10705_v21 = vld [vmem:[%s13240_s16 + $0x5c0] ss:$28 sps:$4 sm:$0xff]  }
 0xbb8   : > { %7374 = vmatpush1.bf16.msra.mxu1 %v10693_v19 }
 0xbb9   : > { %7375 = vmatprep.subr.bf16.mxu1 %v10698_v35 }
 0xbbc   : > { %7376 = vmatpush1.bf16.msra.mxu1 %v10696_v15 }
 0xbbd   : > { %7377 = vmatprep.subr.bf16.mxu1 %v10701_v48 }
 0xbc0   : > { %7378 = vmatpush1.bf16.msra.mxu1 %v10699_v14 }
 0xbc1   : > { %7379 = vmatprep.subr.bf16.mxu1 %v10704_v11 }
 0xbc4   : > { %7380 = vmatpush1.bf16.msra.mxu1 %v10702_v59 }
 0xbc5   : > { %7381 = vmatprep.subr.bf16.mxu1 %v10707_v45  ;;  %v7781_v45 = vadd.s32 56, %v11121_v42 }
 0xbc8   : > { %7382 = vmatpush1.bf16.msra.mxu1 %v10705_v21 }
 0xbc9   : > { %7383 = vmatprep.subr.bf16.mxu1 %v10710_v26 }
 0xbcc   : > { %7384 = vmatpush1.bf16.msra.mxu1 %v10708_v10 }
 0xbcd   : > { %7385 = vmatprep.subr.bf16.mxu1 %v10713_v6 }
 0xbd0   : > { %7386 = vmatpush1.bf16.msra.mxu1 %v10711_v8 }
 0xbd1   : > { %7387 = vmatprep.subr.bf16.mxu1 %v10716_v9 }
 0xbd4   : > { %7388 = vmatpush1.bf16.msra.mxu1 %v10714_v31 }
 0xbd5   : > { %7389 = vmatprep.subr.bf16.mxu1 %v10719_v18 }
 0xbd8   : > { %7390 = vmatpush1.bf16.msra.mxu1 %v10717_v52 }
 0xbd9   : > { %7391 = vmatprep.subr.bf16.mxu1 %v10722_v16 }
 0xbdc   : > { %7392 = vmatpush1.bf16.msra.mxu1 %v10720_v56 }
 0xbdd   : > { %9498 = vmatprep.subr.bf16.mxu1 %v12229_v34  ;;  %v7777_v34 = vadd.s32 24, %v11121_v42 }
 0xbdf   : > { %7394 = vmatmul.mubr.bf16.vlgmr.msra.gmra.mrb[112].mxu1 %v12058_v55  ;;  %v7775_v55 = vadd.s32 8, %v11121_v42 }
 0xbe0   : > { %7403 = vmatprep.mubr.bf16.mxu1 %v12096_v7  ;;  %9506 = vmatpush3.bf16.msra.mxu1 %v12234_v36  ;;  %v7776_v7 = vadd.s32 16, %v11121_v42 }
 0xbe1   : > { %9499 = vmatprep.subr.bf16.mxu1 %v12238_v3 }
 0xbe4   : > { %9507 = vmatpush3.bf16.msra.mxu1 %v12246_v39 }
 0xbe5   : > { %9500 = vmatprep.subr.bf16.mxu1 %v12253_v28  ;;  %v7778_v28 = vadd.s32 32, %v11121_v42 }
 0xbe7   : > { %7404 = vmatmul.mubr.bf16.gmra.mrb[116].mxu1 %v12086_v0  ;;  %v12391_v0 = vstv %s9200_s1  ;;  %s927_s1 = scalar_lea.vmem %s11058_s27, %s9771_s11 }
 0xbe8   : > { %7413 = vmatprep.mubr.bf16.mxu1 %v12117_v49  ;;  %9508 = vmatpush3.bf16.msra.mxu1 %v12258_v60  ;;  %v7783_v49 = vadd.s32 %v12391_v0, %v11121_v42  ;;  %v7785_v3 = vadd.s32 %v12391_v0, %v7776_v7  ;;  %v7786_v39 = vadd.s32 %v12391_v0, %v7777_v34 }
 0xbe9   : > { %9501 = vmatprep.subr.bf16.mxu1 %v12263_v5  ;;  %v7779_v5 = vadd.s32 40, %v11121_v42 }
 0xbea   : > { %vm7791_vm3 = vcmp.lt.s32.totalorder %v7783_v49, 100  ;;  %vm7793_vm5 = vcmp.lt.s32.totalorder %v7785_v3, 100  ;;  %vm7794_vm6 = vcmp.lt.s32.totalorder %v7786_v39, 100  ;;  %v12508_v49 = vadd.s32 %v12391_v0, %v7780_v29 }
 0xbeb   : > { %v12443_v25 = vadd.s32 %v12391_v0, %v7779_v5  ;;  %v12518_v5 = vadd.s32 %v12391_v0, %v7781_v45 }
 0xbec   : > { %9509 = vmatpush3.bf16.msra.mxu1 %v12270_v53  ;;  %v10908_v53 = vmov 0.0   ;;  %vm7797_vm9 = vcmp.lt.s32.totalorder %v12508_v49, 100 }
 0xbed   : > { %9502 = vmatprep.subr.bf16.mxu1 %v12275_v43  ;;  %v12422_v43 = vsel %vm7791_vm3, 1.0, %v10908_v53  ;;  %v12483_v11 = vsel %vm7793_vm5, 1.0, %v10908_v53  ;;  %v12487_v59 = vsel %vm7794_vm6, 1.0, %v10908_v53  ;;  %vm7796_vm8 = vcmp.lt.s32.totalorder %v12443_v25, 100 }
 0xbee   : > { %13244 = vst [vmem:[#allocation18_spill] sm:$0xff] %v12422_v43  ;;  %13246 = vst [vmem:[#allocation20_spill] sm:$0xff] %v12483_v11  ;;  %vm7798_vm10 = vcmp.lt.s32.totalorder %v12518_v5, 100 }
 0xbef   : > { %7414 = vmatmul.mubr.bf16.gmra.mrb[120].mxu1 %v12109_v30  ;;  %v12395_v30 = vld [vmem:[%s11048_s12] sm:$0xff]  ;;  %13247 = vst [vmem:[#allocation21_spill] sm:$0xff] %v12487_v59 }
 0xbf0   : > { %7423 = vmatprep.mubr.bf16.mxu1 %v12135_v38  ;;  %9510 = vmatpush3.bf16.msra.mxu1 %v12280_v58  ;;  %13243 = vst [vmem:[#allocation17_spill] sm:$0xff] %v12395_v30  ;;  %v12403_v36 = vrot.slane %v12395_v30, %v11161_v1  ;;  %v12414_v60 = vrot.slane %v12395_v30, %v11133_v47 }
 0xbf1   : > { %9503 = vmatprep.subr.bf16.mxu1 %v12285_v32  ;;  %v12418_v1 = vrot.slane %v12395_v30, %v11234_v24 }
 0xbf4   : > { %9511 = vmatpush3.bf16.msra.mxu1 %v12292_v12 }
 0xbf5   : > { %9504 = vmatprep.subr.bf16.mxu1 %v12297_v50 }
 0xbf7   : > { %7424 = vmatmul.mubr.bf16.gmra.mrb[124].mxu1 %v12129_v13 }
 0xbf8   : > { %9512 = vmatpush3.bf16.msra.mxu1 %v12302_v27  ;;  %7555 = vmatprep.mubr.bf16.mxu1 %v12135_v38  ;;  %v7784_v38 = vadd.s32 %v12391_v0, %v7775_v55  ;;  %v12434_v27 = vadd.s32 %v12391_v0, %v7778_v28 }
 0xbf9   : > { %9505 = vmatprep.subr.bf16.mxu1 %v12307_v20 }
 0xbfa   : > { %vm7792_vm4 = vcmp.lt.s32.totalorder %v7784_v38, 100  ;;  %vm7795_vm7 = vcmp.lt.s32.totalorder %v12434_v27, 100 }
 0xbfb   : > { %v12425_v32 = vsel %vm7792_vm4, 1.0, %v10908_v53 }
 0xbfc   : > { %9513 = vmatpush3.bf16.msra.mxu1 %v12314_v22  ;;  %13245 = vst [vmem:[#allocation19_spill] sm:$0xff] %v12425_v32 }
 0xbff   : > { %7556 = vmatmul.mubr.bf16.vlgmr.msra.gmra.mrb[128].mxu1 %v12129_v13  ;;  %v12407_v13 = vrot.slane %v12395_v30, %v11231_v23 }
 0xc30   : > { %v7103_v23 = vpop.f32.mrb[96].mxu1  ;;  %v7249_v58 = vpop.f32.mrb[80].mxu0 }
 0xc31   : > { %v12428_v47 = vadd.f32 %v7103_v23, %v12403_v36  ;;  %v12431_v24 = vadd.f32 %v7249_v58, %v12407_v13  ;;  %v7105_v12 = vpop.f32.mrb[97].mxu1  ;;  %v7251_v50 = vpop.f32.mrb[81].mxu0 }
 0xc32   : > { %v12437_v20 = vadd.f32 %v7105_v12, %v12414_v60  ;;  %v12440_v22 = vadd.f32 %v7251_v50, %v12418_v1  ;;  %v7107_v41 = vpop.f32.mrb[98].mxu1  ;;  %v7253_v63 = vpop.f32.mrb[82].mxu0 }
 0xc33   : > { %v7819_v61 = vmul.f32 %v12428_v47, %v12422_v43  ;;  %v7821_v57 = vmul.f32 %v12431_v24, %v12422_v43  ;;  %v12456_v4 = vadd.f32 %v7107_v41, %v12403_v36  ;;  %v12459_v2 = vadd.f32 %v7253_v63, %v12407_v13  ;;  %v7109_v40 = vpop.f32.mrb[99].mxu1  ;;  %v7255_v44 = vpop.f32.mrb[83].mxu0 }
 0xc34   : > { %v9211_v51 = vpack.c.bf16 %v12437_v20, %v12428_v47  ;;  %v7820_v62 = vmul.f32 %v12437_v20, %v12422_v43  ;;  %v9212_v54 = vpack.c.bf16 %v12440_v22, %v12431_v24  ;;  %v7822_v19 = vmul.f32 %v12440_v22, %v12422_v43 }
 0xc35   : > { %v7826_v35 = vmul.f32 %v12456_v4, %v12425_v32  ;;  %v7828_v15 = vmul.f32 %v12459_v2, %v12425_v32  ;;  %v12474_v48 = vadd.f32 %v7109_v40, %v12414_v60  ;;  %v12477_v14 = vadd.f32 %v7255_v44, %v12418_v1 }
 0xc36   : > { %7740 = vst [vmem:[%s12453_s23] sm:$0xff] %v9211_v51  ;;  %7741 = vst [vmem:[%s12453_s23 + $0x8] sm:$0xff] %v9212_v54 }
 0xc37   : > { %v7875_v21 = vadd.f32 %v7826_v35, %v7819_v61  ;;  %v7901_v26 = vadd.f32 %v7828_v15, %v7821_v57  ;;  %v9215_v10 = vpack.c.bf16 %v12474_v48, %v12456_v4  ;;  %v7827_v6 = vmul.f32 %v12474_v48, %v12425_v32 }
 0xc38   : > { %v9216_v8 = vpack.c.bf16 %v12477_v14, %v12459_v2  ;;  %v7829_v9 = vmul.f32 %v12477_v14, %v12425_v32  ;;  %v7113_v31 = vpop.f32.mrb[100].mxu1  ;;  %v7259_v18 = vpop.f32.mrb[84].mxu0 }
 0xc39   : > { %7744 = vst [vmem:[%s12453_s23 + $0x1c] sm:$0xff] %v9215_v10  ;;  %v7888_v52 = vadd.f32 %v7827_v6, %v7820_v62  ;;  %v12502_v16 = vadd.f32 %v7113_v31, %v12403_v36  ;;  %v12505_v56 = vadd.f32 %v7259_v18, %v12407_v13  ;;  %v7115_v55 = vpop.f32.mrb[101].mxu1  ;;  %v7261_v7 = vpop.f32.mrb[85].mxu0  ;;  %v12558_v10 = vsel %vm7796_vm8, 1.0, %v10908_v53 }
 0xc3a   : > { %7745 = vst [vmem:[%s12453_s23 + $0x24] sm:$0xff] %v9216_v8  ;;  %v7914_v38 = vadd.f32 %v7829_v9, %v7822_v19  ;;  %v12512_v34 = vadd.f32 %v7115_v55, %v12414_v60  ;;  %v12515_v3 = vadd.f32 %v7261_v7, %v12418_v1  ;;  %v7117_v39 = vpop.f32.mrb[102].mxu1  ;;  %v7263_v28 = vpop.f32.mrb[86].mxu0  ;;  %13249 = vst [vmem:[#allocation23_spill] sm:$0xff] %v12558_v10 }
 0xc3b   : > { %v7833_v23 = vmul.f32 %v12502_v16, %v12483_v11  ;;  %v7835_v58 = vmul.f32 %v12505_v56, %v12483_v11  ;;  %v12525_v12 = vadd.f32 %v7117_v39, %v12403_v36  ;;  %v12528_v50 = vadd.f32 %v7263_v28, %v12407_v13  ;;  %v7119_v41 = vpop.f32.mrb[103].mxu1  ;;  %v7265_v63 = vpop.f32.mrb[87].mxu0 }
 0xc3c   : > { %v9219_v29 = vpack.c.bf16 %v12512_v34, %v12502_v16  ;;  %v7834_v0 = vmul.f32 %v12512_v34, %v12483_v11  ;;  %v9220_v61 = vpack.c.bf16 %v12515_v3, %v12505_v56  ;;  %v7836_v57 = vmul.f32 %v12515_v3, %v12483_v11 }
 0xc3d   : > { %v7876_v40 = vadd.f32 %v7875_v21, %v7833_v23  ;;  %v7902_v44 = vadd.f32 %v7901_v26, %v7835_v58  ;;  %v7840_v51 = vmul.f32 %v12525_v12, %v12487_v59  ;;  %v7842_v62 = vmul.f32 %v12528_v50, %v12487_v59 }
 0xc3e   : > { %7748 = vst [vmem:[%s12453_s23 + $0x38] sm:$0xff] %v9219_v29  ;;  %v7889_v54 = vadd.f32 %v7888_v52, %v7834_v0  ;;  %7749 = vst [vmem:[%s12453_s23 + $0x40] sm:$0xff] %v9220_v61  ;;  %v7915_v19 = vadd.f32 %v7914_v38, %v7836_v57  ;;  %v12545_v35 = vadd.f32 %v7119_v41, %v12414_v60  ;;  %v12553_v26 = vsel %vm7795_vm7, 1.0, %v10908_v53 }
 0xc3f   : > { %v12548_v15 = vadd.f32 %v7265_v63, %v12418_v1  ;;  %v7877_v45 = vadd.f32 %v7876_v40, %v7840_v51  ;;  %v7903_v21 = vadd.f32 %v7902_v44, %v7842_v62  ;;  %13248 = vst [vmem:[#allocation22_spill] sm:$0xff] %v12553_v26 }
 0xc40   : > { %v9223_v6 = vpack.c.bf16 %v12545_v35, %v12525_v12  ;;  %v7841_v8 = vmul.f32 %v12545_v35, %v12487_v59  ;;  %v7123_v31 = vpop.f32.mrb[104].mxu1  ;;  %v7269_v18 = vpop.f32.mrb[88].mxu0 }
 0xc41   : > { %v9224_v9 = vpack.c.bf16 %v12548_v15, %v12528_v50  ;;  %v7843_v27 = vmul.f32 %v12548_v15, %v12487_v59  ;;  %v12569_v52 = vadd.f32 %v7123_v31, %v12403_v36  ;;  %v12572_v25 = vadd.f32 %v7269_v18, %v12407_v13  ;;  %v7125_v55 = vpop.f32.mrb[105].mxu1  ;;  %v7271_v7 = vpop.f32.mrb[89].mxu0 }
 0xc42   : > { %7752 = vst [vmem:[%s12453_s23 + $0x54] sm:$0xff] %v9223_v6  ;;  %v7890_v38 = vadd.f32 %v7889_v54, %v7841_v8  ;;  %v12579_v28 = vadd.f32 %v7125_v55, %v12414_v60  ;;  %v12582_v23 = vadd.f32 %v7271_v7, %v12418_v1  ;;  %v7127_v58 = vpop.f32.mrb[106].mxu1  ;;  %v7273_v41 = vpop.f32.mrb[90].mxu0 }
 0xc43   : > { %7753 = vst [vmem:[%s12453_s23 + $0x5c] sm:$0xff] %v9224_v9  ;;  %v7916_v39 = vadd.f32 %v7915_v19, %v7843_v27  ;;  %v7847_v63 = vmul.f32 %v12569_v52, %v12553_v26  ;;  %v7849_v29 = vmul.f32 %v12572_v25, %v12553_v26  ;;  %v12589_v0 = vadd.f32 %v7127_v58, %v12403_v36  ;;  %v7129_v57 = vpop.f32.mrb[107].mxu1  ;;  %v7275_v40 = vpop.f32.mrb[91].mxu0 }
 0xc44   : > { %v12592_v61 = vadd.f32 %v7273_v41, %v12407_v13  ;;  %v9227_v44 = vpack.c.bf16 %v12579_v28, %v12569_v52  ;;  %v7848_v51 = vmul.f32 %v12579_v28, %v12553_v26  ;;  %v9228_v62 = vpack.c.bf16 %v12582_v23, %v12572_v25 }
 0xc45   : > { %v7850_v54 = vmul.f32 %v12582_v23, %v12553_v26  ;;  %v7878_v19 = vadd.f32 %v7877_v45, %v7847_v63  ;;  %v7904_v6 = vadd.f32 %v7903_v21, %v7849_v29  ;;  %v7854_v8 = vmul.f32 %v12589_v0, %v12558_v10 }
 0xc46   : > { %v7856_v9 = vmul.f32 %v12592_v61, %v12558_v10  ;;  %7756 = vst [vmem:[%s12453_s23 + $0x70] sm:$0xff] %v9227_v44  ;;  %v7891_v27 = vadd.f32 %v7890_v38, %v7848_v51  ;;  %7757 = vst [vmem:[%s12453_s23 + $0x78] sm:$0xff] %v9228_v62  ;;  %v12609_v18 = vadd.f32 %v7129_v57, %v12414_v60  ;;  %v12617_v21 = vsel %vm7797_vm9, 1.0, %v10908_v53 }
 0xc47   : > { %v7917_v31 = vadd.f32 %v7916_v39, %v7850_v54  ;;  %v12612_v55 = vadd.f32 %v7275_v40, %v12418_v1  ;;  %v7879_v7 = vadd.f32 %v7878_v19, %v7854_v8  ;;  %13250 = vst [vmem:[#allocation24_spill] sm:$0xff] %v12617_v21  ;;  %v12636_v51 = vsel %vm7798_vm10, 1.0, %v10908_v53 }
 0xc48   : > { %v7905_v45 = vadd.f32 %v7904_v6, %v7856_v9  ;;  %v9231_v38 = vpack.c.bf16 %v12609_v18, %v12589_v0  ;;  %v7855_v39 = vmul.f32 %v12609_v18, %v12558_v10  ;;  %v7133_v63 = vpop.f32.mrb[108].mxu1  ;;  %v7279_v29 = vpop.f32.mrb[92].mxu0  ;;  %13251 = vst [vmem:[#allocation25_spill] sm:$0xff] %v12636_v51 }
 0xc49   : > { %v9232_v58 = vpack.c.bf16 %v12612_v55, %v12592_v61  ;;  %v7857_v41 = vmul.f32 %v12612_v55, %v12558_v10  ;;  %v12628_v57 = vadd.f32 %v7133_v63, %v12403_v36  ;;  %v12631_v49 = vadd.f32 %v7279_v29, %v12407_v13  ;;  %v7135_v40 = vpop.f32.mrb[109].mxu1  ;;  %v7281_v44 = vpop.f32.mrb[93].mxu0 }
 0xc4a   : > { %7760 = vst [vmem:[%s12453_s23 + $0x8c] sm:$0xff] %v9231_v38  ;;  %v7892_v62 = vadd.f32 %v7891_v27, %v7855_v39  ;;  %v12641_v19 = vadd.f32 %v7135_v40, %v12414_v60  ;;  %v12644_v6 = vadd.f32 %v7281_v44, %v12418_v1  ;;  %v7137_v8 = vpop.f32.mrb[110].mxu1  ;;  %v7283_v9 = vpop.f32.mrb[94].mxu0  ;;  %v10909_v10 = vmov 1966171168  }
 0xc4b   : > { %7761 = vst [vmem:[%s12453_s23 + $0x94] sm:$0xff] %v9232_v58  ;;  %v7918_v54 = vadd.f32 %v7917_v31, %v7857_v41  ;;  %v7861_v63 = vmul.f32 %v12628_v57, %v12617_v21  ;;  %v7863_v53 = vmul.f32 %v12631_v49, %v12617_v21  ;;  %v12651_v5 = vadd.f32 %v7137_v8, %v12403_v36  ;;  %v7139_v31 = vpop.f32.mrb[111].mxu1  ;;  %v7285_v38 = vpop.f32.mrb[95].mxu0 }
 0xc4c   : > { %v12654_v27 = vadd.f32 %v7283_v9, %v12407_v13  ;;  %v9235_v39 = vpack.c.bf16 %v12641_v19, %v12628_v57  ;;  %v7862_v58 = vmul.f32 %v12641_v19, %v12617_v21  ;;  %v9236_v41 = vpack.c.bf16 %v12644_v6, %v12631_v49 }
 0xc4d   : > { %v7864_v29 = vmul.f32 %v12644_v6, %v12617_v21  ;;  %v7880_v40 = vadd.f32 %v7879_v7, %v7861_v63  ;;  %v7906_v36 = vadd.f32 %v7905_v45, %v7863_v53  ;;  %v7868_v13 = vmul.f32 %v12651_v5, %v12636_v51 }
 0xc4e   : > { %v7870_v44 = vmul.f32 %v12654_v27, %v12636_v51  ;;  %7764 = vst [vmem:[%s12453_s23 + $0xa8] sm:$0xff] %v9235_v39  ;;  %v7893_v8 = vadd.f32 %v7892_v62, %v7862_v58  ;;  %7765 = vst [vmem:[%s12453_s23 + $0xb0] sm:$0xff] %v9236_v41  ;;  %v12671_v37 = vadd.f32 %v7139_v31, %v12414_v60  ;;  %v8100_v26 = vunpack.c.l.s4 %v10909_v10 }
 0xc4f   : > { %v7919_v9 = vadd.f32 %v7918_v54, %v7864_v29  ;;  %v12674_v17 = vadd.f32 %v7285_v38, %v12418_v1  ;;  %v7881_v7 = vadd.f32 %v7880_v40, %v7868_v13 }
 0xc50   : > { %v7907_v45 = vadd.f32 %v7906_v36, %v7870_v44  ;;  %v9239_v63 = vpack.c.bf16 %v12671_v37, %v12651_v5  ;;  %v7869_v53 = vmul.f32 %v12671_v37, %v12636_v51 }
 0xc51   : > { %v9240_v62 = vpack.c.bf16 %v12674_v17, %v12654_v27  ;;  %v7871_v54 = vmul.f32 %v12674_v17, %v12636_v51  ;;  %v7882_v39 = vrot.slane %v7881_v7, 4  ;;  %v9344_v31 = vpop.f32.mrb[96].mxu0 }
 0xc52   : > { %v7908_v60 = vrot.slane %v7907_v45, 4  ;;  %7768 = vst [vmem:[%s12453_s23 + $0xc4] sm:$0xff] %v9239_v63  ;;  %v7894_v1 = vadd.f32 %v7893_v8, %v7869_v53  ;;  %v9345_v58 = vpop.f32.mrb[97].mxu0 }
 0xc53   : > { %7769 = vst [vmem:[%s12453_s23 + $0xcc] sm:$0xff] %v9240_v62  ;;  %v7920_v38 = vadd.f32 %v7919_v9, %v7871_v54  ;;  %v7883_v41 = vadd.f32 %v7882_v39, %v7881_v7  ;;  %v12686_v40 = vadd.f32 %v9345_v58, %v9344_v31  ;;  %v9347_v36 = vpop.f32.mrb[98].mxu0 }
 0xc54   : > { %v7909_v29 = vadd.f32 %v7908_v60, %v7907_v45  ;;  %v7895_v13 = vrot.slane %v7894_v1, 4  ;;  %v9348_v33 = vpop.f32.mrb[99].mxu0  ;;  %v8101_v60 = vunpack.c.0.s8 %v8100_v26 }
 0xc55   : > { %13252 = vst [vmem:[#allocation26_spill] sm:$0xff] %v12686_v40  ;;  %v7921_v44 = vrot.slane %v7920_v38, 4  ;;  %v7884_v21 = vrot.slane %v7883_v41, 2  ;;  %v12688_v46 = vadd.f32 %v9348_v33, %v9347_v36  ;;  %v12690_v40 = vstv %s9773_s0 }
 0xc56   : > { %v7910_v30 = vrot.slane %v7909_v29, 2  ;;  %v7896_v51 = vadd.f32 %v7895_v13, %v7894_v1  ;;  %13253 = vst [vmem:[#allocation27_spill] sm:$0xff] %v12690_v40  ;;  %v12703_v13 = vsub.s32 %v8101_v60, %v11121_v42 }
 0xc57   : > { %v7922_v63 = vadd.f32 %v7921_v44, %v7920_v38  ;;  %v7885_v8 = vadd.f32 %v7884_v21, %v7883_v41 }
 0xc58   : > { %v7911_v53 = vadd.f32 %v7910_v30, %v7909_v29  ;;  %v7897_v9 = vrot.slane %v7896_v51, 2  ;;  %13254 = vst [vmem:[#allocation28_spill] sm:$0xff] %v12703_v13 }
 0xc59   : > { %v7923_v7 = vrot.slane %v7922_v63, 2  ;;  %v7886_v45 = vrot.slane %v7885_v8, 1  ;;  %v9350_v54 = vpop.f32.mrb[100].mxu0 }
 0xc5a   : > { %v7912_v62 = vrot.slane %v7911_v53, 1  ;;  %v7898_v39 = vadd.f32 %v7897_v9, %v7896_v51  ;;  %v9351_v58 = vpop.f32.mrb[101].mxu0 }
 0xc5b   : > { %v7924_v31 = vadd.f32 %v7923_v7, %v7922_v63  ;;  %v7887_v33 = vadd.f32 %v7886_v45, %v7885_v8  ;;  %v12692_v1 = vadd.f32 %v9351_v58, %v9350_v54  ;;  %v9353_v10 = vpop.f32.mrb[102].mxu0 }
 0xc5c   : > { %v7913_v36 = vadd.f32 %v7912_v62, %v7911_v53  ;;  %v7899_v38 = vrot.slane %v7898_v39, 1  ;;  %v9354_v30 = vpop.f32.mrb[103].mxu0 }
 0xc5d   : > { %v7925_v21 = vrot.slane %v7924_v31, 1  ;;  %v12694_v41 = vadd.f32 %v9354_v30, %v9353_v10  ;;  %v12697_v29 = vmul.f32 %v12690_v40, %v7887_v33 }
 0xc5e   : > { %v12700_v51 = vmul.f32 %v12690_v40, %v7913_v36  ;;  %v7900_v26 = vadd.f32 %v7899_v38, %v7898_v39 }
 0xc5f   : > { %v7926_v44 = vadd.f32 %v7925_v21, %v7924_v31  ;;  %v7977_v63 = vsub.f32 %v12428_v47, %v12697_v29  ;;  %v7984_v53 = vsub.f32 %v12456_v4, %v12697_v29  ;;  %v7991_v47 = vsub.f32 %v12502_v16, %v12697_v29 }
 0xc60   : > { %v7979_v8 = vsub.f32 %v12431_v24, %v12700_v51  ;;  %v8096_v9 = vcombine.low %v7887_v33, %v7900_v26  ;;  %v12712_v45 = vmul.f32 %v12690_v40, %v7900_v26  ;;  %v7986_v42 = vsub.f32 %v12459_v2, %v12700_v51 }
 0xc61   : > { %v8097_v7 = vcombine.low %v7913_v36, %v7926_v44  ;;  %v12715_v62 = vmul.f32 %v12690_v40, %v7926_v44  ;;  %v7993_v24 = vsub.f32 %v12505_v56, %v12700_v51  ;;  %v7998_v4 = vsub.f32 %v12525_v12, %v12697_v29  ;;  %v12725_v54 = vpop.f32.mrb[104].mxu0 }
 0xc62   : > { %v12728_v39 = vrot.slane %v8096_v9, %v12703_v13  ;;  %v7978_v2 = vsub.f32 %v12437_v20, %v12712_v45  ;;  %v12737_v31 = vpop.f32.mrb[105].mxu0  ;;  %v7985_v56 = vsub.f32 %v12474_v48, %v12712_v45  ;;  %v7992_v58 = vsub.f32 %v12512_v34, %v12712_v45 }
 0xc63   : > { %v12731_v60 = vrot.slane %v8097_v7, %v12703_v13  ;;  %v7980_v16 = vsub.f32 %v12440_v22, %v12715_v62  ;;  %v7987_v12 = vsub.f32 %v12477_v14, %v12715_v62  ;;  %v7994_v33 = vsub.f32 %v12515_v3, %v12715_v62  ;;  %v12747_v36 = vpop.f32.mrb[106].mxu0 }
 0xc64   : > { %13255 = vst [vmem:[#allocation29_spill] sm:$0xff] %v12728_v39  ;;  %v7999_v22 = vsub.f32 %v12545_v35, %v12712_v45  ;;  %v8000_v48 = vsub.f32 %v12528_v50, %v12700_v51  ;;  %v8001_v14 = vsub.f32 %v12548_v15, %v12715_v62  ;;  %v12757_v10 = vpop.f32.mrb[107].mxu0  ;;  %v8005_v34 = vsub.f32 %v12569_v52, %v12697_v29 }
 0xc65   : > { %13256 = vst [vmem:[#allocation30_spill] sm:$0xff] %v12731_v60  ;;  %v8006_v3 = vsub.f32 %v12579_v28, %v12712_v45  ;;  %v8007_v38 = vsub.f32 %v12572_v25, %v12700_v51  ;;  %v8008_v35 = vsub.f32 %v12582_v23, %v12715_v62  ;;  %v8012_v50 = vsub.f32 %v12589_v0, %v12697_v29  ;;  %v13257_v60 = vld [vmem:[#allocation22_spill] sm:$0xff] }
 0xc66   : > { %v8013_v15 = vsub.f32 %v12609_v18, %v12712_v45  ;;  %v8014_v21 = vsub.f32 %v12592_v61, %v12700_v51  ;;  %v8015_v52 = vsub.f32 %v12612_v55, %v12715_v62  ;;  %v8033_v26 = vmul.f32 %v12422_v43, %v7977_v63 }
 0xc67   : > { %v8034_v44 = vmul.f32 %v12422_v43, %v7978_v2  ;;  %v8035_v9 = vmul.f32 %v12422_v43, %v7979_v8  ;;  %v8036_v20 = vmul.f32 %v12422_v43, %v7980_v16  ;;  %v8040_v18 = vmul.f32 %v12425_v32, %v7984_v53  ;;  %v13264_v43 = vld [vmem:[#allocation26_spill] sm:$0xff] }
 0xc68   : > { %v8041_v0 = vmul.f32 %v12425_v32, %v7985_v56  ;;  %v8042_v61 = vmul.f32 %v12425_v32, %v7986_v42  ;;  %v8043_v55 = vmul.f32 %v12425_v32, %v7987_v12  ;;  %v8047_v30 = vmul.f32 %v12483_v11, %v7991_v47 }
 0xc69   : > { %v9362_v7 = vpop.f32.mrb[108].mxu0  ;;  %v8048_v63 = vmul.f32 %v12483_v11, %v7992_v58  ;;  %v8049_v2 = vmul.f32 %v12483_v11, %v7993_v24  ;;  %v8050_v8 = vmul.f32 %v12483_v11, %v7994_v33  ;;  %v8054_v16 = vmul.f32 %v12487_v59, %v7998_v4  ;;  %v13258_v4 = vld [vmem:[#allocation23_spill] sm:$0xff] }
 0xc6a   : > { %v9363_v23 = vpop.f32.mrb[109].mxu0  ;;  %v8055_v53 = vmul.f32 %v12487_v59, %v7999_v22  ;;  %v8056_v56 = vmul.f32 %v12487_v59, %v8000_v48  ;;  %v8057_v42 = vmul.f32 %v12487_v59, %v8001_v14  ;;  %v12808_v12 = vmul.f32 %v13257_v60, %v8005_v34  ;;  %v13262_v14 = vld [vmem:[#allocation16_spill] sm:$0xff]  ;;  %v13263_v34 = vld [vmem:[#allocation17_spill] sm:$0xff] }
 0xc6b   : > { %v9365_v25 = vpop.f32.mrb[110].mxu0  ;;  %v12811_v47 = vmul.f32 %v13257_v60, %v8006_v3  ;;  %v12814_v24 = vmul.f32 %v13257_v60, %v8007_v38  ;;  %v12817_v58 = vmul.f32 %v13257_v60, %v8008_v35  ;;  %v12820_v33 = vmul.f32 %v13258_v4, %v8012_v50 }
 0xc6c   : > { %v9366_v28 = vpop.f32.mrb[111].mxu0  ;;  %v12823_v22 = vmul.f32 %v13258_v4, %v8013_v15  ;;  %v12826_v48 = vmul.f32 %v13258_v4, %v8014_v21  ;;  %v12830_v39 = vrot.slane %v13263_v34, %v13262_v14  ;;  %v12833_v3 = vmul.f32 %v13258_v4, %v8015_v52 }
 0xc6d   : > { %13259 = vst [vmem:[#allocation31_spill] sm:$0xff] %v12820_v33  ;;  %v8150_v38 = vmul.f32 %v8033_v26, %v8033_v26  ;;  %v8151_v40 = vmul.f32 %v8034_v44, %v8034_v44  ;;  %v8152_v35 = vmul.f32 %v8035_v9, %v8035_v9  ;;  %v8157_v60 = vmul.f32 %v8040_v18, %v8040_v18 }
 0xc6e   : > { %13260 = vst [vmem:[#allocation32_spill] sm:$0xff] %v12823_v22  ;;  %13261 = vst [vmem:[#allocation33_spill] sm:$0xff] %v12826_v48  ;;  %v8158_v59 = vmul.f32 %v8041_v0, %v8041_v0  ;;  %v8159_v50 = vmul.f32 %v8042_v61, %v8042_v61  ;;  %v8153_v11 = vmul.f32 %v8036_v20, %v8036_v20 }
 0xc6f   : > { %v8160_v32 = vmul.f32 %v8043_v55, %v8043_v55  ;;  %v7469_v21 = vadd.f32 %v13264_v43, %v12830_v39  ;;  %v8164_v13 = vmul.f32 %v8047_v30, %v8047_v30  ;;  %v8165_v48 = vmul.f32 %v8048_v63, %v8048_v63 }
 0xc70   : > { %v8166_v14 = vmul.f32 %v8049_v2, %v8049_v2  ;;  %v8167_v34 = vmul.f32 %v8050_v8, %v8050_v8  ;;  %v8171_v33 = vmul.f32 %v8054_v16, %v8054_v16  ;;  %v8172_v52 = vmul.f32 %v8055_v53, %v8055_v53 }
 0xc71   : > { %v8173_v26 = vmul.f32 %v8056_v56, %v8056_v56  ;;  %v8206_v44 = vadd.f32 %v8157_v60, %v8150_v38  ;;  %v8219_v9 = vadd.f32 %v8158_v59, %v8151_v40  ;;  %v8232_v18 = vadd.f32 %v8159_v50, %v8152_v35 }
 0xc72   : > { %v9384_v15 = vpop.f32.mrb[112].mxu0  ;;  %v8245_v61 = vadd.f32 %v8160_v32, %v8153_v11  ;;  %v9358_v20 = vadd.f32 %v12737_v31, %v12725_v54  ;;  %v9361_v43 = vadd.f32 %v12757_v10, %v12747_v36  ;;  %v9364_v55 = vadd.f32 %v9363_v23, %v9362_v7 }
 0xc73   : > { %v9385_v22 = vpop.f32.mrb[113].mxu0  ;;  %v8207_v30 = vadd.f32 %v8206_v44, %v8164_v13  ;;  %v8220_v63 = vadd.f32 %v8219_v9, %v8165_v48  ;;  %v8233_v2 = vadd.f32 %v8232_v18, %v8166_v14  ;;  %v9367_v8 = vadd.f32 %v9366_v28, %v9365_v25  ;;  %v13266_v25 = vld [vmem:[#allocation24_spill] sm:$0xff]  ;;  %v13271_v48 = vld [vmem:[#allocation25_spill] sm:$0xff] }
 0xc74   : > { %v9387_v4 = vpop.f32.mrb[114].mxu0  ;;  %v7472_v16 = vadd.f32 %v12688_v46, %v12830_v39  ;;  %v8174_v53 = vmul.f32 %v8057_v42, %v8057_v42  ;;  %v8246_v60 = vadd.f32 %v8245_v61, %v8167_v34  ;;  %v12844_v59 = vadd.f32 %v9364_v55, %v12830_v39  ;;  %v13275_v44 = vld [vmem:[#allocation31_spill] sm:$0xff] }
 0xc75   : > { %v9388_v0 = vpop.f32.mrb[115].mxu0  ;;  %v8208_v32 = vadd.f32 %v8207_v30, %v8171_v33  ;;  %v8221_v11 = vadd.f32 %v8220_v63, %v8172_v52  ;;  %v8234_v40 = vadd.f32 %v8233_v2, %v8173_v26  ;;  %v12847_v54 = vadd.f32 %v9367_v8, %v12830_v39  ;;  %v13277_v18 = vld [vmem:[#allocation33_spill] sm:$0xff] }
 0xc76   : > { %v8247_v31 = vadd.f32 %v8246_v60, %v8174_v53  ;;  %v9386_v36 = vadd.f32 %v9385_v22, %v9384_v15  ;;  %v9389_v13 = vadd.f32 %v9388_v0, %v9387_v4  ;;  %v13265_v28 = vsub.f32 %v12628_v57, %v12697_v29 }
 0xc77   : > { %v13267_v7 = vsub.f32 %v12641_v19, %v12712_v45  ;;  %v13268_v42 = vsub.f32 %v12631_v49, %v12700_v51  ;;  %v13269_v4 = vsub.f32 %v12644_v6, %v12715_v62  ;;  %v13270_v57 = vsub.f32 %v12651_v5, %v12697_v29 }
 0xc78   : > { %v8075_v46 = vmul.f32 %v13266_v25, %v13265_v28  ;;  %v12869_v38 = vadd.f32 %v9386_v36, %v7469_v21  ;;  %v12871_v19 = vadd.f32 %v9389_v13, %v7472_v16  ;;  %v13272_v49 = vsub.f32 %v12671_v37, %v12712_v45 }
 0xc79   : > { %v8076_v56 = vmul.f32 %v13266_v25, %v13267_v7  ;;  %v8077_v33 = vmul.f32 %v13266_v25, %v13268_v42  ;;  %v8078_v22 = vmul.f32 %v13266_v25, %v13269_v4  ;;  %v8082_v34 = vmul.f32 %v13271_v48, %v13270_v57 }
 0xc7a   : > { %v9390_v10 = vpop.f32.mrb[116].mxu0  ;;  %v8083_v15 = vmul.f32 %v13271_v48, %v13272_v49  ;;  %v7477_v6 = vadd.f32 %v12692_v1, %v12830_v39  ;;  %v7480_v14 = vadd.f32 %v12694_v41, %v12830_v39  ;;  %v13273_v29 = vsub.f32 %v12654_v27, %v12700_v51 }
 0xc7b   : > { %v9391_v23 = vpop.f32.mrb[117].mxu0  ;;  %v13274_v52 = vsub.f32 %v12674_v17, %v12715_v62  ;;  %v8178_v45 = vmul.f32 %v12808_v12, %v12808_v12  ;;  %v8179_v1 = vmul.f32 %v12811_v47, %v12811_v47  ;;  %v9214_v41 = vpack.c.bf16 %v12869_v38, %v12869_v38  ;;  %v13276_v47 = vld [vmem:[#allocation32_spill] sm:$0xff] }
 0xc7c   : > { %v9392_v35 = vadd.f32 %v9391_v23, %v9390_v10  ;;  %v9393_v50 = vpop.f32.mrb[118].mxu0  ;;  %v8084_v21 = vmul.f32 %v13271_v48, %v13273_v29  ;;  %v9218_v27 = vpack.c.bf16 %v12871_v19, %v12871_v19  ;;  %v8180_v51 = vmul.f32 %v12814_v24, %v12814_v24 }
 0xc7d   : > { %v9394_v5 = vpop.f32.mrb[119].mxu0  ;;  %v8085_v37 = vmul.f32 %v13271_v48, %v13274_v52  ;;  %v8181_v17 = vmul.f32 %v12817_v58, %v12817_v58  ;;  %v8185_v12 = vmul.f32 %v13275_v44, %v13275_v44  ;;  %v8186_v9 = vmul.f32 %v13276_v47, %v13276_v47  ;;  %7743 = vst [vmem:[%s12453_s23 + $0x18] sm:$0xf] %v9214_v41 }
 0xc7e   : > { %v12901_v62 = vadd.f32 %v9392_v35, %v7477_v6  ;;  %v9395_v26 = vadd.f32 %v9394_v5, %v9393_v50  ;;  %v8187_v0 = vmul.f32 %v13277_v18, %v13277_v18  ;;  %v8188_v61 = vmul.f32 %v12833_v3, %v12833_v3  ;;  %7747 = vst [vmem:[%s12453_s23 + $0x34] sm:$0xf] %v9218_v27 }
 0xc7f   : > { %v7485_v24 = vadd.f32 %v9358_v20, %v12830_v39  ;;  %v7488_v58 = vadd.f32 %v9361_v43, %v12830_v39  ;;  %v8209_v2 = vadd.f32 %v8208_v32, %v8178_v45  ;;  %v8222_v8 = vadd.f32 %v8221_v11, %v8179_v1 }
 0xc80   : > { %v9222_v55 = vpack.c.bf16 %v12901_v62, %v12901_v62  ;;  %v12917_v30 = vadd.f32 %v9395_v26, %v7480_v14  ;;  %v8235_v16 = vadd.f32 %v8234_v40, %v8180_v51  ;;  %v8248_v53 = vadd.f32 %v8247_v31, %v8181_v17 }
 0xc81   : > { %v8192_v36 = vmul.f32 %v8075_v46, %v8075_v46  ;;  %v8193_v20 = vmul.f32 %v8076_v56, %v8076_v56  ;;  %v8194_v13 = vmul.f32 %v8077_v33, %v8077_v33  ;;  %v8210_v10 = vadd.f32 %v8209_v2, %v8185_v12 }
 0xc82   : > { %v9396_v63 = vpop.f32.mrb[120].mxu0  ;;  %7751 = vst [vmem:[%s12453_s23 + $0x50] sm:$0xf] %v9222_v55  ;;  %v9226_v3 = vpack.c.bf16 %v12917_v30, %v12917_v30  ;;  %v8223_v28 = vadd.f32 %v8222_v8, %v8186_v9  ;;  %v8236_v23 = vadd.f32 %v8235_v16, %v8187_v0  ;;  %v8195_v42 = vmul.f32 %v8078_v22, %v8078_v22 }
 0xc83   : > { %v9397_v60 = vpop.f32.mrb[121].mxu0  ;;  %v8199_v32 = vmul.f32 %v8082_v34, %v8082_v34  ;;  %v8200_v11 = vmul.f32 %v8083_v15, %v8083_v15  ;;  %v8249_v40 = vadd.f32 %v8248_v53, %v8188_v61  ;;  %v8211_v57 = vadd.f32 %v8210_v10, %v8192_v36  ;;  %v13281_v10 = vld [vmem:[#allocation14_spill] sm:$0xff] }
 0xc84   : > { %v9398_v39 = vadd.f32 %v9397_v60, %v9396_v63  ;;  %v9399_v43 = vpop.f32.mrb[122].mxu0  ;;  %7755 = vst [vmem:[%s12453_s23 + $0x6c] sm:$0xf] %v9226_v3  ;;  %v8224_v35 = vadd.f32 %v8223_v28, %v8193_v20  ;;  %v8201_v46 = vmul.f32 %v8084_v21, %v8084_v21  ;;  %v8202_v56 = vmul.f32 %v8085_v37, %v8085_v37  ;;  %v13278_v3 = vld [vmem:[#allocation28_spill] sm:$0xff] }
 0xc85   : > { %v9400_v7 = vpop.f32.mrb[123].mxu0  ;;  %v8237_v33 = vadd.f32 %v8236_v23, %v8194_v13  ;;  %v8250_v50 = vadd.f32 %v8249_v40, %v8195_v42  ;;  %v8212_v22 = vadd.f32 %v8211_v57, %v8199_v32  ;;  %v13279_v13 = vld [vmem:[#allocation15_spill] sm:$0xff]  ;;  %v13282_v40 = vld [vmem:[#allocation18_spill] sm:$0xff] }
 0xc86   : > { %v12923_v31 = vadd.f32 %v9398_v39, %v7485_v24  ;;  %v9401_v4 = vadd.f32 %v9400_v7, %v9399_v43  ;;  %v8225_v34 = vadd.f32 %v8224_v35, %v8200_v11  ;;  %v13280_v39 = vld [vmem:[#allocation17_spill] sm:$0xff] }
 0xc87   : > { %v8238_v15 = vadd.f32 %v8237_v33, %v8201_v46  ;;  %v8251_v14 = vadd.f32 %v8250_v50, %v8202_v56  ;;  %v8213_v29 = vrot.slane %v8212_v22, 4  ;;  %v12943_v43 = vrot.slane %v13280_v39, %v13279_v13  ;;  %v13283_v50 = vld [vmem:[#allocation19_spill] sm:$0xff] }
 0xc88   : > { %v9230_v49 = vpack.c.bf16 %v12923_v31, %v12923_v31  ;;  %v12927_v6 = vadd.f32 %v9401_v4, %v7488_v58  ;;  %v8226_v52 = vrot.slane %v8225_v34, 4  ;;  %v12947_v28 = vrot.slane %v13280_v39, %v13281_v10 }
 0xc89   : > { %v8239_v21 = vrot.slane %v8238_v15, 4  ;;  %v8252_v45 = vrot.slane %v8251_v14, 4  ;;  %v8214_v37 = vadd.f32 %v8213_v29, %v8212_v22 }
 0xc8a   : > { %7759 = vst [vmem:[%s12453_s23 + $0x88] sm:$0xf] %v9230_v49  ;;  %v9234_v5 = vpack.c.bf16 %v12927_v6, %v12927_v6  ;;  %v8227_v1 = vadd.f32 %v8226_v52, %v8225_v34 }
 0xc8b   : > { %v8240_v41 = vadd.f32 %v8239_v21, %v8238_v15  ;;  %v8253_v27 = vadd.f32 %v8252_v45, %v8251_v14  ;;  %v8215_v51 = vrot.slane %v8214_v37, 2 }
 0xc8c   : > { %7763 = vst [vmem:[%s12453_s23 + $0xa4] sm:$0xf] %v9234_v5  ;;  %v8228_v17 = vrot.slane %v8227_v1, 2 }
 0xc8d   : > { %v8241_v26 = vrot.slane %v8240_v41, 2  ;;  %v8254_v44 = vrot.slane %v8253_v27, 2  ;;  %v8216_v12 = vadd.f32 %v8215_v51, %v8214_v37  ;;  %v13284_v37 = vld [vmem:[#allocation20_spill] sm:$0xff] }
 0xc8e   : > { %v8229_v47 = vadd.f32 %v8228_v17, %v8227_v1 }
 0xc8f   : > { %v8242_v9 = vadd.f32 %v8241_v26, %v8240_v41  ;;  %v8255_v18 = vadd.f32 %v8254_v44, %v8253_v27  ;;  %v8217_v0 = vrot.slane %v8216_v12, 1 }
 0xc90   : > { %v8230_v61 = vrot.slane %v8229_v47, 1 }
 0xc91   : > { %v8243_v24 = vrot.slane %v8242_v9, 1  ;;  %v8256_v58 = vrot.slane %v8255_v18, 1  ;;  %v8218_v55 = vadd.f32 %v8217_v0, %v8216_v12  ;;  %v13285_v12 = vld [vmem:[#allocation21_spill] sm:$0xff] }
 0xc92   : > { %v8231_v63 = vadd.f32 %v8230_v61, %v8229_v47 }
 0xc93   : > { %v8244_v2 = vadd.f32 %v8243_v24, %v8242_v9  ;;  %v8257_v8 = vadd.f32 %v8256_v58, %v8255_v18 }
 0xc94   : > { %v8304_v16 = vcombine.low %v8218_v55, %v8231_v63 }
 0xc95   : > { %v8305_v53 = vcombine.low %v8244_v2, %v8257_v8 }
 0xc96   : > { %v12934_v60 = vrot.slane %v8304_v16, %v13278_v3  ;;  %v13286_v16 = vld [vmem:[#allocation22_spill] sm:$0xff] }
 0xc97   : > { %v12937_v36 = vrot.slane %v8305_v53, %v13278_v3 }
 0xc99   : > { %v8335_v20 = vcombine.low %v12934_v60, %v12937_v36 }
 0xcb2   : > { %v7395_v23 = vpop.f32.mrb[112].mxu1 }
 0xcb3   : > { %v12950_v7 = vadd.f32 %v7395_v23, %v12943_v43  ;;  %v7397_v42 = vpop.f32.mrb[113].mxu1 }
 0xcb4   : > { %v12953_v32 = vadd.f32 %v7397_v42, %v12947_v28  ;;  %v7399_v11 = vpop.f32.mrb[114].mxu1 }
 0xcb5   : > { %v7823_v4 = vmul.f32 %v12950_v7, %v13282_v40  ;;  %v12958_v57 = vadd.f32 %v7399_v11, %v12943_v43  ;;  %v7401_v35 = vpop.f32.mrb[115].mxu1  ;;  %v7832_v11 = vmul.f32 %v13283_v50, %v12871_v19 }
 0xcb6   : > { %v9213_v46 = vpack.c.bf16 %v12953_v32, %v12950_v7  ;;  %v7824_v56 = vmul.f32 %v12953_v32, %v13282_v40  ;;  %v12965_v33 = vadd.f32 %v7401_v35, %v12947_v28  ;;  %v13287_v35 = vld [vmem:[#allocation23_spill] sm:$0xff] }
 0xcb7   : > { %v7830_v49 = vmul.f32 %v12958_v57, %v13283_v50 }
 0xcb8   : > { %7742 = vst [vmem:[%s12453_s23 + $0x10] sm:$0xff] %v9213_v46  ;;  %v9217_v22 = vpack.c.bf16 %v12965_v33, %v12958_v57  ;;  %v7831_v34 = vmul.f32 %v12965_v33, %v13283_v50 }
 0xcb9   : > { %v7927_v15 = vadd.f32 %v7830_v49, %v7823_v4 }
 0xcba   : > { %7746 = vst [vmem:[%s12453_s23 + $0x2c] sm:$0xff] %v9217_v22  ;;  %v7940_v14 = vadd.f32 %v7831_v34, %v7824_v56  ;;  %v7405_v5 = vpop.f32.mrb[116].mxu1  ;;  %v7825_v34 = vmul.f32 %v13282_v40, %v12869_v38 }
 0xcbb   : > { %v12976_v29 = vadd.f32 %v7405_v5, %v12943_v43  ;;  %v7407_v52 = vpop.f32.mrb[117].mxu1 }
 0xcbc   : > { %v12979_v21 = vadd.f32 %v7407_v52, %v12947_v28  ;;  %v7409_v45 = vpop.f32.mrb[118].mxu1 }
 0xcbd   : > { %v7837_v1 = vmul.f32 %v12976_v29, %v13284_v37  ;;  %v12984_v41 = vadd.f32 %v7409_v45, %v12943_v43  ;;  %v7411_v27 = vpop.f32.mrb[119].mxu1  ;;  %v7953_v45 = vadd.f32 %v7832_v11, %v7825_v34 }
 0xcbe   : > { %v9221_v51 = vpack.c.bf16 %v12979_v21, %v12976_v29  ;;  %v7838_v17 = vmul.f32 %v12979_v21, %v13284_v37  ;;  %v12991_v26 = vadd.f32 %v7411_v27, %v12947_v28 }
 0xcbf   : > { %v7928_v44 = vadd.f32 %v7927_v15, %v7837_v1  ;;  %v7844_v47 = vmul.f32 %v12984_v41, %v13285_v12  ;;  %v7839_v15 = vmul.f32 %v13284_v37, %v12901_v62 }
 0xcc0   : > { %7750 = vst [vmem:[%s12453_s23 + $0x48] sm:$0xff] %v9221_v51  ;;  %v7941_v9 = vadd.f32 %v7940_v14, %v7838_v17  ;;  %v9225_v18 = vpack.c.bf16 %v12991_v26, %v12984_v41  ;;  %v7845_v0 = vmul.f32 %v12991_v26, %v13285_v12 }
 0xcc1   : > { %v7929_v61 = vadd.f32 %v7928_v44, %v7844_v47  ;;  %v7954_v44 = vadd.f32 %v7953_v45, %v7839_v15  ;;  %v7846_v47 = vmul.f32 %v13285_v12, %v12917_v30 }
 0xcc2   : > { %7754 = vst [vmem:[%s12453_s23 + $0x64] sm:$0xff] %v9225_v18  ;;  %v7942_v24 = vadd.f32 %v7941_v9, %v7845_v0  ;;  %v7415_v58 = vpop.f32.mrb[120].mxu1 }
 0xcc3   : > { %v13002_v55 = vadd.f32 %v7415_v58, %v12943_v43  ;;  %v7417_v63 = vpop.f32.mrb[121].mxu1 }
 0xcc4   : > { %v13005_v2 = vadd.f32 %v7417_v63, %v12947_v28  ;;  %v7419_v8 = vpop.f32.mrb[122].mxu1  ;;  %v7853_v63 = vmul.f32 %v13286_v16, %v12923_v31 }
 0xcc5   : > { %v7851_v53 = vmul.f32 %v13002_v55, %v13286_v16  ;;  %v13010_v13 = vadd.f32 %v7419_v8, %v12943_v43  ;;  %v7421_v39 = vpop.f32.mrb[123].mxu1 }
 0xcc6   : > { %v9229_v10 = vpack.c.bf16 %v13005_v2, %v13002_v55  ;;  %v7852_v23 = vmul.f32 %v13005_v2, %v13286_v16  ;;  %v13017_v42 = vadd.f32 %v7421_v39, %v12947_v28 }
 0xcc7   : > { %v7930_v4 = vadd.f32 %v7929_v61, %v7851_v53  ;;  %v7858_v46 = vmul.f32 %v13010_v13, %v13287_v35 }
 0xcc8   : > { %7758 = vst [vmem:[%s12453_s23 + $0x80] sm:$0xff] %v9229_v10  ;;  %v7943_v56 = vadd.f32 %v7942_v24, %v7852_v23  ;;  %v9233_v49 = vpack.c.bf16 %v13017_v42, %v13010_v13  ;;  %v7859_v22 = vmul.f32 %v13017_v42, %v13287_v35  ;;  %v7955_v23 = vadd.f32 %v7954_v44, %v7846_v47 }
 0xcc9   : > { %v7931_v14 = vadd.f32 %v7930_v4, %v7858_v46 }
 0xcca   : > { %7762 = vst [vmem:[%s12453_s23 + $0x9c] sm:$0xff] %v9233_v49  ;;  %v7944_v5 = vadd.f32 %v7943_v56, %v7859_v22  ;;  %v7425_v52 = vpop.f32.mrb[124].mxu1  ;;  %v7956_v46 = vadd.f32 %v7955_v23, %v7853_v63  ;;  %v7860_v56 = vmul.f32 %v13287_v35, %v12927_v6 }
 0xccb   : > { %v13034_v1 = vadd.f32 %v7425_v52, %v12943_v43  ;;  %v7427_v27 = vpop.f32.mrb[125].mxu1 }
 0xccc   : > { %v13037_v51 = vadd.f32 %v7427_v27, %v12947_v28  ;;  %v7429_v17 = vpop.f32.mrb[126].mxu1  ;;  %v7957_v44 = vadd.f32 %v7956_v46, %v7860_v56 }
 0xccd   : > { %v7865_v9 = vmul.f32 %v13034_v1, %v13266_v25  ;;  %v13044_v18 = vadd.f32 %v7429_v17, %v12943_v43  ;;  %v7431_v0 = vpop.f32.mrb[127].mxu1 }
 0xcce   : > { %v9237_v61 = vpack.c.bf16 %v13037_v51, %v13034_v1  ;;  %v7866_v24 = vmul.f32 %v13037_v51, %v13266_v25  ;;  %v13051_v58 = vadd.f32 %v7431_v0, %v12947_v28 }
 0xccf   : > { %v7932_v8 = vadd.f32 %v7931_v14, %v7865_v9  ;;  %v7872_v53 = vmul.f32 %v13044_v18, %v13271_v48 }
 0xcd0   : > { %7766 = vst [vmem:[%s12453_s23 + $0xb8] sm:$0xff] %v9237_v61  ;;  %v7945_v43 = vadd.f32 %v7944_v5, %v7866_v24  ;;  %v9241_v39 = vpack.c.bf16 %v13051_v58, %v13044_v18  ;;  %v7873_v10 = vmul.f32 %v13051_v58, %v13271_v48 }
 0xcd1   : > { %v7933_v11 = vadd.f32 %v7932_v8, %v7872_v53 }
 0xcd2   : > { %7770 = vst [vmem:[%s12453_s23 + $0xd4] sm:$0xff] %v9241_v39  ;;  %v7946_v28 = vadd.f32 %v7945_v43, %v7873_v10  ;;  %v9402_v4 = vpop.f32.mrb[128].mxu1 }
 0xcd3   : > { %v7934_v49 = vrot.slane %v7933_v11, 4  ;;  %v9403_v22 = vpop.f32.mrb[129].mxu1 }
 0xcd4   : > { %v7947_v34 = vrot.slane %v7946_v28, 4  ;;  %v9404_v15 = vadd.f32 %v9403_v22, %v9402_v4  ;;  %v9405_v14 = vpop.f32.mrb[130].mxu1 }
 0xcd5   : > { %v7935_v5 = vadd.f32 %v7934_v49, %v7933_v11  ;;  %v9406_v52 = vpop.f32.mrb[131].mxu1 }
 0xcd6   : > { %v7948_v45 = vadd.f32 %v7947_v34, %v7946_v28  ;;  %v13066_v27 = vadd.f32 %v9404_v15, %v12844_v59  ;;  %v9407_v17 = vadd.f32 %v9406_v52, %v9405_v14 }
 0xcd7   : > { %v7936_v47 = vrot.slane %v7935_v5, 2 }
 0xcd8   : > { %v7949_v9 = vrot.slane %v7948_v45, 2  ;;  %v9238_v0 = vpack.c.bf16 %v13066_v27, %v13066_v27  ;;  %v7867_v61 = vmul.f32 %v13266_v25, %v13066_v27  ;;  %v13073_v24 = vadd.f32 %v9407_v17, %v12847_v54  ;;  %v13288_v54 = vld [vmem:[#allocation27_spill] sm:$0xff] }
 0xcd9   : > { %v7937_v63 = vadd.f32 %v7936_v47, %v7935_v5 }
 0xcda   : > { %v7950_v8 = vadd.f32 %v7949_v9, %v7948_v45  ;;  %7767 = vst [vmem:[%s12453_s23 + $0xc0] sm:$0xf] %v9238_v0  ;;  %v7958_v53 = vadd.f32 %v7957_v44, %v7867_v61  ;;  %v9242_v59 = vpack.c.bf16 %v13073_v24, %v13073_v24  ;;  %v7874_v43 = vmul.f32 %v13271_v48, %v13073_v24 }
 0xcdb   : > { %v7938_v39 = vrot.slane %v7937_v63, 1 }
 0xcdc   : > { %v7951_v10 = vrot.slane %v7950_v8, 1  ;;  %7771 = vst [vmem:[%s12453_s23 + $0xdc] sm:$0xf] %v9242_v59  ;;  %v7959_v23 = vadd.f32 %v7958_v53, %v7874_v43 }
 0xcdd   : > { %v13081_v11 = vadd.f32 %v7938_v39, %v7937_v63 }
 0xcde   : > { %v13083_v28 = vadd.f32 %v7951_v10, %v7950_v8  ;;  %v7960_v49 = vrot.slane %v7959_v23, 4 }
 0xcdf   : > { %v7974_v4 = vmul.f32 %v13288_v54, %v13081_v11 }
 0xce0   : > { %v7975_v46 = vmul.f32 %v13288_v54, %v13083_v28  ;;  %v8098_v56 = vcombine.low %v13081_v11, %v13083_v28  ;;  %v7961_v61 = vadd.f32 %v7960_v49, %v7959_v23 }
 0xce1   : > { %v7981_v22 = vsub.f32 %v12950_v7, %v7974_v4  ;;  %v7988_v34 = vsub.f32 %v12958_v57, %v7974_v4  ;;  %v7995_v15 = vsub.f32 %v12976_v29, %v7974_v4  ;;  %v8002_v14 = vsub.f32 %v12984_v41, %v7974_v4 }
 0xce2   : > { %v8009_v5 = vsub.f32 %v13002_v55, %v7974_v4  ;;  %v8016_v52 = vsub.f32 %v13010_v13, %v7974_v4  ;;  %v8023_v45 = vsub.f32 %v13034_v1, %v7974_v4  ;;  %v8030_v17 = vsub.f32 %v13044_v18, %v7974_v4 }
 0xce3   : > { %v8037_v44 = vmul.f32 %v13282_v40, %v7981_v22  ;;  %v8044_v47 = vmul.f32 %v13283_v50, %v7988_v34  ;;  %v8051_v7 = vmul.f32 %v13284_v37, %v7995_v15  ;;  %v8058_v57 = vmul.f32 %v13285_v12, %v8002_v14 }
 0xce4   : > { %v8065_v29 = vmul.f32 %v13286_v16, %v8009_v5  ;;  %v8072_v41 = vmul.f32 %v13287_v35, %v8016_v52  ;;  %v8079_v55 = vmul.f32 %v13266_v25, %v8023_v45  ;;  %v8086_v13 = vmul.f32 %v13271_v48, %v8030_v17 }
 0xce5   : > { %v8154_v9 = vmul.f32 %v8037_v44, %v8037_v44  ;;  %v8161_v1 = vmul.f32 %v8044_v47, %v8044_v47  ;;  %v8168_v0 = vmul.f32 %v8051_v7, %v8051_v7  ;;  %v8175_v18 = vmul.f32 %v8058_v57, %v8058_v57 }
 0xce6   : > { %v7982_v8 = vsub.f32 %v12953_v32, %v7975_v46  ;;  %v7989_v53 = vsub.f32 %v12965_v33, %v7975_v46  ;;  %v7996_v59 = vsub.f32 %v12979_v21, %v7975_v46  ;;  %v8003_v43 = vsub.f32 %v12991_v26, %v7975_v46 }
 0xce7   : > { %v8258_v63 = vadd.f32 %v8161_v1, %v8154_v9  ;;  %v8010_v39 = vsub.f32 %v13005_v2, %v7975_v46  ;;  %v8017_v10 = vsub.f32 %v13017_v42, %v7975_v46  ;;  %v8024_v4 = vsub.f32 %v13037_v51, %v7975_v46 }
 0xce8   : > { %v8031_v34 = vsub.f32 %v13051_v58, %v7975_v46  ;;  %v8038_v23 = vmul.f32 %v13282_v40, %v7982_v8  ;;  %v8045_v49 = vmul.f32 %v13283_v50, %v7989_v53  ;;  %v8052_v32 = vmul.f32 %v13284_v37, %v7996_v59 }
 0xce9   : > { %v8259_v22 = vadd.f32 %v8258_v63, %v8168_v0  ;;  %v8059_v33 = vmul.f32 %v13285_v12, %v8003_v43  ;;  %v8066_v21 = vmul.f32 %v13286_v16, %v8010_v39  ;;  %v8073_v26 = vmul.f32 %v13287_v35, %v8017_v10 }
 0xcea   : > { %v8182_v2 = vmul.f32 %v8065_v29, %v8065_v29  ;;  %v8080_v42 = vmul.f32 %v13266_v25, %v8024_v4  ;;  %v8087_v51 = vmul.f32 %v13271_v48, %v8031_v34  ;;  %v8155_v14 = vmul.f32 %v8038_v23, %v8038_v23 }
 0xceb   : > { %v8260_v15 = vadd.f32 %v8259_v22, %v8175_v18  ;;  %v8162_v58 = vmul.f32 %v8045_v49, %v8045_v49  ;;  %v8189_v46 = vmul.f32 %v8072_v41, %v8072_v41  ;;  %v8169_v52 = vmul.f32 %v8052_v32, %v8052_v32 }
 0xcec   : > { %v7962_v17 = vrot.slane %v7961_v61, 2  ;;  %v8196_v44 = vmul.f32 %v8079_v55, %v8079_v55  ;;  %v8176_v7 = vmul.f32 %v8059_v33, %v8059_v33  ;;  %v8203_v1 = vmul.f32 %v8086_v13, %v8086_v13 }
 0xced   : > { %v8261_v5 = vadd.f32 %v8260_v15, %v8182_v2  ;;  %v8271_v45 = vadd.f32 %v8162_v58, %v8155_v14  ;;  %v8183_v0 = vmul.f32 %v8066_v21, %v8066_v21  ;;  %v8190_v53 = vmul.f32 %v8073_v26, %v8073_v26  ;;  %v13290_v14 = vld [vmem:[#allocation30_spill] sm:$0xff] }
 0xcee   : > { %v7963_v9 = vadd.f32 %v7962_v17, %v7961_v61  ;;  %v8197_v39 = vmul.f32 %v8080_v42, %v8080_v42  ;;  %v8119_v13 = vrot.slane %v8098_v56, %v13278_v3  ;;  %v8204_v61 = vmul.f32 %v8087_v51, %v8087_v51 }
 0xcef   : > { %v8262_v47 = vadd.f32 %v8261_v5, %v8189_v46  ;;  %v8272_v57 = vadd.f32 %v8271_v45, %v8169_v52  ;;  %v13292_v5 = vlaneseq }
 0xcf0   : > { %v7964_v63 = vrot.slane %v7963_v9, 1 }
 0xcf1   : > { %v8263_v29 = vadd.f32 %v8262_v47, %v8196_v44  ;;  %v8273_v18 = vadd.f32 %v8272_v57, %v8176_v7  ;;  %vm13156_vm11 = vcmp.lt.s32.totalorder %v13292_v5, 896 }
 0xcf2   : > { %v7965_v41 = vadd.f32 %v7964_v63, %v7963_v9 }
 0xcf3   : > { %v8264_v8 = vadd.f32 %v8263_v29, %v8203_v1  ;;  %v8274_v59 = vadd.f32 %v8273_v18, %v8183_v0 }
 0xcf4   : > { %v7976_v55 = vmul.f32 %v13288_v54, %v7965_v41  ;;  %v8126_v22 = vrot.slane %v7965_v41, %v13278_v3 }
 0xcf5   : > { %v8265_v43 = vrot.slane %v8264_v8, 4  ;;  %v8275_v10 = vadd.f32 %v8274_v59, %v8190_v53 }
 0xcf6   : > { %v7983_v23 = vsub.f32 %v12869_v38, %v7976_v55  ;;  %v7990_v49 = vsub.f32 %v12871_v19, %v7976_v55  ;;  %v7997_v32 = vsub.f32 %v12901_v62, %v7976_v55  ;;  %v8004_v33 = vsub.f32 %v12917_v30, %v7976_v55 }
 0xcf7   : > { %v8266_v4 = vadd.f32 %v8265_v43, %v8264_v8  ;;  %v8276_v34 = vadd.f32 %v8275_v10, %v8197_v39  ;;  %v8011_v21 = vsub.f32 %v12923_v31, %v7976_v55  ;;  %v8018_v11 = vsub.f32 %v12927_v6, %v7976_v55 }
 0xcf8   : > { %v8025_v56 = vsub.f32 %v13066_v27, %v7976_v55  ;;  %v8032_v26 = vsub.f32 %v13073_v24, %v7976_v55  ;;  %v8039_v2 = vmul.f32 %v13282_v40, %v7983_v23  ;;  %v8046_v15 = vmul.f32 %v13283_v50, %v7990_v49 }
 0xcf9   : > { %v8267_v54 = vrot.slane %v8266_v4, 2  ;;  %v8277_v28 = vadd.f32 %v8276_v34, %v8204_v61  ;;  %v8053_v19 = vmul.f32 %v13284_v37, %v7997_v32  ;;  %v8060_v62 = vmul.f32 %v13285_v12, %v8004_v33  ;;  %v13289_v37 = vld [vmem:[#allocation29_spill] sm:$0xff] }
 0xcfa   : > { %v8067_v31 = vmul.f32 %v13286_v16, %v8011_v21  ;;  %v8074_v6 = vmul.f32 %v13287_v35, %v8018_v11  ;;  %v8081_v27 = vmul.f32 %v13266_v25, %v8025_v56  ;;  %v8088_v24 = vmul.f32 %v13271_v48, %v8032_v26 }
 0xcfb   : > { %v8268_v38 = vadd.f32 %v8267_v54, %v8266_v4  ;;  %v8278_v30 = vrot.slane %v8277_v28, 4  ;;  %v8128_v40 = vcombine.low %v8119_v13, %v8126_v22  ;;  %v8156_v42 = vmul.f32 %v8039_v2, %v8039_v2 }
 0xcfc   : > { %v8163_v50 = vmul.f32 %v8046_v15, %v8046_v15  ;;  %v13291_v12 = vcombine.low %v13289_v37, %v13290_v14  ;;  %v8170_v48 = vmul.f32 %v8053_v19, %v8053_v19  ;;  %v8177_v44 = vmul.f32 %v8060_v62, %v8060_v62 }
 0xcfd   : > { %v8279_v51 = vadd.f32 %v8278_v30, %v8277_v28  ;;  %v8142_v46 = vrot.slane %v8128_v40, %v13278_v3  ;;  %v8269_v35 = vrot.slane %v8268_v38, 1  ;;  %v8184_v9 = vmul.f32 %v8067_v31, %v8067_v31 }
 0xcfe   : > { %v8135_v58 = vrot.slane %v13291_v12, %v13278_v3  ;;  %v8284_v52 = vadd.f32 %v8163_v50, %v8156_v42  ;;  %v8191_v0 = vmul.f32 %v8074_v6, %v8074_v6  ;;  %v8198_v8 = vmul.f32 %v8081_v27, %v8081_v27 }
 0xcff   : > { %v8280_v25 = vrot.slane %v8279_v51, 2  ;;  %v8270_v7 = vadd.f32 %v8269_v35, %v8268_v38  ;;  %v8205_v59 = vmul.f32 %v8088_v24, %v8088_v24  ;;  %v8343_v49 = vrot.slane %v8335_v20, %v13278_v3 }
 0xd00   : > { %v8143_v45 = vcombine.low %v8135_v58, %v8142_v46  ;;  %v8285_v47 = vadd.f32 %v8284_v52, %v8170_v48 }
 0xd01   : > { %v8281_v17 = vadd.f32 %v8280_v25, %v8279_v51 }
 0xd02   : > { %8149 = vst.msk [vmem:[%s927_s1] sm:$0x7f] %vm13156_vm11, %v8143_v45  ;;  %v8286_v1 = vadd.f32 %v8285_v47, %v8177_v44 }
 0xd03   : > { %v8282_v57 = vrot.slane %v8281_v17, 1 }
 0xd04   : > { %v8287_v18 = vadd.f32 %v8286_v1, %v8184_v9 }
 0xd05   : > { %v8283_v29 = vadd.f32 %v8282_v57, %v8281_v17 }
 0xd06   : > { %v8288_v53 = vadd.f32 %v8287_v18, %v8191_v0 }
 0xd07   : > { %v8306_v63 = vcombine.low %v8270_v7, %v8283_v29 }
 0xd08   : > { %v8289_v41 = vadd.f32 %v8288_v53, %v8198_v8 }
 0xd09   : > { %v8327_v22 = vrot.slane %v8306_v63, %v13278_v3 }
 0xd0a   : > { %v8290_v43 = vadd.f32 %v8289_v41, %v8205_v59 }
 0xd0c   : > { %v8291_v39 = vrot.slane %v8290_v43, 4 }
 0xd0e   : > { %v8292_v10 = vadd.f32 %v8291_v39, %v8290_v43 }
 0xd10   : > { %v8293_v55 = vrot.slane %v8292_v10, 2 }
 0xd12   : > { %v8294_v4 = vadd.f32 %v8293_v55, %v8292_v10 }
 0xd14   : > { %v8295_v13 = vrot.slane %v8294_v4, 1 }
 0xd16   : > { %v8296_v61 = vadd.f32 %v8295_v13, %v8294_v4 }
 0xd18   : > { %v8334_v34 = vrot.slane %v8296_v61, %v13278_v3 }
 0xd1a   : > { %v8336_v23 = vcombine.low %v8327_v22, %v8334_v34 }
 0xd1c   : > { %v8350_v32 = vrot.slane %v8336_v23, %v13278_v3 }
 0xd1e   : > { %v8351_v54 = vcombine.low %v8343_v49, %v8350_v32 }
 0xd20   : > { %8353 = vst.msk [vmem:[%s931_s15] sm:$0x7f] %vm13156_vm11, %v8351_v54 }
 0xd21 PF: > { %s70_s7 = sadd.s32 1, %s10876_s7  }
 0xd22   : > { %p67_p6 = scmp.ge.s32.totalorder %s70_s7, 4  }
 0xd24   :  { %69 = sbr.rel (!%p67_p6) target bundleno = 43 (0x2b), region = 211 }

</bundles_post_ra>
